<compile_context>
chip_gen: v7x
topology: tpu7x:2x2x1
jax: 0.10.0
libtpu: 0.0.40
codegen_flags: <defaults>
</compile_context>

<pallas_src>
import numpy as np
import jax
import jax.numpy as jnp
from jax.experimental import pallas as pl
from jax.experimental.pallas import tpu as pltpu

NEG_SLOPE = 0.01            # nn.LeakyReLU() default negative_slope
SEL_DTYPE = jnp.bfloat16    # storage dtype of 0/1 selection matrices & masks


def _ceil8(n):
    return -(-n // 8) * 8


# ----------------------------------------------------------------------------
# Padded-frame geometry.
#
# An activation at spatial level (H, W) is a (Cp, L) value: the last axis is
# the zero-padded (H+2)x(W+2) frame flattened row-major onto the lane axis,
# possibly with extra zero margin lanes.  "base" = frame coordinate of lane 0.
# Interior pixel (y, x) lives at frame coordinate (y+1)*(W+2) + (x+1).
# ----------------------------------------------------------------------------
def _geom(H, W):
    Hp, Wp = H + 2, W + 2
    return Hp, Wp, Hp * Wp, Wp + 1          # Hp, Wp, S, P  (P = max |tap offset|)


def _fpos(y, x, Wp):
    return (y + 1) * Wp + (x + 1)


# ----------------------------------------------------------------------------
# Trace-time numpy builders for masks / 0-1 selection matrices.
# ----------------------------------------------------------------------------
def _interior_mask_np(H, W, base, width):
    _, Wp, _, _ = _geom(H, W)
    m = np.zeros((1, width), np.float32)
    for y in range(H):
        for x in range(W):
            c = _fpos(y, x, Wp) - base
            assert 0 <= c < width
            m[0, c] = 1.0
    return m


def _pool_sel_np(H, W):
    """MaxPool2d(2): rows index the 2x2-window max; columns emit the
    half-resolution level in its standard stored layout (base -Po)."""
    _, Wp, S, P = _geom(H, W)
    Ho, Wo = H // 2, W // 2
    _, Wpo, So, Po = _geom(Ho, Wo)
    Lm = (S - 2 * P) - (Wp + 1)
    sel = np.zeros((Lm, So + 2 * Po), np.float32)
    for oy in range(Ho):
        for ox in range(Wo):
            r = _fpos(2 * oy, 2 * ox, Wp) - P
            c = _fpos(oy, ox, Wpo) + Po
            assert 0 <= r < Lm and 0 <= c < So + 2 * Po
            sel[r, c] = 1.0
    return sel


def _upsample_mat_np(Hs, Ws, base_s, width_s, Ht, Wt, base_t, width_t):
    """2x nearest upsample of the skip tensor, emitted directly in the lane
    frame of the tensor it is concatenated with (fused concat)."""
    assert (Ht, Wt) == (2 * Hs, 2 * Ws)
    _, Wps, _, _ = _geom(Hs, Ws)
    _, Wpt, _, _ = _geom(Ht, Wt)
    mat = np.zeros((width_s, width_t), np.float32)
    for sy in range(Hs):
        for sx in range(Ws):
            r = _fpos(sy, sx, Wps) - base_s
            assert 0 <= r < width_s
            for dy in range(2):
                for dx in range(2):
                    c = _fpos(2 * sy + dy, 2 * sx + dx, Wpt) - base_t
                    assert 0 <= c < width_t
                    mat[r, c] = 1.0
    return mat


def _tconv_scatter_np(Hi, Wi, base_i, width_i, base_o, width_o):
    """ConvTranspose2d(k=2, s=2) output scatter: 4 matrices (one per (dy, dx)
    tap) mapping input-frame lanes to upsampled output-frame lanes."""
    _, Wpi, _, _ = _geom(Hi, Wi)
    _, Wpo, _, _ = _geom(2 * Hi, 2 * Wi)
    scat = np.zeros((4, width_i, width_o), np.float32)
    for y in range(Hi):
        for x in range(Wi):
            r = _fpos(y, x, Wpi) - base_i
            assert 0 <= r < width_i
            for dy in range(2):
                for dx in range(2):
                    c = _fpos(2 * y + dy, 2 * x + dx, Wpo) - base_o
                    assert 0 <= c < width_o
                    scat[dy * 2 + dx, r, c] = 1.0
    return scat


def _final_sel_np(H, W, base, width):
    """Gathers the interior pixels into a dense, lane-contiguous (H*W) output."""
    _, Wp, _, _ = _geom(H, W)
    sel = np.zeros((width, H * W), np.float32)
    for y in range(H):
        for x in range(W):
            r = _fpos(y, x, Wp) - base
            assert 0 <= r < width
            sel[r, y * W + x] = 1.0
    return sel


# ----------------------------------------------------------------------------
# Weight re-packing (PyTorch layouts -> channel-padded, tap-merged matrices).
# ----------------------------------------------------------------------------
def _pack_conv_np(w, b, groups=None):
    """Conv2d weight (Cout, Cin, 3, 3) -> (Cp_out, 9*Cp_in): the 9 taps are
    concatenated along the contraction axis (tap-major, channel-minor), every
    channel group padded to a multiple of 8 so the in-kernel operand stacking
    stays 8-sublane aligned.  `groups` lists the real channel counts of the
    channel-padded input groups concatenated to form the kernel operand."""
    w = np.asarray(w, np.float32)
    b = np.asarray(b, np.float32)
    co, ci = w.shape[0], w.shape[1]
    if groups is None:
        groups = [ci]
    assert sum(groups) == ci
    cop = _ceil8(co)
    gpad = [_ceil8(g) for g in groups]
    cip = sum(gpad)
    wt = np.transpose(w, (0, 2, 3, 1)).reshape(co, 9, ci)      # [co, ky*3+kx, ci]
    packed = np.zeros((cop, 9, cip), np.float32)
    src = dst = 0
    for g, gp in zip(groups, gpad):
        packed[:co, :, dst:dst + g] = wt[:, :, src:src + g]
        src += g
        dst += gp
    bias = np.zeros((cop, 1), np.float32)
    bias[:co, 0] = b
    return packed.reshape(cop, 9 * cip), bias


def _pack_tconv_np(w, b, groups):
    """ConvTranspose2d weight (Cin, Cout, 2, 2) -> (4*Cp_out, sum(Cp_groups)),
    tap-major on rows so tmp_all[t*Cp_out:(t+1)*Cp_out] is tap t's output."""
    w = np.asarray(w, np.float32)
    b = np.asarray(b, np.float32)
    ci, co = w.shape[0], w.shape[1]
    assert sum(groups) == ci
    cop = _ceil8(co)
    gpad = [_ceil8(g) for g in groups]
    wt = np.transpose(w, (2, 3, 1, 0)).reshape(4, co, ci)      # [dy*2+dx, co, ci]
    packed = np.zeros((4, cop, sum(gpad)), np.float32)
    src = dst = 0
    for g, gp in zip(groups, gpad):
        packed[:, :co, dst:dst + g] = wt[:, :, src:src + g]
        src += g
        dst += gp
    bias = np.zeros((cop, 1), np.float32)
    bias[:co, 0] = b
    return packed.reshape(4 * cop, sum(gpad)), bias


# ----------------------------------------------------------------------------
# Fused-forward builder: packs parameters ONCE and returns a jitted forward.
# ----------------------------------------------------------------------------
def build_unet_forward(params, in_channels, H0, W0):
    nl = len(params["down"])
    slope = NEG_SLOPE
    assert H0 % (2 ** nl) == 0 and W0 % (2 ** nl) == 0
    # Scalability guard: selection matrices are O(L^2); use spatial tiling
    # before scaling the frame.
    assert H0 * W0 <= 64 * 64, "TODO(synk): switch to spatial grid tiling"

    arrays = []                       # packed parameters, kernel consumption order

    def add(a, dt):
        arrays.append(jnp.asarray(a, dt))

    f32 = np.float32

    # ------------------------------ down path -------------------------------
    down_cfg = []
    skip_meta = []                    # geometry of each down-block output
    H, W = H0, W0
    for (w1, b1), (w2, b2) in params["down"]:
        _, Wp, S, P = _geom(H, W)
        cout = w1.shape[0]
        Ho, Wo = H // 2, W // 2
        _, _, So, Po = _geom(Ho, Wo)
        wp1, bp1 = _pack_conv_np(w1, b1)
        wp2, bp2 = _pack_conv_np(w2, b2)
        add(wp1, f32); add(bp1, f32)
        add(_interior_mask_np(H, W, 0, S), SEL_DTYPE)
        add(wp2, f32); add(bp2, f32)
        add(_pool_sel_np(H, W), SEL_DTYPE)
        down_cfg.append(dict(Wp=Wp, S=S, P=P, Lm=S - 3 * P))
        skip_meta.append(dict(c=cout, H=Ho, W=Wo, base=-Po, width=So + 2 * Po))
        H, W = Ho, Wo

    # ------------------------------ bottleneck ------------------------------
    (w1, b1), (w2, b2) = params["bottleneck"]
    _, Wp, S, P = _geom(H, W)
    wp1, bp1 = _pack_conv_np(w1, b1)
    wp2, bp2 = _pack_conv_np(w2, b2)
    add(wp1, f32); add(bp1, f32)
    add(_interior_mask_np(H, W, 0, S), SEL_DTYPE)
    add(wp2, f32); add(bp2, f32)
    bott_cfg = dict(Wp=Wp, S=S, P=P)
    cu = w2.shape[0]                  # real channels of the running `u`
    u_base, u_width = P, S - 2 * P

    # ------------------------------- up path --------------------------------
    # The reference does `x = up_layer(x); x = cat([x, skip])`; here each up
    # block consumes the previous (u, skip) pair directly so the channel concat
    # (and the TODO(synk) 2x-nearest upsample of the skip) is fused into the
    # transposed conv.
    up_cfg = []
    for j, ((wt, bt), (wc1, bc1), (wc2, bc2)) in enumerate(params["up"]):
        Hi, Wi = H, W
        Ho, Wo = 2 * Hi, 2 * Wi
        _, Wpo, So, Po = _geom(Ho, Wo)
        cout = wt.shape[1]
        cop = _ceil8(cout)
        has_skip = j > 0
        L_t = So + 4 * Po
        if has_skip:
            sk = skip_meta[nl - j]
            add(_upsample_mat_np(sk["H"], sk["W"], sk["base"], sk["width"],
                                 Hi, Wi, u_base, u_width), SEL_DTYPE)
            wtp, btp = _pack_tconv_np(wt, bt, [cu, sk["c"]])
        else:
            wtp, btp = _pack_tconv_np(wt, bt, [cu])
        add(wtp, f32); add(btp, f32)
        add(_tconv_scatter_np(Hi, Wi, u_base, u_width, -2 * Po, L_t), SEL_DTYPE)
        add(_interior_mask_np(Ho, Wo, -2 * Po, L_t), SEL_DTYPE)
        wcp1, bcp1 = _pack_conv_np(wc1, bc1)
        wcp2, bcp2 = _pack_conv_np(wc2, bc2)
        add(wcp1, f32); add(bcp1, f32)
        add(_interior_mask_np(Ho, Wo, -Po, So + 2 * Po), SEL_DTYPE)
        add(wcp2, f32); add(bcp2, f32)
        add(_interior_mask_np(Ho, Wo, 0, So), SEL_DTYPE)
        up_cfg.append(dict(Wpo=Wpo, So=So, Po=Po, cop=cop, has_skip=has_skip))
        cu = cout
        u_base, u_width = 0, So
        H, W = Ho, Wo

    # ------------------------------ output conv -----------------------------
    wo, bo = params["output"]
    _, Wp, S, P = _geom(H, W)
    sk = skip_meta[0]
    add(_upsample_mat_np(sk["H"], sk["W"], sk["base"], sk["width"],
                         H, W, u_base, u_width), SEL_DTYPE)
    wop, bop = _pack_conv_np(wo, bo, groups=[cu, sk["c"]])
    add(wop, f32); add(bop, f32)
    add(_final_sel_np(H, W, P, S - 2 * P), SEL_DTYPE)
    out_cfg = dict(Wp=Wp, S=S, P=P)
    cout_final = wo.shape[0]
    cop_final = _ceil8(cout_final)

    cin0_p = _ceil8(in_channels)
    _, _, S0, P0 = _geom(H0, W0)
    L0 = S0 + 2 * P0
    HW = H0 * W0

    # ------------------------------- kernel ---------------------------------
    def conv_stage(x, w_ref, b_ref, Wp, P, out_len, *, act, mask_ref=None):
        """Conv2d(3, pad=1) as ONE matmul with K = 9*Cp_in.
        `x` has its base exactly P frame positions below the output base."""
        xs = jnp.concatenate(
            [x[:, P + (ky - 1) * Wp + (kx - 1):
                  P + (ky - 1) * Wp + (kx - 1) + out_len]
             for ky in range(3) for kx in range(3)], axis=0)
        y = jnp.dot(w_ref[...], xs, preferred_element_type=jnp.float32)
        y = y + b_ref[...]
        if act:
            y = jnp.where(y >= 0, y, y * slope)
        if mask_ref is not None:
            y = y * mask_ref[...].astype(jnp.float32)
        return y

    def kernel(*refs):
        o_ref = refs[-1]
        rs = list(refs[:-1])
        pos = [0]

        def take():
            r = rs[pos[0]]
            pos[0] += 1
            return r

        x = take()[0]                                        # (cin0_p, L0) f32

        # ------------------------- down path --------------------------------
        skips = []
        for g in down_cfg:
            w1 = take(); b1 = take(); m1 = take()
            w2 = take(); b2 = take(); sel = take()
            y1 = conv_stage(x, w1, b1, g["Wp"], g["P"], g["S"],
                            act=True, mask_ref=m1)                    # base 0
            y2 = conv_stage(y1, w2, b2, g["Wp"], g["P"], g["S"] - 2 * g["P"],
                            act=True)                                 # base P
            Lm, Wp_ = g["Lm"], g["Wp"]
            m = jnp.maximum(
                jnp.maximum(y2[:, 0:Lm], y2[:, 1:1 + Lm]),
                jnp.maximum(y2[:, Wp_:Wp_ + Lm], y2[:, Wp_ + 1:Wp_ + 1 + Lm]))
            x = jnp.dot(m, sel[...].astype(jnp.float32),
                        preferred_element_type=jnp.float32)
            skips.append(x)

        # ------------------------- bottleneck -------------------------------
        w1 = take(); b1 = take(); m1 = take(); w2 = take(); b2 = take()
        g = bott_cfg
        y1 = conv_stage(x, w1, b1, g["Wp"], g["P"], g["S"], act=True, mask_ref=m1)
        u = conv_stage(y1, w2, b2, g["Wp"], g["P"], g["S"] - 2 * g["P"], act=True)

        # --------------------------- up path --------------------------------
        for j, g in enumerate(up_cfg):
            if g["has_skip"]:
                upm = take()
                s_up = jnp.dot(skips[nl - j], upm[...].astype(jnp.float32),
                               preferred_element_type=jnp.float32)
                u = jnp.concatenate([u, s_up], axis=0)       # fused channel concat
            wt = take(); bt = take(); scat = take(); mt = take()
            w1 = take(); b1 = take(); m1 = take()
            w2 = take(); b2 = take(); m2 = take()
            # ConvTranspose2d(2, s=2): all 4 taps in one weight matmul, then
            # per-tap scatter matmuls straight into the upsampled frame.
            tmp = jnp.dot(wt[...], u, preferred_element_type=jnp.float32)
            cop = g["cop"]
            acc = None
            for t in range(4):
                term = jnp.dot(tmp[t * cop:(t + 1) * cop],
                               scat[t].astype(jnp.float32),
                               preferred_element_type=jnp.float32)
                acc = term if acc is None else acc + term
            acc = acc + bt[...]
            acc = jnp.where(acc >= 0, acc, acc * slope)
            acc = acc * mt[...].astype(jnp.float32)          # base -2*Po
            y1 = conv_stage(acc, w1, b1, g["Wpo"], g["Po"],
                            g["So"] + 2 * g["Po"], act=True, mask_ref=m1)
            u = conv_stage(y1, w2, b2, g["Wpo"], g["Po"], g["So"],
                           act=True, mask_ref=m2)            # base 0

        # ------------------------- output conv ------------------------------
        upm = take(); wo_ = take(); bo_ = take(); fsel = take()
        g = out_cfg
        s_up = jnp.dot(skips[0], upm[...].astype(jnp.float32),
                       preferred_element_type=jnp.float32)
        xin = jnp.concatenate([u, s_up], axis=0)
        y = conv_stage(xin, wo_, bo_, g["Wp"], g["P"], g["S"] - 2 * g["P"],
                       act=False)
        out = jnp.dot(y, fsel[...].astype(jnp.float32),
                      preferred_element_type=jnp.float32)    # (cop_final, H*W)
        o_ref[0] = out.astype(o_ref.dtype)

    # ------------------------------- wrapper --------------------------------
    packed = arrays
    in_specs = [pl.BlockSpec((1, cin0_p, L0), lambda b: (b, 0, 0))]
    for a in packed:
        in_specs.append(pl.BlockSpec(a.shape, lambda b, _n=a.ndim: (0,) * _n))
    out_specs = pl.BlockSpec((1, cop_final, HW), lambda b: (b, 0, 0))

    @jax.jit
    def forward(x):
        B = x.shape[0]
        assert x.shape[1:] == (in_channels, H0, W0)
        # Embed NCHW input into the lane-flattened padded-frame layout.
        xe = jnp.pad(x.astype(jnp.float32),
                     ((0, 0), (0, cin0_p - in_channels), (1, 1), (1, 1)))
        xe = xe.reshape(B, cin0_p, S0)
        xe = jnp.pad(xe, ((0, 0), (0, 0), (P0, P0)))          # base -P0
        out = pl.pallas_call(
            kernel,
            out_shape=jax.ShapeDtypeStruct((B, cop_final, HW), jnp.float32),
            grid=(B,),
            in_specs=in_specs,
            out_specs=out_specs,
            compiler_params=pltpu.CompilerParams(
                dimension_semantics=("parallel",)),
        )(xe, *packed)
        return out[:, :cout_final].reshape(B, cout_final, H0, W0)

    return forward


# ----------------------------------------------------------------------------
# Parameter construction (deterministic, PyTorch weight layouts).
# ----------------------------------------------------------------------------
def init_unet_params(key, in_channels, out_channels, num_layers):
    C = out_channels
    state = {"k": key}

    def nk():
        state["k"], sub = jax.random.split(state["k"])
        return sub

    def conv_param(cout, cin, k):
        kw, kb = jax.random.split(nk())
        bound = 1.0 / float(cin * k * k) ** 0.5
        w = jax.random.uniform(kw, (cout, cin, k, k), jnp.float32, -bound, bound)
        b = jax.random.uniform(kb, (cout,), jnp.float32, -bound, bound)
        return w, b

    def convt_param(cin, cout, k):
        kw, kb = jax.random.split(nk())
        bound = 1.0 / float(cin * k * k) ** 0.5
        w = jax.random.uniform(kw, (cin, cout, k, k), jnp.float32, -bound, bound)
        b = jax.random.uniform(kb, (cout,), jnp.float32, -bound, bound)
        return w, b

    params = {"down": [], "up": []}
    ch = in_channels
    down_chs = []
    for i in range(num_layers):
        out_ch = (2 ** i) * C
        params["down"].append(
            (conv_param(out_ch, ch, 3), conv_param(out_ch, out_ch, 3)))
        ch = out_ch
        down_chs.append(out_ch)

    params["bottleneck"] = (conv_param(C, ch, 3), conv_param(C, C, 3))
    ch = C

    for j, i in enumerate(reversed(range(num_layers))):
        # TODO(synk): the reference __init__ declares in_ch inconsistently with
        # the channel counts its own forward() produces; in_ch is derived from
        # the real data flow here.
        # TODO(synk): reference uses 2**(i-1)*out_channels which is fractional
        # for i==0 (would fail nn.Conv2d init); use C//2 for the last up layer.
        out_ch = C // 2 if i == 0 else (2 ** (i - 1)) * C
        params["up"].append(
            (convt_param(ch, out_ch, 2),
             conv_param(out_ch, out_ch, 3),
             conv_param(out_ch, out_ch, 3)))
        ch = out_ch + down_chs[num_layers - 1 - j]     # channels after concat

    # TODO(synk): reference declares output_layer = Conv2d(C, C) but its input
    # after the final concat has `ch` channels; use the actual channel count.
    params["output"] = conv_param(C, ch, 3)
    return params


# ----------------------------------------------------------------------------
# Pure-JAX reference (same TODO(synk) semantic fixes) for tolerance checks.
# ----------------------------------------------------------------------------
def unet_reference(params, x):
    slope = NEG_SLOPE

    def conv(x, w, b):
        y = jax.lax.conv_general_dilated(
            x, w, (1, 1), ((1, 1), (1, 1)),
            dimension_numbers=("NCHW", "OIHW", "NCHW"),
            precision=jax.lax.Precision.HIGHEST)
        return y + b.reshape(1, -1, 1, 1)

    def lrelu(v):
        return jnp.where(v >= 0, v, v * slope)

    def pool(v):
        return jax.lax.reduce_window(v, -jnp.inf, jax.lax.max,
                                     (1, 1, 2, 2), (1, 1, 2, 2), "VALID")

    def tconv(v, w, b):
        B, _, H, W = v.shape
        Co = w.shape[1]
        y = jnp.einsum("bchw,copq->bohpwq", v, w,
                       precision=jax.lax.Precision.HIGHEST)
        return y.reshape(B, Co, 2 * H, 2 * W) + b.reshape(1, -1, 1, 1)

    feats = []
    for (w1, b1), (w2, b2) in params["down"]:
        x = lrelu(conv(x, w1, b1))
        x = lrelu(conv(x, w2, b2))
        x = pool(x)
        feats.append(x)
    (w1, b1), (w2, b2) = params["bottleneck"]
    x = lrelu(conv(x, w1, b1))
    x = lrelu(conv(x, w2, b2))
    for i, ((wt, bt), (wc1, bc1), (wc2, bc2)) in enumerate(params["up"]):
        x = lrelu(tconv(x, wt, bt))
        x = lrelu(conv(x, wc1, bc1))
        x = lrelu(conv(x, wc2, bc2))
        skip = feats[-(i + 1)]
        skip = jnp.repeat(jnp.repeat(skip, 2, axis=2), 2, axis=3)  # TODO(synk)
        x = jnp.concatenate([x, skip], axis=1)
    wo, bo = params["output"]
    return conv(x, wo, bo)


# ----------------------------------------------------------------------------
if __name__ == "__main__":
    key = jax.random.PRNGKey(0)
    kx, kp = jax.random.split(key)

    B, Cin, H, W = 2, 3, 16, 16
    Cout, num_layers = 4, 3          # 16 / 2**3 = 2x2 bottleneck

    x = jax.random.normal(kx, (B, Cin, H, W), jnp.float32)
    params = init_unet_params(kp, Cin, Cout, num_layers)

    forward = build_unet_forward(params, Cin, H, W)   # packs params once
    y = forward(x)
    jax.block_until_ready(y)

    assert y.shape == (B, Cout, H, W), y.shape
    assert bool(jnp.all(jnp.isfinite(y)))

    y_ref = jax.jit(unet_reference)(params, x)
    err = float(jnp.max(jnp.abs(y - y_ref)))
    assert err < 5e-2, f"max |kernel - reference| = {err}"
    print("KERNEL_OK")
</pallas_src>

<mosaic_0001>
module attributes {stable_mosaic.version = 11 : i64} {
  func.func @kernel(%arg0: i32, %arg1: memref<1x8x362xf32, #tpu.memory_space<vmem>>, %arg2: memref<8x72xf32, #tpu.memory_space<vmem>>, %arg3: memref<8x1xf32, #tpu.memory_space<vmem>>, %arg4: memref<1x324xbf16, #tpu.memory_space<vmem>>, %arg5: memref<8x72xf32, #tpu.memory_space<vmem>>, %arg6: memref<8x1xf32, #tpu.memory_space<vmem>>, %arg7: memref<267x122xbf16, #tpu.memory_space<vmem>>, %arg8: memref<8x72xf32, #tpu.memory_space<vmem>>, %arg9: memref<8x1xf32, #tpu.memory_space<vmem>>, %arg10: memref<1x100xbf16, #tpu.memory_space<vmem>>, %arg11: memref<8x72xf32, #tpu.memory_space<vmem>>, %arg12: memref<8x1xf32, #tpu.memory_space<vmem>>, %arg13: memref<67x50xbf16, #tpu.memory_space<vmem>>, %arg14: memref<16x72xf32, #tpu.memory_space<vmem>>, %arg15: memref<16x1xf32, #tpu.memory_space<vmem>>, %arg16: memref<1x36xbf16, #tpu.memory_space<vmem>>, %arg17: memref<16x144xf32, #tpu.memory_space<vmem>>, %arg18: memref<16x1xf32, #tpu.memory_space<vmem>>, %arg19: memref<15x26xbf16, #tpu.memory_space<vmem>>, %arg20: memref<8x144xf32, #tpu.memory_space<vmem>>, %arg21: memref<8x1xf32, #tpu.memory_space<vmem>>, %arg22: memref<1x16xbf16, #tpu.memory_space<vmem>>, %arg23: memref<8x72xf32, #tpu.memory_space<vmem>>, %arg24: memref<8x1xf32, #tpu.memory_space<vmem>>, %arg25: memref<32x8xf32, #tpu.memory_space<vmem>>, %arg26: memref<8x1xf32, #tpu.memory_space<vmem>>, %arg27: memref<4x6x64xbf16, #tpu.memory_space<vmem>>, %arg28: memref<1x64xbf16, #tpu.memory_space<vmem>>, %arg29: memref<8x72xf32, #tpu.memory_space<vmem>>, %arg30: memref<8x1xf32, #tpu.memory_space<vmem>>, %arg31: memref<1x50xbf16, #tpu.memory_space<vmem>>, %arg32: memref<8x72xf32, #tpu.memory_space<vmem>>, %arg33: memref<8x1xf32, #tpu.memory_space<vmem>>, %arg34: memref<1x36xbf16, #tpu.memory_space<vmem>>, %arg35: memref<26x36xbf16, #tpu.memory_space<vmem>>, %arg36: memref<32x24xf32, #tpu.memory_space<vmem>>, %arg37: memref<8x1xf32, #tpu.memory_space<vmem>>, %arg38: memref<4x36x144xbf16, #tpu.memory_space<vmem>>, %arg39: memref<1x144xbf16, #tpu.memory_space<vmem>>, %arg40: memref<8x72xf32, #tpu.memory_space<vmem>>, %arg41: memref<8x1xf32, #tpu.memory_space<vmem>>, %arg42: memref<1x122xbf16, #tpu.memory_space<vmem>>, %arg43: memref<8x72xf32, #tpu.memory_space<vmem>>, %arg44: memref<8x1xf32, #tpu.memory_space<vmem>>, %arg45: memref<1x100xbf16, #tpu.memory_space<vmem>>, %arg46: memref<50x100xbf16, #tpu.memory_space<vmem>>, %arg47: memref<32x16xf32, #tpu.memory_space<vmem>>, %arg48: memref<8x1xf32, #tpu.memory_space<vmem>>, %arg49: memref<4x100x400xbf16, #tpu.memory_space<vmem>>, %arg50: memref<1x400xbf16, #tpu.memory_space<vmem>>, %arg51: memref<8x72xf32, #tpu.memory_space<vmem>>, %arg52: memref<8x1xf32, #tpu.memory_space<vmem>>, %arg53: memref<1x362xbf16, #tpu.memory_space<vmem>>, %arg54: memref<8x72xf32, #tpu.memory_space<vmem>>, %arg55: memref<8x1xf32, #tpu.memory_space<vmem>>, %arg56: memref<1x324xbf16, #tpu.memory_space<vmem>>, %arg57: memref<122x324xbf16, #tpu.memory_space<vmem>>, %arg58: memref<8x144xf32, #tpu.memory_space<vmem>>, %arg59: memref<8x1xf32, #tpu.memory_space<vmem>>, %arg60: memref<286x256xbf16, #tpu.memory_space<vmem>>, %arg61: memref<1x8x256xf32, #tpu.memory_space<vmem>>) attributes {dimension_semantics = [#tpu.dimension_semantics<parallel>], iteration_bounds = array<i64: 2>, scalar_prefetch = 0 : i64, scratch_operands = 0 : i64, tpu.core_type = #tpu.core_type<tc>, window_params = [{transform_indices = @transform_0, window_bounds = array<i64: 1, 8, 362>}, {pipeline_mode = #tpu.pipeline_mode<synchronous>, transform_indices = @transform_1, window_bounds = array<i64: 8, 72>}, {pipeline_mode = #tpu.pipeline_mode<synchronous>, transform_indices = @transform_2, window_bounds = array<i64: 8, 1>}, {pipeline_mode = #tpu.pipeline_mode<synchronous>, transform_indices = @transform_3, window_bounds = array<i64: 1, 324>}, {pipeline_mode = #tpu.pipeline_mode<synchronous>, transform_indices = @transform_4, window_bounds = array<i64: 8, 72>}, {pipeline_mode = #tpu.pipeline_mode<synchronous>, transform_indices = @transform_5, window_bounds = array<i64: 8, 1>}, {pipeline_mode = #tpu.pipeline_mode<synchronous>, transform_indices = @transform_6, window_bounds = array<i64: 267, 122>}, {pipeline_mode = #tpu.pipeline_mode<synchronous>, transform_indices = @transform_7, window_bounds = array<i64: 8, 72>}, {pipeline_mode = #tpu.pipeline_mode<synchronous>, transform_indices = @transform_8, window_bounds = array<i64: 8, 1>}, {pipeline_mode = #tpu.pipeline_mode<synchronous>, transform_indices = @transform_9, window_bounds = array<i64: 1, 100>}, {pipeline_mode = #tpu.pipeline_mode<synchronous>, transform_indices = @transform_10, window_bounds = array<i64: 8, 72>}, {pipeline_mode = #tpu.pipeline_mode<synchronous>, transform_indices = @transform_11, window_bounds = array<i64: 8, 1>}, {pipeline_mode = #tpu.pipeline_mode<synchronous>, transform_indices = @transform_12, window_bounds = array<i64: 67, 50>}, {pipeline_mode = #tpu.pipeline_mode<synchronous>, transform_indices = @transform_13, window_bounds = array<i64: 16, 72>}, {pipeline_mode = #tpu.pipeline_mode<synchronous>, transform_indices = @transform_14, window_bounds = array<i64: 16, 1>}, {pipeline_mode = #tpu.pipeline_mode<synchronous>, transform_indices = @transform_15, window_bounds = array<i64: 1, 36>}, {pipeline_mode = #tpu.pipeline_mode<synchronous>, transform_indices = @transform_16, window_bounds = array<i64: 16, 144>}, {pipeline_mode = #tpu.pipeline_mode<synchronous>, transform_indices = @transform_17, window_bounds = array<i64: 16, 1>}, {pipeline_mode = #tpu.pipeline_mode<synchronous>, transform_indices = @transform_18, window_bounds = array<i64: 15, 26>}, {pipeline_mode = #tpu.pipeline_mode<synchronous>, transform_indices = @transform_19, window_bounds = array<i64: 8, 144>}, {pipeline_mode = #tpu.pipeline_mode<synchronous>, transform_indices = @transform_20, window_bounds = array<i64: 8, 1>}, {pipeline_mode = #tpu.pipeline_mode<synchronous>, transform_indices = @transform_21, window_bounds = array<i64: 1, 16>}, {pipeline_mode = #tpu.pipeline_mode<synchronous>, transform_indices = @transform_22, window_bounds = array<i64: 8, 72>}, {pipeline_mode = #tpu.pipeline_mode<synchronous>, transform_indices = @transform_23, window_bounds = array<i64: 8, 1>}, {pipeline_mode = #tpu.pipeline_mode<synchronous>, transform_indices = @transform_24, window_bounds = array<i64: 32, 8>}, {pipeline_mode = #tpu.pipeline_mode<synchronous>, transform_indices = @transform_25, window_bounds = array<i64: 8, 1>}, {pipeline_mode = #tpu.pipeline_mode<synchronous>, transform_indices = @transform_26, window_bounds = array<i64: 4, 6, 64>}, {pipeline_mode = #tpu.pipeline_mode<synchronous>, transform_indices = @transform_27, window_bounds = array<i64: 1, 64>}, {pipeline_mode = #tpu.pipeline_mode<synchronous>, transform_indices = @transform_28, window_bounds = array<i64: 8, 72>}, {pipeline_mode = #tpu.pipeline_mode<synchronous>, transform_indices = @transform_29, window_bounds = array<i64: 8, 1>}, {pipeline_mode = #tpu.pipeline_mode<synchronous>, transform_indices = @transform_30, window_bounds = array<i64: 1, 50>}, {pipeline_mode = #tpu.pipeline_mode<synchronous>, transform_indices = @transform_31, window_bounds = array<i64: 8, 72>}, {pipeline_mode = #tpu.pipeline_mode<synchronous>, transform_indices = @transform_32, window_bounds = array<i64: 8, 1>}, {pipeline_mode = #tpu.pipeline_mode<synchronous>, transform_indices = @transform_33, window_bounds = array<i64: 1, 36>}, {pipeline_mode = #tpu.pipeline_mode<synchronous>, transform_indices = @transform_34, window_bounds = array<i64: 26, 36>}, {pipeline_mode = #tpu.pipeline_mode<synchronous>, transform_indices = @transform_35, window_bounds = array<i64: 32, 24>}, {pipeline_mode = #tpu.pipeline_mode<synchronous>, transform_indices = @transform_36, window_bounds = array<i64: 8, 1>}, {pipeline_mode = #tpu.pipeline_mode<synchronous>, transform_indices = @transform_37, window_bounds = array<i64: 4, 36, 144>}, {pipeline_mode = #tpu.pipeline_mode<synchronous>, transform_indices = @transform_38, window_bounds = array<i64: 1, 144>}, {pipeline_mode = #tpu.pipeline_mode<synchronous>, transform_indices = @transform_39, window_bounds = array<i64: 8, 72>}, {pipeline_mode = #tpu.pipeline_mode<synchronous>, transform_indices = @transform_40, window_bounds = array<i64: 8, 1>}, {pipeline_mode = #tpu.pipeline_mode<synchronous>, transform_indices = @transform_41, window_bounds = array<i64: 1, 122>}, {pipeline_mode = #tpu.pipeline_mode<synchronous>, transform_indices = @transform_42, window_bounds = array<i64: 8, 72>}, {pipeline_mode = #tpu.pipeline_mode<synchronous>, transform_indices = @transform_43, window_bounds = array<i64: 8, 1>}, {pipeline_mode = #tpu.pipeline_mode<synchronous>, transform_indices = @transform_44, window_bounds = array<i64: 1, 100>}, {pipeline_mode = #tpu.pipeline_mode<synchronous>, transform_indices = @transform_45, window_bounds = array<i64: 50, 100>}, {pipeline_mode = #tpu.pipeline_mode<synchronous>, transform_indices = @transform_46, window_bounds = array<i64: 32, 16>}, {pipeline_mode = #tpu.pipeline_mode<synchronous>, transform_indices = @transform_47, window_bounds = array<i64: 8, 1>}, {pipeline_mode = #tpu.pipeline_mode<synchronous>, transform_indices = @transform_48, window_bounds = array<i64: 4, 100, 400>}, {pipeline_mode = #tpu.pipeline_mode<synchronous>, transform_indices = @transform_49, window_bounds = array<i64: 1, 400>}, {pipeline_mode = #tpu.pipeline_mode<synchronous>, transform_indices = @transform_50, window_bounds = array<i64: 8, 72>}, {pipeline_mode = #tpu.pipeline_mode<synchronous>, transform_indices = @transform_51, window_bounds = array<i64: 8, 1>}, {pipeline_mode = #tpu.pipeline_mode<synchronous>, transform_indices = @transform_52, window_bounds = array<i64: 1, 362>}, {pipeline_mode = #tpu.pipeline_mode<synchronous>, transform_indices = @transform_53, window_bounds = array<i64: 8, 72>}, {pipeline_mode = #tpu.pipeline_mode<synchronous>, transform_indices = @transform_54, window_bounds = array<i64: 8, 1>}, {pipeline_mode = #tpu.pipeline_mode<synchronous>, transform_indices = @transform_55, window_bounds = array<i64: 1, 324>}, {pipeline_mode = #tpu.pipeline_mode<synchronous>, transform_indices = @transform_56, window_bounds = array<i64: 122, 324>}, {pipeline_mode = #tpu.pipeline_mode<synchronous>, transform_indices = @transform_57, window_bounds = array<i64: 8, 144>}, {pipeline_mode = #tpu.pipeline_mode<synchronous>, transform_indices = @transform_58, window_bounds = array<i64: 8, 1>}, {pipeline_mode = #tpu.pipeline_mode<synchronous>, transform_indices = @transform_59, window_bounds = array<i64: 286, 256>}, {transform_indices = @transform_60, window_bounds = array<i64: 1, 8, 256>}]} {
    %c0 = arith.constant 0 : index
    %c0_0 = arith.constant 0 : index
    %c0_1 = arith.constant 0 : index
    %0 = vector.load %arg1[%c0, %c0_0, %c0_1] : memref<1x8x362xf32, #tpu.memory_space<vmem>>, vector<1x8x362xf32>
    %1 = vector.shape_cast %0 : vector<1x8x362xf32> to vector<8x362xf32>
    %2 = vector.extract_strided_slice %1 {offsets = [0, 0], sizes = [8, 324], strides = [1, 1]} : vector<8x362xf32> to vector<8x324xf32>
    %3 = vector.extract_strided_slice %1 {offsets = [0, 1], sizes = [8, 324], strides = [1, 1]} : vector<8x362xf32> to vector<8x324xf32>
    %4 = vector.extract_strided_slice %1 {offsets = [0, 2], sizes = [8, 324], strides = [1, 1]} : vector<8x362xf32> to vector<8x324xf32>
    %5 = vector.extract_strided_slice %1 {offsets = [0, 18], sizes = [8, 324], strides = [1, 1]} : vector<8x362xf32> to vector<8x324xf32>
    %6 = vector.extract_strided_slice %1 {offsets = [0, 19], sizes = [8, 324], strides = [1, 1]} : vector<8x362xf32> to vector<8x324xf32>
    %7 = vector.extract_strided_slice %1 {offsets = [0, 20], sizes = [8, 324], strides = [1, 1]} : vector<8x362xf32> to vector<8x324xf32>
    %8 = vector.extract_strided_slice %1 {offsets = [0, 36], sizes = [8, 324], strides = [1, 1]} : vector<8x362xf32> to vector<8x324xf32>
    %9 = vector.extract_strided_slice %1 {offsets = [0, 37], sizes = [8, 324], strides = [1, 1]} : vector<8x362xf32> to vector<8x324xf32>
    %10 = vector.extract_strided_slice %1 {offsets = [0, 38], sizes = [8, 324], strides = [1, 1]} : vector<8x362xf32> to vector<8x324xf32>
    %11 = tpu.concatenate %2, %3, %4, %5, %6, %7, %8, %9, %10 in 0 : vector<8x324xf32>, vector<8x324xf32>, vector<8x324xf32>, vector<8x324xf32>, vector<8x324xf32>, vector<8x324xf32>, vector<8x324xf32>, vector<8x324xf32>, vector<8x324xf32> -> vector<72x324xf32>
    %c0_2 = arith.constant 0 : index
    %c0_3 = arith.constant 0 : index
    %12 = vector.load %arg2[%c0_2, %c0_3] : memref<8x72xf32, #tpu.memory_space<vmem>>, vector<8x72xf32>
    %cst = arith.constant dense<0.000000e+00> : vector<8x324xf32>
    %13 = tpu.matmul %12, %11, %cst {dimension_numbers = #tpu.dot_dimension_numbers<[1], [0], [0], [1], [0, 0, 1, 1], [], []>} : vector<8x72xf32>, vector<72x324xf32>, vector<8x324xf32> -> vector<8x324xf32>
    %c0_4 = arith.constant 0 : index
    %c0_5 = arith.constant 0 : index
    %14 = vector.load %arg3[%c0_4, %c0_5] : memref<8x1xf32, #tpu.memory_space<vmem>>, vector<8x1xf32>
    %15 = vector.broadcast %14 : vector<8x1xf32> to vector<8x324xf32>
    %16 = arith.addf %13, %15 : vector<8x324xf32>
    %cst_6 = arith.constant 0.000000e+00 : f32
    %17 = vector.broadcast %cst_6 : f32 to vector<8x324xf32>
    %18 = arith.cmpf oge, %16, %17 : vector<8x324xf32>
    %cst_7 = arith.constant 0.00999999977 : f32
    %19 = vector.broadcast %cst_7 : f32 to vector<8x324xf32>
    %20 = arith.mulf %16, %19 : vector<8x324xf32>
    %21 = arith.select %18, %16, %20 : vector<8x324xi1>, vector<8x324xf32>
    %c0_8 = arith.constant 0 : index
    %c0_9 = arith.constant 0 : index
    %22 = vector.load %arg4[%c0_8, %c0_9] : memref<1x324xbf16, #tpu.memory_space<vmem>>, vector<1x324xbf16>
    %23 = arith.extf %22 : vector<1x324xbf16> to vector<1x324xf32>
    %24 = vector.broadcast %23 : vector<1x324xf32> to vector<8x324xf32>
    %25 = arith.mulf %21, %24 : vector<8x324xf32>
    %26 = vector.extract_strided_slice %25 {offsets = [0, 0], sizes = [8, 286], strides = [1, 1]} : vector<8x324xf32> to vector<8x286xf32>
    %27 = vector.extract_strided_slice %25 {offsets = [0, 1], sizes = [8, 286], strides = [1, 1]} : vector<8x324xf32> to vector<8x286xf32>
    %28 = vector.extract_strided_slice %25 {offsets = [0, 2], sizes = [8, 286], strides = [1, 1]} : vector<8x324xf32> to vector<8x286xf32>
    %29 = vector.extract_strided_slice %25 {offsets = [0, 18], sizes = [8, 286], strides = [1, 1]} : vector<8x324xf32> to vector<8x286xf32>
    %30 = vector.extract_strided_slice %25 {offsets = [0, 19], sizes = [8, 286], strides = [1, 1]} : vector<8x324xf32> to vector<8x286xf32>
    %31 = vector.extract_strided_slice %25 {offsets = [0, 20], sizes = [8, 286], strides = [1, 1]} : vector<8x324xf32> to vector<8x286xf32>
    %32 = vector.extract_strided_slice %25 {offsets = [0, 36], sizes = [8, 286], strides = [1, 1]} : vector<8x324xf32> to vector<8x286xf32>
    %33 = vector.extract_strided_slice %25 {offsets = [0, 37], sizes = [8, 286], strides = [1, 1]} : vector<8x324xf32> to vector<8x286xf32>
    %34 = vector.extract_strided_slice %25 {offsets = [0, 38], sizes = [8, 286], strides = [1, 1]} : vector<8x324xf32> to vector<8x286xf32>
    %35 = tpu.concatenate %26, %27, %28, %29, %30, %31, %32, %33, %34 in 0 : vector<8x286xf32>, vector<8x286xf32>, vector<8x286xf32>, vector<8x286xf32>, vector<8x286xf32>, vector<8x286xf32>, vector<8x286xf32>, vector<8x286xf32>, vector<8x286xf32> -> vector<72x286xf32>
    %c0_10 = arith.constant 0 : index
    %c0_11 = arith.constant 0 : index
    %36 = vector.load %arg5[%c0_10, %c0_11] : memref<8x72xf32, #tpu.memory_space<vmem>>, vector<8x72xf32>
    %cst_12 = arith.constant dense<0.000000e+00> : vector<8x286xf32>
    %37 = tpu.matmul %36, %35, %cst_12 {dimension_numbers = #tpu.dot_dimension_numbers<[1], [0], [0], [1], [0, 0, 1, 1], [], []>} : vector<8x72xf32>, vector<72x286xf32>, vector<8x286xf32> -> vector<8x286xf32>
    %c0_13 = arith.constant 0 : index
    %c0_14 = arith.constant 0 : index
    %38 = vector.load %arg6[%c0_13, %c0_14] : memref<8x1xf32, #tpu.memory_space<vmem>>, vector<8x1xf32>
    %39 = vector.broadcast %38 : vector<8x1xf32> to vector<8x286xf32>
    %40 = arith.addf %37, %39 : vector<8x286xf32>
    %cst_15 = arith.constant 0.000000e+00 : f32
    %41 = vector.broadcast %cst_15 : f32 to vector<8x286xf32>
    %42 = arith.cmpf oge, %40, %41 : vector<8x286xf32>
    %cst_16 = arith.constant 0.00999999977 : f32
    %43 = vector.broadcast %cst_16 : f32 to vector<8x286xf32>
    %44 = arith.mulf %40, %43 : vector<8x286xf32>
    %45 = arith.select %42, %40, %44 : vector<8x286xi1>, vector<8x286xf32>
    %46 = vector.extract_strided_slice %45 {offsets = [0, 0], sizes = [8, 267], strides = [1, 1]} : vector<8x286xf32> to vector<8x267xf32>
    %47 = vector.extract_strided_slice %45 {offsets = [0, 1], sizes = [8, 267], strides = [1, 1]} : vector<8x286xf32> to vector<8x267xf32>
    %48 = arith.maximumf %46, %47 : vector<8x267xf32>
    %49 = vector.extract_strided_slice %45 {offsets = [0, 18], sizes = [8, 267], strides = [1, 1]} : vector<8x286xf32> to vector<8x267xf32>
    %50 = vector.extract_strided_slice %45 {offsets = [0, 19], sizes = [8, 267], strides = [1, 1]} : vector<8x286xf32> to vector<8x267xf32>
    %51 = arith.maximumf %49, %50 : vector<8x267xf32>
    %52 = arith.maximumf %48, %51 : vector<8x267xf32>
    %c0_17 = arith.constant 0 : index
    %c0_18 = arith.constant 0 : index
    %53 = vector.load %arg7[%c0_17, %c0_18] : memref<267x122xbf16, #tpu.memory_space<vmem>>, vector<267x122xbf16>
    %54 = arith.extf %53 : vector<267x122xbf16> to vector<267x122xf32>
    %cst_19 = arith.constant dense<0.000000e+00> : vector<8x122xf32>
    %55 = tpu.matmul %52, %54, %cst_19 {dimension_numbers = #tpu.dot_dimension_numbers<[1], [0], [0], [1], [0, 0, 1, 1], [], []>} : vector<8x267xf32>, vector<267x122xf32>, vector<8x122xf32> -> vector<8x122xf32>
    %56 = vector.extract_strided_slice %55 {offsets = [0, 0], sizes = [8, 100], strides = [1, 1]} : vector<8x122xf32> to vector<8x100xf32>
    %57 = vector.extract_strided_slice %55 {offsets = [0, 1], sizes = [8, 100], strides = [1, 1]} : vector<8x122xf32> to vector<8x100xf32>
    %58 = vector.extract_strided_slice %55 {offsets = [0, 2], sizes = [8, 100], strides = [1, 1]} : vector<8x122xf32> to vector<8x100xf32>
    %59 = vector.extract_strided_slice %55 {offsets = [0, 10], sizes = [8, 100], strides = [1, 1]} : vector<8x122xf32> to vector<8x100xf32>
    %60 = vector.extract_strided_slice %55 {offsets = [0, 11], sizes = [8, 100], strides = [1, 1]} : vector<8x122xf32> to vector<8x100xf32>
    %61 = vector.extract_strided_slice %55 {offsets = [0, 12], sizes = [8, 100], strides = [1, 1]} : vector<8x122xf32> to vector<8x100xf32>
    %62 = vector.extract_strided_slice %55 {offsets = [0, 20], sizes = [8, 100], strides = [1, 1]} : vector<8x122xf32> to vector<8x100xf32>
    %63 = vector.extract_strided_slice %55 {offsets = [0, 21], sizes = [8, 100], strides = [1, 1]} : vector<8x122xf32> to vector<8x100xf32>
    %64 = vector.extract_strided_slice %55 {offsets = [0, 22], sizes = [8, 100], strides = [1, 1]} : vector<8x122xf32> to vector<8x100xf32>
    %65 = tpu.concatenate %56, %57, %58, %59, %60, %61, %62, %63, %64 in 0 : vector<8x100xf32>, vector<8x100xf32>, vector<8x100xf32>, vector<8x100xf32>, vector<8x100xf32>, vector<8x100xf32>, vector<8x100xf32>, vector<8x100xf32>, vector<8x100xf32> -> vector<72x100xf32>
    %c0_20 = arith.constant 0 : index
    %c0_21 = arith.constant 0 : index
    %66 = vector.load %arg8[%c0_20, %c0_21] : memref<8x72xf32, #tpu.memory_space<vmem>>, vector<8x72xf32>
    %cst_22 = arith.constant dense<0.000000e+00> : vector<8x100xf32>
    %67 = tpu.matmul %66, %65, %cst_22 {dimension_numbers = #tpu.dot_dimension_numbers<[1], [0], [0], [1], [0, 0, 1, 1], [], []>} : vector<8x72xf32>, vector<72x100xf32>, vector<8x100xf32> -> vector<8x100xf32>
    %c0_23 = arith.constant 0 : index
    %c0_24 = arith.constant 0 : index
    %68 = vector.load %arg9[%c0_23, %c0_24] : memref<8x1xf32, #tpu.memory_space<vmem>>, vector<8x1xf32>
    %69 = vector.broadcast %68 : vector<8x1xf32> to vector<8x100xf32>
    %70 = arith.addf %67, %69 : vector<8x100xf32>
    %cst_25 = arith.constant 0.000000e+00 : f32
    %71 = vector.broadcast %cst_25 : f32 to vector<8x100xf32>
    %72 = arith.cmpf oge, %70, %71 : vector<8x100xf32>
    %cst_26 = arith.constant 0.00999999977 : f32
    %73 = vector.broadcast %cst_26 : f32 to vector<8x100xf32>
    %74 = arith.mulf %70, %73 : vector<8x100xf32>
    %75 = arith.select %72, %70, %74 : vector<8x100xi1>, vector<8x100xf32>
    %c0_27 = arith.constant 0 : index
    %c0_28 = arith.constant 0 : index
    %76 = vector.load %arg10[%c0_27, %c0_28] : memref<1x100xbf16, #tpu.memory_space<vmem>>, vector<1x100xbf16>
    %77 = arith.extf %76 : vector<1x100xbf16> to vector<1x100xf32>
    %78 = vector.broadcast %77 : vector<1x100xf32> to vector<8x100xf32>
    %79 = arith.mulf %75, %78 : vector<8x100xf32>
    %80 = vector.extract_strided_slice %79 {offsets = [0, 0], sizes = [8, 78], strides = [1, 1]} : vector<8x100xf32> to vector<8x78xf32>
    %81 = vector.extract_strided_slice %79 {offsets = [0, 1], sizes = [8, 78], strides = [1, 1]} : vector<8x100xf32> to vector<8x78xf32>
    %82 = vector.extract_strided_slice %79 {offsets = [0, 2], sizes = [8, 78], strides = [1, 1]} : vector<8x100xf32> to vector<8x78xf32>
    %83 = vector.extract_strided_slice %79 {offsets = [0, 10], sizes = [8, 78], strides = [1, 1]} : vector<8x100xf32> to vector<8x78xf32>
    %84 = vector.extract_strided_slice %79 {offsets = [0, 11], sizes = [8, 78], strides = [1, 1]} : vector<8x100xf32> to vector<8x78xf32>
    %85 = vector.extract_strided_slice %79 {offsets = [0, 12], sizes = [8, 78], strides = [1, 1]} : vector<8x100xf32> to vector<8x78xf32>
    %86 = vector.extract_strided_slice %79 {offsets = [0, 20], sizes = [8, 78], strides = [1, 1]} : vector<8x100xf32> to vector<8x78xf32>
    %87 = vector.extract_strided_slice %79 {offsets = [0, 21], sizes = [8, 78], strides = [1, 1]} : vector<8x100xf32> to vector<8x78xf32>
    %88 = vector.extract_strided_slice %79 {offsets = [0, 22], sizes = [8, 78], strides = [1, 1]} : vector<8x100xf32> to vector<8x78xf32>
    %89 = tpu.concatenate %80, %81, %82, %83, %84, %85, %86, %87, %88 in 0 : vector<8x78xf32>, vector<8x78xf32>, vector<8x78xf32>, vector<8x78xf32>, vector<8x78xf32>, vector<8x78xf32>, vector<8x78xf32>, vector<8x78xf32>, vector<8x78xf32> -> vector<72x78xf32>
    %c0_29 = arith.constant 0 : index
    %c0_30 = arith.constant 0 : index
    %90 = vector.load %arg11[%c0_29, %c0_30] : memref<8x72xf32, #tpu.memory_space<vmem>>, vector<8x72xf32>
    %cst_31 = arith.constant dense<0.000000e+00> : vector<8x78xf32>
    %91 = tpu.matmul %90, %89, %cst_31 {dimension_numbers = #tpu.dot_dimension_numbers<[1], [0], [0], [1], [0, 0, 1, 1], [], []>} : vector<8x72xf32>, vector<72x78xf32>, vector<8x78xf32> -> vector<8x78xf32>
    %c0_32 = arith.constant 0 : index
    %c0_33 = arith.constant 0 : index
    %92 = vector.load %arg12[%c0_32, %c0_33] : memref<8x1xf32, #tpu.memory_space<vmem>>, vector<8x1xf32>
    %93 = vector.broadcast %92 : vector<8x1xf32> to vector<8x78xf32>
    %94 = arith.addf %91, %93 : vector<8x78xf32>
    %cst_34 = arith.constant 0.000000e+00 : f32
    %95 = vector.broadcast %cst_34 : f32 to vector<8x78xf32>
    %96 = arith.cmpf oge, %94, %95 : vector<8x78xf32>
    %cst_35 = arith.constant 0.00999999977 : f32
    %97 = vector.broadcast %cst_35 : f32 to vector<8x78xf32>
    %98 = arith.mulf %94, %97 : vector<8x78xf32>
    %99 = arith.select %96, %94, %98 : vector<8x78xi1>, vector<8x78xf32>
    %100 = vector.extract_strided_slice %99 {offsets = [0, 0], sizes = [8, 67], strides = [1, 1]} : vector<8x78xf32> to vector<8x67xf32>
    %101 = vector.extract_strided_slice %99 {offsets = [0, 1], sizes = [8, 67], strides = [1, 1]} : vector<8x78xf32> to vector<8x67xf32>
    %102 = arith.maximumf %100, %101 : vector<8x67xf32>
    %103 = vector.extract_strided_slice %99 {offsets = [0, 10], sizes = [8, 67], strides = [1, 1]} : vector<8x78xf32> to vector<8x67xf32>
    %104 = vector.extract_strided_slice %99 {offsets = [0, 11], sizes = [8, 67], strides = [1, 1]} : vector<8x78xf32> to vector<8x67xf32>
    %105 = arith.maximumf %103, %104 : vector<8x67xf32>
    %106 = arith.maximumf %102, %105 : vector<8x67xf32>
    %c0_36 = arith.constant 0 : index
    %c0_37 = arith.constant 0 : index
    %107 = vector.load %arg13[%c0_36, %c0_37] : memref<67x50xbf16, #tpu.memory_space<vmem>>, vector<67x50xbf16>
    %108 = arith.extf %107 : vector<67x50xbf16> to vector<67x50xf32>
    %cst_38 = arith.constant dense<0.000000e+00> : vector<8x50xf32>
    %109 = tpu.matmul %106, %108, %cst_38 {dimension_numbers = #tpu.dot_dimension_numbers<[1], [0], [0], [1], [0, 0, 1, 1], [], []>} : vector<8x67xf32>, vector<67x50xf32>, vector<8x50xf32> -> vector<8x50xf32>
    %110 = vector.extract_strided_slice %109 {offsets = [0, 0], sizes = [8, 36], strides = [1, 1]} : vector<8x50xf32> to vector<8x36xf32>
    %111 = vector.extract_strided_slice %109 {offsets = [0, 1], sizes = [8, 36], strides = [1, 1]} : vector<8x50xf32> to vector<8x36xf32>
    %112 = vector.extract_strided_slice %109 {offsets = [0, 2], sizes = [8, 36], strides = [1, 1]} : vector<8x50xf32> to vector<8x36xf32>
    %113 = vector.extract_strided_slice %109 {offsets = [0, 6], sizes = [8, 36], strides = [1, 1]} : vector<8x50xf32> to vector<8x36xf32>
    %114 = vector.extract_strided_slice %109 {offsets = [0, 7], sizes = [8, 36], strides = [1, 1]} : vector<8x50xf32> to vector<8x36xf32>
    %115 = vector.extract_strided_slice %109 {offsets = [0, 8], sizes = [8, 36], strides = [1, 1]} : vector<8x50xf32> to vector<8x36xf32>
    %116 = vector.extract_strided_slice %109 {offsets = [0, 12], sizes = [8, 36], strides = [1, 1]} : vector<8x50xf32> to vector<8x36xf32>
    %117 = vector.extract_strided_slice %109 {offsets = [0, 13], sizes = [8, 36], strides = [1, 1]} : vector<8x50xf32> to vector<8x36xf32>
    %118 = vector.extract_strided_slice %109 {offsets = [0, 14], sizes = [8, 36], strides = [1, 1]} : vector<8x50xf32> to vector<8x36xf32>
    %119 = tpu.concatenate %110, %111, %112, %113, %114, %115, %116, %117, %118 in 0 : vector<8x36xf32>, vector<8x36xf32>, vector<8x36xf32>, vector<8x36xf32>, vector<8x36xf32>, vector<8x36xf32>, vector<8x36xf32>, vector<8x36xf32>, vector<8x36xf32> -> vector<72x36xf32>
    %c0_39 = arith.constant 0 : index
    %c0_40 = arith.constant 0 : index
    %120 = vector.load %arg14[%c0_39, %c0_40] : memref<16x72xf32, #tpu.memory_space<vmem>>, vector<16x72xf32>
    %cst_41 = arith.constant dense<0.000000e+00> : vector<16x36xf32>
    %121 = tpu.matmul %120, %119, %cst_41 {dimension_numbers = #tpu.dot_dimension_numbers<[1], [0], [0], [1], [0, 0, 1, 1], [], []>} : vector<16x72xf32>, vector<72x36xf32>, vector<16x36xf32> -> vector<16x36xf32>
    %c0_42 = arith.constant 0 : index
    %c0_43 = arith.constant 0 : index
    %122 = vector.load %arg15[%c0_42, %c0_43] : memref<16x1xf32, #tpu.memory_space<vmem>>, vector<16x1xf32>
    %123 = vector.broadcast %122 : vector<16x1xf32> to vector<16x36xf32>
    %124 = arith.addf %121, %123 : vector<16x36xf32>
    %cst_44 = arith.constant 0.000000e+00 : f32
    %125 = vector.broadcast %cst_44 : f32 to vector<16x36xf32>
    %126 = arith.cmpf oge, %124, %125 : vector<16x36xf32>
    %cst_45 = arith.constant 0.00999999977 : f32
    %127 = vector.broadcast %cst_45 : f32 to vector<16x36xf32>
    %128 = arith.mulf %124, %127 : vector<16x36xf32>
    %129 = arith.select %126, %124, %128 : vector<16x36xi1>, vector<16x36xf32>
    %c0_46 = arith.constant 0 : index
    %c0_47 = arith.constant 0 : index
    %130 = vector.load %arg16[%c0_46, %c0_47] : memref<1x36xbf16, #tpu.memory_space<vmem>>, vector<1x36xbf16>
    %131 = arith.extf %130 : vector<1x36xbf16> to vector<1x36xf32>
    %132 = vector.broadcast %131 : vector<1x36xf32> to vector<16x36xf32>
    %133 = arith.mulf %129, %132 : vector<16x36xf32>
    %134 = vector.extract_strided_slice %133 {offsets = [0, 0], sizes = [16, 22], strides = [1, 1]} : vector<16x36xf32> to vector<16x22xf32>
    %135 = vector.extract_strided_slice %133 {offsets = [0, 1], sizes = [16, 22], strides = [1, 1]} : vector<16x36xf32> to vector<16x22xf32>
    %136 = vector.extract_strided_slice %133 {offsets = [0, 2], sizes = [16, 22], strides = [1, 1]} : vector<16x36xf32> to vector<16x22xf32>
    %137 = vector.extract_strided_slice %133 {offsets = [0, 6], sizes = [16, 22], strides = [1, 1]} : vector<16x36xf32> to vector<16x22xf32>
    %138 = vector.extract_strided_slice %133 {offsets = [0, 7], sizes = [16, 22], strides = [1, 1]} : vector<16x36xf32> to vector<16x22xf32>
    %139 = vector.extract_strided_slice %133 {offsets = [0, 8], sizes = [16, 22], strides = [1, 1]} : vector<16x36xf32> to vector<16x22xf32>
    %140 = vector.extract_strided_slice %133 {offsets = [0, 12], sizes = [16, 22], strides = [1, 1]} : vector<16x36xf32> to vector<16x22xf32>
    %141 = vector.extract_strided_slice %133 {offsets = [0, 13], sizes = [16, 22], strides = [1, 1]} : vector<16x36xf32> to vector<16x22xf32>
    %142 = vector.extract_strided_slice %133 {offsets = [0, 14], sizes = [16, 22], strides = [1, 1]} : vector<16x36xf32> to vector<16x22xf32>
    %143 = tpu.concatenate %134, %135, %136, %137, %138, %139, %140, %141, %142 in 0 : vector<16x22xf32>, vector<16x22xf32>, vector<16x22xf32>, vector<16x22xf32>, vector<16x22xf32>, vector<16x22xf32>, vector<16x22xf32>, vector<16x22xf32>, vector<16x22xf32> -> vector<144x22xf32>
    %c0_48 = arith.constant 0 : index
    %c0_49 = arith.constant 0 : index
    %144 = vector.load %arg17[%c0_48, %c0_49] : memref<16x144xf32, #tpu.memory_space<vmem>>, vector<16x144xf32>
    %cst_50 = arith.constant dense<0.000000e+00> : vector<16x22xf32>
    %145 = tpu.matmul %144, %143, %cst_50 {dimension_numbers = #tpu.dot_dimension_numbers<[1], [0], [0], [1], [0, 0, 1, 1], [], []>} : vector<16x144xf32>, vector<144x22xf32>, vector<16x22xf32> -> vector<16x22xf32>
    %c0_51 = arith.constant 0 : index
    %c0_52 = arith.constant 0 : index
    %146 = vector.load %arg18[%c0_51, %c0_52] : memref<16x1xf32, #tpu.memory_space<vmem>>, vector<16x1xf32>
    %147 = vector.broadcast %146 : vector<16x1xf32> to vector<16x22xf32>
    %148 = arith.addf %145, %147 : vector<16x22xf32>
    %cst_53 = arith.constant 0.000000e+00 : f32
    %149 = vector.broadcast %cst_53 : f32 to vector<16x22xf32>
    %150 = arith.cmpf oge, %148, %149 : vector<16x22xf32>
    %cst_54 = arith.constant 0.00999999977 : f32
    %151 = vector.broadcast %cst_54 : f32 to vector<16x22xf32>
    %152 = arith.mulf %148, %151 : vector<16x22xf32>
    %153 = arith.select %150, %148, %152 : vector<16x22xi1>, vector<16x22xf32>
    %154 = vector.extract_strided_slice %153 {offsets = [0, 0], sizes = [16, 15], strides = [1, 1]} : vector<16x22xf32> to vector<16x15xf32>
    %155 = vector.extract_strided_slice %153 {offsets = [0, 1], sizes = [16, 15], strides = [1, 1]} : vector<16x22xf32> to vector<16x15xf32>
    %156 = arith.maximumf %154, %155 : vector<16x15xf32>
    %157 = vector.extract_strided_slice %153 {offsets = [0, 6], sizes = [16, 15], strides = [1, 1]} : vector<16x22xf32> to vector<16x15xf32>
    %158 = vector.extract_strided_slice %153 {offsets = [0, 7], sizes = [16, 15], strides = [1, 1]} : vector<16x22xf32> to vector<16x15xf32>
    %159 = arith.maximumf %157, %158 : vector<16x15xf32>
    %160 = arith.maximumf %156, %159 : vector<16x15xf32>
    %c0_55 = arith.constant 0 : index
    %c0_56 = arith.constant 0 : index
    %161 = vector.load %arg19[%c0_55, %c0_56] : memref<15x26xbf16, #tpu.memory_space<vmem>>, vector<15x26xbf16>
    %162 = arith.extf %161 : vector<15x26xbf16> to vector<15x26xf32>
    %cst_57 = arith.constant dense<0.000000e+00> : vector<16x26xf32>
    %163 = tpu.matmul %160, %162, %cst_57 {dimension_numbers = #tpu.dot_dimension_numbers<[1], [0], [0], [1], [0, 0, 1, 1], [], []>} : vector<16x15xf32>, vector<15x26xf32>, vector<16x26xf32> -> vector<16x26xf32>
    %164 = vector.extract_strided_slice %163 {offsets = [0, 0], sizes = [16, 16], strides = [1, 1]} : vector<16x26xf32> to vector<16x16xf32>
    %165 = vector.extract_strided_slice %163 {offsets = [0, 1], sizes = [16, 16], strides = [1, 1]} : vector<16x26xf32> to vector<16x16xf32>
    %166 = vector.extract_strided_slice %163 {offsets = [0, 2], sizes = [16, 16], strides = [1, 1]} : vector<16x26xf32> to vector<16x16xf32>
    %167 = vector.extract_strided_slice %163 {offsets = [0, 4], sizes = [16, 16], strides = [1, 1]} : vector<16x26xf32> to vector<16x16xf32>
    %168 = vector.extract_strided_slice %163 {offsets = [0, 5], sizes = [16, 16], strides = [1, 1]} : vector<16x26xf32> to vector<16x16xf32>
    %169 = vector.extract_strided_slice %163 {offsets = [0, 6], sizes = [16, 16], strides = [1, 1]} : vector<16x26xf32> to vector<16x16xf32>
    %170 = vector.extract_strided_slice %163 {offsets = [0, 8], sizes = [16, 16], strides = [1, 1]} : vector<16x26xf32> to vector<16x16xf32>
    %171 = vector.extract_strided_slice %163 {offsets = [0, 9], sizes = [16, 16], strides = [1, 1]} : vector<16x26xf32> to vector<16x16xf32>
    %172 = vector.extract_strided_slice %163 {offsets = [0, 10], sizes = [16, 16], strides = [1, 1]} : vector<16x26xf32> to vector<16x16xf32>
    %173 = tpu.concatenate %164, %165, %166, %167, %168, %169, %170, %171, %172 in 0 : vector<16x16xf32>, vector<16x16xf32>, vector<16x16xf32>, vector<16x16xf32>, vector<16x16xf32>, vector<16x16xf32>, vector<16x16xf32>, vector<16x16xf32>, vector<16x16xf32> -> vector<144x16xf32>
    %c0_58 = arith.constant 0 : index
    %c0_59 = arith.constant 0 : index
    %174 = vector.load %arg20[%c0_58, %c0_59] : memref<8x144xf32, #tpu.memory_space<vmem>>, vector<8x144xf32>
    %cst_60 = arith.constant dense<0.000000e+00> : vector<8x16xf32>
    %175 = tpu.matmul %174, %173, %cst_60 {dimension_numbers = #tpu.dot_dimension_numbers<[1], [0], [0], [1], [0, 0, 1, 1], [], []>} : vector<8x144xf32>, vector<144x16xf32>, vector<8x16xf32> -> vector<8x16xf32>
    %c0_61 = arith.constant 0 : index
    %c0_62 = arith.constant 0 : index
    %176 = vector.load %arg21[%c0_61, %c0_62] : memref<8x1xf32, #tpu.memory_space<vmem>>, vector<8x1xf32>
    %177 = vector.broadcast %176 : vector<8x1xf32> to vector<8x16xf32>
    %178 = arith.addf %175, %177 : vector<8x16xf32>
    %cst_63 = arith.constant 0.000000e+00 : f32
    %179 = vector.broadcast %cst_63 : f32 to vector<8x16xf32>
    %180 = arith.cmpf oge, %178, %179 : vector<8x16xf32>
    %cst_64 = arith.constant 0.00999999977 : f32
    %181 = vector.broadcast %cst_64 : f32 to vector<8x16xf32>
    %182 = arith.mulf %178, %181 : vector<8x16xf32>
    %183 = arith.select %180, %178, %182 : vector<8x16xi1>, vector<8x16xf32>
    %c0_65 = arith.constant 0 : index
    %c0_66 = arith.constant 0 : index
    %184 = vector.load %arg22[%c0_65, %c0_66] : memref<1x16xbf16, #tpu.memory_space<vmem>>, vector<1x16xbf16>
    %185 = arith.extf %184 : vector<1x16xbf16> to vector<1x16xf32>
    %186 = vector.broadcast %185 : vector<1x16xf32> to vector<8x16xf32>
    %187 = arith.mulf %183, %186 : vector<8x16xf32>
    %188 = vector.extract_strided_slice %187 {offsets = [0, 0], sizes = [8, 6], strides = [1, 1]} : vector<8x16xf32> to vector<8x6xf32>
    %189 = vector.extract_strided_slice %187 {offsets = [0, 1], sizes = [8, 6], strides = [1, 1]} : vector<8x16xf32> to vector<8x6xf32>
    %190 = vector.extract_strided_slice %187 {offsets = [0, 2], sizes = [8, 6], strides = [1, 1]} : vector<8x16xf32> to vector<8x6xf32>
    %191 = vector.extract_strided_slice %187 {offsets = [0, 4], sizes = [8, 6], strides = [1, 1]} : vector<8x16xf32> to vector<8x6xf32>
    %192 = vector.extract_strided_slice %187 {offsets = [0, 5], sizes = [8, 6], strides = [1, 1]} : vector<8x16xf32> to vector<8x6xf32>
    %193 = vector.extract_strided_slice %187 {offsets = [0, 6], sizes = [8, 6], strides = [1, 1]} : vector<8x16xf32> to vector<8x6xf32>
    %194 = vector.extract_strided_slice %187 {offsets = [0, 8], sizes = [8, 6], strides = [1, 1]} : vector<8x16xf32> to vector<8x6xf32>
    %195 = vector.extract_strided_slice %187 {offsets = [0, 9], sizes = [8, 6], strides = [1, 1]} : vector<8x16xf32> to vector<8x6xf32>
    %196 = vector.extract_strided_slice %187 {offsets = [0, 10], sizes = [8, 6], strides = [1, 1]} : vector<8x16xf32> to vector<8x6xf32>
    %197 = tpu.concatenate %188, %189, %190, %191, %192, %193, %194, %195, %196 in 0 : vector<8x6xf32>, vector<8x6xf32>, vector<8x6xf32>, vector<8x6xf32>, vector<8x6xf32>, vector<8x6xf32>, vector<8x6xf32>, vector<8x6xf32>, vector<8x6xf32> -> vector<72x6xf32>
    %c0_67 = arith.constant 0 : index
    %c0_68 = arith.constant 0 : index
    %198 = vector.load %arg23[%c0_67, %c0_68] : memref<8x72xf32, #tpu.memory_space<vmem>>, vector<8x72xf32>
    %cst_69 = arith.constant dense<0.000000e+00> : vector<8x6xf32>
    %199 = tpu.matmul %198, %197, %cst_69 {dimension_numbers = #tpu.dot_dimension_numbers<[1], [0], [0], [1], [0, 0, 1, 1], [], []>} : vector<8x72xf32>, vector<72x6xf32>, vector<8x6xf32> -> vector<8x6xf32>
    %c0_70 = arith.constant 0 : index
    %c0_71 = arith.constant 0 : index
    %200 = vector.load %arg24[%c0_70, %c0_71] : memref<8x1xf32, #tpu.memory_space<vmem>>, vector<8x1xf32>
    %201 = vector.broadcast %200 : vector<8x1xf32> to vector<8x6xf32>
    %202 = arith.addf %199, %201 : vector<8x6xf32>
    %cst_72 = arith.constant 0.000000e+00 : f32
    %203 = vector.broadcast %cst_72 : f32 to vector<8x6xf32>
    %204 = arith.cmpf oge, %202, %203 : vector<8x6xf32>
    %cst_73 = arith.constant 0.00999999977 : f32
    %205 = vector.broadcast %cst_73 : f32 to vector<8x6xf32>
    %206 = arith.mulf %202, %205 : vector<8x6xf32>
    %207 = arith.select %204, %202, %206 : vector<8x6xi1>, vector<8x6xf32>
    %c0_74 = arith.constant 0 : index
    %c0_75 = arith.constant 0 : index
    %208 = vector.load %arg25[%c0_74, %c0_75] : memref<32x8xf32, #tpu.memory_space<vmem>>, vector<32x8xf32>
    %cst_76 = arith.constant dense<0.000000e+00> : vector<32x6xf32>
    %209 = tpu.matmul %208, %207, %cst_76 {dimension_numbers = #tpu.dot_dimension_numbers<[1], [0], [0], [1], [0, 0, 1, 1], [], []>} : vector<32x8xf32>, vector<8x6xf32>, vector<32x6xf32> -> vector<32x6xf32>
    %210 = vector.extract_strided_slice %209 {offsets = [0, 0], sizes = [8, 6], strides = [1, 1]} : vector<32x6xf32> to vector<8x6xf32>
    %c0_77 = arith.constant 0 : index
    %c0_78 = arith.constant 0 : index
    %c0_79 = arith.constant 0 : index
    %211 = vector.load %arg27[%c0_77, %c0_78, %c0_79] : memref<4x6x64xbf16, #tpu.memory_space<vmem>>, vector<1x6x64xbf16>
    %212 = vector.shape_cast %211 : vector<1x6x64xbf16> to vector<6x64xbf16>
    %213 = arith.extf %212 : vector<6x64xbf16> to vector<6x64xf32>
    %cst_80 = arith.constant dense<0.000000e+00> : vector<8x64xf32>
    %214 = tpu.matmul %210, %213, %cst_80 {dimension_numbers = #tpu.dot_dimension_numbers<[1], [0], [0], [1], [0, 0, 1, 1], [], []>} : vector<8x6xf32>, vector<6x64xf32>, vector<8x64xf32> -> vector<8x64xf32>
    %215 = vector.extract_strided_slice %209 {offsets = [8, 0], sizes = [8, 6], strides = [1, 1]} : vector<32x6xf32> to vector<8x6xf32>
    %c1 = arith.constant 1 : index
    %c0_81 = arith.constant 0 : index
    %c0_82 = arith.constant 0 : index
    %216 = vector.load %arg27[%c1, %c0_81, %c0_82] : memref<4x6x64xbf16, #tpu.memory_space<vmem>>, vector<1x6x64xbf16>
    %217 = vector.shape_cast %216 : vector<1x6x64xbf16> to vector<6x64xbf16>
    %218 = arith.extf %217 : vector<6x64xbf16> to vector<6x64xf32>
    %cst_83 = arith.constant dense<0.000000e+00> : vector<8x64xf32>
    %219 = tpu.matmul %215, %218, %cst_83 {dimension_numbers = #tpu.dot_dimension_numbers<[1], [0], [0], [1], [0, 0, 1, 1], [], []>} : vector<8x6xf32>, vector<6x64xf32>, vector<8x64xf32> -> vector<8x64xf32>
    %220 = arith.addf %214, %219 : vector<8x64xf32>
    %221 = vector.extract_strided_slice %209 {offsets = [16, 0], sizes = [8, 6], strides = [1, 1]} : vector<32x6xf32> to vector<8x6xf32>
    %c2 = arith.constant 2 : index
    %c0_84 = arith.constant 0 : index
    %c0_85 = arith.constant 0 : index
    %222 = vector.load %arg27[%c2, %c0_84, %c0_85] : memref<4x6x64xbf16, #tpu.memory_space<vmem>>, vector<1x6x64xbf16>
    %223 = vector.shape_cast %222 : vector<1x6x64xbf16> to vector<6x64xbf16>
    %224 = arith.extf %223 : vector<6x64xbf16> to vector<6x64xf32>
    %cst_86 = arith.constant dense<0.000000e+00> : vector<8x64xf32>
    %225 = tpu.matmul %221, %224, %cst_86 {dimension_numbers = #tpu.dot_dimension_numbers<[1], [0], [0], [1], [0, 0, 1, 1], [], []>} : vector<8x6xf32>, vector<6x64xf32>, vector<8x64xf32> -> vector<8x64xf32>
    %226 = arith.addf %220, %225 : vector<8x64xf32>
    %227 = vector.extract_strided_slice %209 {offsets = [24, 0], sizes = [8, 6], strides = [1, 1]} : vector<32x6xf32> to vector<8x6xf32>
    %c3 = arith.constant 3 : index
    %c0_87 = arith.constant 0 : index
    %c0_88 = arith.constant 0 : index
    %228 = vector.load %arg27[%c3, %c0_87, %c0_88] : memref<4x6x64xbf16, #tpu.memory_space<vmem>>, vector<1x6x64xbf16>
    %229 = vector.shape_cast %228 : vector<1x6x64xbf16> to vector<6x64xbf16>
    %230 = arith.extf %229 : vector<6x64xbf16> to vector<6x64xf32>
    %cst_89 = arith.constant dense<0.000000e+00> : vector<8x64xf32>
    %231 = tpu.matmul %227, %230, %cst_89 {dimension_numbers = #tpu.dot_dimension_numbers<[1], [0], [0], [1], [0, 0, 1, 1], [], []>} : vector<8x6xf32>, vector<6x64xf32>, vector<8x64xf32> -> vector<8x64xf32>
    %232 = arith.addf %226, %231 : vector<8x64xf32>
    %c0_90 = arith.constant 0 : index
    %c0_91 = arith.constant 0 : index
    %233 = vector.load %arg26[%c0_90, %c0_91] : memref<8x1xf32, #tpu.memory_space<vmem>>, vector<8x1xf32>
    %234 = vector.broadcast %233 : vector<8x1xf32> to vector<8x64xf32>
    %235 = arith.addf %232, %234 : vector<8x64xf32>
    %cst_92 = arith.constant 0.000000e+00 : f32
    %236 = vector.broadcast %cst_92 : f32 to vector<8x64xf32>
    %237 = arith.cmpf oge, %235, %236 : vector<8x64xf32>
    %cst_93 = arith.constant 0.00999999977 : f32
    %238 = vector.broadcast %cst_93 : f32 to vector<8x64xf32>
    %239 = arith.mulf %235, %238 : vector<8x64xf32>
    %240 = arith.select %237, %235, %239 : vector<8x64xi1>, vector<8x64xf32>
    %c0_94 = arith.constant 0 : index
    %c0_95 = arith.constant 0 : index
    %241 = vector.load %arg28[%c0_94, %c0_95] : memref<1x64xbf16, #tpu.memory_space<vmem>>, vector<1x64xbf16>
    %242 = arith.extf %241 : vector<1x64xbf16> to vector<1x64xf32>
    %243 = vector.broadcast %242 : vector<1x64xf32> to vector<8x64xf32>
    %244 = arith.mulf %240, %243 : vector<8x64xf32>
    %245 = vector.extract_strided_slice %244 {offsets = [0, 0], sizes = [8, 50], strides = [1, 1]} : vector<8x64xf32> to vector<8x50xf32>
    %246 = vector.extract_strided_slice %244 {offsets = [0, 1], sizes = [8, 50], strides = [1, 1]} : vector<8x64xf32> to vector<8x50xf32>
    %247 = vector.extract_strided_slice %244 {offsets = [0, 2], sizes = [8, 50], strides = [1, 1]} : vector<8x64xf32> to vector<8x50xf32>
    %248 = vector.extract_strided_slice %244 {offsets = [0, 6], sizes = [8, 50], strides = [1, 1]} : vector<8x64xf32> to vector<8x50xf32>
    %249 = vector.extract_strided_slice %244 {offsets = [0, 7], sizes = [8, 50], strides = [1, 1]} : vector<8x64xf32> to vector<8x50xf32>
    %250 = vector.extract_strided_slice %244 {offsets = [0, 8], sizes = [8, 50], strides = [1, 1]} : vector<8x64xf32> to vector<8x50xf32>
    %251 = vector.extract_strided_slice %244 {offsets = [0, 12], sizes = [8, 50], strides = [1, 1]} : vector<8x64xf32> to vector<8x50xf32>
    %252 = vector.extract_strided_slice %244 {offsets = [0, 13], sizes = [8, 50], strides = [1, 1]} : vector<8x64xf32> to vector<8x50xf32>
    %253 = vector.extract_strided_slice %244 {offsets = [0, 14], sizes = [8, 50], strides = [1, 1]} : vector<8x64xf32> to vector<8x50xf32>
    %254 = tpu.concatenate %245, %246, %247, %248, %249, %250, %251, %252, %253 in 0 : vector<8x50xf32>, vector<8x50xf32>, vector<8x50xf32>, vector<8x50xf32>, vector<8x50xf32>, vector<8x50xf32>, vector<8x50xf32>, vector<8x50xf32>, vector<8x50xf32> -> vector<72x50xf32>
    %c0_96 = arith.constant 0 : index
    %c0_97 = arith.constant 0 : index
    %255 = vector.load %arg29[%c0_96, %c0_97] : memref<8x72xf32, #tpu.memory_space<vmem>>, vector<8x72xf32>
    %cst_98 = arith.constant dense<0.000000e+00> : vector<8x50xf32>
    %256 = tpu.matmul %255, %254, %cst_98 {dimension_numbers = #tpu.dot_dimension_numbers<[1], [0], [0], [1], [0, 0, 1, 1], [], []>} : vector<8x72xf32>, vector<72x50xf32>, vector<8x50xf32> -> vector<8x50xf32>
    %c0_99 = arith.constant 0 : index
    %c0_100 = arith.constant 0 : index
    %257 = vector.load %arg30[%c0_99, %c0_100] : memref<8x1xf32, #tpu.memory_space<vmem>>, vector<8x1xf32>
    %258 = vector.broadcast %257 : vector<8x1xf32> to vector<8x50xf32>
    %259 = arith.addf %256, %258 : vector<8x50xf32>
    %cst_101 = arith.constant 0.000000e+00 : f32
    %260 = vector.broadcast %cst_101 : f32 to vector<8x50xf32>
    %261 = arith.cmpf oge, %259, %260 : vector<8x50xf32>
    %cst_102 = arith.constant 0.00999999977 : f32
    %262 = vector.broadcast %cst_102 : f32 to vector<8x50xf32>
    %263 = arith.mulf %259, %262 : vector<8x50xf32>
    %264 = arith.select %261, %259, %263 : vector<8x50xi1>, vector<8x50xf32>
    %c0_103 = arith.constant 0 : index
    %c0_104 = arith.constant 0 : index
    %265 = vector.load %arg31[%c0_103, %c0_104] : memref<1x50xbf16, #tpu.memory_space<vmem>>, vector<1x50xbf16>
    %266 = arith.extf %265 : vector<1x50xbf16> to vector<1x50xf32>
    %267 = vector.broadcast %266 : vector<1x50xf32> to vector<8x50xf32>
    %268 = arith.mulf %264, %267 : vector<8x50xf32>
    %269 = vector.extract_strided_slice %268 {offsets = [0, 0], sizes = [8, 36], strides = [1, 1]} : vector<8x50xf32> to vector<8x36xf32>
    %270 = vector.extract_strided_slice %268 {offsets = [0, 1], sizes = [8, 36], strides = [1, 1]} : vector<8x50xf32> to vector<8x36xf32>
    %271 = vector.extract_strided_slice %268 {offsets = [0, 2], sizes = [8, 36], strides = [1, 1]} : vector<8x50xf32> to vector<8x36xf32>
    %272 = vector.extract_strided_slice %268 {offsets = [0, 6], sizes = [8, 36], strides = [1, 1]} : vector<8x50xf32> to vector<8x36xf32>
    %273 = vector.extract_strided_slice %268 {offsets = [0, 7], sizes = [8, 36], strides = [1, 1]} : vector<8x50xf32> to vector<8x36xf32>
    %274 = vector.extract_strided_slice %268 {offsets = [0, 8], sizes = [8, 36], strides = [1, 1]} : vector<8x50xf32> to vector<8x36xf32>
    %275 = vector.extract_strided_slice %268 {offsets = [0, 12], sizes = [8, 36], strides = [1, 1]} : vector<8x50xf32> to vector<8x36xf32>
    %276 = vector.extract_strided_slice %268 {offsets = [0, 13], sizes = [8, 36], strides = [1, 1]} : vector<8x50xf32> to vector<8x36xf32>
    %277 = vector.extract_strided_slice %268 {offsets = [0, 14], sizes = [8, 36], strides = [1, 1]} : vector<8x50xf32> to vector<8x36xf32>
    %278 = tpu.concatenate %269, %270, %271, %272, %273, %274, %275, %276, %277 in 0 : vector<8x36xf32>, vector<8x36xf32>, vector<8x36xf32>, vector<8x36xf32>, vector<8x36xf32>, vector<8x36xf32>, vector<8x36xf32>, vector<8x36xf32>, vector<8x36xf32> -> vector<72x36xf32>
    %c0_105 = arith.constant 0 : index
    %c0_106 = arith.constant 0 : index
    %279 = vector.load %arg32[%c0_105, %c0_106] : memref<8x72xf32, #tpu.memory_space<vmem>>, vector<8x72xf32>
    %cst_107 = arith.constant dense<0.000000e+00> : vector<8x36xf32>
    %280 = tpu.matmul %279, %278, %cst_107 {dimension_numbers = #tpu.dot_dimension_numbers<[1], [0], [0], [1], [0, 0, 1, 1], [], []>} : vector<8x72xf32>, vector<72x36xf32>, vector<8x36xf32> -> vector<8x36xf32>
    %c0_108 = arith.constant 0 : index
    %c0_109 = arith.constant 0 : index
    %281 = vector.load %arg33[%c0_108, %c0_109] : memref<8x1xf32, #tpu.memory_space<vmem>>, vector<8x1xf32>
    %282 = vector.broadcast %281 : vector<8x1xf32> to vector<8x36xf32>
    %283 = arith.addf %280, %282 : vector<8x36xf32>
    %cst_110 = arith.constant 0.000000e+00 : f32
    %284 = vector.broadcast %cst_110 : f32 to vector<8x36xf32>
    %285 = arith.cmpf oge, %283, %284 : vector<8x36xf32>
    %cst_111 = arith.constant 0.00999999977 : f32
    %286 = vector.broadcast %cst_111 : f32 to vector<8x36xf32>
    %287 = arith.mulf %283, %286 : vector<8x36xf32>
    %288 = arith.select %285, %283, %287 : vector<8x36xi1>, vector<8x36xf32>
    %c0_112 = arith.constant 0 : index
    %c0_113 = arith.constant 0 : index
    %289 = vector.load %arg34[%c0_112, %c0_113] : memref<1x36xbf16, #tpu.memory_space<vmem>>, vector<1x36xbf16>
    %290 = arith.extf %289 : vector<1x36xbf16> to vector<1x36xf32>
    %291 = vector.broadcast %290 : vector<1x36xf32> to vector<8x36xf32>
    %292 = arith.mulf %288, %291 : vector<8x36xf32>
    %c0_114 = arith.constant 0 : index
    %c0_115 = arith.constant 0 : index
    %293 = vector.load %arg35[%c0_114, %c0_115] : memref<26x36xbf16, #tpu.memory_space<vmem>>, vector<26x36xbf16>
    %294 = arith.extf %293 : vector<26x36xbf16> to vector<26x36xf32>
    %cst_116 = arith.constant dense<0.000000e+00> : vector<16x36xf32>
    %295 = tpu.matmul %163, %294, %cst_116 {dimension_numbers = #tpu.dot_dimension_numbers<[1], [0], [0], [1], [0, 0, 1, 1], [], []>} : vector<16x26xf32>, vector<26x36xf32>, vector<16x36xf32> -> vector<16x36xf32>
    %296 = tpu.concatenate %292, %295 in 0 : vector<8x36xf32>, vector<16x36xf32> -> vector<24x36xf32>
    %c0_117 = arith.constant 0 : index
    %c0_118 = arith.constant 0 : index
    %297 = vector.load %arg36[%c0_117, %c0_118] : memref<32x24xf32, #tpu.memory_space<vmem>>, vector<32x24xf32>
    %cst_119 = arith.constant dense<0.000000e+00> : vector<32x36xf32>
    %298 = tpu.matmul %297, %296, %cst_119 {dimension_numbers = #tpu.dot_dimension_numbers<[1], [0], [0], [1], [0, 0, 1, 1], [], []>} : vector<32x24xf32>, vector<24x36xf32>, vector<32x36xf32> -> vector<32x36xf32>
    %299 = vector.extract_strided_slice %298 {offsets = [0, 0], sizes = [8, 36], strides = [1, 1]} : vector<32x36xf32> to vector<8x36xf32>
    %c0_120 = arith.constant 0 : index
    %c0_121 = arith.constant 0 : index
    %c0_122 = arith.constant 0 : index
    %300 = vector.load %arg38[%c0_120, %c0_121, %c0_122] : memref<4x36x144xbf16, #tpu.memory_space<vmem>>, vector<1x36x144xbf16>
    %301 = vector.shape_cast %300 : vector<1x36x144xbf16> to vector<36x144xbf16>
    %302 = arith.extf %301 : vector<36x144xbf16> to vector<36x144xf32>
    %cst_123 = arith.constant dense<0.000000e+00> : vector<8x144xf32>
    %303 = tpu.matmul %299, %302, %cst_123 {dimension_numbers = #tpu.dot_dimension_numbers<[1], [0], [0], [1], [0, 0, 1, 1], [], []>} : vector<8x36xf32>, vector<36x144xf32>, vector<8x144xf32> -> vector<8x144xf32>
    %304 = vector.extract_strided_slice %298 {offsets = [8, 0], sizes = [8, 36], strides = [1, 1]} : vector<32x36xf32> to vector<8x36xf32>
    %c1_124 = arith.constant 1 : index
    %c0_125 = arith.constant 0 : index
    %c0_126 = arith.constant 0 : index
    %305 = vector.load %arg38[%c1_124, %c0_125, %c0_126] : memref<4x36x144xbf16, #tpu.memory_space<vmem>>, vector<1x36x144xbf16>
    %306 = vector.shape_cast %305 : vector<1x36x144xbf16> to vector<36x144xbf16>
    %307 = arith.extf %306 : vector<36x144xbf16> to vector<36x144xf32>
    %cst_127 = arith.constant dense<0.000000e+00> : vector<8x144xf32>
    %308 = tpu.matmul %304, %307, %cst_127 {dimension_numbers = #tpu.dot_dimension_numbers<[1], [0], [0], [1], [0, 0, 1, 1], [], []>} : vector<8x36xf32>, vector<36x144xf32>, vector<8x144xf32> -> vector<8x144xf32>
    %309 = arith.addf %303, %308 : vector<8x144xf32>
    %310 = vector.extract_strided_slice %298 {offsets = [16, 0], sizes = [8, 36], strides = [1, 1]} : vector<32x36xf32> to vector<8x36xf32>
    %c2_128 = arith.constant 2 : index
    %c0_129 = arith.constant 0 : index
    %c0_130 = arith.constant 0 : index
    %311 = vector.load %arg38[%c2_128, %c0_129, %c0_130] : memref<4x36x144xbf16, #tpu.memory_space<vmem>>, vector<1x36x144xbf16>
    %312 = vector.shape_cast %311 : vector<1x36x144xbf16> to vector<36x144xbf16>
    %313 = arith.extf %312 : vector<36x144xbf16> to vector<36x144xf32>
    %cst_131 = arith.constant dense<0.000000e+00> : vector<8x144xf32>
    %314 = tpu.matmul %310, %313, %cst_131 {dimension_numbers = #tpu.dot_dimension_numbers<[1], [0], [0], [1], [0, 0, 1, 1], [], []>} : vector<8x36xf32>, vector<36x144xf32>, vector<8x144xf32> -> vector<8x144xf32>
    %315 = arith.addf %309, %314 : vector<8x144xf32>
    %316 = vector.extract_strided_slice %298 {offsets = [24, 0], sizes = [8, 36], strides = [1, 1]} : vector<32x36xf32> to vector<8x36xf32>
    %c3_132 = arith.constant 3 : index
    %c0_133 = arith.constant 0 : index
    %c0_134 = arith.constant 0 : index
    %317 = vector.load %arg38[%c3_132, %c0_133, %c0_134] : memref<4x36x144xbf16, #tpu.memory_space<vmem>>, vector<1x36x144xbf16>
    %318 = vector.shape_cast %317 : vector<1x36x144xbf16> to vector<36x144xbf16>
    %319 = arith.extf %318 : vector<36x144xbf16> to vector<36x144xf32>
    %cst_135 = arith.constant dense<0.000000e+00> : vector<8x144xf32>
    %320 = tpu.matmul %316, %319, %cst_135 {dimension_numbers = #tpu.dot_dimension_numbers<[1], [0], [0], [1], [0, 0, 1, 1], [], []>} : vector<8x36xf32>, vector<36x144xf32>, vector<8x144xf32> -> vector<8x144xf32>
    %321 = arith.addf %315, %320 : vector<8x144xf32>
    %c0_136 = arith.constant 0 : index
    %c0_137 = arith.constant 0 : index
    %322 = vector.load %arg37[%c0_136, %c0_137] : memref<8x1xf32, #tpu.memory_space<vmem>>, vector<8x1xf32>
    %323 = vector.broadcast %322 : vector<8x1xf32> to vector<8x144xf32>
    %324 = arith.addf %321, %323 : vector<8x144xf32>
    %cst_138 = arith.constant 0.000000e+00 : f32
    %325 = vector.broadcast %cst_138 : f32 to vector<8x144xf32>
    %326 = arith.cmpf oge, %324, %325 : vector<8x144xf32>
    %cst_139 = arith.constant 0.00999999977 : f32
    %327 = vector.broadcast %cst_139 : f32 to vector<8x144xf32>
    %328 = arith.mulf %324, %327 : vector<8x144xf32>
    %329 = arith.select %326, %324, %328 : vector<8x144xi1>, vector<8x144xf32>
    %c0_140 = arith.constant 0 : index
    %c0_141 = arith.constant 0 : index
    %330 = vector.load %arg39[%c0_140, %c0_141] : memref<1x144xbf16, #tpu.memory_space<vmem>>, vector<1x144xbf16>
    %331 = arith.extf %330 : vector<1x144xbf16> to vector<1x144xf32>
    %332 = vector.broadcast %331 : vector<1x144xf32> to vector<8x144xf32>
    %333 = arith.mulf %329, %332 : vector<8x144xf32>
    %334 = vector.extract_strided_slice %333 {offsets = [0, 0], sizes = [8, 122], strides = [1, 1]} : vector<8x144xf32> to vector<8x122xf32>
    %335 = vector.extract_strided_slice %333 {offsets = [0, 1], sizes = [8, 122], strides = [1, 1]} : vector<8x144xf32> to vector<8x122xf32>
    %336 = vector.extract_strided_slice %333 {offsets = [0, 2], sizes = [8, 122], strides = [1, 1]} : vector<8x144xf32> to vector<8x122xf32>
    %337 = vector.extract_strided_slice %333 {offsets = [0, 10], sizes = [8, 122], strides = [1, 1]} : vector<8x144xf32> to vector<8x122xf32>
    %338 = vector.extract_strided_slice %333 {offsets = [0, 11], sizes = [8, 122], strides = [1, 1]} : vector<8x144xf32> to vector<8x122xf32>
    %339 = vector.extract_strided_slice %333 {offsets = [0, 12], sizes = [8, 122], strides = [1, 1]} : vector<8x144xf32> to vector<8x122xf32>
    %340 = vector.extract_strided_slice %333 {offsets = [0, 20], sizes = [8, 122], strides = [1, 1]} : vector<8x144xf32> to vector<8x122xf32>
    %341 = vector.extract_strided_slice %333 {offsets = [0, 21], sizes = [8, 122], strides = [1, 1]} : vector<8x144xf32> to vector<8x122xf32>
    %342 = vector.extract_strided_slice %333 {offsets = [0, 22], sizes = [8, 122], strides = [1, 1]} : vector<8x144xf32> to vector<8x122xf32>
    %343 = tpu.concatenate %334, %335, %336, %337, %338, %339, %340, %341, %342 in 0 : vector<8x122xf32>, vector<8x122xf32>, vector<8x122xf32>, vector<8x122xf32>, vector<8x122xf32>, vector<8x122xf32>, vector<8x122xf32>, vector<8x122xf32>, vector<8x122xf32> -> vector<72x122xf32>
    %c0_142 = arith.constant 0 : index
    %c0_143 = arith.constant 0 : index
    %344 = vector.load %arg40[%c0_142, %c0_143] : memref<8x72xf32, #tpu.memory_space<vmem>>, vector<8x72xf32>
    %cst_144 = arith.constant dense<0.000000e+00> : vector<8x122xf32>
    %345 = tpu.matmul %344, %343, %cst_144 {dimension_numbers = #tpu.dot_dimension_numbers<[1], [0], [0], [1], [0, 0, 1, 1], [], []>} : vector<8x72xf32>, vector<72x122xf32>, vector<8x122xf32> -> vector<8x122xf32>
    %c0_145 = arith.constant 0 : index
    %c0_146 = arith.constant 0 : index
    %346 = vector.load %arg41[%c0_145, %c0_146] : memref<8x1xf32, #tpu.memory_space<vmem>>, vector<8x1xf32>
    %347 = vector.broadcast %346 : vector<8x1xf32> to vector<8x122xf32>
    %348 = arith.addf %345, %347 : vector<8x122xf32>
    %cst_147 = arith.constant 0.000000e+00 : f32
    %349 = vector.broadcast %cst_147 : f32 to vector<8x122xf32>
    %350 = arith.cmpf oge, %348, %349 : vector<8x122xf32>
    %cst_148 = arith.constant 0.00999999977 : f32
    %351 = vector.broadcast %cst_148 : f32 to vector<8x122xf32>
    %352 = arith.mulf %348, %351 : vector<8x122xf32>
    %353 = arith.select %350, %348, %352 : vector<8x122xi1>, vector<8x122xf32>
    %c0_149 = arith.constant 0 : index
    %c0_150 = arith.constant 0 : index
    %354 = vector.load %arg42[%c0_149, %c0_150] : memref<1x122xbf16, #tpu.memory_space<vmem>>, vector<1x122xbf16>
    %355 = arith.extf %354 : vector<1x122xbf16> to vector<1x122xf32>
    %356 = vector.broadcast %355 : vector<1x122xf32> to vector<8x122xf32>
    %357 = arith.mulf %353, %356 : vector<8x122xf32>
    %358 = vector.extract_strided_slice %357 {offsets = [0, 0], sizes = [8, 100], strides = [1, 1]} : vector<8x122xf32> to vector<8x100xf32>
    %359 = vector.extract_strided_slice %357 {offsets = [0, 1], sizes = [8, 100], strides = [1, 1]} : vector<8x122xf32> to vector<8x100xf32>
    %360 = vector.extract_strided_slice %357 {offsets = [0, 2], sizes = [8, 100], strides = [1, 1]} : vector<8x122xf32> to vector<8x100xf32>
    %361 = vector.extract_strided_slice %357 {offsets = [0, 10], sizes = [8, 100], strides = [1, 1]} : vector<8x122xf32> to vector<8x100xf32>
    %362 = vector.extract_strided_slice %357 {offsets = [0, 11], sizes = [8, 100], strides = [1, 1]} : vector<8x122xf32> to vector<8x100xf32>
    %363 = vector.extract_strided_slice %357 {offsets = [0, 12], sizes = [8, 100], strides = [1, 1]} : vector<8x122xf32> to vector<8x100xf32>
    %364 = vector.extract_strided_slice %357 {offsets = [0, 20], sizes = [8, 100], strides = [1, 1]} : vector<8x122xf32> to vector<8x100xf32>
    %365 = vector.extract_strided_slice %357 {offsets = [0, 21], sizes = [8, 100], strides = [1, 1]} : vector<8x122xf32> to vector<8x100xf32>
    %366 = vector.extract_strided_slice %357 {offsets = [0, 22], sizes = [8, 100], strides = [1, 1]} : vector<8x122xf32> to vector<8x100xf32>
    %367 = tpu.concatenate %358, %359, %360, %361, %362, %363, %364, %365, %366 in 0 : vector<8x100xf32>, vector<8x100xf32>, vector<8x100xf32>, vector<8x100xf32>, vector<8x100xf32>, vector<8x100xf32>, vector<8x100xf32>, vector<8x100xf32>, vector<8x100xf32> -> vector<72x100xf32>
    %c0_151 = arith.constant 0 : index
    %c0_152 = arith.constant 0 : index
    %368 = vector.load %arg43[%c0_151, %c0_152] : memref<8x72xf32, #tpu.memory_space<vmem>>, vector<8x72xf32>
    %cst_153 = arith.constant dense<0.000000e+00> : vector<8x100xf32>
    %369 = tpu.matmul %368, %367, %cst_153 {dimension_numbers = #tpu.dot_dimension_numbers<[1], [0], [0], [1], [0, 0, 1, 1], [], []>} : vector<8x72xf32>, vector<72x100xf32>, vector<8x100xf32> -> vector<8x100xf32>
    %c0_154 = arith.constant 0 : index
    %c0_155 = arith.constant 0 : index
    %370 = vector.load %arg44[%c0_154, %c0_155] : memref<8x1xf32, #tpu.memory_space<vmem>>, vector<8x1xf32>
    %371 = vector.broadcast %370 : vector<8x1xf32> to vector<8x100xf32>
    %372 = arith.addf %369, %371 : vector<8x100xf32>
    %cst_156 = arith.constant 0.000000e+00 : f32
    %373 = vector.broadcast %cst_156 : f32 to vector<8x100xf32>
    %374 = arith.cmpf oge, %372, %373 : vector<8x100xf32>
    %cst_157 = arith.constant 0.00999999977 : f32
    %375 = vector.broadcast %cst_157 : f32 to vector<8x100xf32>
    %376 = arith.mulf %372, %375 : vector<8x100xf32>
    %377 = arith.select %374, %372, %376 : vector<8x100xi1>, vector<8x100xf32>
    %c0_158 = arith.constant 0 : index
    %c0_159 = arith.constant 0 : index
    %378 = vector.load %arg45[%c0_158, %c0_159] : memref<1x100xbf16, #tpu.memory_space<vmem>>, vector<1x100xbf16>
    %379 = arith.extf %378 : vector<1x100xbf16> to vector<1x100xf32>
    %380 = vector.broadcast %379 : vector<1x100xf32> to vector<8x100xf32>
    %381 = arith.mulf %377, %380 : vector<8x100xf32>
    %c0_160 = arith.constant 0 : index
    %c0_161 = arith.constant 0 : index
    %382 = vector.load %arg46[%c0_160, %c0_161] : memref<50x100xbf16, #tpu.memory_space<vmem>>, vector<50x100xbf16>
    %383 = arith.extf %382 : vector<50x100xbf16> to vector<50x100xf32>
    %cst_162 = arith.constant dense<0.000000e+00> : vector<8x100xf32>
    %384 = tpu.matmul %109, %383, %cst_162 {dimension_numbers = #tpu.dot_dimension_numbers<[1], [0], [0], [1], [0, 0, 1, 1], [], []>} : vector<8x50xf32>, vector<50x100xf32>, vector<8x100xf32> -> vector<8x100xf32>
    %385 = tpu.concatenate %381, %384 in 0 : vector<8x100xf32>, vector<8x100xf32> -> vector<16x100xf32>
    %c0_163 = arith.constant 0 : index
    %c0_164 = arith.constant 0 : index
    %386 = vector.load %arg47[%c0_163, %c0_164] : memref<32x16xf32, #tpu.memory_space<vmem>>, vector<32x16xf32>
    %cst_165 = arith.constant dense<0.000000e+00> : vector<32x100xf32>
    %387 = tpu.matmul %386, %385, %cst_165 {dimension_numbers = #tpu.dot_dimension_numbers<[1], [0], [0], [1], [0, 0, 1, 1], [], []>} : vector<32x16xf32>, vector<16x100xf32>, vector<32x100xf32> -> vector<32x100xf32>
    %388 = vector.extract_strided_slice %387 {offsets = [0, 0], sizes = [8, 100], strides = [1, 1]} : vector<32x100xf32> to vector<8x100xf32>
    %c0_166 = arith.constant 0 : index
    %c0_167 = arith.constant 0 : index
    %c0_168 = arith.constant 0 : index
    %389 = vector.load %arg49[%c0_166, %c0_167, %c0_168] : memref<4x100x400xbf16, #tpu.memory_space<vmem>>, vector<1x100x400xbf16>
    %390 = vector.shape_cast %389 : vector<1x100x400xbf16> to vector<100x400xbf16>
    %391 = arith.extf %390 : vector<100x400xbf16> to vector<100x400xf32>
    %cst_169 = arith.constant dense<0.000000e+00> : vector<8x400xf32>
    %392 = tpu.matmul %388, %391, %cst_169 {dimension_numbers = #tpu.dot_dimension_numbers<[1], [0], [0], [1], [0, 0, 1, 1], [], []>} : vector<8x100xf32>, vector<100x400xf32>, vector<8x400xf32> -> vector<8x400xf32>
    %393 = vector.extract_strided_slice %387 {offsets = [8, 0], sizes = [8, 100], strides = [1, 1]} : vector<32x100xf32> to vector<8x100xf32>
    %c1_170 = arith.constant 1 : index
    %c0_171 = arith.constant 0 : index
    %c0_172 = arith.constant 0 : index
    %394 = vector.load %arg49[%c1_170, %c0_171, %c0_172] : memref<4x100x400xbf16, #tpu.memory_space<vmem>>, vector<1x100x400xbf16>
    %395 = vector.shape_cast %394 : vector<1x100x400xbf16> to vector<100x400xbf16>
    %396 = arith.extf %395 : vector<100x400xbf16> to vector<100x400xf32>
    %cst_173 = arith.constant dense<0.000000e+00> : vector<8x400xf32>
    %397 = tpu.matmul %393, %396, %cst_173 {dimension_numbers = #tpu.dot_dimension_numbers<[1], [0], [0], [1], [0, 0, 1, 1], [], []>} : vector<8x100xf32>, vector<100x400xf32>, vector<8x400xf32> -> vector<8x400xf32>
    %398 = arith.addf %392, %397 : vector<8x400xf32>
    %399 = vector.extract_strided_slice %387 {offsets = [16, 0], sizes = [8, 100], strides = [1, 1]} : vector<32x100xf32> to vector<8x100xf32>
    %c2_174 = arith.constant 2 : index
    %c0_175 = arith.constant 0 : index
    %c0_176 = arith.constant 0 : index
    %400 = vector.load %arg49[%c2_174, %c0_175, %c0_176] : memref<4x100x400xbf16, #tpu.memory_space<vmem>>, vector<1x100x400xbf16>
    %401 = vector.shape_cast %400 : vector<1x100x400xbf16> to vector<100x400xbf16>
    %402 = arith.extf %401 : vector<100x400xbf16> to vector<100x400xf32>
    %cst_177 = arith.constant dense<0.000000e+00> : vector<8x400xf32>
    %403 = tpu.matmul %399, %402, %cst_177 {dimension_numbers = #tpu.dot_dimension_numbers<[1], [0], [0], [1], [0, 0, 1, 1], [], []>} : vector<8x100xf32>, vector<100x400xf32>, vector<8x400xf32> -> vector<8x400xf32>
    %404 = arith.addf %398, %403 : vector<8x400xf32>
    %405 = vector.extract_strided_slice %387 {offsets = [24, 0], sizes = [8, 100], strides = [1, 1]} : vector<32x100xf32> to vector<8x100xf32>
    %c3_178 = arith.constant 3 : index
    %c0_179 = arith.constant 0 : index
    %c0_180 = arith.constant 0 : index
    %406 = vector.load %arg49[%c3_178, %c0_179, %c0_180] : memref<4x100x400xbf16, #tpu.memory_space<vmem>>, vector<1x100x400xbf16>
    %407 = vector.shape_cast %406 : vector<1x100x400xbf16> to vector<100x400xbf16>
    %408 = arith.extf %407 : vector<100x400xbf16> to vector<100x400xf32>
    %cst_181 = arith.constant dense<0.000000e+00> : vector<8x400xf32>
    %409 = tpu.matmul %405, %408, %cst_181 {dimension_numbers = #tpu.dot_dimension_numbers<[1], [0], [0], [1], [0, 0, 1, 1], [], []>} : vector<8x100xf32>, vector<100x400xf32>, vector<8x400xf32> -> vector<8x400xf32>
    %410 = arith.addf %404, %409 : vector<8x400xf32>
    %c0_182 = arith.constant 0 : index
    %c0_183 = arith.constant 0 : index
    %411 = vector.load %arg48[%c0_182, %c0_183] : memref<8x1xf32, #tpu.memory_space<vmem>>, vector<8x1xf32>
    %412 = vector.broadcast %411 : vector<8x1xf32> to vector<8x400xf32>
    %413 = arith.addf %410, %412 : vector<8x400xf32>
    %cst_184 = arith.constant 0.000000e+00 : f32
    %414 = vector.broadcast %cst_184 : f32 to vector<8x400xf32>
    %415 = arith.cmpf oge, %413, %414 : vector<8x400xf32>
    %cst_185 = arith.constant 0.00999999977 : f32
    %416 = vector.broadcast %cst_185 : f32 to vector<8x400xf32>
    %417 = arith.mulf %413, %416 : vector<8x400xf32>
    %418 = arith.select %415, %413, %417 : vector<8x400xi1>, vector<8x400xf32>
    %c0_186 = arith.constant 0 : index
    %c0_187 = arith.constant 0 : index
    %419 = vector.load %arg50[%c0_186, %c0_187] : memref<1x400xbf16, #tpu.memory_space<vmem>>, vector<1x400xbf16>
    %420 = arith.extf %419 : vector<1x400xbf16> to vector<1x400xf32>
    %421 = vector.broadcast %420 : vector<1x400xf32> to vector<8x400xf32>
    %422 = arith.mulf %418, %421 : vector<8x400xf32>
    %423 = vector.extract_strided_slice %422 {offsets = [0, 0], sizes = [8, 362], strides = [1, 1]} : vector<8x400xf32> to vector<8x362xf32>
    %424 = vector.extract_strided_slice %422 {offsets = [0, 1], sizes = [8, 362], strides = [1, 1]} : vector<8x400xf32> to vector<8x362xf32>
    %425 = vector.extract_strided_slice %422 {offsets = [0, 2], sizes = [8, 362], strides = [1, 1]} : vector<8x400xf32> to vector<8x362xf32>
    %426 = vector.extract_strided_slice %422 {offsets = [0, 18], sizes = [8, 362], strides = [1, 1]} : vector<8x400xf32> to vector<8x362xf32>
    %427 = vector.extract_strided_slice %422 {offsets = [0, 19], sizes = [8, 362], strides = [1, 1]} : vector<8x400xf32> to vector<8x362xf32>
    %428 = vector.extract_strided_slice %422 {offsets = [0, 20], sizes = [8, 362], strides = [1, 1]} : vector<8x400xf32> to vector<8x362xf32>
    %429 = vector.extract_strided_slice %422 {offsets = [0, 36], sizes = [8, 362], strides = [1, 1]} : vector<8x400xf32> to vector<8x362xf32>
    %430 = vector.extract_strided_slice %422 {offsets = [0, 37], sizes = [8, 362], strides = [1, 1]} : vector<8x400xf32> to vector<8x362xf32>
    %431 = vector.extract_strided_slice %422 {offsets = [0, 38], sizes = [8, 362], strides = [1, 1]} : vector<8x400xf32> to vector<8x362xf32>
    %432 = tpu.concatenate %423, %424, %425, %426, %427, %428, %429, %430, %431 in 0 : vector<8x362xf32>, vector<8x362xf32>, vector<8x362xf32>, vector<8x362xf32>, vector<8x362xf32>, vector<8x362xf32>, vector<8x362xf32>, vector<8x362xf32>, vector<8x362xf32> -> vector<72x362xf32>
    %c0_188 = arith.constant 0 : index
    %c0_189 = arith.constant 0 : index
    %433 = vector.load %arg51[%c0_188, %c0_189] : memref<8x72xf32, #tpu.memory_space<vmem>>, vector<8x72xf32>
    %cst_190 = arith.constant dense<0.000000e+00> : vector<8x362xf32>
    %434 = tpu.matmul %433, %432, %cst_190 {dimension_numbers = #tpu.dot_dimension_numbers<[1], [0], [0], [1], [0, 0, 1, 1], [], []>} : vector<8x72xf32>, vector<72x362xf32>, vector<8x362xf32> -> vector<8x362xf32>
    %c0_191 = arith.constant 0 : index
    %c0_192 = arith.constant 0 : index
    %435 = vector.load %arg52[%c0_191, %c0_192] : memref<8x1xf32, #tpu.memory_space<vmem>>, vector<8x1xf32>
    %436 = vector.broadcast %435 : vector<8x1xf32> to vector<8x362xf32>
    %437 = arith.addf %434, %436 : vector<8x362xf32>
    %cst_193 = arith.constant 0.000000e+00 : f32
    %438 = vector.broadcast %cst_193 : f32 to vector<8x362xf32>
    %439 = arith.cmpf oge, %437, %438 : vector<8x362xf32>
    %cst_194 = arith.constant 0.00999999977 : f32
    %440 = vector.broadcast %cst_194 : f32 to vector<8x362xf32>
    %441 = arith.mulf %437, %440 : vector<8x362xf32>
    %442 = arith.select %439, %437, %441 : vector<8x362xi1>, vector<8x362xf32>
    %c0_195 = arith.constant 0 : index
    %c0_196 = arith.constant 0 : index
    %443 = vector.load %arg53[%c0_195, %c0_196] : memref<1x362xbf16, #tpu.memory_space<vmem>>, vector<1x362xbf16>
    %444 = arith.extf %443 : vector<1x362xbf16> to vector<1x362xf32>
    %445 = vector.broadcast %444 : vector<1x362xf32> to vector<8x362xf32>
    %446 = arith.mulf %442, %445 : vector<8x362xf32>
    %447 = vector.extract_strided_slice %446 {offsets = [0, 0], sizes = [8, 324], strides = [1, 1]} : vector<8x362xf32> to vector<8x324xf32>
    %448 = vector.extract_strided_slice %446 {offsets = [0, 1], sizes = [8, 324], strides = [1, 1]} : vector<8x362xf32> to vector<8x324xf32>
    %449 = vector.extract_strided_slice %446 {offsets = [0, 2], sizes = [8, 324], strides = [1, 1]} : vector<8x362xf32> to vector<8x324xf32>
    %450 = vector.extract_strided_slice %446 {offsets = [0, 18], sizes = [8, 324], strides = [1, 1]} : vector<8x362xf32> to vector<8x324xf32>
    %451 = vector.extract_strided_slice %446 {offsets = [0, 19], sizes = [8, 324], strides = [1, 1]} : vector<8x362xf32> to vector<8x324xf32>
    %452 = vector.extract_strided_slice %446 {offsets = [0, 20], sizes = [8, 324], strides = [1, 1]} : vector<8x362xf32> to vector<8x324xf32>
    %453 = vector.extract_strided_slice %446 {offsets = [0, 36], sizes = [8, 324], strides = [1, 1]} : vector<8x362xf32> to vector<8x324xf32>
    %454 = vector.extract_strided_slice %446 {offsets = [0, 37], sizes = [8, 324], strides = [1, 1]} : vector<8x362xf32> to vector<8x324xf32>
    %455 = vector.extract_strided_slice %446 {offsets = [0, 38], sizes = [8, 324], strides = [1, 1]} : vector<8x362xf32> to vector<8x324xf32>
    %456 = tpu.concatenate %447, %448, %449, %450, %451, %452, %453, %454, %455 in 0 : vector<8x324xf32>, vector<8x324xf32>, vector<8x324xf32>, vector<8x324xf32>, vector<8x324xf32>, vector<8x324xf32>, vector<8x324xf32>, vector<8x324xf32>, vector<8x324xf32> -> vector<72x324xf32>
    %c0_197 = arith.constant 0 : index
    %c0_198 = arith.constant 0 : index
    %457 = vector.load %arg54[%c0_197, %c0_198] : memref<8x72xf32, #tpu.memory_space<vmem>>, vector<8x72xf32>
    %cst_199 = arith.constant dense<0.000000e+00> : vector<8x324xf32>
    %458 = tpu.matmul %457, %456, %cst_199 {dimension_numbers = #tpu.dot_dimension_numbers<[1], [0], [0], [1], [0, 0, 1, 1], [], []>} : vector<8x72xf32>, vector<72x324xf32>, vector<8x324xf32> -> vector<8x324xf32>
    %c0_200 = arith.constant 0 : index
    %c0_201 = arith.constant 0 : index
    %459 = vector.load %arg55[%c0_200, %c0_201] : memref<8x1xf32, #tpu.memory_space<vmem>>, vector<8x1xf32>
    %460 = vector.broadcast %459 : vector<8x1xf32> to vector<8x324xf32>
    %461 = arith.addf %458, %460 : vector<8x324xf32>
    %cst_202 = arith.constant 0.000000e+00 : f32
    %462 = vector.broadcast %cst_202 : f32 to vector<8x324xf32>
    %463 = arith.cmpf oge, %461, %462 : vector<8x324xf32>
    %cst_203 = arith.constant 0.00999999977 : f32
    %464 = vector.broadcast %cst_203 : f32 to vector<8x324xf32>
    %465 = arith.mulf %461, %464 : vector<8x324xf32>
    %466 = arith.select %463, %461, %465 : vector<8x324xi1>, vector<8x324xf32>
    %c0_204 = arith.constant 0 : index
    %c0_205 = arith.constant 0 : index
    %467 = vector.load %arg56[%c0_204, %c0_205] : memref<1x324xbf16, #tpu.memory_space<vmem>>, vector<1x324xbf16>
    %468 = arith.extf %467 : vector<1x324xbf16> to vector<1x324xf32>
    %469 = vector.broadcast %468 : vector<1x324xf32> to vector<8x324xf32>
    %470 = arith.mulf %466, %469 : vector<8x324xf32>
    %c0_206 = arith.constant 0 : index
    %c0_207 = arith.constant 0 : index
    %471 = vector.load %arg57[%c0_206, %c0_207] : memref<122x324xbf16, #tpu.memory_space<vmem>>, vector<122x324xbf16>
    %472 = arith.extf %471 : vector<122x324xbf16> to vector<122x324xf32>
    %cst_208 = arith.constant dense<0.000000e+00> : vector<8x324xf32>
    %473 = tpu.matmul %55, %472, %cst_208 {dimension_numbers = #tpu.dot_dimension_numbers<[1], [0], [0], [1], [0, 0, 1, 1], [], []>} : vector<8x122xf32>, vector<122x324xf32>, vector<8x324xf32> -> vector<8x324xf32>
    %474 = tpu.concatenate %470, %473 in 0 : vector<8x324xf32>, vector<8x324xf32> -> vector<16x324xf32>
    %475 = vector.extract_strided_slice %474 {offsets = [0, 0], sizes = [16, 286], strides = [1, 1]} : vector<16x324xf32> to vector<16x286xf32>
    %476 = vector.extract_strided_slice %474 {offsets = [0, 1], sizes = [16, 286], strides = [1, 1]} : vector<16x324xf32> to vector<16x286xf32>
    %477 = vector.extract_strided_slice %474 {offsets = [0, 2], sizes = [16, 286], strides = [1, 1]} : vector<16x324xf32> to vector<16x286xf32>
    %478 = vector.extract_strided_slice %474 {offsets = [0, 18], sizes = [16, 286], strides = [1, 1]} : vector<16x324xf32> to vector<16x286xf32>
    %479 = vector.extract_strided_slice %474 {offsets = [0, 19], sizes = [16, 286], strides = [1, 1]} : vector<16x324xf32> to vector<16x286xf32>
    %480 = vector.extract_strided_slice %474 {offsets = [0, 20], sizes = [16, 286], strides = [1, 1]} : vector<16x324xf32> to vector<16x286xf32>
    %481 = vector.extract_strided_slice %474 {offsets = [0, 36], sizes = [16, 286], strides = [1, 1]} : vector<16x324xf32> to vector<16x286xf32>
    %482 = vector.extract_strided_slice %474 {offsets = [0, 37], sizes = [16, 286], strides = [1, 1]} : vector<16x324xf32> to vector<16x286xf32>
    %483 = vector.extract_strided_slice %474 {offsets = [0, 38], sizes = [16, 286], strides = [1, 1]} : vector<16x324xf32> to vector<16x286xf32>
    %484 = tpu.concatenate %475, %476, %477, %478, %479, %480, %481, %482, %483 in 0 : vector<16x286xf32>, vector<16x286xf32>, vector<16x286xf32>, vector<16x286xf32>, vector<16x286xf32>, vector<16x286xf32>, vector<16x286xf32>, vector<16x286xf32>, vector<16x286xf32> -> vector<144x286xf32>
    %c0_209 = arith.constant 0 : index
    %c0_210 = arith.constant 0 : index
    %485 = vector.load %arg58[%c0_209, %c0_210] : memref<8x144xf32, #tpu.memory_space<vmem>>, vector<8x144xf32>
    %cst_211 = arith.constant dense<0.000000e+00> : vector<8x286xf32>
    %486 = tpu.matmul %485, %484, %cst_211 {dimension_numbers = #tpu.dot_dimension_numbers<[1], [0], [0], [1], [0, 0, 1, 1], [], []>} : vector<8x144xf32>, vector<144x286xf32>, vector<8x286xf32> -> vector<8x286xf32>
    %c0_212 = arith.constant 0 : index
    %c0_213 = arith.constant 0 : index
    %487 = vector.load %arg59[%c0_212, %c0_213] : memref<8x1xf32, #tpu.memory_space<vmem>>, vector<8x1xf32>
    %488 = vector.broadcast %487 : vector<8x1xf32> to vector<8x286xf32>
    %489 = arith.addf %486, %488 : vector<8x286xf32>
    %c0_214 = arith.constant 0 : index
    %c0_215 = arith.constant 0 : index
    %490 = vector.load %arg60[%c0_214, %c0_215] : memref<286x256xbf16, #tpu.memory_space<vmem>>, vector<286x256xbf16>
    %491 = arith.extf %490 : vector<286x256xbf16> to vector<286x256xf32>
    %cst_216 = arith.constant dense<0.000000e+00> : vector<8x256xf32>
    %492 = tpu.matmul %489, %491, %cst_216 {dimension_numbers = #tpu.dot_dimension_numbers<[1], [0], [0], [1], [0, 0, 1, 1], [], []>} : vector<8x286xf32>, vector<286x256xf32>, vector<8x256xf32> -> vector<8x256xf32>
    %c0_217 = arith.constant 0 : index
    %c0_218 = arith.constant 0 : index
    %c0_219 = arith.constant 0 : index
    %493 = vector.load %arg61[%c0_217, %c0_218, %c0_219] : memref<1x8x256xf32, #tpu.memory_space<vmem>>, vector<1x8x256xf32>
    %494 = vector.shape_cast %493 : vector<1x8x256xf32> to vector<8x256xf32>
    %495 = vector.shape_cast %492 : vector<8x256xf32> to vector<1x8x256xf32>
    tpu.vector_store %arg61[%c0_217, %c0_218, %c0_219], %495 {strides = array<i32>} : memref<1x8x256xf32, #tpu.memory_space<vmem>>, vector<1x8x256xf32>,
    return
  }
  func.func @transform_0(%arg0: i32) -> (i32, i32, i32) {
    %c0_i32 = arith.constant 0 : i32
    %c0_i32_0 = arith.constant 0 : i32
    %c0_i32_1 = arith.constant 0 : i32
    return %arg0, %c0_i32, %c0_i32_0 : i32, i32, i32
  }
  func.func @transform_1(%arg0: i32) -> (i32, i32) {
    %c0_i32 = arith.constant 0 : i32
    %c0_i32_0 = arith.constant 0 : i32
    %c0_i32_1 = arith.constant 0 : i32
    return %c0_i32, %c0_i32_0 : i32, i32
  }
  func.func @transform_2(%arg0: i32) -> (i32, i32) {
    %c0_i32 = arith.constant 0 : i32
    %c0_i32_0 = arith.constant 0 : i32
    %c0_i32_1 = arith.constant 0 : i32
    return %c0_i32, %c0_i32_0 : i32, i32
  }
  func.func @transform_3(%arg0: i32) -> (i32, i32) {
    %c0_i32 = arith.constant 0 : i32
    %c0_i32_0 = arith.constant 0 : i32
    %c0_i32_1 = arith.constant 0 : i32
    return %c0_i32, %c0_i32_0 : i32, i32
  }
  func.func @transform_4(%arg0: i32) -> (i32, i32) {
    %c0_i32 = arith.constant 0 : i32
    %c0_i32_0 = arith.constant 0 : i32
    %c0_i32_1 = arith.constant 0 : i32
    return %c0_i32, %c0_i32_0 : i32, i32
  }
  func.func @transform_5(%arg0: i32) -> (i32, i32) {
    %c0_i32 = arith.constant 0 : i32
    %c0_i32_0 = arith.constant 0 : i32
    %c0_i32_1 = arith.constant 0 : i32
    return %c0_i32, %c0_i32_0 : i32, i32
  }
  func.func @transform_6(%arg0: i32) -> (i32, i32) {
    %c0_i32 = arith.constant 0 : i32
    %c0_i32_0 = arith.constant 0 : i32
    %c0_i32_1 = arith.constant 0 : i32
    return %c0_i32, %c0_i32_0 : i32, i32
  }
  func.func @transform_7(%arg0: i32) -> (i32, i32) {
    %c0_i32 = arith.constant 0 : i32
    %c0_i32_0 = arith.constant 0 : i32
    %c0_i32_1 = arith.constant 0 : i32
    return %c0_i32, %c0_i32_0 : i32, i32
  }
  func.func @transform_8(%arg0: i32) -> (i32, i32) {
    %c0_i32 = arith.constant 0 : i32
    %c0_i32_0 = arith.constant 0 : i32
    %c0_i32_1 = arith.constant 0 : i32
    return %c0_i32, %c0_i32_0 : i32, i32
  }
  func.func @transform_9(%arg0: i32) -> (i32, i32) {
    %c0_i32 = arith.constant 0 : i32
    %c0_i32_0 = arith.constant 0 : i32
    %c0_i32_1 = arith.constant 0 : i32
    return %c0_i32, %c0_i32_0 : i32, i32
  }
  func.func @transform_10(%arg0: i32) -> (i32, i32) {
    %c0_i32 = arith.constant 0 : i32
    %c0_i32_0 = arith.constant 0 : i32
    %c0_i32_1 = arith.constant 0 : i32
    return %c0_i32, %c0_i32_0 : i32, i32
  }
  func.func @transform_11(%arg0: i32) -> (i32, i32) {
    %c0_i32 = arith.constant 0 : i32
    %c0_i32_0 = arith.constant 0 : i32
    %c0_i32_1 = arith.constant 0 : i32
    return %c0_i32, %c0_i32_0 : i32, i32
  }
  func.func @transform_12(%arg0: i32) -> (i32, i32) {
    %c0_i32 = arith.constant 0 : i32
    %c0_i32_0 = arith.constant 0 : i32
    %c0_i32_1 = arith.constant 0 : i32
    return %c0_i32, %c0_i32_0 : i32, i32
  }
  func.func @transform_13(%arg0: i32) -> (i32, i32) {
    %c0_i32 = arith.constant 0 : i32
    %c0_i32_0 = arith.constant 0 : i32
    %c0_i32_1 = arith.constant 0 : i32
    return %c0_i32, %c0_i32_0 : i32, i32
  }
  func.func @transform_14(%arg0: i32) -> (i32, i32) {
    %c0_i32 = arith.constant 0 : i32
    %c0_i32_0 = arith.constant 0 : i32
    %c0_i32_1 = arith.constant 0 : i32
    return %c0_i32, %c0_i32_0 : i32, i32
  }
  func.func @transform_15(%arg0: i32) -> (i32, i32) {
    %c0_i32 = arith.constant 0 : i32
    %c0_i32_0 = arith.constant 0 : i32
    %c0_i32_1 = arith.constant 0 : i32
    return %c0_i32, %c0_i32_0 : i32, i32
  }
  func.func @transform_16(%arg0: i32) -> (i32, i32) {
    %c0_i32 = arith.constant 0 : i32
    %c0_i32_0 = arith.constant 0 : i32
    %c0_i32_1 = arith.constant 0 : i32
    return %c0_i32, %c0_i32_0 : i32, i32
  }
  func.func @transform_17(%arg0: i32) -> (i32, i32) {
    %c0_i32 = arith.constant 0 : i32
    %c0_i32_0 = arith.constant 0 : i32
    %c0_i32_1 = arith.constant 0 : i32
    return %c0_i32, %c0_i32_0 : i32, i32
  }
  func.func @transform_18(%arg0: i32) -> (i32, i32) {
    %c0_i32 = arith.constant 0 : i32
    %c0_i32_0 = arith.constant 0 : i32
    %c0_i32_1 = arith.constant 0 : i32
    return %c0_i32, %c0_i32_0 : i32, i32
  }
  func.func @transform_19(%arg0: i32) -> (i32, i32) {
    %c0_i32 = arith.constant 0 : i32
    %c0_i32_0 = arith.constant 0 : i32
    %c0_i32_1 = arith.constant 0 : i32
    return %c0_i32, %c0_i32_0 : i32, i32
  }
  func.func @transform_20(%arg0: i32) -> (i32, i32) {
    %c0_i32 = arith.constant 0 : i32
    %c0_i32_0 = arith.constant 0 : i32
    %c0_i32_1 = arith.constant 0 : i32
    return %c0_i32, %c0_i32_0 : i32, i32
  }
  func.func @transform_21(%arg0: i32) -> (i32, i32) {
    %c0_i32 = arith.constant 0 : i32
    %c0_i32_0 = arith.constant 0 : i32
    %c0_i32_1 = arith.constant 0 : i32
    return %c0_i32, %c0_i32_0 : i32, i32
  }
  func.func @transform_22(%arg0: i32) -> (i32, i32) {
    %c0_i32 = arith.constant 0 : i32
    %c0_i32_0 = arith.constant 0 : i32
    %c0_i32_1 = arith.constant 0 : i32
    return %c0_i32, %c0_i32_0 : i32, i32
  }
  func.func @transform_23(%arg0: i32) -> (i32, i32) {
    %c0_i32 = arith.constant 0 : i32
    %c0_i32_0 = arith.constant 0 : i32
    %c0_i32_1 = arith.constant 0 : i32
    return %c0_i32, %c0_i32_0 : i32, i32
  }
  func.func @transform_24(%arg0: i32) -> (i32, i32) {
    %c0_i32 = arith.constant 0 : i32
    %c0_i32_0 = arith.constant 0 : i32
    %c0_i32_1 = arith.constant 0 : i32
    return %c0_i32, %c0_i32_0 : i32, i32
  }
  func.func @transform_25(%arg0: i32) -> (i32, i32) {
    %c0_i32 = arith.constant 0 : i32
    %c0_i32_0 = arith.constant 0 : i32
    %c0_i32_1 = arith.constant 0 : i32
    return %c0_i32, %c0_i32_0 : i32, i32
  }
  func.func @transform_26(%arg0: i32) -> (i32, i32, i32) {
    %c0_i32 = arith.constant 0 : i32
    %c0_i32_0 = arith.constant 0 : i32
    %c0_i32_1 = arith.constant 0 : i32
    %c0_i32_2 = arith.constant 0 : i32
    return %c0_i32, %c0_i32_0, %c0_i32_1 : i32, i32, i32
  }
  func.func @transform_27(%arg0: i32) -> (i32, i32) {
    %c0_i32 = arith.constant 0 : i32
    %c0_i32_0 = arith.constant 0 : i32
    %c0_i32_1 = arith.constant 0 : i32
    return %c0_i32, %c0_i32_0 : i32, i32
  }
  func.func @transform_28(%arg0: i32) -> (i32, i32) {
    %c0_i32 = arith.constant 0 : i32
    %c0_i32_0 = arith.constant 0 : i32
    %c0_i32_1 = arith.constant 0 : i32
    return %c0_i32, %c0_i32_0 : i32, i32
  }
  func.func @transform_29(%arg0: i32) -> (i32, i32) {
    %c0_i32 = arith.constant 0 : i32
    %c0_i32_0 = arith.constant 0 : i32
    %c0_i32_1 = arith.constant 0 : i32
    return %c0_i32, %c0_i32_0 : i32, i32
  }
  func.func @transform_30(%arg0: i32) -> (i32, i32) {
    %c0_i32 = arith.constant 0 : i32
    %c0_i32_0 = arith.constant 0 : i32
    %c0_i32_1 = arith.constant 0 : i32
    return %c0_i32, %c0_i32_0 : i32, i32
  }
  func.func @transform_31(%arg0: i32) -> (i32, i32) {
    %c0_i32 = arith.constant 0 : i32
    %c0_i32_0 = arith.constant 0 : i32
    %c0_i32_1 = arith.constant 0 : i32
    return %c0_i32, %c0_i32_0 : i32, i32
  }
  func.func @transform_32(%arg0: i32) -> (i32, i32) {
    %c0_i32 = arith.constant 0 : i32
    %c0_i32_0 = arith.constant 0 : i32
    %c0_i32_1 = arith.constant 0 : i32
    return %c0_i32, %c0_i32_0 : i32, i32
  }
  func.func @transform_33(%arg0: i32) -> (i32, i32) {
    %c0_i32 = arith.constant 0 : i32
    %c0_i32_0 = arith.constant 0 : i32
    %c0_i32_1 = arith.constant 0 : i32
    return %c0_i32, %c0_i32_0 : i32, i32
  }
  func.func @transform_34(%arg0: i32) -> (i32, i32) {
    %c0_i32 = arith.constant 0 : i32
    %c0_i32_0 = arith.constant 0 : i32
    %c0_i32_1 = arith.constant 0 : i32
    return %c0_i32, %c0_i32_0 : i32, i32
  }
  func.func @transform_35(%arg0: i32) -> (i32, i32) {
    %c0_i32 = arith.constant 0 : i32
    %c0_i32_0 = arith.constant 0 : i32
    %c0_i32_1 = arith.constant 0 : i32
    return %c0_i32, %c0_i32_0 : i32, i32
  }
  func.func @transform_36(%arg0: i32) -> (i32, i32) {
    %c0_i32 = arith.constant 0 : i32
    %c0_i32_0 = arith.constant 0 : i32
    %c0_i32_1 = arith.constant 0 : i32
    return %c0_i32, %c0_i32_0 : i32, i32
  }
  func.func @transform_37(%arg0: i32) -> (i32, i32, i32) {
    %c0_i32 = arith.constant 0 : i32
    %c0_i32_0 = arith.constant 0 : i32
    %c0_i32_1 = arith.constant 0 : i32
    %c0_i32_2 = arith.constant 0 : i32
    return %c0_i32, %c0_i32_0, %c0_i32_1 : i32, i32, i32
  }
  func.func @transform_38(%arg0: i32) -> (i32, i32) {
    %c0_i32 = arith.constant 0 : i32
    %c0_i32_0 = arith.constant 0 : i32
    %c0_i32_1 = arith.constant 0 : i32
    return %c0_i32, %c0_i32_0 : i32, i32
  }
  func.func @transform_39(%arg0: i32) -> (i32, i32) {
    %c0_i32 = arith.constant 0 : i32
    %c0_i32_0 = arith.constant 0 : i32
    %c0_i32_1 = arith.constant 0 : i32
    return %c0_i32, %c0_i32_0 : i32, i32
  }
  func.func @transform_40(%arg0: i32) -> (i32, i32) {
    %c0_i32 = arith.constant 0 : i32
    %c0_i32_0 = arith.constant 0 : i32
    %c0_i32_1 = arith.constant 0 : i32
    return %c0_i32, %c0_i32_0 : i32, i32
  }
  func.func @transform_41(%arg0: i32) -> (i32, i32) {
    %c0_i32 = arith.constant 0 : i32
    %c0_i32_0 = arith.constant 0 : i32
    %c0_i32_1 = arith.constant 0 : i32
    return %c0_i32, %c0_i32_0 : i32, i32
  }
  func.func @transform_42(%arg0: i32) -> (i32, i32) {
    %c0_i32 = arith.constant 0 : i32
    %c0_i32_0 = arith.constant 0 : i32
    %c0_i32_1 = arith.constant 0 : i32
    return %c0_i32, %c0_i32_0 : i32, i32
  }
  func.func @transform_43(%arg0: i32) -> (i32, i32) {
    %c0_i32 = arith.constant 0 : i32
    %c0_i32_0 = arith.constant 0 : i32
    %c0_i32_1 = arith.constant 0 : i32
    return %c0_i32, %c0_i32_0 : i32, i32
  }
  func.func @transform_44(%arg0: i32) -> (i32, i32) {
    %c0_i32 = arith.constant 0 : i32
    %c0_i32_0 = arith.constant 0 : i32
    %c0_i32_1 = arith.constant 0 : i32
    return %c0_i32, %c0_i32_0 : i32, i32
  }
  func.func @transform_45(%arg0: i32) -> (i32, i32) {
    %c0_i32 = arith.constant 0 : i32
    %c0_i32_0 = arith.constant 0 : i32
    %c0_i32_1 = arith.constant 0 : i32
    return %c0_i32, %c0_i32_0 : i32, i32
  }
  func.func @transform_46(%arg0: i32) -> (i32, i32) {
    %c0_i32 = arith.constant 0 : i32
    %c0_i32_0 = arith.constant 0 : i32
    %c0_i32_1 = arith.constant 0 : i32
    return %c0_i32, %c0_i32_0 : i32, i32
  }
  func.func @transform_47(%arg0: i32) -> (i32, i32) {
    %c0_i32 = arith.constant 0 : i32
    %c0_i32_0 = arith.constant 0 : i32
    %c0_i32_1 = arith.constant 0 : i32
    return %c0_i32, %c0_i32_0 : i32, i32
  }
  func.func @transform_48(%arg0: i32) -> (i32, i32, i32) {
    %c0_i32 = arith.constant 0 : i32
    %c0_i32_0 = arith.constant 0 : i32
    %c0_i32_1 = arith.constant 0 : i32
    %c0_i32_2 = arith.constant 0 : i32
    return %c0_i32, %c0_i32_0, %c0_i32_1 : i32, i32, i32
  }
  func.func @transform_49(%arg0: i32) -> (i32, i32) {
    %c0_i32 = arith.constant 0 : i32
    %c0_i32_0 = arith.constant 0 : i32
    %c0_i32_1 = arith.constant 0 : i32
    return %c0_i32, %c0_i32_0 : i32, i32
  }
  func.func @transform_50(%arg0: i32) -> (i32, i32) {
    %c0_i32 = arith.constant 0 : i32
    %c0_i32_0 = arith.constant 0 : i32
    %c0_i32_1 = arith.constant 0 : i32
    return %c0_i32, %c0_i32_0 : i32, i32
  }
  func.func @transform_51(%arg0: i32) -> (i32, i32) {
    %c0_i32 = arith.constant 0 : i32
    %c0_i32_0 = arith.constant 0 : i32
    %c0_i32_1 = arith.constant 0 : i32
    return %c0_i32, %c0_i32_0 : i32, i32
  }
  func.func @transform_52(%arg0: i32) -> (i32, i32) {
    %c0_i32 = arith.constant 0 : i32
    %c0_i32_0 = arith.constant 0 : i32
    %c0_i32_1 = arith.constant 0 : i32
    return %c0_i32, %c0_i32_0 : i32, i32
  }
  func.func @transform_53(%arg0: i32) -> (i32, i32) {
    %c0_i32 = arith.constant 0 : i32
    %c0_i32_0 = arith.constant 0 : i32
    %c0_i32_1 = arith.constant 0 : i32
    return %c0_i32, %c0_i32_0 : i32, i32
  }
  func.func @transform_54(%arg0: i32) -> (i32, i32) {
    %c0_i32 = arith.constant 0 : i32
    %c0_i32_0 = arith.constant 0 : i32
    %c0_i32_1 = arith.constant 0 : i32
    return %c0_i32, %c0_i32_0 : i32, i32
  }
  func.func @transform_55(%arg0: i32) -> (i32, i32) {
    %c0_i32 = arith.constant 0 : i32
    %c0_i32_0 = arith.constant 0 : i32
    %c0_i32_1 = arith.constant 0 : i32
    return %c0_i32, %c0_i32_0 : i32, i32
  }
  func.func @transform_56(%arg0: i32) -> (i32, i32) {
    %c0_i32 = arith.constant 0 : i32
    %c0_i32_0 = arith.constant 0 : i32
    %c0_i32_1 = arith.constant 0 : i32
    return %c0_i32, %c0_i32_0 : i32, i32
  }
  func.func @transform_57(%arg0: i32) -> (i32, i32) {
    %c0_i32 = arith.constant 0 : i32
    %c0_i32_0 = arith.constant 0 : i32
    %c0_i32_1 = arith.constant 0 : i32
    return %c0_i32, %c0_i32_0 : i32, i32
  }
  func.func @transform_58(%arg0: i32) -> (i32, i32) {
    %c0_i32 = arith.constant 0 : i32
    %c0_i32_0 = arith.constant 0 : i32
    %c0_i32_1 = arith.constant 0 : i32
    return %c0_i32, %c0_i32_0 : i32, i32
  }
  func.func @transform_59(%arg0: i32) -> (i32, i32) {
    %c0_i32 = arith.constant 0 : i32
    %c0_i32_0 = arith.constant 0 : i32
    %c0_i32_1 = arith.constant 0 : i32
    return %c0_i32, %c0_i32_0 : i32, i32
  }
  func.func @transform_60(%arg0: i32) -> (i32, i32, i32) {
    %c0_i32 = arith.constant 0 : i32
    %c0_i32_0 = arith.constant 0 : i32
    %c0_i32_1 = arith.constant 0 : i32
    return %arg0, %c0_i32, %c0_i32_0 : i32, i32, i32
  }
}

</mosaic_0001>

<bundles_post_ra>
// kernel: forward.1
= control target key start
LH: loop header
LB: loop body
LE: loop exit
PB: predicated region body
PF: predicated region fallthrough
CT: control target
= control target key end

     0   :  { %s13626_s6 = smov 1   ;;  %s13627_s10 = smov 2   ;;  %s15731_s0 = inlined_call_operand.smem [shape: u32[61], index: -1, kind: input, shape index: {}] }
   0x1   :  { %s13781_s5 = sld [smem:[%s15731_s0]]   ;;  %s13628_s14 = smov 3  }
   0x2   :  { %s13786_s9 = sld [smem:[%s15731_s0 + %s13626_s6]]   ;;  %s13629_s18 = smov 4  }
   0x3   :  { %s13791_s13 = sld [smem:[%s15731_s0 + %s13627_s10]]   ;;  %s13630_s22 = smov 5  }
   0x4   :  { %s13796_s17 = sld [smem:[%s15731_s0 + %s13628_s14]]   ;;  %s13631_s26 = smov 6  }
   0x5   :  { %s13801_s21 = sld [smem:[%s15731_s0 + %s13629_s18]]   ;;  %s13632_s30 = smov 7  }
   0x6   :  { %s13806_s25 = sld [smem:[%s15731_s0 + %s13630_s22]]   ;;  %s13633_s4 = smov 8  }
   0x7   :  { %15858 = sst [smem:[#allocation109_spill]] %s13781_s5  ;;  %s13634_s10 = smov 9  }
   0x8   :  { %15859 = sst [smem:[#allocation110_spill]] %s13786_s9  ;;  %s13635_s15 = smov 10  }
   0x9   :  { %15860 = sst [smem:[#allocation111_spill]] %s13791_s13  ;;  %s13636_s20 = smov 11  }
   0xa   :  { %15861 = sst [smem:[#allocation112_spill]] %s13796_s17  ;;  %s13638_s1 = smov 13  }
   0xb   :  { %s13811_s29 = sld [smem:[%s15731_s0 + %s13631_s26]]   ;;  %s13637_s26 = smov 12  }
   0xc   :  { %15862 = sst [smem:[#allocation113_spill]] %s13806_s25  ;;  %s13639_s7 = smov 14  }
   0xd   :  { %s13816_s3 = sld [smem:[%s15731_s0 + %s13632_s30]]   ;;  %s13641_s22 = smov 16  }
   0xe   :  { %s13821_s8 = sld [smem:[%s15731_s0 + %s13633_s4]]   ;;  %s13642_s28 = smov 17  }
   0xf   :  { %s13826_s14 = sld [smem:[%s15731_s0 + %s13634_s10]]  }
  0x10   :  { %s13831_s19 = sld [smem:[%s15731_s0 + %s13635_s15]]   ;;  %s13640_s15 = smov 15  }
  0x11   :  { %s13836_s24 = sld [smem:[%s15731_s0 + %s13636_s20]]  }
  0x12   :  { %s13841_s30 = sld [smem:[%s15731_s0 + %s13637_s26]]  }
  0x13   :  { %15863 = sst [smem:[#allocation114_spill]] %s13816_s3 }
  0x14   :  { %15864 = sst [smem:[#allocation115_spill]] %s13821_s8 }
  0x15   :  { %15865 = sst [smem:[#allocation116_spill]] %s13826_s14 }
  0x16   :  { %s13846_s6 = sld [smem:[%s15731_s0 + %s13638_s1]]  }
  0x17   :  { %15866 = sst [smem:[#allocation117_spill]] %s13836_s24 }
  0x18   :  { %15867 = sst [smem:[#allocation118_spill]] %s13841_s30 }
  0x19   :  { %s13851_s12 = sld [smem:[%s15731_s0 + %s13639_s7]]   ;;  %s13643_s7 = smov 18  }
  0x1a   :  { %s13856_s20 = sld [smem:[%s15731_s0 + %s13640_s15]]   ;;  %s13644_s15 = smov 19  }
  0x1b   :  { %s13861_s27 = sld [smem:[%s15731_s0 + %s13641_s22]]   ;;  %s13645_s22 = smov 20  }
  0x1c   :  { %15868 = sst [smem:[#allocation119_spill]] %s13846_s6 }
  0x1d   :  { %s13866_s4 = sld [smem:[%s15731_s0 + %s13642_s28]]   ;;  %s13646_s28 = smov 21  }
  0x1e   :  { %s13871_s30 = sld [smem:[%s15731_s0 + %s13643_s7]]   ;;  %s13647_s7 = smov 22  }
  0x1f   :  { %15869 = sst [smem:[#allocation120_spill]] %s13851_s12 }
  0x20   :  { %s13876_s5 = sld [smem:[%s15731_s0 + %s13644_s15]]   ;;  %s13648_s15 = smov 23  }
  0x21   :  { %15870 = sst [smem:[#allocation121_spill]] %s13861_s27 }
  0x22   :  { %s13881_s27 = sld [smem:[%s15731_s0 + %s13645_s22]]   ;;  %s13649_s22 = smov 24  }
  0x23   :  { %15871 = sst [smem:[#allocation122_spill]] %s13866_s4 }
  0x24   :  { %15872 = sst [smem:[#allocation123_spill]] %s13871_s30 }
  0x25   :  { %s13886_s12 = sld [smem:[%s15731_s0 + %s13646_s28]]   ;;  %s13650_s28 = smov 25  }
  0x26   :  { %15873 = sst [smem:[#allocation124_spill]] %s13876_s5 }
  0x27   :  { %s13891_s30 = sld [smem:[%s15731_s0 + %s13647_s7]]   ;;  %s13651_s7 = smov 26  }
  0x28   :  { %15874 = sst [smem:[#allocation125_spill]] %s13881_s27 }
  0x29   :  { %s13896_s24 = sld [smem:[%s15731_s0 + %s13648_s15]]   ;;  %s13652_s15 = smov 27  }
  0x2a   :  { %s13901_s27 = sld [smem:[%s15731_s0 + %s13649_s22]]   ;;  %s13653_s22 = smov 28  }
  0x2b   :  { %15875 = sst [smem:[#allocation126_spill]] %s13886_s12 }
  0x2c   :  { %s13906_s14 = sld [smem:[%s15731_s0 + %s13650_s28]]   ;;  %s13654_s28 = smov 29  }
  0x2d   :  { %15876 = sst [smem:[#allocation127_spill]] %s13891_s30 }
  0x2e   :  { %s13911_s30 = sld [smem:[%s15731_s0 + %s13651_s7]]   ;;  %s13655_s7 = smov 30  }
  0x2f   :  { %s13916_s3 = sld [smem:[%s15731_s0 + %s13652_s15]]   ;;  %s13656_s15 = smov 31  }
  0x30   :  { %15877 = sst [smem:[#allocation128_spill]] %s13901_s27 }
  0x31   :  { %s13921_s27 = sld [smem:[%s15731_s0 + %s13653_s22]]   ;;  %s13657_s22 = smov 32  }
  0x32   :  { %15878 = sst [smem:[#allocation129_spill]] %s13906_s14 }
  0x33   :  { %s13926_s25 = sld [smem:[%s15731_s0 + %s13654_s28]]   ;;  %s13658_s28 = smov 33  }
  0x34   :  { %15879 = sst [smem:[#allocation130_spill]] %s13911_s30 }
  0x35   :  { %15880 = sst [smem:[#allocation131_spill]] %s13916_s3 }
  0x36   :  { %s13931_s30 = sld [smem:[%s15731_s0 + %s13655_s7]]   ;;  %s13659_s7 = smov 34  }
  0x37   :  { %15881 = sst [smem:[#allocation132_spill]] %s13921_s27 }
  0x38   :  { %s13936_s17 = sld [smem:[%s15731_s0 + %s13656_s15]]   ;;  %s13660_s15 = smov 35  }
  0x39   :  { %s13941_s27 = sld [smem:[%s15731_s0 + %s13657_s22]]   ;;  %s13661_s22 = smov 36  }
  0x3a   :  { %s13946_s9 = sld [smem:[%s15731_s0 + %s13658_s28]]   ;;  %s13662_s28 = smov 37  }
  0x3c   :  { %15882 = sst [smem:[#allocation133_spill]] %s13931_s30 }
  0x3d   :  { %s13951_s30 = sld [smem:[%s15731_s0 + %s13659_s7]]   ;;  %s13663_s7 = smov 38  }
  0x3e   :  { %15883 = sst [smem:[#allocation134_spill]] %s13936_s17 }
  0x3f   :  { %15884 = sst [smem:[#allocation135_spill]] %s13941_s27 }
  0x40   :  { %15885 = sst [smem:[#allocation136_spill]] %s13946_s9 }
  0x41   :  { %s13956_s17 = sld [smem:[%s15731_s0 + %s13660_s15]]   ;;  %s13664_s15 = smov 39  }
  0x42   :  { %s13961_s27 = sld [smem:[%s15731_s0 + %s13661_s22]]   ;;  %s13665_s22 = smov 40  }
  0x43   :  { %15886 = sst [smem:[#allocation137_spill]] %s13951_s30 }
  0x44   :  { %s13966_s9 = sld [smem:[%s15731_s0 + %s13662_s28]]   ;;  %s13666_s28 = smov 41  }
  0x45   :  { %s13971_s30 = sld [smem:[%s15731_s0 + %s13663_s7]]   ;;  %s13667_s7 = smov 42  }
  0x47   :  { %15887 = sst [smem:[#allocation138_spill]] %s13956_s17 }
  0x48   :  { %15888 = sst [smem:[#allocation139_spill]] %s13961_s27 }
  0x49   :  { %s13976_s17 = sld [smem:[%s15731_s0 + %s13664_s15]]   ;;  %s13668_s15 = smov 43  }
  0x4a   :  { %15889 = sst [smem:[#allocation140_spill]] %s13966_s9 }
  0x4b   :  { %15890 = sst [smem:[#allocation141_spill]] %s13971_s30 }
  0x4c   :  { %s13981_s27 = sld [smem:[%s15731_s0 + %s13665_s22]]   ;;  %s13669_s22 = smov 44  }
  0x4d   :  { %s13986_s9 = sld [smem:[%s15731_s0 + %s13666_s28]]   ;;  %s13670_s28 = smov 45  }
  0x4e   :  { %s13991_s30 = sld [smem:[%s15731_s0 + %s13667_s7]]   ;;  %s13671_s7 = smov 46  }
  0x4f   :  { %15891 = sst [smem:[#allocation142_spill]] %s13976_s17 }
  0x50   :  { %s13996_s17 = sld [smem:[%s15731_s0 + %s13668_s15]]   ;;  %s13672_s15 = smov 47  }
  0x52   :  { %15892 = sst [smem:[#allocation143_spill]] %s13981_s27 }
  0x53   :  { %15893 = sst [smem:[#allocation144_spill]] %s13986_s9 }
  0x54   :  { %15894 = sst [smem:[#allocation145_spill]] %s13991_s30 }
  0x55   :  { %s14001_s27 = sld [smem:[%s15731_s0 + %s13669_s22]]   ;;  %s13673_s22 = smov 48  }
  0x56   :  { %15895 = sst [smem:[#allocation146_spill]] %s13996_s17 }
  0x57   :  { %s14006_s9 = sld [smem:[%s15731_s0 + %s13670_s28]]   ;;  %s13674_s28 = smov 49  }
  0x58   :  { %s14011_s30 = sld [smem:[%s15731_s0 + %s13671_s7]]   ;;  %s13675_s7 = smov 50  }
  0x59   :  { %s14016_s17 = sld [smem:[%s15731_s0 + %s13672_s15]]   ;;  %s13676_s15 = smov 51  }
  0x5b   :  { %15896 = sst [smem:[#allocation147_spill]] %s14001_s27 }
  0x5c   :  { %s14021_s27 = sld [smem:[%s15731_s0 + %s13673_s22]]   ;;  %s13677_s22 = smov 52  }
  0x5d   :  { %15897 = sst [smem:[#allocation148_spill]] %s14006_s9 }
  0x5e   :  { %15898 = sst [smem:[#allocation149_spill]] %s14011_s30 }
  0x5f   :  { %15899 = sst [smem:[#allocation150_spill]] %s14016_s17 }
  0x60   :  { %s14026_s9 = sld [smem:[%s15731_s0 + %s13674_s28]]   ;;  %s13678_s28 = smov 53  }
  0x61   :  { %s14031_s30 = sld [smem:[%s15731_s0 + %s13675_s7]]   ;;  %s13679_s7 = smov 54  }
  0x62   :  { %15900 = sst [smem:[#allocation151_spill]] %s14021_s27 }
  0x63   :  { %s14036_s17 = sld [smem:[%s15731_s0 + %s13676_s15]]   ;;  %s13680_s15 = smov 55  }
  0x64   :  { %s14041_s27 = sld [smem:[%s15731_s0 + %s13677_s22]]   ;;  %s13681_s22 = smov 56  }
  0x66   :  { %15901 = sst [smem:[#allocation152_spill]] %s14026_s9 }
  0x67   :  { %15902 = sst [smem:[#allocation153_spill]] %s14031_s30 }
  0x68   :  { %s14046_s9 = sld [smem:[%s15731_s0 + %s13678_s28]]   ;;  %s13682_s28 = smov 57  }
  0x69   :  { %15903 = sst [smem:[#allocation154_spill]] %s14036_s17 }
  0x6a   :  { %15904 = sst [smem:[#allocation155_spill]] %s14041_s27 }
  0x6b   :  { %s14051_s30 = sld [smem:[%s15731_s0 + %s13679_s7]]   ;;  %s13683_s7 = smov 58  }
  0x6c   :  { %s14056_s17 = sld [smem:[%s15731_s0 + %s13680_s15]]   ;;  %s13684_s15 = smov 59  }
  0x6d   :  { %s14061_s27 = sld [smem:[%s15731_s0 + %s13681_s22]]   ;;  %s13685_s22 = smov 60  }
  0x6e   :  { %15905 = sst [smem:[#allocation156_spill]] %s14046_s9 }
  0x6f   :  { %s14066_s9 = sld [smem:[%s15731_s0 + %s13682_s28]]  }
  0x71   :  { %15906 = sst [smem:[#allocation157_spill]] %s14051_s30 }
  0x72   :  { %15907 = sst [smem:[#allocation158_spill]] %s14056_s17 }
  0x73   :  { %15908 = sst [smem:[#allocation159_spill]] %s14061_s27 }
  0x74   :  { %s14071_s30 = sld [smem:[%s15731_s0 + %s13683_s7]]  }
  0x75   :  { %s14076_s17 = sld [smem:[%s15731_s0 + %s13684_s15]]  }
  0x76   :  { %s14081_s27 = sld [smem:[%s15731_s0 + %s13685_s22]]  }
  0x77   :  { %126 = vsyncpa [#allocation3], 0 }
  0x78   :  { %127 = vsyncpa [#allocation5], 0 }
  0x79   :  { %128 = vsyncpa [#allocation8], 0 }
  0x7a   :  { %129 = vsyncpa [#allocation11], 0 }
  0x7b   :  { %130 = vsyncpa [#allocation14], 0 }
  0x7c   :  { %131 = vsyncpa [#allocation17], 0 }
  0x7d   :  { %132 = vsyncpa [#allocation20], 0 }
  0x7e   :  { %133 = vsyncpa [#allocation23], 0 }
  0x7f   :  { %134 = vsyncpa [#allocation26], 0 }
  0x80   :  { %135 = vsyncpa [#allocation29], 0 }
  0x81   :  { %136 = vsyncpa [#allocation32], 0 }
  0x82   :  { %137 = vsyncpa [#allocation35], 0 }
  0x83   :  { %138 = vsyncpa [#allocation38], 0 }
  0x84   :  { %139 = vsyncpa [#allocation41], 0 }
  0x85   :  { %140 = vsyncpa [#allocation44], 0 }
  0x86   :  { %141 = vsyncpa [#allocation47], 0 }
  0x87   :  { %142 = vsyncpa [#allocation50], 0 }
  0x88   :  { %143 = vsyncpa [#allocation53], 0 }
  0x89   :  { %144 = vsyncpa [#allocation56], 0 }
  0x8a   :  { %145 = vsyncpa [#allocation59], 0 }
  0x8b   :  { %146 = vsyncpa [#allocation62], 0 }
  0x8c   :  { %147 = vsyncpa [#allocation65], 0 }
  0x8d   :  { %148 = vsyncpa [#allocation68], 0 }
  0x8e   :  { %149 = vsyncpa [#allocation71], 0 }
  0x8f   :  { %150 = vsyncpa [#allocation74], 0 }
  0x90   :  { %151 = vsyncpa [#allocation77], 0 }
  0x91   :  { %152 = vsyncpa [#allocation80], 0  ;;  %s14083_s0 = smov 0  }
  0x92 LB: > { %s15909_s14 = sld [smem:[#allocation129_spill]]  ;;  %s15910_s13 = sld [smem:[#allocation111_spill]]  ;;  %s13624_s0 = sphi %s14083_s0, %s158_s0  }
  0x93   : > { %s15911_s12 = sld [smem:[#allocation126_spill]]  ;;  %s15912_s8 = sld [smem:[#allocation115_spill]] }
  0x94   : > { %s15913_s6 = sld [smem:[#allocation119_spill]]  ;;  %s15914_s5 = sld [smem:[#allocation124_spill]] }
  0x95   : > { %s15915_s4 = sld [smem:[#allocation122_spill]]  ;;  %s15916_s3 = sld [smem:[#allocation131_spill]] }
  0x96   : > { %s14089_s28 = sadd.s32 4294967295, %s13624_s0   ;;  %p9012_p0 = scmp.ge.s32.totalorder %s13624_s0, 1 }
  0x97   : > { %p1454_p1 = scmp.lt.s32.totalorder %s13624_s0, 3 }
  0x99   : > { %p14093_p2 = pnand %p9012_p0, %p1454_p1 }
  0x9a   : > { %p11228_p3 = scmp.eq.s32.totalorder (!%p14093_p2), %s14089_s28, 0  ;;  %s13686_s2 = smov (!%p14093_p2), [#allocation4]  }
  0x9b   : > { %1458 = sbr.rel (%p14093_p2) target bundleno = 1473 (0x5c1), region = 12  ;;  %s1478_s7 = sshll.u32 (!%p14093_p2), %s13686_s2, 4  ;;  %s1479_s7 = int_to_ptr.vmem [resolvable:$true] %s1478_s7 }
  0x9c   : > { %s13687_s10 = smov (!%p14093_p2), [#allocation7]   ;;  %s12132_s15 = scalar_lea.hbm (!%p14093_p2), %s15910_s13, 128 }
  0x9d   : > { %s1500_s11 = sshll.u32 (!%p14093_p2), %s13687_s10, 4  ;;  %p12133_p4 = scmp.ne.s32.totalorder (!%p14093_p2), %s15910_s13, %s12132_s15  ;;  %s1501_s11 = int_to_ptr.vmem [resolvable:$true] %s1500_s11 }
  0x9e   : > { %p12138_p7 = scmp.lt.u32.totalorder (!%p14093_p2), %s12132_s15, %s15910_s13 }
  0x9f   : > { %p12134_p5 = pnand (!%p14093_p2), %p12133_p4, %p11228_p3 }
  0xa1   : > { %p12135_p6 = pneg (!%p14093_p2), %p12134_p5 }
  0xa3   : > { %p12140_p8 = pnand %p12138_p7, %p12135_p6 }
  0xa5   : > { %12143 = shalt.err (!%p12140_p8)
}
  0xa6   : > { %s12144_s16 = scalar_lea.vmem %s1479_s7, 128  ;;  %p12151_p12 = scmp.lt.s32.totalorder %s1479_s7, %s1479_s7 }
  0xa7   : > { %p12145_p9 = scmp.ne.s32.totalorder %s1479_s7, %s12144_s16  ;;  %p12152_p13 = scmp.lt.s32.totalorder %s12144_s16, %s12144_s16 }
  0xa9   : > { %p12146_p10 = pnand %p12145_p9, %p11228_p3  ;;  %p12153_p0 = por %p12152_p13, %p12151_p12 }
  0xab   : > { %p12147_p11 = pneg %p12146_p10 }
  0xad   : > { %p12154_p1 = pnand %p12153_p0, %p12147_p11 }
  0xaf   : > { %12157 = shalt.err (!%p12154_p1)
}
  0xb0   : > { %11019 = dma.hbm_to_vmem [thread:$0]  (%p11228_p3), %s15910_s13, 128, %s1479_s7, [#allocation5]  }
  0xb1   : > { %s12158_s18 = scalar_lea.hbm %s13801_s21, 128 }
  0xb2   : > { %p12159_p4 = scmp.ne.s32.totalorder %s13801_s21, %s12158_s18  ;;  %p12164_p7 = scmp.lt.u32.totalorder %s12158_s18, %s13801_s21 }
  0xb4   : > { %p12160_p5 = pnand %p12159_p4, %p11228_p3 }
  0xb6   : > { %p12161_p6 = pneg %p12160_p5 }
  0xb8   : > { %p12166_p8 = pnand %p12164_p7, %p12161_p6 }
  0xba   : > { %12169 = shalt.err (!%p12166_p8)
}
  0xbb   : > { %s12170_s22 = scalar_lea.vmem %s1501_s11, 128  ;;  %p12177_p12 = scmp.lt.s32.totalorder %s1501_s11, %s1501_s11 }
  0xbc   : > { %p12171_p9 = scmp.ne.s32.totalorder %s1501_s11, %s12170_s22  ;;  %p12178_p13 = scmp.lt.s32.totalorder %s12170_s22, %s12170_s22 }
  0xbe   : > { %p12172_p10 = pnand %p12171_p9, %p11228_p3  ;;  %p12179_p0 = por %p12178_p13, %p12177_p12 }
  0xc0   : > { %p12173_p11 = pneg %p12172_p10 }
  0xc2   : > { %p12180_p1 = pnand %p12179_p0, %p12173_p11 }
  0xc4   : > { %12183 = shalt.err (!%p12180_p1)
}
  0xc5   : > { %11023 = dma.hbm_to_vmem [thread:$0]  (%p11228_p3), %s13801_s21, 128, %s1501_s11, [#allocation8]  }
  0xc6   : > { %s13688_s23 = smov [#allocation10]   ;;  %s12184_s2 = scalar_lea.hbm %s13811_s29, 2176 }
  0xc7   : > { %s1521_s26 = sshll.u32 %s13688_s23, 4  ;;  %p12185_p4 = scmp.ne.s32.totalorder %s13811_s29, %s12184_s2  ;;  %s1522_s26 = int_to_ptr.vmem [resolvable:$true] %s1521_s26 }
  0xc8   : > { %p12190_p7 = scmp.lt.u32.totalorder %s12184_s2, %s13811_s29 }
  0xc9   : > { %p12186_p5 = pnand %p12185_p4, %p11228_p3 }
  0xcb   : > { %p12187_p6 = pneg %p12186_p5 }
  0xcd   : > { %p12192_p8 = pnand %p12190_p7, %p12187_p6 }
  0xcf   : > { %12195 = shalt.err (!%p12192_p8)
}
  0xd0   : > { %s12196_s7 = scalar_lea.vmem %s1522_s26, 2176  ;;  %p12203_p12 = scmp.lt.s32.totalorder %s1522_s26, %s1522_s26 }
  0xd1   : > { %p12197_p9 = scmp.ne.s32.totalorder %s1522_s26, %s12196_s7  ;;  %p12204_p13 = scmp.lt.s32.totalorder %s12196_s7, %s12196_s7 }
  0xd3   : > { %p12198_p10 = pnand %p12197_p9, %p11228_p3  ;;  %p12205_p0 = por %p12204_p13, %p12203_p12 }
  0xd5   : > { %p12199_p11 = pneg %p12198_p10 }
  0xd7   : > { %p12206_p1 = pnand %p12205_p0, %p12199_p11 }
  0xd9   : > { %12209 = shalt.err (!%p12206_p1)
}
  0xda   : > { %s15773_s10 = smov 64   ;;  %s15775_s11 = smov 4  }
  0xdb   : > { %11027 = dma.hbm_to_vmem [thread:$0]  (%p11228_p3), %s13811_s29, 2176, %s1522_s26, [#allocation11], %s15773_s10, %s15773_s10, %s15775_s11  }
  0xdc   : > { %s13691_s15 = smov [#allocation13]   ;;  %s13692_s18 = smov [#allocation16]  }
  0xdd   : > { %s1546_s16 = sshll.u32 %s13691_s15, 4  ;;  %s1568_s22 = sshll.u32 %s13692_s18, 4  ;;  %s1547_s16 = int_to_ptr.vmem [resolvable:$true] %s1546_s16  ;;  %s14133_s22 = int_to_ptr.vmem [resolvable:$true] %s1568_s22 }
  0xde   : > { %s12210_s23 = scalar_lea.hbm %s15912_s8, 128 }
  0xdf   : > { %p12211_p4 = scmp.ne.s32.totalorder %s15912_s8, %s12210_s23  ;;  %p12216_p7 = scmp.lt.u32.totalorder %s12210_s23, %s15912_s8 }
  0xe1   : > { %p12212_p5 = pnand %p12211_p4, %p11228_p3 }
  0xe3   : > { %p12213_p6 = pneg %p12212_p5 }
  0xe5   : > { %p12218_p8 = pnand %p12216_p7, %p12213_p6 }
  0xe7   : > { %12221 = shalt.err (!%p12218_p8)
}
  0xe8   : > { %s12222_s2 = scalar_lea.vmem %s1547_s16, 128  ;;  %p12229_p12 = scmp.lt.s32.totalorder %s1547_s16, %s1547_s16 }
  0xe9   : > { %p12223_p9 = scmp.ne.s32.totalorder %s1547_s16, %s12222_s2  ;;  %p12230_p13 = scmp.lt.s32.totalorder %s12222_s2, %s12222_s2 }
  0xeb   : > { %p12224_p10 = pnand %p12223_p9, %p11228_p3  ;;  %p12231_p0 = por %p12230_p13, %p12229_p12 }
  0xed   : > { %p12225_p11 = pneg %p12224_p10 }
  0xef   : > { %p12232_p1 = pnand %p12231_p0, %p12225_p11 }
  0xf1   : > { %12235 = shalt.err (!%p12232_p1)
}
  0xf2   : > { %11031 = dma.hbm_to_vmem [thread:$0]  (%p11228_p3), %s15912_s8, 128, %s1547_s16, [#allocation14]  }
  0xf3   : > { %s12236_s26 = scalar_lea.hbm %s13831_s19, 128 }
  0xf4   : > { %p12237_p4 = scmp.ne.s32.totalorder %s13831_s19, %s12236_s26  ;;  %p12242_p7 = scmp.lt.u32.totalorder %s12236_s26, %s13831_s19 }
  0xf6   : > { %p12238_p5 = pnand %p12237_p4, %p11228_p3 }
  0xf8   : > { %p12239_p6 = pneg %p12238_p5 }
  0xfa   : > { %p12244_p8 = pnand %p12242_p7, %p12239_p6 }
  0xfc   : > { %12247 = shalt.err (!%p12244_p8)
}
  0xfd   : > { %s12248_s7 = scalar_lea.vmem %s14133_s22, 128  ;;  %p12255_p12 = scmp.lt.s32.totalorder %s14133_s22, %s14133_s22 }
  0xfe   : > { %p12249_p9 = scmp.ne.s32.totalorder %s14133_s22, %s12248_s7  ;;  %p12256_p13 = scmp.lt.s32.totalorder %s12248_s7, %s12248_s7 }
 0x100   : > { %p12250_p10 = pnand %p12249_p9, %p11228_p3  ;;  %p12257_p0 = por %p12256_p13, %p12255_p12 }
 0x102   : > { %p12251_p11 = pneg %p12250_p10 }
 0x104   : > { %p12258_p1 = pnand %p12257_p0, %p12251_p11 }
 0x106   : > { %12261 = shalt.err (!%p12258_p1)
}
 0x107   : > { %11035 = dma.hbm_to_vmem [thread:$0]  (%p11228_p3), %s13831_s19, 128, %s14133_s22, [#allocation17]  }
 0x108   : > { %s13693_s15 = smov [#allocation19]   ;;  %s12262_s18 = scalar_lea.hbm %s15913_s6, 256 }
 0x109   : > { %s1592_s16 = sshll.u32 %s13693_s15, 4  ;;  %p12263_p4 = scmp.ne.s32.totalorder %s15913_s6, %s12262_s18  ;;  %s1593_s16 = int_to_ptr.vmem [resolvable:$true] %s1592_s16 }
 0x10a   : > { %p12268_p7 = scmp.lt.u32.totalorder %s12262_s18, %s15913_s6 }
 0x10b   : > { %p12264_p5 = pnand %p12263_p4, %p11228_p3 }
 0x10d   : > { %p12265_p6 = pneg %p12264_p5 }
 0x10f   : > { %p12270_p8 = pnand %p12268_p7, %p12265_p6 }
 0x111   : > { %12273 = shalt.err (!%p12270_p8)
}
 0x112   : > { %s12274_s23 = scalar_lea.vmem %s1593_s16, 256  ;;  %p12281_p12 = scmp.lt.s32.totalorder %s1593_s16, %s1593_s16 }
 0x113   : > { %p12275_p9 = scmp.ne.s32.totalorder %s1593_s16, %s12274_s23  ;;  %p12282_p13 = scmp.lt.s32.totalorder %s12274_s23, %s12274_s23 }
 0x115   : > { %p12276_p10 = pnand %p12275_p9, %p11228_p3  ;;  %p12283_p0 = por %p12282_p13, %p12281_p12 }
 0x117   : > { %p12277_p11 = pneg %p12276_p10 }
 0x119   : > { %p12284_p1 = pnand %p12283_p0, %p12277_p11 }
 0x11b   : > { %12287 = shalt.err (!%p12284_p1)
}
 0x11c   : > { %s15777_s22 = smov 128   ;;  %s15779_s2 = smov 8  }
 0x11d   : > { %11039 = dma.hbm_to_vmem [thread:$0]  (%p11228_p3), %s15913_s6, 256, %s1593_s16, [#allocation20], %s15777_s22, %s15777_s22, %s15779_s2  }
 0x11e   : > { %s13696_s26 = smov [#allocation22]   ;;  %s13697_s15 = smov [#allocation25]  }
 0x11f   : > { %s1619_s7 = sshll.u32 %s13696_s26, 4  ;;  %s1642_s18 = sshll.u32 %s13697_s15, 4  ;;  %s1620_s7 = int_to_ptr.vmem [resolvable:$true] %s1619_s7  ;;  %s1643_s18 = int_to_ptr.vmem [resolvable:$true] %s1642_s18 }
 0x120   : > { %s12288_s23 = scalar_lea.hbm %s13856_s20, 16 }
 0x121   : > { %p12289_p4 = scmp.ne.s32.totalorder %s13856_s20, %s12288_s23  ;;  %p12294_p7 = scmp.lt.u32.totalorder %s12288_s23, %s13856_s20 }
 0x123   : > { %p12290_p5 = pnand %p12289_p4, %p11228_p3 }
 0x125   : > { %p12291_p6 = pneg %p12290_p5 }
 0x127   : > { %p12296_p8 = pnand %p12294_p7, %p12291_p6 }
 0x129   : > { %12299 = shalt.err (!%p12296_p8)
}
 0x12a   : > { %s12300_s10 = scalar_lea.vmem %s1620_s7, 16  ;;  %s12306_s16 = scalar_lea.vmem %s1620_s7, 32 }
 0x12b   : > { %p12301_p9 = scmp.ne.s32.totalorder %s1620_s7, %s12300_s10  ;;  %p12307_p12 = scmp.lt.s32.totalorder %s1620_s7, %s1620_s7 }
 0x12c   : > { %p12308_p13 = scmp.lt.s32.totalorder %s12306_s16, %s12300_s10 }
 0x12d   : > { %p12302_p10 = pnand %p12301_p9, %p11228_p3 }
 0x12e   : > { %p12309_p0 = por %p12308_p13, %p12307_p12 }
 0x12f   : > { %p12303_p11 = pneg %p12302_p10 }
 0x131   : > { %p12310_p1 = pnand %p12309_p0, %p12303_p11 }
 0x133   : > { %12313 = shalt.err (!%p12310_p1)
}
 0x134   : > { %11043 = dma.hbm_to_vmem [thread:$0]  (%p11228_p3), %s13856_s20, 16, %s1620_s7, [#allocation23]  }
 0x135   : > { %s12314_s26 = scalar_lea.hbm %s15915_s4, 256 }
 0x136   : > { %p12315_p4 = scmp.ne.s32.totalorder %s15915_s4, %s12314_s26  ;;  %p12320_p7 = scmp.lt.u32.totalorder %s12314_s26, %s15915_s4 }
 0x138   : > { %p12316_p5 = pnand %p12315_p4, %p11228_p3 }
 0x13a   : > { %p12317_p6 = pneg %p12316_p5 }
 0x13c   : > { %p12322_p8 = pnand %p12320_p7, %p12317_p6 }
 0x13e   : > { %12325 = shalt.err (!%p12322_p8)
}
 0x13f   : > { %s12326_s10 = scalar_lea.vmem %s1643_s18, 256  ;;  %p12333_p12 = scmp.lt.s32.totalorder %s1643_s18, %s1643_s18 }
 0x140   : > { %p12327_p9 = scmp.ne.s32.totalorder %s1643_s18, %s12326_s10  ;;  %p12334_p13 = scmp.lt.s32.totalorder %s12326_s10, %s12326_s10 }
 0x142   : > { %p12328_p10 = pnand %p12327_p9, %p11228_p3  ;;  %p12335_p0 = por %p12334_p13, %p12333_p12 }
 0x144   : > { %p12329_p11 = pneg %p12328_p10 }
 0x146   : > { %p12336_p1 = pnand %p12335_p0, %p12329_p11 }
 0x148   : > { %12339 = shalt.err (!%p12336_p1)
}
 0x149   : > { %11047 = dma.hbm_to_vmem [thread:$0]  (%p11228_p3), %s15915_s4, 256, %s1643_s18, [#allocation26], %s15777_s22, %s15777_s22, %s15779_s2  }
 0x14a   : > { %s13698_s7 = smov [#allocation28]   ;;  %s13699_s23 = smov [#allocation31]  }
 0x14b   : > { %s1669_s15 = sshll.u32 %s13698_s7, 4  ;;  %s1691_s16 = sshll.u32 %s13699_s23, 4  ;;  %s1670_s15 = int_to_ptr.vmem [resolvable:$true] %s1669_s15  ;;  %s1692_s16 = int_to_ptr.vmem [resolvable:$true] %s1691_s16 }
 0x14c   : > { %s12340_s26 = scalar_lea.hbm %s15914_s5, 256 }
 0x14d   : > { %p12341_p4 = scmp.ne.s32.totalorder %s15914_s5, %s12340_s26  ;;  %p12346_p7 = scmp.lt.u32.totalorder %s12340_s26, %s15914_s5 }
 0x14f   : > { %p12342_p5 = pnand %p12341_p4, %p11228_p3 }
 0x151   : > { %p12343_p6 = pneg %p12342_p5 }
 0x153   : > { %p12348_p8 = pnand %p12346_p7, %p12343_p6 }
 0x155   : > { %12351 = shalt.err (!%p12348_p8)
}
 0x156   : > { %s12352_s10 = scalar_lea.vmem %s1670_s15, 256  ;;  %p12359_p12 = scmp.lt.s32.totalorder %s1670_s15, %s1670_s15 }
 0x157   : > { %p12353_p9 = scmp.ne.s32.totalorder %s1670_s15, %s12352_s10  ;;  %p12360_p13 = scmp.lt.s32.totalorder %s12352_s10, %s12352_s10 }
 0x159   : > { %p12354_p10 = pnand %p12353_p9, %p11228_p3  ;;  %p12361_p0 = por %p12360_p13, %p12359_p12 }
 0x15b   : > { %p12355_p11 = pneg %p12354_p10 }
 0x15d   : > { %p12362_p1 = pnand %p12361_p0, %p12355_p11 }
 0x15f   : > { %12365 = shalt.err (!%p12362_p1)
}
 0x160   : > { %11051 = dma.hbm_to_vmem [thread:$0]  (%p11228_p3), %s15914_s5, 256, %s1670_s15, [#allocation29]  }
 0x161   : > { %s12366_s18 = scalar_lea.hbm %s15911_s12, 16 }
 0x162   : > { %p12367_p4 = scmp.ne.s32.totalorder %s15911_s12, %s12366_s18  ;;  %p12372_p7 = scmp.lt.u32.totalorder %s12366_s18, %s15911_s12 }
 0x164   : > { %p12368_p5 = pnand %p12367_p4, %p11228_p3 }
 0x166   : > { %p12369_p6 = pneg %p12368_p5 }
 0x168   : > { %p12374_p8 = pnand %p12372_p7, %p12369_p6 }
 0x16a   : > { %12377 = shalt.err (!%p12374_p8)
}
 0x16b   : > { %s12378_s7 = scalar_lea.vmem %s1692_s16, 16  ;;  %s12384_s23 = scalar_lea.vmem %s1692_s16, 32 }
 0x16c   : > { %p12379_p9 = scmp.ne.s32.totalorder %s1692_s16, %s12378_s7  ;;  %p12385_p12 = scmp.lt.s32.totalorder %s1692_s16, %s1692_s16 }
 0x16d   : > { %p12386_p13 = scmp.lt.s32.totalorder %s12384_s23, %s12378_s7 }
 0x16e   : > { %p12380_p10 = pnand %p12379_p9, %p11228_p3 }
 0x16f   : > { %p12387_p0 = por %p12386_p13, %p12385_p12 }
 0x170   : > { %p12381_p11 = pneg %p12380_p10 }
 0x172   : > { %p12388_p1 = pnand %p12387_p0, %p12381_p11 }
 0x174   : > { %12391 = shalt.err (!%p12388_p1)
}
 0x175   : > { %11055 = dma.hbm_to_vmem [thread:$0]  (%p11228_p3), %s15911_s12, 16, %s1692_s16, [#allocation32]  }
 0x176   : > { %s13700_s15 = smov [#allocation34]   ;;  %s13701_s10 = smov [#allocation37]  }
 0x177   : > { %s1713_s26 = sshll.u32 %s13700_s15, 4  ;;  %s1737_s18 = sshll.u32 %s13701_s10, 4  ;;  %s1714_s26 = int_to_ptr.vmem [resolvable:$true] %s1713_s26  ;;  %s1738_s18 = int_to_ptr.vmem [resolvable:$true] %s1737_s18 }
 0x178   : > { %s12392_s11 = scalar_lea.hbm %s13896_s24, 128 }
 0x179   : > { %p12393_p4 = scmp.ne.s32.totalorder %s13896_s24, %s12392_s11  ;;  %p12398_p7 = scmp.lt.u32.totalorder %s12392_s11, %s13896_s24 }
 0x17b   : > { %p12394_p5 = pnand %p12393_p4, %p11228_p3 }
 0x17d   : > { %p12395_p6 = pneg %p12394_p5 }
 0x17f   : > { %p12400_p8 = pnand %p12398_p7, %p12395_p6 }
 0x181   : > { %12403 = shalt.err (!%p12400_p8)
}
 0x182   : > { %s12404_s7 = scalar_lea.vmem %s1714_s26, 128  ;;  %p12411_p12 = scmp.lt.s32.totalorder %s1714_s26, %s1714_s26 }
 0x183   : > { %p12405_p9 = scmp.ne.s32.totalorder %s1714_s26, %s12404_s7  ;;  %p12412_p13 = scmp.lt.s32.totalorder %s12404_s7, %s12404_s7 }
 0x185   : > { %p12406_p10 = pnand %p12405_p9, %p11228_p3  ;;  %p12413_p0 = por %p12412_p13, %p12411_p12 }
 0x187   : > { %p12407_p11 = pneg %p12406_p10 }
 0x189   : > { %p12414_p1 = pnand %p12413_p0, %p12407_p11 }
 0x18b   : > { %12417 = shalt.err (!%p12414_p1)
}
 0x18c   : > { %11059 = dma.hbm_to_vmem [thread:$0]  (%p11228_p3), %s13896_s24, 128, %s1714_s26, [#allocation35]  }
 0x18d   : > { %s12418_s11 = scalar_lea.hbm %s15909_s14, 128 }
 0x18e   : > { %p12419_p4 = scmp.ne.s32.totalorder %s15909_s14, %s12418_s11  ;;  %p12424_p7 = scmp.lt.u32.totalorder %s12418_s11, %s15909_s14 }
 0x190   : > { %p12420_p5 = pnand %p12419_p4, %p11228_p3 }
 0x192   : > { %p12421_p6 = pneg %p12420_p5 }
 0x194   : > { %p12426_p8 = pnand %p12424_p7, %p12421_p6 }
 0x196   : > { %12429 = shalt.err (!%p12426_p8)
}
 0x197   : > { %s12430_s16 = scalar_lea.vmem %s1738_s18, 128  ;;  %p12437_p12 = scmp.lt.s32.totalorder %s1738_s18, %s1738_s18 }
 0x198   : > { %p12431_p9 = scmp.ne.s32.totalorder %s1738_s18, %s12430_s16  ;;  %p12438_p13 = scmp.lt.s32.totalorder %s12430_s16, %s12430_s16 }
 0x19a   : > { %p12432_p10 = pnand %p12431_p9, %p11228_p3  ;;  %p12439_p0 = por %p12438_p13, %p12437_p12 }
 0x19c   : > { %p12433_p11 = pneg %p12432_p10 }
 0x19e   : > { %p12440_p1 = pnand %p12439_p0, %p12433_p11 }
 0x1a0   : > { %12443 = shalt.err (!%p12440_p1)
}
 0x1a1   : > { %11063 = dma.hbm_to_vmem [thread:$0]  (%p11228_p3), %s15909_s14, 128, %s1738_s18, [#allocation38]  }
 0x1a2   : > { %s13702_s23 = smov [#allocation40]   ;;  %s13703_s26 = smov [#allocation43]  }
 0x1a3   : > { %s1761_s15 = sshll.u32 %s13702_s23, 4  ;;  %s1783_s10 = sshll.u32 %s13703_s26, 4  ;;  %s1762_s15 = int_to_ptr.vmem [resolvable:$true] %s1761_s15  ;;  %s1784_s10 = int_to_ptr.vmem [resolvable:$true] %s1783_s10 }
 0x1a4   : > { %s12444_s7 = scalar_lea.hbm %s15916_s3, 16 }
 0x1a5   : > { %p12445_p4 = scmp.ne.s32.totalorder %s15916_s3, %s12444_s7  ;;  %p12450_p7 = scmp.lt.u32.totalorder %s12444_s7, %s15916_s3 }
 0x1a7   : > { %p12446_p5 = pnand %p12445_p4, %p11228_p3 }
 0x1a9   : > { %p12447_p6 = pneg %p12446_p5 }
 0x1ab   : > { %p12452_p8 = pnand %p12450_p7, %p12447_p6 }
 0x1ad   : > { %12455 = shalt.err (!%p12452_p8)
}
 0x1ae   : > { %s12456_s11 = scalar_lea.vmem %s1762_s15, 16  ;;  %s12462_s18 = scalar_lea.vmem %s1762_s15, 32 }
 0x1af   : > { %p12457_p9 = scmp.ne.s32.totalorder %s1762_s15, %s12456_s11  ;;  %p12463_p12 = scmp.lt.s32.totalorder %s1762_s15, %s1762_s15 }
 0x1b0   : > { %p12464_p13 = scmp.lt.s32.totalorder %s12462_s18, %s12456_s11 }
 0x1b1   : > { %p12458_p10 = pnand %p12457_p9, %p11228_p3 }
 0x1b2   : > { %p12465_p0 = por %p12464_p13, %p12463_p12 }
 0x1b3   : > { %p12459_p11 = pneg %p12458_p10 }
 0x1b5   : > { %p12466_p1 = pnand %p12465_p0, %p12459_p11 }
 0x1b7   : > { %12469 = shalt.err (!%p12466_p1)
}
 0x1b8   : > { %11067 = dma.hbm_to_vmem [thread:$0]  (%p11228_p3), %s15916_s3, 16, %s1762_s15, [#allocation41]  }
 0x1b9   : > { %s12470_s16 = scalar_lea.hbm %s13926_s25, 128 }
 0x1ba   : > { %p12471_p4 = scmp.ne.s32.totalorder %s13926_s25, %s12470_s16  ;;  %p12476_p7 = scmp.lt.u32.totalorder %s12470_s16, %s13926_s25 }
 0x1bc   : > { %p12472_p5 = pnand %p12471_p4, %p11228_p3 }
 0x1be   : > { %p12473_p6 = pneg %p12472_p5 }
 0x1c0   : > { %p12478_p8 = pnand %p12476_p7, %p12473_p6 }
 0x1c2   : > { %12481 = shalt.err (!%p12478_p8)
}
 0x1c3   : > { %s12482_s23 = scalar_lea.vmem %s1784_s10, 128  ;;  %p12489_p12 = scmp.lt.s32.totalorder %s1784_s10, %s1784_s10 }
 0x1c4   : > { %p12483_p9 = scmp.ne.s32.totalorder %s1784_s10, %s12482_s23  ;;  %p12490_p13 = scmp.lt.s32.totalorder %s12482_s23, %s12482_s23 }
 0x1c6   : > { %p12484_p10 = pnand %p12483_p9, %p11228_p3  ;;  %p12491_p0 = por %p12490_p13, %p12489_p12 }
 0x1c8   : > { %p12485_p11 = pneg %p12484_p10 }
 0x1ca   : > { %p12492_p1 = pnand %p12491_p0, %p12485_p11 }
 0x1cc   : > { %12495 = shalt.err (!%p12492_p1)
}
 0x1cd   : > { %s15918_s15 = sld [smem:[#allocation134_spill]]  ;;  %s13704_s26 = smov [#allocation46]  }
 0x1ce   : > { %11071 = dma.hbm_to_vmem [thread:$0]  (%p11228_p3), %s13926_s25, 128, %s1784_s10, [#allocation44]  }
 0x1cf   : > { %s1805_s7 = sshll.u32 %s13704_s26, 4  ;;  %s13705_s11 = smov [#allocation49]   ;;  %s1806_s7 = int_to_ptr.vmem [resolvable:$true] %s1805_s7 }
 0x1d0   : > { %s1827_s18 = sshll.u32 %s13705_s11, 4  ;;  %s1828_s18 = int_to_ptr.vmem [resolvable:$true] %s1827_s18 }
 0x1d3   : > { %s12496_s16 = scalar_lea.hbm %s15918_s15, 128 }
 0x1d4   : > { %p12497_p4 = scmp.ne.s32.totalorder %s15918_s15, %s12496_s16  ;;  %p12502_p7 = scmp.lt.u32.totalorder %s12496_s16, %s15918_s15 }
 0x1d6   : > { %p12498_p5 = pnand %p12497_p4, %p11228_p3 }
 0x1d8   : > { %p12499_p6 = pneg %p12498_p5 }
 0x1da   : > { %p12504_p8 = pnand %p12502_p7, %p12499_p6 }
 0x1dc   : > { %12507 = shalt.err (!%p12504_p8)
}
 0x1dd   : > { %s12508_s23 = scalar_lea.vmem %s1806_s7, 128  ;;  %p12515_p12 = scmp.lt.s32.totalorder %s1806_s7, %s1806_s7 }
 0x1de   : > { %p12509_p9 = scmp.ne.s32.totalorder %s1806_s7, %s12508_s23  ;;  %p12516_p13 = scmp.lt.s32.totalorder %s12508_s23, %s12508_s23 }
 0x1e0   : > { %p12510_p10 = pnand %p12509_p9, %p11228_p3  ;;  %p12517_p0 = por %p12516_p13, %p12515_p12 }
 0x1e2   : > { %p12511_p11 = pneg %p12510_p10 }
 0x1e4   : > { %p12518_p1 = pnand %p12517_p0, %p12511_p11 }
 0x1e6   : > { %12521 = shalt.err (!%p12518_p1)
}
 0x1e7   : > { %s15919_s10 = sld [smem:[#allocation136_spill]] }
 0x1e8   : > { %11075 = dma.hbm_to_vmem [thread:$0]  (%p11228_p3), %s15918_s15, 128, %s1806_s7, [#allocation47]  }
 0x1ed   : > { %s12522_s26 = scalar_lea.hbm %s15919_s10, 16 }
 0x1ee   : > { %p12523_p4 = scmp.ne.s32.totalorder %s15919_s10, %s12522_s26  ;;  %p12528_p7 = scmp.lt.u32.totalorder %s12522_s26, %s15919_s10 }
 0x1f0   : > { %p12524_p5 = pnand %p12523_p4, %p11228_p3 }
 0x1f2   : > { %p12525_p6 = pneg %p12524_p5 }
 0x1f4   : > { %p12530_p8 = pnand %p12528_p7, %p12525_p6 }
 0x1f6   : > { %12533 = shalt.err (!%p12530_p8)
}
 0x1f7   : > { %s12534_s11 = scalar_lea.vmem %s1828_s18, 16  ;;  %s12540_s16 = scalar_lea.vmem %s1828_s18, 32 }
 0x1f8   : > { %p12535_p9 = scmp.ne.s32.totalorder %s1828_s18, %s12534_s11  ;;  %p12541_p12 = scmp.lt.s32.totalorder %s1828_s18, %s1828_s18 }
 0x1f9   : > { %p12542_p13 = scmp.lt.s32.totalorder %s12540_s16, %s12534_s11 }
 0x1fa   : > { %p12536_p10 = pnand %p12535_p9, %p11228_p3 }
 0x1fb   : > { %p12543_p0 = por %p12542_p13, %p12541_p12 }
 0x1fc   : > { %p12537_p11 = pneg %p12536_p10 }
 0x1fe   : > { %p12544_p1 = pnand %p12543_p0, %p12537_p11 }
 0x200   : > { %12547 = shalt.err (!%p12544_p1)
}
 0x201   : > { %s15920_s7 = sld [smem:[#allocation138_spill]]  ;;  %s13706_s23 = smov [#allocation52]  }
 0x202   : > { %11079 = dma.hbm_to_vmem [thread:$0]  (%p11228_p3), %s15919_s10, 16, %s1828_s18, [#allocation50]  }
 0x203   : > { %s1850_s26 = sshll.u32 %s13706_s23, 4  ;;  %s13707_s22 = smov [#allocation55]   ;;  %s1851_s26 = int_to_ptr.vmem [resolvable:$true] %s1850_s26 }
 0x204   : > { %s1874_s2 = sshll.u32 %s13707_s22, 4  ;;  %s1875_s2 = int_to_ptr.vmem [resolvable:$true] %s1874_s2 }
 0x207   : > { %s12548_s3 = scalar_lea.hbm %s15920_s7, 512 }
 0x208   : > { %p12549_p4 = scmp.ne.s32.totalorder %s15920_s7, %s12548_s3  ;;  %p12554_p7 = scmp.lt.u32.totalorder %s12548_s3, %s15920_s7 }
 0x20a   : > { %p12550_p5 = pnand %p12549_p4, %p11228_p3 }
 0x20c   : > { %p12551_p6 = pneg %p12550_p5 }
 0x20e   : > { %p12556_p8 = pnand %p12554_p7, %p12551_p6 }
 0x210   : > { %12559 = shalt.err (!%p12556_p8)
}
 0x211   : > { %s12560_s11 = scalar_lea.vmem %s1851_s26, 512  ;;  %p12567_p12 = scmp.lt.s32.totalorder %s1851_s26, %s1851_s26 }
 0x212   : > { %p12561_p9 = scmp.ne.s32.totalorder %s1851_s26, %s12560_s11  ;;  %p12568_p13 = scmp.lt.s32.totalorder %s12560_s11, %s12560_s11 }
 0x214   : > { %p12562_p10 = pnand %p12561_p9, %p11228_p3  ;;  %p12569_p0 = por %p12568_p13, %p12567_p12 }
 0x216   : > { %p12563_p11 = pneg %p12562_p10 }
 0x218   : > { %p12570_p1 = pnand %p12569_p0, %p12563_p11 }
 0x21a   : > { %12573 = shalt.err (!%p12570_p1)
}
 0x21b   : > { %s15921_s22 = smov 8   ;;  %s15922_s18 = smov 128  }
 0x21c   : > { %s15923_s3 = sld [smem:[#allocation140_spill]] }
 0x21d   : > { %11083 = dma.hbm_to_vmem [thread:$0]  (%p11228_p3), %s15920_s7, 512, %s1851_s26, [#allocation53], %s15922_s18, %s15922_s18, %s15921_s22  }
 0x222   : > { %s12574_s16 = scalar_lea.hbm %s15923_s3, 2560 }
 0x223   : > { %p12575_p4 = scmp.ne.s32.totalorder %s15923_s3, %s12574_s16  ;;  %p12580_p7 = scmp.lt.u32.totalorder %s12574_s16, %s15923_s3 }
 0x225   : > { %p12576_p5 = pnand %p12575_p4, %p11228_p3 }
 0x227   : > { %p12577_p6 = pneg %p12576_p5 }
 0x229   : > { %p12582_p8 = pnand %p12580_p7, %p12577_p6 }
 0x22b   : > { %12585 = shalt.err (!%p12582_p8)
}
 0x22c   : > { %s12586_s23 = scalar_lea.vmem %s1875_s2, 2560  ;;  %p12593_p12 = scmp.lt.s32.totalorder %s1875_s2, %s1875_s2 }
 0x22d   : > { %p12587_p9 = scmp.ne.s32.totalorder %s1875_s2, %s12586_s23  ;;  %p12594_p13 = scmp.lt.s32.totalorder %s12586_s23, %s12586_s23 }
 0x22f   : > { %p12588_p10 = pnand %p12587_p9, %p11228_p3  ;;  %p12595_p0 = por %p12594_p13, %p12593_p12 }
 0x231   : > { %p12589_p11 = pneg %p12588_p10 }
 0x233   : > { %p12596_p1 = pnand %p12595_p0, %p12589_p11 }
 0x235   : > { %12599 = shalt.err (!%p12596_p1)
}
 0x236   : > { %s15924_s26 = sld [smem:[#allocation142_spill]]  ;;  %s13708_s11 = smov [#allocation58]  }
 0x237   : > { %11087 = dma.hbm_to_vmem [thread:$0]  (%p11228_p3), %s15923_s3, 2560, %s1875_s2, [#allocation56], %s15922_s18, %s15922_s18, %s15921_s22  }
 0x238   : > { %s1899_s16 = sshll.u32 %s13708_s11, 4  ;;  %s13709_s4 = smov [#allocation61]   ;;  %s1900_s16 = int_to_ptr.vmem [resolvable:$true] %s1899_s16 }
 0x239   : > { %s1921_s5 = sshll.u32 %s13709_s4, 4  ;;  %s1922_s5 = int_to_ptr.vmem [resolvable:$true] %s1921_s5 }
 0x23c   : > { %s12600_s23 = scalar_lea.hbm %s15924_s26, 128 }
 0x23d   : > { %p12601_p4 = scmp.ne.s32.totalorder %s15924_s26, %s12600_s23  ;;  %p12606_p7 = scmp.lt.u32.totalorder %s12600_s23, %s15924_s26 }
 0x23f   : > { %p12602_p5 = pnand %p12601_p4, %p11228_p3 }
 0x241   : > { %p12603_p6 = pneg %p12602_p5 }
 0x243   : > { %p12608_p8 = pnand %p12606_p7, %p12603_p6 }
 0x245   : > { %12611 = shalt.err (!%p12608_p8)
}
 0x246   : > { %s12612_s6 = scalar_lea.vmem %s1900_s16, 128  ;;  %p12619_p12 = scmp.lt.s32.totalorder %s1900_s16, %s1900_s16 }
 0x247   : > { %p12613_p9 = scmp.ne.s32.totalorder %s1900_s16, %s12612_s6  ;;  %p12620_p13 = scmp.lt.s32.totalorder %s12612_s6, %s12612_s6 }
 0x249   : > { %p12614_p10 = pnand %p12613_p9, %p11228_p3  ;;  %p12621_p0 = por %p12620_p13, %p12619_p12 }
 0x24b   : > { %p12615_p11 = pneg %p12614_p10 }
 0x24d   : > { %p12622_p1 = pnand %p12621_p0, %p12615_p11 }
 0x24f   : > { %12625 = shalt.err (!%p12622_p1)
}
 0x250   : > { %s15925_s4 = sld [smem:[#allocation144_spill]] }
 0x251   : > { %11091 = dma.hbm_to_vmem [thread:$0]  (%p11228_p3), %s15924_s26, 128, %s1900_s16, [#allocation59]  }
 0x256   : > { %s12626_s2 = scalar_lea.hbm %s15925_s4, 16 }
 0x257   : > { %p12627_p4 = scmp.ne.s32.totalorder %s15925_s4, %s12626_s2  ;;  %p12632_p7 = scmp.lt.u32.totalorder %s12626_s2, %s15925_s4 }
 0x259   : > { %p12628_p5 = pnand %p12627_p4, %p11228_p3 }
 0x25b   : > { %p12629_p6 = pneg %p12628_p5 }
 0x25d   : > { %p12634_p8 = pnand %p12632_p7, %p12629_p6 }
 0x25f   : > { %12637 = shalt.err (!%p12634_p8)
}
 0x260   : > { %s12638_s6 = scalar_lea.vmem %s1922_s5, 16  ;;  %s12644_s11 = scalar_lea.vmem %s1922_s5, 32 }
 0x261   : > { %p12639_p9 = scmp.ne.s32.totalorder %s1922_s5, %s12638_s6  ;;  %p12645_p12 = scmp.lt.s32.totalorder %s1922_s5, %s1922_s5 }
 0x262   : > { %p12646_p13 = scmp.lt.s32.totalorder %s12644_s11, %s12638_s6 }
 0x263   : > { %p12640_p10 = pnand %p12639_p9, %p11228_p3 }
 0x264   : > { %p12647_p0 = por %p12646_p13, %p12645_p12 }
 0x265   : > { %p12641_p11 = pneg %p12640_p10 }
 0x267   : > { %p12648_p1 = pnand %p12647_p0, %p12641_p11 }
 0x269   : > { %12651 = shalt.err (!%p12648_p1)
}
 0x26a   : > { %s15926_s16 = sld [smem:[#allocation146_spill]]  ;;  %s13710_s23 = smov [#allocation64]  }
 0x26b   : > { %11095 = dma.hbm_to_vmem [thread:$0]  (%p11228_p3), %s15925_s4, 16, %s1922_s5, [#allocation62]  }
 0x26c   : > { %s1943_s2 = sshll.u32 %s13710_s23, 4  ;;  %s13711_s3 = smov [#allocation67]   ;;  %s1944_s2 = int_to_ptr.vmem [resolvable:$true] %s1943_s2 }
 0x26d   : > { %s1967_s7 = sshll.u32 %s13711_s3, 4  ;;  %s1968_s7 = int_to_ptr.vmem [resolvable:$true] %s1967_s7 }
 0x270   : > { %s12652_s8 = scalar_lea.hbm %s15926_s16, 128 }
 0x271   : > { %p12653_p4 = scmp.ne.s32.totalorder %s15926_s16, %s12652_s8  ;;  %p12658_p7 = scmp.lt.u32.totalorder %s12652_s8, %s15926_s16 }
 0x273   : > { %p12654_p5 = pnand %p12653_p4, %p11228_p3 }
 0x275   : > { %p12655_p6 = pneg %p12654_p5 }
 0x277   : > { %p12660_p8 = pnand %p12658_p7, %p12655_p6 }
 0x279   : > { %12663 = shalt.err (!%p12660_p8)
}
 0x27a   : > { %s12664_s6 = scalar_lea.vmem %s1944_s2, 128  ;;  %p12671_p12 = scmp.lt.s32.totalorder %s1944_s2, %s1944_s2 }
 0x27b   : > { %p12665_p9 = scmp.ne.s32.totalorder %s1944_s2, %s12664_s6  ;;  %p12672_p13 = scmp.lt.s32.totalorder %s12664_s6, %s12664_s6 }
 0x27d   : > { %p12666_p10 = pnand %p12665_p9, %p11228_p3  ;;  %p12673_p0 = por %p12672_p13, %p12671_p12 }
 0x27f   : > { %p12667_p11 = pneg %p12666_p10 }
 0x281   : > { %p12674_p1 = pnand %p12673_p0, %p12667_p11 }
 0x283   : > { %12677 = shalt.err (!%p12674_p1)
}
 0x284   : > { %s15927_s5 = sld [smem:[#allocation149_spill]] }
 0x285   : > { %11099 = dma.hbm_to_vmem [thread:$0]  (%p11228_p3), %s15926_s16, 128, %s1944_s2, [#allocation65]  }
 0x28a   : > { %s12678_s8 = scalar_lea.hbm %s15927_s5, 512 }
 0x28b   : > { %p12679_p4 = scmp.ne.s32.totalorder %s15927_s5, %s12678_s8  ;;  %p12684_p7 = scmp.lt.u32.totalorder %s12678_s8, %s15927_s5 }
 0x28d   : > { %p12680_p5 = pnand %p12679_p4, %p11228_p3 }
 0x28f   : > { %p12681_p6 = pneg %p12680_p5 }
 0x291   : > { %p12686_p8 = pnand %p12684_p7, %p12681_p6 }
 0x293   : > { %12689 = shalt.err (!%p12686_p8)
}
 0x294   : > { %s12690_s3 = scalar_lea.vmem %s1968_s7, 512  ;;  %p12697_p12 = scmp.lt.s32.totalorder %s1968_s7, %s1968_s7 }
 0x295   : > { %p12691_p9 = scmp.ne.s32.totalorder %s1968_s7, %s12690_s3  ;;  %p12698_p13 = scmp.lt.s32.totalorder %s12690_s3, %s12690_s3 }
 0x297   : > { %p12692_p10 = pnand %p12691_p9, %p11228_p3  ;;  %p12699_p0 = por %p12698_p13, %p12697_p12 }
 0x299   : > { %p12693_p11 = pneg %p12692_p10 }
 0x29b   : > { %p12700_p1 = pnand %p12699_p0, %p12693_p11 }
 0x29d   : > { %12703 = shalt.err (!%p12700_p1)
}
 0x29e   : > { %s15928_s11 = sld [smem:[#allocation152_spill]]  ;;  %s13712_s23 = smov [#allocation70]  }
 0x29f   : > { %11103 = dma.hbm_to_vmem [thread:$0]  (%p11228_p3), %s15927_s5, 512, %s1968_s7, [#allocation68], %s15922_s18, %s15922_s18, %s15921_s22  }
 0x2a0   : > { %s1995_s2 = sshll.u32 %s13712_s23, 4  ;;  %s13713_s6 = smov [#allocation73]   ;;  %s1996_s2 = int_to_ptr.vmem [resolvable:$true] %s1995_s2 }
 0x2a1   : > { %s2017_s8 = sshll.u32 %s13713_s6, 4  ;;  %s2018_s8 = int_to_ptr.vmem [resolvable:$true] %s2017_s8 }
 0x2a4   : > { %s12704_s3 = scalar_lea.hbm %s15928_s11, 64 }
 0x2a5   : > { %p12705_p4 = scmp.ne.s32.totalorder %s15928_s11, %s12704_s3  ;;  %p12710_p7 = scmp.lt.u32.totalorder %s12704_s3, %s15928_s11 }
 0x2a7   : > { %p12706_p5 = pnand %p12705_p4, %p11228_p3 }
 0x2a9   : > { %p12707_p6 = pneg %p12706_p5 }
 0x2ab   : > { %p12712_p8 = pnand %p12710_p7, %p12707_p6 }
 0x2ad   : > { %12715 = shalt.err (!%p12712_p8)
}
 0x2ae   : > { %s12716_s4 = scalar_lea.vmem %s1996_s2, 64  ;;  %p12723_p12 = scmp.lt.s32.totalorder %s1996_s2, %s1996_s2 }
 0x2af   : > { %p12717_p9 = scmp.ne.s32.totalorder %s1996_s2, %s12716_s4  ;;  %p12724_p13 = scmp.lt.s32.totalorder %s12716_s4, %s12716_s4 }
 0x2b1   : > { %p12718_p10 = pnand %p12717_p9, %p11228_p3  ;;  %p12725_p0 = por %p12724_p13, %p12723_p12 }
 0x2b3   : > { %p12719_p11 = pneg %p12718_p10 }
 0x2b5   : > { %p12726_p1 = pnand %p12725_p0, %p12719_p11 }
 0x2b7   : > { %12729 = shalt.err (!%p12726_p1)
}
 0x2b8   : > { %s15929_s7 = sld [smem:[#allocation154_spill]] }
 0x2b9   : > { %11107 = dma.hbm_to_vmem [thread:$0]  (%p11228_p3), %s15928_s11, 64, %s1996_s2, [#allocation71]  }
 0x2be   : > { %s12730_s23 = scalar_lea.hbm %s15929_s7, 128 }
 0x2bf   : > { %p12731_p4 = scmp.ne.s32.totalorder %s15929_s7, %s12730_s23  ;;  %p12736_p7 = scmp.lt.u32.totalorder %s12730_s23, %s15929_s7 }
 0x2c1   : > { %p12732_p5 = pnand %p12731_p4, %p11228_p3 }
 0x2c3   : > { %p12733_p6 = pneg %p12732_p5 }
 0x2c5   : > { %p12738_p8 = pnand %p12736_p7, %p12733_p6 }
 0x2c7   : > { %12741 = shalt.err (!%p12738_p8)
}
 0x2c8   : > { %s12742_s4 = scalar_lea.vmem %s2018_s8, 128  ;;  %p12749_p12 = scmp.lt.s32.totalorder %s2018_s8, %s2018_s8 }
 0x2c9   : > { %p12743_p9 = scmp.ne.s32.totalorder %s2018_s8, %s12742_s4  ;;  %p12750_p13 = scmp.lt.s32.totalorder %s12742_s4, %s12742_s4 }
 0x2cb   : > { %p12744_p10 = pnand %p12743_p9, %p11228_p3  ;;  %p12751_p0 = por %p12750_p13, %p12749_p12 }
 0x2cd   : > { %p12745_p11 = pneg %p12744_p10 }
 0x2cf   : > { %p12752_p1 = pnand %p12751_p0, %p12745_p11 }
 0x2d1   : > { %12755 = shalt.err (!%p12752_p1)
}
 0x2d2   : > { %s15930_s2 = sld [smem:[#allocation157_spill]]  ;;  %s13714_s6 = smov [#allocation76]  }
 0x2d3   : > { %11111 = dma.hbm_to_vmem [thread:$0]  (%p11228_p3), %s15929_s7, 128, %s2018_s8, [#allocation74]  }
 0x2d4   : > { %s2042_s3 = sshll.u32 %s13714_s6, 4  ;;  %s13715_s23 = smov [#allocation79]   ;;  %s2043_s3 = int_to_ptr.vmem [resolvable:$true] %s2042_s3 }
 0x2d5   : > { %s2063_s5 = sshll.u32 %s13715_s23, 4  ;;  %s2064_s5 = int_to_ptr.vmem [resolvable:$true] %s2063_s5 }
 0x2d8   : > { %s12756_s10 = scalar_lea.hbm %s15930_s2, 128 }
 0x2d9   : > { %p12757_p4 = scmp.ne.s32.totalorder %s15930_s2, %s12756_s10  ;;  %p12762_p7 = scmp.lt.u32.totalorder %s12756_s10, %s15930_s2 }
 0x2db   : > { %p12758_p5 = pnand %p12757_p4, %p11228_p3 }
 0x2dd   : > { %p12759_p6 = pneg %p12758_p5 }
 0x2df   : > { %p12764_p8 = pnand %p12762_p7, %p12759_p6 }
 0x2e1   : > { %12767 = shalt.err (!%p12764_p8)
}
 0x2e2   : > { %s12768_s4 = scalar_lea.vmem %s2043_s3, 128  ;;  %p12775_p12 = scmp.lt.s32.totalorder %s2043_s3, %s2043_s3 }
 0x2e3   : > { %p12769_p9 = scmp.ne.s32.totalorder %s2043_s3, %s12768_s4  ;;  %p12776_p13 = scmp.lt.s32.totalorder %s12768_s4, %s12768_s4 }
 0x2e5   : > { %p12770_p10 = pnand %p12769_p9, %p11228_p3  ;;  %p12777_p0 = por %p12776_p13, %p12775_p12 }
 0x2e7   : > { %p12771_p11 = pneg %p12770_p10 }
 0x2e9   : > { %p12778_p1 = pnand %p12777_p0, %p12771_p11 }
 0x2eb   : > { %12781 = shalt.err (!%p12778_p1)
}
 0x2ec   : > { %s15931_s8 = sld [smem:[#allocation159_spill]] }
 0x2ed   : > { %11115 = dma.hbm_to_vmem [thread:$0]  (%p11228_p3), %s15930_s2, 128, %s2043_s3, [#allocation77]  }
 0x2f2   : > { %s12782_s10 = scalar_lea.hbm %s15931_s8, 3072 }
 0x2f3   : > { %p12783_p4 = scmp.ne.s32.totalorder %s15931_s8, %s12782_s10  ;;  %p12788_p7 = scmp.lt.u32.totalorder %s12782_s10, %s15931_s8 }
 0x2f5   : > { %p12784_p5 = pnand %p12783_p4, %p11228_p3 }
 0x2f7   : > { %p12785_p6 = pneg %p12784_p5 }
 0x2f9   : > { %p12790_p8 = pnand %p12788_p7, %p12785_p6 }
 0x2fb   : > { %12793 = shalt.err (!%p12790_p8)
}
 0x2fc   : > { %s12794_s6 = scalar_lea.vmem %s2064_s5, 3072  ;;  %p12801_p12 = scmp.lt.s32.totalorder %s2064_s5, %s2064_s5 }
 0x2fd   : > { %p12795_p9 = scmp.ne.s32.totalorder %s2064_s5, %s12794_s6  ;;  %p12802_p13 = scmp.lt.s32.totalorder %s12794_s6, %s12794_s6 }
 0x2ff   : > { %p12796_p10 = pnand %p12795_p9, %p11228_p3  ;;  %p12803_p0 = por %p12802_p13, %p12801_p12 }
 0x301   : > { %p12797_p11 = pneg %p12796_p10 }
 0x303   : > { %p12804_p1 = pnand %p12803_p0, %p12797_p11 }
 0x305   : > { %12807 = shalt.err (!%p12804_p1)
}
 0x306   : > { %s13716_s3 = smov 192   ;;  %s15932_s23 = sld [smem:[#allocation110_spill]] }
 0x307   : > { %s13717_s4 = smov 12   ;;  %s13718_s10 = smov [#allocation2]  }
 0x308   : > { %11119 = dma.hbm_to_vmem [thread:$0]  (%p11228_p3), %s15931_s8, 3072, %s2064_s5, [#allocation80], %s13716_s3, %s13716_s3, %s13717_s4  }
 0x309   : > { %s1467_s2 = sshll.u32 %s13718_s10, 4  ;;  %s13719_s7 = smov [#allocation6]   ;;  %s1468_s2 = int_to_ptr.vmem [resolvable:$true] %s1467_s2 }
 0x30a   : > { %s1489_s11 = sshll.u32 %s13719_s7, 4  ;;  %s14385_s11 = int_to_ptr.vmem [resolvable:$true] %s1489_s11 }
 0x30c   : > { %s12808_s6 = scalar_lea.hbm %s15932_s23, 128 }
 0x30d   : > { %p12809_p4 = scmp.ne.s32.totalorder %s15932_s23, %s12808_s6  ;;  %p12814_p7 = scmp.lt.u32.totalorder %s12808_s6, %s15932_s23 }
 0x30f   : > { %p12810_p5 = pnand %p12809_p4, %p11228_p3 }
 0x311   : > { %p12811_p6 = pneg %p12810_p5 }
 0x313   : > { %p12816_p8 = pnand %p12814_p7, %p12811_p6 }
 0x315   : > { %12819 = shalt.err (!%p12816_p8)
}
 0x316   : > { %s12820_s12 = scalar_lea.vmem %s1468_s2, 128  ;;  %p12827_p12 = scmp.lt.s32.totalorder %s1468_s2, %s1468_s2 }
 0x317   : > { %p12821_p9 = scmp.ne.s32.totalorder %s1468_s2, %s12820_s12  ;;  %p12828_p13 = scmp.lt.s32.totalorder %s12820_s12, %s12820_s12 }
 0x319   : > { %p12822_p10 = pnand %p12821_p9, %p11228_p3  ;;  %p12829_p0 = por %p12828_p13, %p12827_p12 }
 0x31b   : > { %p12823_p11 = pneg %p12822_p10 }
 0x31d   : > { %p12830_p1 = pnand %p12829_p0, %p12823_p11 }
 0x31f   : > { %12833 = shalt.err (!%p12830_p1)
}
 0x320   : > { %s15933_s5 = sld [smem:[#allocation112_spill]] }
 0x321   : > { %11017 = dma.hbm_to_vmem [thread:$0]  (%p11228_p3), %s15932_s23, 128, %s1468_s2, [#allocation3]  }
 0x326   : > { %s12834_s7 = scalar_lea.hbm %s15933_s5, 48 }
 0x327   : > { %p12835_p4 = scmp.ne.s32.totalorder %s15933_s5, %s12834_s7  ;;  %p12840_p7 = scmp.lt.u32.totalorder %s12834_s7, %s15933_s5 }
 0x329   : > { %p12836_p5 = pnand %p12835_p4, %p11228_p3 }
 0x32b   : > { %p12837_p6 = pneg %p12836_p5 }
 0x32d   : > { %p12842_p8 = pnand %p12840_p7, %p12837_p6 }
 0x32f   : > { %12845 = shalt.err (!%p12842_p8)
}
 0x330   : > { %s12846_s12 = scalar_lea.vmem %s14385_s11, 48  ;;  %s12852_s3 = scalar_lea.vmem %s14385_s11, 64 }
 0x331   : > { %p12847_p9 = scmp.ne.s32.totalorder %s14385_s11, %s12846_s12  ;;  %p12853_p12 = scmp.lt.s32.totalorder %s14385_s11, %s14385_s11 }
 0x332   : > { %p12854_p13 = scmp.lt.s32.totalorder %s12852_s3, %s12846_s12 }
 0x333   : > { %p12848_p10 = pnand %p12847_p9, %p11228_p3 }
 0x334   : > { %p12855_p0 = por %p12854_p13, %p12853_p12 }
 0x335   : > { %p12849_p11 = pneg %p12848_p10 }
 0x337   : > { %p12856_p1 = pnand %p12855_p0, %p12849_p11 }
 0x339   : > { %12859 = shalt.err (!%p12856_p1)
}
 0x33a   : > { %s15934_s2 = sld [smem:[#allocation113_spill]]  ;;  %s13720_s4 = smov [#allocation9]  }
 0x33b   : > { %11021 = dma.hbm_to_vmem [thread:$0]  (%p11228_p3), %s15933_s5, 48, %s14385_s11, [#allocation5]  }
 0x33c   : > { %s1511_s10 = sshll.u32 %s13720_s4, 4  ;;  %s13721_s6 = smov [#allocation12]   ;;  %s1512_s10 = int_to_ptr.vmem [resolvable:$true] %s1511_s10 }
 0x33d   : > { %s1535_s7 = sshll.u32 %s13721_s6, 4  ;;  %s14413_s7 = int_to_ptr.vmem [resolvable:$true] %s1535_s7 }
 0x340   : > { %s12860_s12 = scalar_lea.hbm %s15934_s2, 128 }
 0x341   : > { %p12861_p4 = scmp.ne.s32.totalorder %s15934_s2, %s12860_s12  ;;  %p12866_p7 = scmp.lt.u32.totalorder %s12860_s12, %s15934_s2 }
 0x343   : > { %p12862_p5 = pnand %p12861_p4, %p11228_p3 }
 0x345   : > { %p12863_p6 = pneg %p12862_p5 }
 0x347   : > { %p12868_p8 = pnand %p12866_p7, %p12863_p6 }
 0x349   : > { %12871 = shalt.err (!%p12868_p8)
}
 0x34a   : > { %s12872_s3 = scalar_lea.vmem %s1512_s10, 128  ;;  %p12879_p12 = scmp.lt.s32.totalorder %s1512_s10, %s1512_s10 }
 0x34b   : > { %p12873_p9 = scmp.ne.s32.totalorder %s1512_s10, %s12872_s3  ;;  %p12880_p13 = scmp.lt.s32.totalorder %s12872_s3, %s12872_s3 }
 0x34d   : > { %p12874_p10 = pnand %p12873_p9, %p11228_p3  ;;  %p12881_p0 = por %p12880_p13, %p12879_p12 }
 0x34f   : > { %p12875_p11 = pneg %p12874_p10 }
 0x351   : > { %p12882_p1 = pnand %p12881_p0, %p12875_p11 }
 0x353   : > { %12885 = shalt.err (!%p12882_p1)
}
 0x354   : > { %s15935_s11 = sld [smem:[#allocation114_spill]] }
 0x355   : > { %11025 = dma.hbm_to_vmem [thread:$0]  (%p11228_p3), %s15934_s2, 128, %s1512_s10, [#allocation8]  }
 0x35a   : > { %s12886_s4 = scalar_lea.hbm %s15935_s11, 128 }
 0x35b   : > { %p12887_p4 = scmp.ne.s32.totalorder %s15935_s11, %s12886_s4  ;;  %p12892_p7 = scmp.lt.u32.totalorder %s12886_s4, %s15935_s11 }
 0x35d   : > { %p12888_p5 = pnand %p12887_p4, %p11228_p3 }
 0x35f   : > { %p12889_p6 = pneg %p12888_p5 }
 0x361   : > { %p12894_p8 = pnand %p12892_p7, %p12889_p6 }
 0x363   : > { %12897 = shalt.err (!%p12894_p8)
}
 0x364   : > { %s12898_s6 = scalar_lea.vmem %s14413_s7, 128  ;;  %p12905_p12 = scmp.lt.s32.totalorder %s14413_s7, %s14413_s7 }
 0x365   : > { %p12899_p9 = scmp.ne.s32.totalorder %s14413_s7, %s12898_s6  ;;  %p12906_p13 = scmp.lt.s32.totalorder %s12898_s6, %s12898_s6 }
 0x367   : > { %p12900_p10 = pnand %p12899_p9, %p11228_p3  ;;  %p12907_p0 = por %p12906_p13, %p12905_p12 }
 0x369   : > { %p12901_p11 = pneg %p12900_p10 }
 0x36b   : > { %p12908_p1 = pnand %p12907_p0, %p12901_p11 }
 0x36d   : > { %12911 = shalt.err (!%p12908_p1)
}
 0x36e   : > { %s15936_s10 = sld [smem:[#allocation116_spill]]  ;;  %s13722_s12 = smov [#allocation15]  }
 0x36f   : > { %11029 = dma.hbm_to_vmem [thread:$0]  (%p11228_p3), %s15935_s11, 128, %s14413_s7, [#allocation11]  }
 0x370   : > { %s1557_s3 = sshll.u32 %s13722_s12, 4  ;;  %s13723_s4 = smov [#allocation18]   ;;  %s1558_s3 = int_to_ptr.vmem [resolvable:$true] %s1557_s3 }
 0x371   : > { %s1579_s2 = sshll.u32 %s13723_s4, 4  ;;  %s14440_s2 = int_to_ptr.vmem [resolvable:$true] %s1579_s2 }
 0x374   : > { %s12912_s6 = scalar_lea.hbm %s15936_s10, 16 }
 0x375   : > { %p12913_p4 = scmp.ne.s32.totalorder %s15936_s10, %s12912_s6  ;;  %p12918_p7 = scmp.lt.u32.totalorder %s12912_s6, %s15936_s10 }
 0x377   : > { %p12914_p5 = pnand %p12913_p4, %p11228_p3 }
 0x379   : > { %p12915_p6 = pneg %p12914_p5 }
 0x37b   : > { %p12920_p8 = pnand %p12918_p7, %p12915_p6 }
 0x37d   : > { %12923 = shalt.err (!%p12920_p8)
}
 0x37e   : > { %s12924_s5 = scalar_lea.vmem %s1558_s3, 16  ;;  %s12930_s7 = scalar_lea.vmem %s1558_s3, 32 }
 0x37f   : > { %p12925_p9 = scmp.ne.s32.totalorder %s1558_s3, %s12924_s5  ;;  %p12931_p12 = scmp.lt.s32.totalorder %s1558_s3, %s1558_s3 }
 0x380   : > { %p12932_p13 = scmp.lt.s32.totalorder %s12930_s7, %s12924_s5 }
 0x381   : > { %p12926_p10 = pnand %p12925_p9, %p11228_p3 }
 0x382   : > { %p12933_p0 = por %p12932_p13, %p12931_p12 }
 0x383   : > { %p12927_p11 = pneg %p12926_p10 }
 0x385   : > { %p12934_p1 = pnand %p12933_p0, %p12927_p11 }
 0x387   : > { %12937 = shalt.err (!%p12934_p1)
}
 0x388   : > { %s15937_s12 = sld [smem:[#allocation117_spill]] }
 0x389   : > { %11033 = dma.hbm_to_vmem [thread:$0]  (%p11228_p3), %s15936_s10, 16, %s1558_s3, [#allocation14]  }
 0x38e   : > { %s12938_s4 = scalar_lea.hbm %s15937_s12, 128 }
 0x38f   : > { %p12939_p4 = scmp.ne.s32.totalorder %s15937_s12, %s12938_s4  ;;  %p12944_p7 = scmp.lt.u32.totalorder %s12938_s4, %s15937_s12 }
 0x391   : > { %p12940_p5 = pnand %p12939_p4, %p11228_p3 }
 0x393   : > { %p12941_p6 = pneg %p12940_p5 }
 0x395   : > { %p12946_p8 = pnand %p12944_p7, %p12941_p6 }
 0x397   : > { %12949 = shalt.err (!%p12946_p8)
}
 0x398   : > { %s12950_s5 = scalar_lea.vmem %s14440_s2, 128  ;;  %p12957_p12 = scmp.lt.s32.totalorder %s14440_s2, %s14440_s2 }
 0x399   : > { %p12951_p9 = scmp.ne.s32.totalorder %s14440_s2, %s12950_s5  ;;  %p12958_p13 = scmp.lt.s32.totalorder %s12950_s5, %s12950_s5 }
 0x39b   : > { %p12952_p10 = pnand %p12951_p9, %p11228_p3  ;;  %p12959_p0 = por %p12958_p13, %p12957_p12 }
 0x39d   : > { %p12953_p11 = pneg %p12952_p10 }
 0x39f   : > { %p12960_p1 = pnand %p12959_p0, %p12953_p11 }
 0x3a1   : > { %12963 = shalt.err (!%p12960_p1)
}
 0x3a2   : > { %s15938_s3 = sld [smem:[#allocation120_spill]]  ;;  %s13724_s6 = smov [#allocation21]  }
 0x3a3   : > { %11037 = dma.hbm_to_vmem [thread:$0]  (%p11228_p3), %s15937_s12, 128, %s14440_s2, [#allocation17]  }
 0x3a4   : > { %s1605_s7 = sshll.u32 %s13724_s6, 4  ;;  %s13725_s4 = smov [#allocation24]   ;;  %s1606_s7 = int_to_ptr.vmem [resolvable:$true] %s1605_s7 }
 0x3a5   : > { %s1629_s8 = sshll.u32 %s13725_s4, 4  ;;  %s14467_s8 = int_to_ptr.vmem [resolvable:$true] %s1629_s8 }
 0x3a8   : > { %s12964_s5 = scalar_lea.hbm %s15938_s3, 256 }
 0x3a9   : > { %p12965_p4 = scmp.ne.s32.totalorder %s15938_s3, %s12964_s5  ;;  %p12970_p7 = scmp.lt.u32.totalorder %s12964_s5, %s15938_s3 }
 0x3ab   : > { %p12966_p5 = pnand %p12965_p4, %p11228_p3 }
 0x3ad   : > { %p12967_p6 = pneg %p12966_p5 }
 0x3af   : > { %p12972_p8 = pnand %p12970_p7, %p12967_p6 }
 0x3b1   : > { %12975 = shalt.err (!%p12972_p8)
}
 0x3b2   : > { %s12976_s10 = scalar_lea.vmem %s1606_s7, 256  ;;  %p12983_p12 = scmp.lt.s32.totalorder %s1606_s7, %s1606_s7 }
 0x3b3   : > { %p12977_p9 = scmp.ne.s32.totalorder %s1606_s7, %s12976_s10  ;;  %p12984_p13 = scmp.lt.s32.totalorder %s12976_s10, %s12976_s10 }
 0x3b5   : > { %p12978_p10 = pnand %p12977_p9, %p11228_p3  ;;  %p12985_p0 = por %p12984_p13, %p12983_p12 }
 0x3b7   : > { %p12979_p11 = pneg %p12978_p10 }
 0x3b9   : > { %p12986_p1 = pnand %p12985_p0, %p12979_p11 }
 0x3bb   : > { %12989 = shalt.err (!%p12986_p1)
}
 0x3bc   : > { %s15939_s2 = sld [smem:[#allocation121_spill]] }
 0x3bd   : > { %11041 = dma.hbm_to_vmem [thread:$0]  (%p11228_p3), %s15938_s3, 256, %s1606_s7, [#allocation20], %s15922_s18, %s15922_s18, %s15921_s22  }
 0x3c2   : > { %s12990_s6 = scalar_lea.hbm %s15939_s2, 512 }
 0x3c3   : > { %p12991_p4 = scmp.ne.s32.totalorder %s15939_s2, %s12990_s6  ;;  %p12996_p7 = scmp.lt.u32.totalorder %s12990_s6, %s15939_s2 }
 0x3c5   : > { %p12992_p5 = pnand %p12991_p4, %p11228_p3 }
 0x3c7   : > { %p12993_p6 = pneg %p12992_p5 }
 0x3c9   : > { %p12998_p8 = pnand %p12996_p7, %p12993_p6 }
 0x3cb   : > { %13001 = shalt.err (!%p12998_p8)
}
 0x3cc   : > { %s13002_s10 = scalar_lea.vmem %s14467_s8, 512  ;;  %p13009_p12 = scmp.lt.s32.totalorder %s14467_s8, %s14467_s8 }
 0x3cd   : > { %p13003_p9 = scmp.ne.s32.totalorder %s14467_s8, %s13002_s10  ;;  %p13010_p13 = scmp.lt.s32.totalorder %s13002_s10, %s13002_s10 }
 0x3cf   : > { %p13004_p10 = pnand %p13003_p9, %p11228_p3  ;;  %p13011_p0 = por %p13010_p13, %p13009_p12 }
 0x3d1   : > { %p13005_p11 = pneg %p13004_p10 }
 0x3d3   : > { %p13012_p1 = pnand %p13011_p0, %p13005_p11 }
 0x3d5   : > { %13015 = shalt.err (!%p13012_p1)
}
 0x3d6   : > { %s13726_s7 = smov 256   ;;  %s15940_s4 = sld [smem:[#allocation123_spill]] }
 0x3d7   : > { %s13727_s5 = smov 16   ;;  %s13728_s6 = smov [#allocation27]  }
 0x3d8   : > { %11045 = dma.hbm_to_vmem [thread:$0]  (%p11228_p3), %s15939_s2, 512, %s14467_s8, [#allocation23], %s13726_s7, %s13726_s7, %s13727_s5  }
 0x3d9   : > { %s1655_s3 = sshll.u32 %s13728_s6, 4  ;;  %s13729_s11 = smov [#allocation30]   ;;  %s1656_s3 = int_to_ptr.vmem [resolvable:$true] %s1655_s3 }
 0x3da   : > { %s1680_s12 = sshll.u32 %s13729_s11, 4  ;;  %s14497_s12 = int_to_ptr.vmem [resolvable:$true] %s1680_s12 }
 0x3dc   : > { %s13016_s10 = scalar_lea.hbm %s15940_s4, 128 }
 0x3dd   : > { %p13017_p4 = scmp.ne.s32.totalorder %s15940_s4, %s13016_s10  ;;  %p13022_p7 = scmp.lt.u32.totalorder %s13016_s10, %s15940_s4 }
 0x3df   : > { %p13018_p5 = pnand %p13017_p4, %p11228_p3 }
 0x3e1   : > { %p13019_p6 = pneg %p13018_p5 }
 0x3e3   : > { %p13024_p8 = pnand %p13022_p7, %p13019_p6 }
 0x3e5   : > { %13027 = shalt.err (!%p13024_p8)
}
 0x3e6   : > { %s13028_s13 = scalar_lea.vmem %s1656_s3, 128  ;;  %p13035_p12 = scmp.lt.s32.totalorder %s1656_s3, %s1656_s3 }
 0x3e7   : > { %p13029_p9 = scmp.ne.s32.totalorder %s1656_s3, %s13028_s13  ;;  %p13036_p13 = scmp.lt.s32.totalorder %s13028_s13, %s13028_s13 }
 0x3e9   : > { %p13030_p10 = pnand %p13029_p9, %p11228_p3  ;;  %p13037_p0 = por %p13036_p13, %p13035_p12 }
 0x3eb   : > { %p13031_p11 = pneg %p13030_p10 }
 0x3ed   : > { %p13038_p1 = pnand %p13037_p0, %p13031_p11 }
 0x3ef   : > { %13041 = shalt.err (!%p13038_p1)
}
 0x3f0   : > { %s15941_s8 = smov 4   ;;  %s15942_s11 = smov 64  }
 0x3f1   : > { %s15943_s7 = sld [smem:[#allocation125_spill]] }
 0x3f2   : > { %11049 = dma.hbm_to_vmem [thread:$0]  (%p11228_p3), %s15940_s4, 128, %s1656_s3, [#allocation26], %s15942_s11, %s15942_s11, %s15941_s8  }
 0x3f7   : > { %s13042_s5 = scalar_lea.hbm %s15943_s7, 128 }
 0x3f8   : > { %p13043_p4 = scmp.ne.s32.totalorder %s15943_s7, %s13042_s5  ;;  %p13048_p7 = scmp.lt.u32.totalorder %s13042_s5, %s15943_s7 }
 0x3fa   : > { %p13044_p5 = pnand %p13043_p4, %p11228_p3 }
 0x3fc   : > { %p13045_p6 = pneg %p13044_p5 }
 0x3fe   : > { %p13050_p8 = pnand %p13048_p7, %p13045_p6 }
 0x400   : > { %13053 = shalt.err (!%p13050_p8)
}
 0x401   : > { %s13054_s13 = scalar_lea.vmem %s14497_s12, 128  ;;  %p13061_p12 = scmp.lt.s32.totalorder %s14497_s12, %s14497_s12 }
 0x402   : > { %p13055_p9 = scmp.ne.s32.totalorder %s14497_s12, %s13054_s13  ;;  %p13062_p13 = scmp.lt.s32.totalorder %s13054_s13, %s13054_s13 }
 0x404   : > { %p13056_p10 = pnand %p13055_p9, %p11228_p3  ;;  %p13063_p0 = por %p13062_p13, %p13061_p12 }
 0x406   : > { %p13057_p11 = pneg %p13056_p10 }
 0x408   : > { %p13064_p1 = pnand %p13063_p0, %p13057_p11 }
 0x40a   : > { %13067 = shalt.err (!%p13064_p1)
}
 0x40b   : > { %s15944_s3 = sld [smem:[#allocation127_spill]]  ;;  %s13730_s6 = smov [#allocation33]  }
 0x40c   : > { %11053 = dma.hbm_to_vmem [thread:$0]  (%p11228_p3), %s15943_s7, 128, %s14497_s12, [#allocation29]  }
 0x40d   : > { %s1702_s10 = sshll.u32 %s13730_s6, 4  ;;  %s13731_s5 = smov [#allocation36]   ;;  %s1703_s10 = int_to_ptr.vmem [resolvable:$true] %s1702_s10 }
 0x40e   : > { %s1723_s2 = sshll.u32 %s13731_s5, 4  ;;  %s14527_s2 = int_to_ptr.vmem [resolvable:$true] %s1723_s2 }
 0x411   : > { %s13068_s13 = scalar_lea.hbm %s15944_s3, 128 }
 0x412   : > { %p13069_p4 = scmp.ne.s32.totalorder %s15944_s3, %s13068_s13  ;;  %p13074_p7 = scmp.lt.u32.totalorder %s13068_s13, %s15944_s3 }
 0x414   : > { %p13070_p5 = pnand %p13069_p4, %p11228_p3 }
 0x416   : > { %p13071_p6 = pneg %p13070_p5 }
 0x418   : > { %p13076_p8 = pnand %p13074_p7, %p13071_p6 }
 0x41a   : > { %13079 = shalt.err (!%p13076_p8)
}
 0x41b   : > { %s13080_s4 = scalar_lea.vmem %s1703_s10, 128  ;;  %p13087_p12 = scmp.lt.s32.totalorder %s1703_s10, %s1703_s10 }
 0x41c   : > { %p13081_p9 = scmp.ne.s32.totalorder %s1703_s10, %s13080_s4  ;;  %p13088_p13 = scmp.lt.s32.totalorder %s13080_s4, %s13080_s4 }
 0x41e   : > { %p13082_p10 = pnand %p13081_p9, %p11228_p3  ;;  %p13089_p0 = por %p13088_p13, %p13087_p12 }
 0x420   : > { %p13083_p11 = pneg %p13082_p10 }
 0x422   : > { %p13090_p1 = pnand %p13089_p0, %p13083_p11 }
 0x424   : > { %13093 = shalt.err (!%p13090_p1)
}
 0x425   : > { %s15945_s12 = sld [smem:[#allocation128_spill]] }
 0x426   : > { %11057 = dma.hbm_to_vmem [thread:$0]  (%p11228_p3), %s15944_s3, 128, %s1703_s10, [#allocation32]  }
 0x42b   : > { %s13094_s6 = scalar_lea.hbm %s15945_s12, 512 }
 0x42c   : > { %p13095_p4 = scmp.ne.s32.totalorder %s15945_s12, %s13094_s6  ;;  %p13100_p7 = scmp.lt.u32.totalorder %s13094_s6, %s15945_s12 }
 0x42e   : > { %p13096_p5 = pnand %p13095_p4, %p11228_p3 }
 0x430   : > { %p13097_p6 = pneg %p13096_p5 }
 0x432   : > { %p13102_p8 = pnand %p13100_p7, %p13097_p6 }
 0x434   : > { %13105 = shalt.err (!%p13102_p8)
}
 0x435   : > { %s13106_s4 = scalar_lea.vmem %s14527_s2, 512  ;;  %p13113_p12 = scmp.lt.s32.totalorder %s14527_s2, %s14527_s2 }
 0x436   : > { %p13107_p9 = scmp.ne.s32.totalorder %s14527_s2, %s13106_s4  ;;  %p13114_p13 = scmp.lt.s32.totalorder %s13106_s4, %s13106_s4 }
 0x438   : > { %p13108_p10 = pnand %p13107_p9, %p11228_p3  ;;  %p13115_p0 = por %p13114_p13, %p13113_p12 }
 0x43a   : > { %p13109_p11 = pneg %p13108_p10 }
 0x43c   : > { %p13116_p1 = pnand %p13115_p0, %p13109_p11 }
 0x43e   : > { %13119 = shalt.err (!%p13116_p1)
}
 0x43f   : > { %s15946_s10 = sld [smem:[#allocation130_spill]]  ;;  %s13732_s5 = smov [#allocation39]  }
 0x440   : > { %11061 = dma.hbm_to_vmem [thread:$0]  (%p11228_p3), %s15945_s12, 512, %s14527_s2, [#allocation35], %s15922_s18, %s15922_s18, %s15921_s22  }
 0x441   : > { %s1747_s13 = sshll.u32 %s13732_s5, 4  ;;  %s13733_s6 = smov [#allocation42]   ;;  %s1748_s13 = int_to_ptr.vmem [resolvable:$true] %s1747_s13 }
 0x442   : > { %s1772_s3 = sshll.u32 %s13733_s6, 4  ;;  %s14557_s3 = int_to_ptr.vmem [resolvable:$true] %s1772_s3 }
 0x445   : > { %s13120_s4 = scalar_lea.hbm %s15946_s10, 256 }
 0x446   : > { %p13121_p4 = scmp.ne.s32.totalorder %s15946_s10, %s13120_s4  ;;  %p13126_p7 = scmp.lt.u32.totalorder %s13120_s4, %s15946_s10 }
 0x448   : > { %p13122_p5 = pnand %p13121_p4, %p11228_p3 }
 0x44a   : > { %p13123_p6 = pneg %p13122_p5 }
 0x44c   : > { %p13128_p8 = pnand %p13126_p7, %p13123_p6 }
 0x44e   : > { %13131 = shalt.err (!%p13128_p8)
}
 0x44f   : > { %s13132_s7 = scalar_lea.vmem %s1748_s13, 256  ;;  %p13139_p12 = scmp.lt.s32.totalorder %s1748_s13, %s1748_s13 }
 0x450   : > { %p13133_p9 = scmp.ne.s32.totalorder %s1748_s13, %s13132_s7  ;;  %p13140_p13 = scmp.lt.s32.totalorder %s13132_s7, %s13132_s7 }
 0x452   : > { %p13134_p10 = pnand %p13133_p9, %p11228_p3  ;;  %p13141_p0 = por %p13140_p13, %p13139_p12 }
 0x454   : > { %p13135_p11 = pneg %p13134_p10 }
 0x456   : > { %p13142_p1 = pnand %p13141_p0, %p13135_p11 }
 0x458   : > { %13145 = shalt.err (!%p13142_p1)
}
 0x459   : > { %s15947_s22 = sld [smem:[#allocation132_spill]] }
 0x45a   : > { %11065 = dma.hbm_to_vmem [thread:$0]  (%p11228_p3), %s15946_s10, 256, %s1748_s13, [#allocation38], %s15942_s11, %s15942_s11, %s15941_s8  }
 0x45f   : > { %s13146_s18 = scalar_lea.hbm %s15947_s22, 128 }
 0x460   : > { %p13147_p4 = scmp.ne.s32.totalorder %s15947_s22, %s13146_s18  ;;  %p13152_p7 = scmp.lt.u32.totalorder %s13146_s18, %s15947_s22 }
 0x462   : > { %p13148_p5 = pnand %p13147_p4, %p11228_p3 }
 0x464   : > { %p13149_p6 = pneg %p13148_p5 }
 0x466   : > { %p13154_p8 = pnand %p13152_p7, %p13149_p6 }
 0x468   : > { %13157 = shalt.err (!%p13154_p8)
}
 0x469   : > { %s13158_s2 = scalar_lea.vmem %s14557_s3, 128  ;;  %p13165_p12 = scmp.lt.s32.totalorder %s14557_s3, %s14557_s3 }
 0x46a   : > { %p13159_p9 = scmp.ne.s32.totalorder %s14557_s3, %s13158_s2  ;;  %p13166_p13 = scmp.lt.s32.totalorder %s13158_s2, %s13158_s2 }
 0x46c   : > { %p13160_p10 = pnand %p13159_p9, %p11228_p3  ;;  %p13167_p0 = por %p13166_p13, %p13165_p12 }
 0x46e   : > { %p13161_p11 = pneg %p13160_p10 }
 0x470   : > { %p13168_p1 = pnand %p13167_p0, %p13161_p11 }
 0x472   : > { %13171 = shalt.err (!%p13168_p1)
}
 0x473   : > { %s15948_s7 = sld [smem:[#allocation133_spill]]  ;;  %s13734_s5 = smov [#allocation45]  }
 0x474   : > { %11069 = dma.hbm_to_vmem [thread:$0]  (%p11228_p3), %s15947_s22, 128, %s14557_s3, [#allocation41]  }
 0x475   : > { %s1794_s13 = sshll.u32 %s13734_s5, 4  ;;  %s13735_s6 = smov [#allocation48]   ;;  %s1795_s13 = int_to_ptr.vmem [resolvable:$true] %s1794_s13 }
 0x476   : > { %s1816_s4 = sshll.u32 %s13735_s6, 4  ;;  %s14587_s4 = int_to_ptr.vmem [resolvable:$true] %s1816_s4 }
 0x479   : > { %s13172_s18 = scalar_lea.hbm %s15948_s7, 16 }
 0x47a   : > { %p13173_p4 = scmp.ne.s32.totalorder %s15948_s7, %s13172_s18  ;;  %p13178_p7 = scmp.lt.u32.totalorder %s13172_s18, %s15948_s7 }
 0x47c   : > { %p13174_p5 = pnand %p13173_p4, %p11228_p3 }
 0x47e   : > { %p13175_p6 = pneg %p13174_p5 }
 0x480   : > { %p13180_p8 = pnand %p13178_p7, %p13175_p6 }
 0x482   : > { %13183 = shalt.err (!%p13180_p8)
}
 0x483   : > { %s13184_s2 = scalar_lea.vmem %s1795_s13, 16  ;;  %s13190_s3 = scalar_lea.vmem %s1795_s13, 32 }
 0x484   : > { %p13185_p9 = scmp.ne.s32.totalorder %s1795_s13, %s13184_s2  ;;  %p13191_p12 = scmp.lt.s32.totalorder %s1795_s13, %s1795_s13 }
 0x485   : > { %p13192_p13 = scmp.lt.s32.totalorder %s13190_s3, %s13184_s2 }
 0x486   : > { %p13186_p10 = pnand %p13185_p9, %p11228_p3 }
 0x487   : > { %p13193_p0 = por %p13192_p13, %p13191_p12 }
 0x488   : > { %p13187_p11 = pneg %p13186_p10 }
 0x48a   : > { %p13194_p1 = pnand %p13193_p0, %p13187_p11 }
 0x48c   : > { %13197 = shalt.err (!%p13194_p1)
}
 0x48d   : > { %s15949_s5 = sld [smem:[#allocation135_spill]] }
 0x48e   : > { %11073 = dma.hbm_to_vmem [thread:$0]  (%p11228_p3), %s15948_s7, 16, %s1795_s13, [#allocation44]  }
 0x493   : > { %s13198_s6 = scalar_lea.hbm %s15949_s5, 128 }
 0x494   : > { %p13199_p4 = scmp.ne.s32.totalorder %s15949_s5, %s13198_s6  ;;  %p13204_p7 = scmp.lt.u32.totalorder %s13198_s6, %s15949_s5 }
 0x496   : > { %p13200_p5 = pnand %p13199_p4, %p11228_p3 }
 0x498   : > { %p13201_p6 = pneg %p13200_p5 }
 0x49a   : > { %p13206_p8 = pnand %p13204_p7, %p13201_p6 }
 0x49c   : > { %13209 = shalt.err (!%p13206_p8)
}
 0x49d   : > { %s13210_s18 = scalar_lea.vmem %s14587_s4, 128  ;;  %p13217_p12 = scmp.lt.s32.totalorder %s14587_s4, %s14587_s4 }
 0x49e   : > { %p13211_p9 = scmp.ne.s32.totalorder %s14587_s4, %s13210_s18  ;;  %p13218_p13 = scmp.lt.s32.totalorder %s13210_s18, %s13210_s18 }
 0x4a0   : > { %p13212_p10 = pnand %p13211_p9, %p11228_p3  ;;  %p13219_p0 = por %p13218_p13, %p13217_p12 }
 0x4a2   : > { %p13213_p11 = pneg %p13212_p10 }
 0x4a4   : > { %p13220_p1 = pnand %p13219_p0, %p13213_p11 }
 0x4a6   : > { %13223 = shalt.err (!%p13220_p1)
}
 0x4a7   : > { %s15950_s13 = sld [smem:[#allocation137_spill]]  ;;  %s13736_s2 = smov [#allocation51]  }
 0x4a8   : > { %11077 = dma.hbm_to_vmem [thread:$0]  (%p11228_p3), %s15949_s5, 128, %s14587_s4, [#allocation47]  }
 0x4a9   : > { %s1837_s3 = sshll.u32 %s13736_s2, 4  ;;  %s13737_s6 = smov [#allocation54]   ;;  %s1838_s3 = int_to_ptr.vmem [resolvable:$true] %s1837_s3 }
 0x4aa   : > { %s1864_s7 = sshll.u32 %s13737_s6, 4  ;;  %s14614_s7 = int_to_ptr.vmem [resolvable:$true] %s1864_s7 }
 0x4ad   : > { %s13224_s18 = scalar_lea.hbm %s15950_s13, 256 }
 0x4ae   : > { %p13225_p4 = scmp.ne.s32.totalorder %s15950_s13, %s13224_s18  ;;  %p13230_p7 = scmp.lt.u32.totalorder %s13224_s18, %s15950_s13 }
 0x4b0   : > { %p13226_p5 = pnand %p13225_p4, %p11228_p3 }
 0x4b2   : > { %p13227_p6 = pneg %p13226_p5 }
 0x4b4   : > { %p13232_p8 = pnand %p13230_p7, %p13227_p6 }
 0x4b6   : > { %13235 = shalt.err (!%p13232_p8)
}
 0x4b7   : > { %s13236_s10 = scalar_lea.vmem %s1838_s3, 256  ;;  %p13243_p12 = scmp.lt.s32.totalorder %s1838_s3, %s1838_s3 }
 0x4b8   : > { %p13237_p9 = scmp.ne.s32.totalorder %s1838_s3, %s13236_s10  ;;  %p13244_p13 = scmp.lt.s32.totalorder %s13236_s10, %s13236_s10 }
 0x4ba   : > { %p13238_p10 = pnand %p13237_p9, %p11228_p3  ;;  %p13245_p0 = por %p13244_p13, %p13243_p12 }
 0x4bc   : > { %p13239_p11 = pneg %p13238_p10 }
 0x4be   : > { %p13246_p1 = pnand %p13245_p0, %p13239_p11 }
 0x4c0   : > { %13249 = shalt.err (!%p13246_p1)
}
 0x4c1   : > { %s15951_s4 = sld [smem:[#allocation139_spill]] }
 0x4c2   : > { %11081 = dma.hbm_to_vmem [thread:$0]  (%p11228_p3), %s15950_s13, 256, %s1838_s3, [#allocation50], %s15942_s11, %s15942_s11, %s15941_s8  }
 0x4c7   : > { %s13250_s2 = scalar_lea.hbm %s15951_s4, 128 }
 0x4c8   : > { %p13251_p4 = scmp.ne.s32.totalorder %s15951_s4, %s13250_s2  ;;  %p13256_p7 = scmp.lt.u32.totalorder %s13250_s2, %s15951_s4 }
 0x4ca   : > { %p13252_p5 = pnand %p13251_p4, %p11228_p3 }
 0x4cc   : > { %p13253_p6 = pneg %p13252_p5 }
 0x4ce   : > { %p13258_p8 = pnand %p13256_p7, %p13253_p6 }
 0x4d0   : > { %13261 = shalt.err (!%p13258_p8)
}
 0x4d1   : > { %s13262_s10 = scalar_lea.vmem %s14614_s7, 128  ;;  %p13269_p12 = scmp.lt.s32.totalorder %s14614_s7, %s14614_s7 }
 0x4d2   : > { %p13263_p9 = scmp.ne.s32.totalorder %s14614_s7, %s13262_s10  ;;  %p13270_p13 = scmp.lt.s32.totalorder %s13262_s10, %s13262_s10 }
 0x4d4   : > { %p13264_p10 = pnand %p13263_p9, %p11228_p3  ;;  %p13271_p0 = por %p13270_p13, %p13269_p12 }
 0x4d6   : > { %p13265_p11 = pneg %p13264_p10 }
 0x4d8   : > { %p13272_p1 = pnand %p13271_p0, %p13265_p11 }
 0x4da   : > { %13275 = shalt.err (!%p13272_p1)
}
 0x4db   : > { %s15952_s8 = sld [smem:[#allocation141_spill]]  ;;  %s13738_s11 = smov [#allocation57]  }
 0x4dc   : > { %11085 = dma.hbm_to_vmem [thread:$0]  (%p11228_p3), %s15951_s4, 128, %s14614_s7, [#allocation53]  }
 0x4dd   : > { %s1888_s3 = sshll.u32 %s13738_s11, 4  ;;  %s13739_s6 = smov [#allocation60]   ;;  %s1889_s3 = int_to_ptr.vmem [resolvable:$true] %s1888_s3 }
 0x4de   : > { %s1910_s18 = sshll.u32 %s13739_s6, 4  ;;  %s14644_s18 = int_to_ptr.vmem [resolvable:$true] %s1910_s18 }
 0x4e1   : > { %s13276_s2 = scalar_lea.hbm %s15952_s8, 32 }
 0x4e2   : > { %p13277_p4 = scmp.ne.s32.totalorder %s15952_s8, %s13276_s2  ;;  %p13282_p7 = scmp.lt.u32.totalorder %s13276_s2, %s15952_s8 }
 0x4e4   : > { %p13278_p5 = pnand %p13277_p4, %p11228_p3 }
 0x4e6   : > { %p13279_p6 = pneg %p13278_p5 }
 0x4e8   : > { %p13284_p8 = pnand %p13282_p7, %p13279_p6 }
 0x4ea   : > { %13287 = shalt.err (!%p13284_p8)
}
 0x4eb   : > { %s13288_s10 = scalar_lea.vmem %s1889_s3, 32  ;;  %p13295_p12 = scmp.lt.s32.totalorder %s1889_s3, %s1889_s3 }
 0x4ec   : > { %p13289_p9 = scmp.ne.s32.totalorder %s1889_s3, %s13288_s10  ;;  %p13296_p13 = scmp.lt.s32.totalorder %s13288_s10, %s13288_s10 }
 0x4ee   : > { %p13290_p10 = pnand %p13289_p9, %p11228_p3  ;;  %p13297_p0 = por %p13296_p13, %p13295_p12 }
 0x4f0   : > { %p13291_p11 = pneg %p13290_p10 }
 0x4f2   : > { %p13298_p1 = pnand %p13297_p0, %p13291_p11 }
 0x4f4   : > { %13301 = shalt.err (!%p13298_p1)
}
 0x4f5   : > { %s15953_s7 = sld [smem:[#allocation143_spill]] }
 0x4f6   : > { %11089 = dma.hbm_to_vmem [thread:$0]  (%p11228_p3), %s15952_s8, 32, %s1889_s3, [#allocation56]  }
 0x4fb   : > { %s13302_s11 = scalar_lea.hbm %s15953_s7, 128 }
 0x4fc   : > { %p13303_p4 = scmp.ne.s32.totalorder %s15953_s7, %s13302_s11  ;;  %p13308_p7 = scmp.lt.u32.totalorder %s13302_s11, %s15953_s7 }
 0x4fe   : > { %p13304_p5 = pnand %p13303_p4, %p11228_p3 }
 0x500   : > { %p13305_p6 = pneg %p13304_p5 }
 0x502   : > { %p13310_p8 = pnand %p13308_p7, %p13305_p6 }
 0x504   : > { %13313 = shalt.err (!%p13310_p8)
}
 0x505   : > { %s13314_s6 = scalar_lea.vmem %s14644_s18, 128  ;;  %p13321_p12 = scmp.lt.s32.totalorder %s14644_s18, %s14644_s18 }
 0x506   : > { %p13315_p9 = scmp.ne.s32.totalorder %s14644_s18, %s13314_s6  ;;  %p13322_p13 = scmp.lt.s32.totalorder %s13314_s6, %s13314_s6 }
 0x508   : > { %p13316_p10 = pnand %p13315_p9, %p11228_p3  ;;  %p13323_p0 = por %p13322_p13, %p13321_p12 }
 0x50a   : > { %p13317_p11 = pneg %p13316_p10 }
 0x50c   : > { %p13324_p1 = pnand %p13323_p0, %p13317_p11 }
 0x50e   : > { %13327 = shalt.err (!%p13324_p1)
}
 0x50f   : > { %s15954_s3 = sld [smem:[#allocation145_spill]]  ;;  %s13740_s2 = smov [#allocation63]  }
 0x510   : > { %11093 = dma.hbm_to_vmem [thread:$0]  (%p11228_p3), %s15953_s7, 128, %s14644_s18, [#allocation59]  }
 0x511   : > { %s1932_s10 = sshll.u32 %s13740_s2, 4  ;;  %s13741_s11 = smov [#allocation66]   ;;  %s1933_s10 = int_to_ptr.vmem [resolvable:$true] %s1932_s10 }
 0x512   : > { %s1954_s4 = sshll.u32 %s13741_s11, 4  ;;  %s14671_s4 = int_to_ptr.vmem [resolvable:$true] %s1954_s4 }
 0x515   : > { %s13328_s6 = scalar_lea.hbm %s15954_s3, 128 }
 0x516   : > { %p13329_p4 = scmp.ne.s32.totalorder %s15954_s3, %s13328_s6  ;;  %p13334_p7 = scmp.lt.u32.totalorder %s13328_s6, %s15954_s3 }
 0x518   : > { %p13330_p5 = pnand %p13329_p4, %p11228_p3 }
 0x51a   : > { %p13331_p6 = pneg %p13330_p5 }
 0x51c   : > { %p13336_p8 = pnand %p13334_p7, %p13331_p6 }
 0x51e   : > { %13339 = shalt.err (!%p13336_p8)
}
 0x51f   : > { %s13340_s5 = scalar_lea.vmem %s1933_s10, 128  ;;  %p13347_p12 = scmp.lt.s32.totalorder %s1933_s10, %s1933_s10 }
 0x520   : > { %p13341_p9 = scmp.ne.s32.totalorder %s1933_s10, %s13340_s5  ;;  %p13348_p13 = scmp.lt.s32.totalorder %s13340_s5, %s13340_s5 }
 0x522   : > { %p13342_p10 = pnand %p13341_p9, %p11228_p3  ;;  %p13349_p0 = por %p13348_p13, %p13347_p12 }
 0x524   : > { %p13343_p11 = pneg %p13342_p10 }
 0x526   : > { %p13350_p1 = pnand %p13349_p0, %p13343_p11 }
 0x528   : > { %13353 = shalt.err (!%p13350_p1)
}
 0x529   : > { %s15955_s18 = sld [smem:[#allocation147_spill]] }
 0x52a   : > { %11097 = dma.hbm_to_vmem [thread:$0]  (%p11228_p3), %s15954_s3, 128, %s1933_s10, [#allocation62]  }
 0x52f   : > { %s13354_s2 = scalar_lea.hbm %s15955_s18, 16 }
 0x530   : > { %p13355_p4 = scmp.ne.s32.totalorder %s15955_s18, %s13354_s2  ;;  %p13360_p7 = scmp.lt.u32.totalorder %s13354_s2, %s15955_s18 }
 0x532   : > { %p13356_p5 = pnand %p13355_p4, %p11228_p3 }
 0x534   : > { %p13357_p6 = pneg %p13356_p5 }
 0x536   : > { %p13362_p8 = pnand %p13360_p7, %p13357_p6 }
 0x538   : > { %13365 = shalt.err (!%p13362_p8)
}
 0x539   : > { %s13366_s5 = scalar_lea.vmem %s14671_s4, 16  ;;  %s13372_s11 = scalar_lea.vmem %s14671_s4, 32 }
 0x53a   : > { %p13367_p9 = scmp.ne.s32.totalorder %s14671_s4, %s13366_s5  ;;  %p13373_p12 = scmp.lt.s32.totalorder %s14671_s4, %s14671_s4 }
 0x53b   : > { %p13374_p13 = scmp.lt.s32.totalorder %s13372_s11, %s13366_s5 }
 0x53c   : > { %p13368_p10 = pnand %p13367_p9, %p11228_p3 }
 0x53d   : > { %p13375_p0 = por %p13374_p13, %p13373_p12 }
 0x53e   : > { %p13369_p11 = pneg %p13368_p10 }
 0x540   : > { %p13376_p1 = pnand %p13375_p0, %p13369_p11 }
 0x542   : > { %13379 = shalt.err (!%p13376_p1)
}
 0x543   : > { %s15956_s10 = sld [smem:[#allocation150_spill]]  ;;  %s13742_s6 = smov [#allocation69]  }
 0x544   : > { %11101 = dma.hbm_to_vmem [thread:$0]  (%p11228_p3), %s15955_s18, 16, %s14671_s4, [#allocation65]  }
 0x545   : > { %s1981_s2 = sshll.u32 %s13742_s6, 4  ;;  %s13743_s3 = smov [#allocation72]   ;;  %s1982_s2 = int_to_ptr.vmem [resolvable:$true] %s1981_s2 }
 0x546   : > { %s2006_s7 = sshll.u32 %s13743_s3, 4  ;;  %s14699_s7 = int_to_ptr.vmem [resolvable:$true] %s2006_s7 }
 0x549   : > { %s13380_s5 = scalar_lea.hbm %s15956_s10, 128 }
 0x54a   : > { %p13381_p4 = scmp.ne.s32.totalorder %s15956_s10, %s13380_s5  ;;  %p13386_p7 = scmp.lt.u32.totalorder %s13380_s5, %s15956_s10 }
 0x54c   : > { %p13382_p5 = pnand %p13381_p4, %p11228_p3 }
 0x54e   : > { %p13383_p6 = pneg %p13382_p5 }
 0x550   : > { %p13388_p8 = pnand %p13386_p7, %p13383_p6 }
 0x552   : > { %13391 = shalt.err (!%p13388_p8)
}
 0x553   : > { %s13392_s11 = scalar_lea.vmem %s1982_s2, 128  ;;  %p13399_p12 = scmp.lt.s32.totalorder %s1982_s2, %s1982_s2 }
 0x554   : > { %p13393_p9 = scmp.ne.s32.totalorder %s1982_s2, %s13392_s11  ;;  %p13400_p13 = scmp.lt.s32.totalorder %s13392_s11, %s13392_s11 }
 0x556   : > { %p13394_p10 = pnand %p13393_p9, %p11228_p3  ;;  %p13401_p0 = por %p13400_p13, %p13399_p12 }
 0x558   : > { %p13395_p11 = pneg %p13394_p10 }
 0x55a   : > { %p13402_p1 = pnand %p13401_p0, %p13395_p11 }
 0x55c   : > { %13405 = shalt.err (!%p13402_p1)
}
 0x55d   : > { %s15957_s4 = sld [smem:[#allocation153_spill]] }
 0x55e   : > { %11105 = dma.hbm_to_vmem [thread:$0]  (%p11228_p3), %s15956_s10, 128, %s1982_s2, [#allocation68]  }
 0x563   : > { %s13406_s3 = scalar_lea.hbm %s15957_s4, 128 }
 0x564   : > { %p13407_p4 = scmp.ne.s32.totalorder %s15957_s4, %s13406_s3  ;;  %p13412_p7 = scmp.lt.u32.totalorder %s13406_s3, %s15957_s4 }
 0x566   : > { %p13408_p5 = pnand %p13407_p4, %p11228_p3 }
 0x568   : > { %p13409_p6 = pneg %p13408_p5 }
 0x56a   : > { %p13414_p8 = pnand %p13412_p7, %p13409_p6 }
 0x56c   : > { %13417 = shalt.err (!%p13414_p8)
}
 0x56d   : > { %s13418_s6 = scalar_lea.vmem %s14699_s7, 128  ;;  %p13425_p12 = scmp.lt.s32.totalorder %s14699_s7, %s14699_s7 }
 0x56e   : > { %p13419_p9 = scmp.ne.s32.totalorder %s14699_s7, %s13418_s6  ;;  %p13426_p13 = scmp.lt.s32.totalorder %s13418_s6, %s13418_s6 }
 0x570   : > { %p13420_p10 = pnand %p13419_p9, %p11228_p3  ;;  %p13427_p0 = por %p13426_p13, %p13425_p12 }
 0x572   : > { %p13421_p11 = pneg %p13420_p10 }
 0x574   : > { %p13428_p1 = pnand %p13427_p0, %p13421_p11 }
 0x576   : > { %13431 = shalt.err (!%p13428_p1)
}
 0x577   : > { %s15958_s2 = sld [smem:[#allocation156_spill]]  ;;  %s13744_s5 = smov [#allocation75]  }
 0x578   : > { %11109 = dma.hbm_to_vmem [thread:$0]  (%p11228_p3), %s15957_s4, 128, %s14699_s7, [#allocation71]  }
 0x579   : > { %s2031_s11 = sshll.u32 %s13744_s5, 4  ;;  %s13745_s3 = smov [#allocation78]   ;;  %s2032_s11 = int_to_ptr.vmem [resolvable:$true] %s2031_s11 }
 0x57a   : > { %s2053_s8 = sshll.u32 %s13745_s3, 4  ;;  %s14726_s8 = int_to_ptr.vmem [resolvable:$true] %s2053_s8 }
 0x57d   : > { %s13432_s6 = scalar_lea.hbm %s15958_s2, 128 }
 0x57e   : > { %p13433_p4 = scmp.ne.s32.totalorder %s15958_s2, %s13432_s6  ;;  %p13438_p7 = scmp.lt.u32.totalorder %s13432_s6, %s15958_s2 }
 0x580   : > { %p13434_p5 = pnand %p13433_p4, %p11228_p3 }
 0x582   : > { %p13435_p6 = pneg %p13434_p5 }
 0x584   : > { %p13440_p8 = pnand %p13438_p7, %p13435_p6 }
 0x586   : > { %13443 = shalt.err (!%p13440_p8)
}
 0x587   : > { %s13444_s10 = scalar_lea.vmem %s2032_s11, 128  ;;  %p13451_p12 = scmp.lt.s32.totalorder %s2032_s11, %s2032_s11 }
 0x588   : > { %p13445_p9 = scmp.ne.s32.totalorder %s2032_s11, %s13444_s10  ;;  %p13452_p13 = scmp.lt.s32.totalorder %s13444_s10, %s13444_s10 }
 0x58a   : > { %p13446_p10 = pnand %p13445_p9, %p11228_p3  ;;  %p13453_p0 = por %p13452_p13, %p13451_p12 }
 0x58c   : > { %p13447_p11 = pneg %p13446_p10 }
 0x58e   : > { %p13454_p1 = pnand %p13453_p0, %p13447_p11 }
 0x590   : > { %13457 = shalt.err (!%p13454_p1)
}
 0x591   : > { %s15959_s7 = sld [smem:[#allocation158_spill]] }
 0x592   : > { %11113 = dma.hbm_to_vmem [thread:$0]  (%p11228_p3), %s15958_s2, 128, %s2032_s11, [#allocation74]  }
 0x597   : > { %s13458_s5 = scalar_lea.hbm %s15959_s7, 48 }
 0x598   : > { %p13459_p4 = scmp.ne.s32.totalorder %s15959_s7, %s13458_s5  ;;  %p13464_p7 = scmp.lt.u32.totalorder %s13458_s5, %s15959_s7 }
 0x59a   : > { %p13460_p5 = pnand %p13459_p4, %p11228_p3 }
 0x59c   : > { %p13461_p6 = pneg %p13460_p5 }
 0x59e   : > { %p13466_p8 = pnand %p13464_p7, %p13461_p6 }
 0x5a0   : > { %13469 = shalt.err (!%p13466_p8)
}
 0x5a1   : > { %s13470_s10 = scalar_lea.vmem %s14726_s8, 48  ;;  %s13476_s3 = scalar_lea.vmem %s14726_s8, 64 }
 0x5a2   : > { %p13471_p9 = scmp.ne.s32.totalorder %s14726_s8, %s13470_s10  ;;  %p13477_p12 = scmp.lt.s32.totalorder %s14726_s8, %s14726_s8 }
 0x5a3   : > { %p13478_p13 = scmp.lt.s32.totalorder %s13476_s3, %s13470_s10 }
 0x5a4   : > { %p13472_p10 = pnand %p13471_p9, %p11228_p3 }
 0x5a5   : > { %p13479_p0 = por %p13478_p13, %p13477_p12 }
 0x5a6   : > { %p13473_p11 = pneg %p13472_p10 }
 0x5a8   : > { %p13480_p1 = pnand %p13479_p0, %p13473_p11 }
 0x5aa   : > { %13483 = shalt.err (!%p13480_p1)
}
 0x5ab   : > { %11117 = dma.hbm_to_vmem [thread:$0]  (%p11228_p3), %s15959_s7, 48, %s14726_s8, [#allocation77]  }
 0x5ac   : > { %s13746_s11 = smov [#allocation81]   ;;  %s13484_s5 = scalar_lea.hbm %s14071_s30, 128 }
 0x5ad   : > { %s2080_s6 = sshll.u32 %s13746_s11, 4  ;;  %p13485_p4 = scmp.ne.s32.totalorder %s14071_s30, %s13484_s5  ;;  %s2081_s6 = int_to_ptr.vmem [resolvable:$true] %s2080_s6 }
 0x5ae   : > { %p13490_p7 = scmp.lt.u32.totalorder %s13484_s5, %s14071_s30 }
 0x5af   : > { %p13486_p5 = pnand %p13485_p4, %p11228_p3 }
 0x5b1   : > { %p13487_p6 = pneg %p13486_p5 }
 0x5b3   : > { %p13492_p8 = pnand %p13490_p7, %p13487_p6 }
 0x5b5   : > { %13495 = shalt.err (!%p13492_p8)
}
 0x5b6   : > { %s13496_s10 = scalar_lea.vmem %s2081_s6, 128  ;;  %p13503_p12 = scmp.lt.s32.totalorder %s2081_s6, %s2081_s6 }
 0x5b7   : > { %p13497_p9 = scmp.ne.s32.totalorder %s2081_s6, %s13496_s10  ;;  %p13504_p13 = scmp.lt.s32.totalorder %s13496_s10, %s13496_s10 }
 0x5b9   : > { %p13498_p10 = pnand %p13497_p9, %p11228_p3  ;;  %p13505_p0 = por %p13504_p13, %p13503_p12 }
 0x5bb   : > { %p13499_p11 = pneg %p13498_p10 }
 0x5bd   : > { %p13506_p1 = pnand %p13505_p0, %p13499_p11 }
 0x5bf   : > { %13509 = shalt.err (!%p13506_p1)
}
 0x5c0   : > { %11121 = dma.hbm_to_vmem [thread:$0]  (%p11228_p3), %s14071_s30, 128, %s2081_s6, [#allocation80]  }
 0x5c1 PF: > { %2104 = sbr.rel (%p14093_p2) target bundleno = 10001 (0x2711), region = 260  ;;  %p11281_p4 = scmp.eq.s32.totalorder (!%p14093_p2), %s14089_s28, 0 }
 0x5c8   : > { %13515 = dma.done.wait (%p11281_p4), [#allocation3], 128  }
 0x5c9   : > { %13517 = vsyncadd (%p11281_p4), [#allocation3], 4294967168 }
 0x5ca   : > { %13519 = dma.done.wait (%p11281_p4), [#allocation5], 176  }
 0x5cb   : > { %13521 = vsyncadd (%p11281_p4), [#allocation5], 4294967120 }
 0x5cc   : > { %13523 = dma.done.wait (%p11281_p4), [#allocation8], 256  }
 0x5cd   : > { %13525 = vsyncadd (%p11281_p4), [#allocation8], 4294967040 }
 0x5ce   : > { %13527 = dma.done.wait (%p11281_p4), [#allocation11], 2304  }
 0x5cf   : > { %13529 = vsyncadd (%p11281_p4), [#allocation11], 4294964992 }
 0x5d0   : > { %13531 = dma.done.wait (%p11281_p4), [#allocation14], 144  }
 0x5d1   : > { %13533 = vsyncadd (%p11281_p4), [#allocation14], 4294967152 }
 0x5d2   : > { %13535 = dma.done.wait (%p11281_p4), [#allocation17], 256  }
 0x5d3   : > { %13537 = vsyncadd (%p11281_p4), [#allocation17], 4294967040 }
 0x5d4   : > { %13539 = dma.done.wait (%p11281_p4), [#allocation20], 512  }
 0x5d5   : > { %13541 = vsyncadd (%p11281_p4), [#allocation20], 4294966784 }
 0x5d6   : > { %13543 = dma.done.wait (%p11281_p4), [#allocation23], 528  }
 0x5d7   : > { %13545 = vsyncadd (%p11281_p4), [#allocation23], 4294966768 }
 0x5d8   : > { %13547 = dma.done.wait (%p11281_p4), [#allocation26], 384  }
 0x5d9   : > { %13549 = vsyncadd (%p11281_p4), [#allocation26], 4294966912 }
 0x5da   : > { %13551 = dma.done.wait (%p11281_p4), [#allocation29], 384  }
 0x5db   : > { %13553 = vsyncadd (%p11281_p4), [#allocation29], 4294966912 }
 0x5dc   : > { %13555 = dma.done.wait (%p11281_p4), [#allocation32], 144  }
 0x5dd   : > { %13557 = vsyncadd (%p11281_p4), [#allocation32], 4294967152 }
 0x5de   : > { %13559 = dma.done.wait (%p11281_p4), [#allocation35], 640  }
 0x5df   : > { %13561 = vsyncadd (%p11281_p4), [#allocation35], 4294966656 }
 0x5e0   : > { %13563 = dma.done.wait (%p11281_p4), [#allocation38], 384  }
 0x5e1   : > { %13565 = vsyncadd (%p11281_p4), [#allocation38], 4294966912 }
 0x5e2   : > { %13567 = dma.done.wait (%p11281_p4), [#allocation41], 144  }
 0x5e3   : > { %13569 = vsyncadd (%p11281_p4), [#allocation41], 4294967152 }
 0x5e4   : > { %13571 = dma.done.wait (%p11281_p4), [#allocation44], 144  }
 0x5e5   : > { %13573 = vsyncadd (%p11281_p4), [#allocation44], 4294967152 }
 0x5e6   : > { %13575 = dma.done.wait (%p11281_p4), [#allocation47], 256  }
 0x5e7   : > { %13577 = vsyncadd (%p11281_p4), [#allocation47], 4294967040 }
 0x5e8   : > { %13579 = dma.done.wait (%p11281_p4), [#allocation50], 272  }
 0x5e9   : > { %13581 = vsyncadd (%p11281_p4), [#allocation50], 4294967024 }
 0x5ea   : > { %13583 = dma.done.wait (%p11281_p4), [#allocation53], 640  }
 0x5eb   : > { %13585 = vsyncadd (%p11281_p4), [#allocation53], 4294966656 }
 0x5ec   : > { %13587 = dma.done.wait (%p11281_p4), [#allocation56], 2592  }
 0x5ed   : > { %13589 = vsyncadd (%p11281_p4), [#allocation56], 4294964704 }
 0x5ee   : > { %13591 = dma.done.wait (%p11281_p4), [#allocation59], 256  }
 0x5ef   : > { %13593 = vsyncadd (%p11281_p4), [#allocation59], 4294967040 }
 0x5f0   : > { %13595 = dma.done.wait (%p11281_p4), [#allocation62], 144  }
 0x5f1   : > { %13597 = vsyncadd (%p11281_p4), [#allocation62], 4294967152 }
 0x5f2   : > { %13599 = dma.done.wait (%p11281_p4), [#allocation65], 144  }
 0x5f3   : > { %13601 = vsyncadd (%p11281_p4), [#allocation65], 4294967152 }
 0x5f4   : > { %13603 = dma.done.wait (%p11281_p4), [#allocation68], 640  }
 0x5f5   : > { %13605 = vsyncadd (%p11281_p4), [#allocation68], 4294966656 }
 0x5f6   : > { %13607 = dma.done.wait (%p11281_p4), [#allocation71], 192  }
 0x5f7   : > { %13609 = vsyncadd (%p11281_p4), [#allocation71], 4294967104 }
 0x5f8   : > { %13611 = dma.done.wait (%p11281_p4), [#allocation74], 256  }
 0x5f9   : > { %13613 = vsyncadd (%p11281_p4), [#allocation74], 4294967040 }
 0x5fa   : > { %13615 = dma.done.wait (%p11281_p4), [#allocation77], 176  }
 0x5fb   : > { %13617 = vsyncadd (%p11281_p4), [#allocation77], 4294967120 }
 0x5fc   : > { %13619 = dma.done.wait (%p11281_p4), [#allocation80], 3200  }
 0x5fd   : > { %13621 = vsyncadd (%p11281_p4), [#allocation80], 4294964096  ;;  %s15960_s1 = sld [smem:[#allocation109_spill]]  ;;  %p2450_p2 = scmp.lt.s32.totalorder %s14089_s28, 1  ;;  %v13747_v0 = vmov 0.0|0.0   ;;  %vm13753_vm0 = vmmov 0  }
 0x5fe   : > { %10069 = vmatprep.subr.bf16.mxu1 %v13747_v0  ;;  %s15828_s11 = smov 126   ;;  %s15842_s6 = smov 127   ;;  %v13754_v5 = vmov 0.0   ;;  %v13757_v6 = vmov 0   ;;  %v2563_v7 = vld [vmem:[#allocation4] sm:$0xff]  ;;  %vm2472_vm1 = vcmask 1039360  }
 0x5ff   : > { %s16003_s28 = smov (!%p2450_p2, %s14089_s28), 1  ;;  %s15824_s5 = smov 110   ;;  %9671 = vmatprep.mubr.msk.f32.mxu1 %vm13753_vm0, %v13754_v5  ;;  %2637 = vmatprep.mubr.f32.mxu0 %v13754_v5  ;;  %vm2496_vm2 = vcmask 900096   ;;  %vm2484_vm3 = vcmask 1031168   ;;  %vm2520_vm4 = vcmask 883712   ;;  %vm2508_vm5 = vcmask 891904  }
 0x600   : > { %s11015_s8 = smul.u32 24, %s16003_s28  ;;  %s15815_s10 = smov 108   ;;  %11524 = vset.pattern.permute.xlu1 %v13757_v6  ;;  %11570 = vset.pattern.permute.xlu0 %v13757_v6  ;;  %vm15857_vm6 = vcmask 744448   ;;  %vm2532_vm7 = vcmask 752640   ;;  %vm15856_vm8 = vcmask 736256   ;;  %v2562_v62 = vld [vmem:[#allocation2] sm:$0xff]  ;;  %v2726_v6 = vlaneseq }
 0x601   : > { %vm2569_vm9 = vcmask 588800   ;;  %s15962_s2 = smov 90   ;;  %s15964_s4 = smov 106  }
 0x602   : > { %s15845_s7 = smov 115   ;;  %s15968_s12 = smov 115  }
 0x603   : > { %s2454_s3 = scalar_lea.vmem %s15960_s1, %s11015_s8  ;;  %s15826_s1 = smov 109  }
 0x604   : > { %v2461_v1 = vld [vmem:[%s2454_s3 + $0x8] sm:$0xff]  ;;  %v2462_v2 = vld [vmem:[%s2454_s3 + $0x10] sm:$0xff]  ;;  %v2460_v4 = vld [vmem:[%s2454_s3] sm:$0xff]  ;;  %s15822_s8 = smov 91   ;;  %s15820_s3 = smov 92  }
 0x605   : > { %v11494_v3 = vpack.i.bf16 %v2462_v2, %v2461_v1  ;;  %s15969_s13 = smov 118   ;;  %s13772_s14 = smov 119  }
 0x607   : > { %11495 = vrot.lane.b32.xlu1 %v11494_v3, %s15828_s11  ;;  %11490 = vrot.lane.b32.xlu0 %v11494_v3, %s15842_s6 }
 0x60b   : > { %11500 = vrot.lane.b32.xlu1 %v11494_v3, %s15824_s5  ;;  %2466 = vrot.lane.b32.xlu0 %v2460_v4, %s15842_s6 }
 0x60f   : > { %2490 = vrot.lane.b32.xlu1 %v2460_v4, %s15824_s5  ;;  %2478 = vrot.lane.b32.xlu0 %v2460_v4, %s15828_s11 }
 0x613   : > { %11510 = vrot.lane.b32.xlu1 %v11494_v3, %s15815_s10  ;;  %11505 = vrot.lane.b32.xlu0 %v11494_v3, %s15826_s1 }
 0x617   : > { %2514 = vrot.lane.b32.xlu1 %v2460_v4, %s15815_s10  ;;  %2502 = vrot.lane.b32.xlu0 %v2460_v4, %s15826_s1  ;;  %s15817_s10 = smov 90  }
 0x61b   : > { %11520 = vrot.lane.b32.xlu1 %v11494_v3, %s15822_s8  ;;  %11515 = vrot.lane.b32.xlu0 %v11494_v3, %s15820_s3 }
 0x61f   : > { %2538 = vrot.lane.b32.xlu1 %v2460_v4, %s15822_s8  ;;  %2526 = vrot.lane.b32.xlu0 %v2460_v4, %s15820_s3 }
 0x623   : > { %2554 = vrot.lane.b32.xlu1 %v2462_v2, %s15817_s10  ;;  %2552 = vrot.lane.b32.xlu0 %v2461_v1, %s15817_s10 }
 0x627   : > { %2550 = vrot.lane.b32.xlu0 %v2460_v4, %s15817_s10  ;;  %2566 = vperm.xlu1 %11524, %v2563_v7   ;;  %v14928_v7 = vshrl.u32 %v2726_v6, 7  ;;  %s15961_s10 = smov 108  }
 0x679   : > { %v11496_v8 = vpop.permute.xlu1 %11495  ;;  %v11491_v9 = vpop.permute.xlu0 %11490 }
 0x67a   : > { %v11492_v10 = vunpack.i.l.bf16 %v11491_v9  ;;  %v11493_v11 = vunpack.i.h.bf16 %v11491_v9  ;;  %v11498_v12 = vunpack.i.h.bf16 %v11496_v8  ;;  %v11497_v13 = vunpack.i.l.bf16 %v11496_v8  ;;  %v2723_v8 = vld [vmem:[#allocation6] sm:$0x7] }
 0x67b   : > { %v14931_v9 = vsub.s32 0, %v14928_v7 }
 0x67c   : > { %v10070_v14 = vpack.c.bf16 %v11493_v11, %v2462_v2  ;;  %v2474_v15 = vsel %vm2472_vm1, %v11492_v10, %v11493_v11  ;;  %v2486_v24 = vsel %vm2484_vm3, %v11497_v13, %v11498_v12  ;;  %v2724_v11 = vunpack.c.l.bf16 %v2723_v8 }
 0x67d   : > { %v11501_v16 = vpop.permute.xlu1 %11500  ;;  %v2467_v17 = vpop.permute.xlu0 %2466  ;;  %v10053_v18 = vpack.c.bf16 %v2474_v15, %v2461_v1 }
 0x67e   : > { %v11503_v19 = vunpack.i.h.bf16 %v11501_v16  ;;  %v11502_v20 = vunpack.i.l.bf16 %v11501_v16  ;;  %v2473_v21 = vsel %vm2472_vm1, %v2467_v17, %v11492_v10  ;;  %10071 = vmatpush3.bf16.msra.mxu1 %v10070_v14 }
 0x67f   : > { %10054 = vmatprep.subr.bf16.mxu0 %v10053_v18  ;;  %10072 = vmatprep.subr.bf16.mxu1 %v13747_v0  ;;  %v10055_v22 = vpack.c.bf16 %v2473_v21, %v2460_v4 }
 0x680   : > { %v10073_v23 = vpack.c.bf16 %v11503_v19, %v11498_v12  ;;  %v2498_v25 = vsel %vm2496_vm2, %v11502_v20, %v11503_v19  ;;  %v14936_v19 = vsub.s32 2, %v14928_v7 }
 0x681   : > { %v2491_v26 = vpop.permute.xlu1 %2490  ;;  %10056 = vmatpush1.bf16.msra.mxu0 %v10055_v22  ;;  %v2479_v27 = vpop.permute.xlu0 %2478  ;;  %v10057_v28 = vpack.c.bf16 %v2498_v25, %v2486_v24  ;;  %v14939_v22 = vsub.s32 4, %v14928_v7 }
 0x682   : > { %v2497_v29 = vsel %vm2496_vm2, %v2491_v26, %v11502_v20  ;;  %v2485_v30 = vsel %vm2484_vm3, %v2479_v27, %v11497_v13  ;;  %10074 = vmatpush3.bf16.msra.mxu1 %v10073_v23  ;;  %v2729_v13 = vrot.slane %v2724_v11, %v14931_v9  ;;  %v2733_v26 = vrot.slane %v2724_v11, %v14936_v19 }
 0x683   : > { %v10059_v31 = vpack.c.bf16 %v2497_v29, %v2485_v30  ;;  %10058 = vmatprep.subr.bf16.mxu0 %v10057_v28  ;;  %10075 = vmatprep.subr.bf16.mxu1 %v13747_v0  ;;  %v2737_v28 = vrot.slane %v2724_v11, %v14939_v22 }
 0x684   : > { %v2744_v18 = vrot.slane %v2729_v13, %v14931_v9  ;;  %v2748_v30 = vrot.slane %v2733_v26, %v14931_v9 }
 0x685   : > { %v11511_v32 = vpop.permute.xlu1 %11510  ;;  %10060 = vmatpush1.bf16.msra.mxu0 %v10059_v31  ;;  %v11506_v33 = vpop.permute.xlu0 %11505 }
 0x686   : > { %v11513_v34 = vunpack.i.h.bf16 %v11511_v32  ;;  %v11512_v35 = vunpack.i.l.bf16 %v11511_v32  ;;  %v11508_v36 = vunpack.i.h.bf16 %v11506_v33  ;;  %v11507_v37 = vunpack.i.l.bf16 %v11506_v33 }
 0x687   : > { %v2752_v32 = vrot.slane %v2737_v28, %v14931_v9 }
 0x688   : > { %v10076_v38 = vpack.c.bf16 %v11513_v34, %v11508_v36  ;;  %v2510_v39 = vsel %vm2508_vm5, %v11507_v37, %v11508_v36  ;;  %v2522_v40 = vsel %vm2520_vm4, %v11512_v35, %v11513_v34 }
 0x689   : > { %v2515_v41 = vpop.permute.xlu1 %2514  ;;  %v2503_v42 = vpop.permute.xlu0 %2502  ;;  %v10061_v43 = vpack.c.bf16 %v2522_v40, %v2510_v39 }
 0x68a   : > { %v2521_v44 = vsel %vm2520_vm4, %v2515_v41, %v11512_v35  ;;  %v2509_v45 = vsel %vm2508_vm5, %v2503_v42, %v11507_v37  ;;  %10077 = vmatpush3.bf16.msra.mxu1 %v10076_v38  ;;  %v2848_v37 = vld [vmem:[#allocation9] sm:$0xff] }
 0x68b   : > { %v10063_v46 = vpack.c.bf16 %v2521_v44, %v2509_v45  ;;  %10062 = vmatprep.subr.bf16.mxu0 %v10061_v43  ;;  %10078 = vmatprep.subr.bf16.mxu1 %v13747_v0 }
 0x68d   : > { %v11521_v47 = vpop.permute.xlu1 %11520  ;;  %v11516_v48 = vpop.permute.xlu0 %11515  ;;  %10064 = vmatpush1.bf16.msra.mxu0 %v10063_v46 }
 0x68e   : > { %v11523_v49 = vunpack.i.h.bf16 %v11521_v47  ;;  %v11522_v50 = vunpack.i.l.bf16 %v11521_v47  ;;  %v11518_v51 = vunpack.i.h.bf16 %v11516_v48  ;;  %v11517_v52 = vunpack.i.l.bf16 %v11516_v48 }
 0x690   : > { %v10079_v53 = vpack.c.bf16 %v11523_v49, %v11518_v51  ;;  %v2534_v54 = vsel %vm2532_vm7, %v11517_v52, %v11518_v51  ;;  %v2546_v55 = vsel %vm15857_vm6, %v11522_v50, %v11523_v49 }
 0x691   : > { %v2539_v56 = vpop.permute.xlu1 %2538  ;;  %v2527_v57 = vpop.permute.xlu0 %2526  ;;  %v10065_v58 = vpack.c.bf16 %v2546_v55, %v2534_v54 }
 0x692   : > { %v2545_v59 = vsel %vm15857_vm6, %v2539_v56, %v11522_v50  ;;  %v2533_v60 = vsel %vm2532_vm7, %v2527_v57, %v11517_v52  ;;  %10080 = vmatpush3.bf16.msra.mxu1 %v10079_v53 }
 0x693   : > { %v10067_v61 = vpack.c.bf16 %v2545_v59, %v2533_v60  ;;  %10066 = vmatprep.subr.bf16.mxu0 %v10065_v58  ;;  %9669 = vmatprep.subr.mxu1 %v13754_v5 }
 0x695   : > { %v2555_v63 = vpop.permute.xlu1 %2554  ;;  %v2553_v1 = vpop.permute.xlu0 %2552  ;;  %10068 = vmatpush1.bf16.msra.mxu0 %v10067_v61 }
 0x696   : > { %v2558_v2 = vsel %vm15856_vm8, %v2553_v1, %v2555_v63  ;;  %9670 = vmatpush3.msra.mxu1 %v2555_v63 }
 0x697   : > { %2589 = vmatprep.subr.mxu0 %v2558_v2  ;;  %9672 = vmatmul.mubr.msk.f32.vlgmr.msra.gmra.mrb[0].mxu1 %vm2569_vm9, %v2562_v62 }
 0x698   : > { %10097 = vmatprep.subr.bf16.mxu1 %v13747_v0  ;;  %9692 = vmatprep.mubr.msk.f32.mxu1 %vm13753_vm0, %v13754_v5 }
 0x699   : > { %v2551_v3 = vpop.permute.xlu0 %2550 }
 0x69a   : > { %v2557_v4 = vsel %vm15856_vm8, %v2551_v3, %v2553_v1 }
 0x69b   : > { %2590 = vmatpush1.msra.mxu0 %v2557_v4 }
 0x69c   : > { %9124 = vmatmul.mubr.msk.f32.vlgmr.msra.gmra.mrb[0].mxu0 %vm2569_vm9, %v2562_v62 }
 0x69d   : > { %2921 = vmatprep.mubr.f32.mxu0 %v13754_v5 }
 0x6a6   : > { %v2567_v14 = vpop.permute.xlu1 %2566 }
 0x76a   : > { %v2710_v10 = vpop.f32.mrb[0].mxu1 }
 0x76b   : > { %v9673_v12 = vpop.f32.mrb[1].mxu1  ;;  %v2711_v23 = vadd.f32 %v2710_v10, %v2567_v14 }
 0x76d   : > { %v2719_v29 = vmul.f32 0.01, %v2711_v23  ;;  %vm2716_vm12 = vcmp.ge.f32.partialorder %v2711_v23, 0.0 }
 0x76f   : > { %v2639_v15 = vpop.f32.mrb[0].mxu0  ;;  %v2722_v33 = vsel %vm2716_vm12, %v2711_v23, %v2719_v29 }
 0x770   : > { %v2640_v16 = vadd.f32 %v2639_v15, %v2567_v14  ;;  %v2641_v17 = vpop.f32.mrb[1].mxu0  ;;  %v2755_v35 = vmul.f32 %v2752_v32, %v2722_v33 }
 0x771   : > { %v2642_v21 = vadd.f32 %v2641_v17, %v2567_v14 }
 0x772   : > { %vm2714_vm10 = vcmp.ge.f32.partialorder %v2640_v16, 0.0  ;;  %v2717_v20 = vmul.f32 0.01, %v2640_v16 }
 0x773   : > { %v2718_v27 = vmul.f32 0.01, %v2642_v21  ;;  %vm2715_vm11 = vcmp.ge.f32.partialorder %v2642_v21, 0.0 }
 0x774   : > { %v2720_v24 = vsel %vm2714_vm10, %v2640_v16, %v2717_v20  ;;  %vm3113_vm10 = vcmask 1042432  }
 0x775   : > { %v14941_v25 = vmul.f32 %v2744_v18, %v2720_v24  ;;  %v2721_v31 = vsel %vm2715_vm11, %v2642_v21, %v2718_v27  ;;  %vm15855_vm11 = vmmov 1  }
 0x776   : > { %v2754_v34 = vmul.f32 %v2748_v30, %v2721_v31  ;;  %vm10143_vm12 = vmpackc.low %vm3113_vm10, %vm15855_vm11 }
 0x777   : > { %2770 = vrot.lane.b32.xlu0 %v14941_v25, %s15828_s11  ;;  %2759 = vrot.lane.b32.xlu1 %v14941_v25, %s15842_s6 }
 0x778   : > { %v11525_v36 = vpack.i.bf16 %v2755_v35, %v2754_v34 }
 0x77b   : > { %2792 = vrot.lane.b32.xlu0 %v14941_v25, %s15826_s1  ;;  %2781 = vrot.lane.b32.xlu1 %v14941_v25, %s15824_s5 }
 0x77f   : > { %2814 = vrot.lane.b32.xlu0 %v14941_v25, %s15820_s3  ;;  %2803 = vrot.lane.b32.xlu1 %v14941_v25, %s15961_s10 }
 0x783   : > { %11526 = vrot.lane.b32.xlu0 %v11525_v36, %s15842_s6  ;;  %11536 = vrot.lane.b32.xlu1 %v11525_v36, %s15824_s5 }
 0x787   : > { %11531 = vrot.lane.b32.xlu0 %v11525_v36, %s15828_s11  ;;  %11546 = vrot.lane.b32.xlu1 %v11525_v36, %s15961_s10 }
 0x78b   : > { %11541 = vrot.lane.b32.xlu0 %v11525_v36, %s15826_s1  ;;  %11556 = vrot.lane.b32.xlu1 %v11525_v36, %s15822_s8  ;;  %s15830_s1 = smov 106  }
 0x78f   : > { %11551 = vrot.lane.b32.xlu0 %v11525_v36, %s15820_s3  ;;  %2825 = vrot.lane.b32.xlu1 %v14941_v25, %s15822_s8  ;;  %s15837_s3 = smov 117   ;;  %s15839_s8 = smov 118  }
 0x793   : > { %2838 = vrot.lane.b32.xlu0 %v2754_v34, %s15962_s2  ;;  %2840 = vrot.lane.b32.xlu1 %v2755_v35, %s15962_s2 }
 0x797   : > { %2836 = vrot.lane.b32.xlu0 %v14941_v25, %s15962_s2  ;;  %2851 = vperm.xlu1 %11524, %v2848_v37   ;;  %v2847_v37 = vld [vmem:[#allocation7] sm:$0xff] }
 0x7e9   : > { %v2771_v38 = vpop.permute.xlu0 %2770  ;;  %v2760_v39 = vpop.permute.xlu1 %2759 }
 0x7ed   : > { %v2793_v40 = vpop.permute.xlu0 %2792  ;;  %v2782_v41 = vpop.permute.xlu1 %2781 }
 0x7f1   : > { %v2815_v42 = vpop.permute.xlu0 %2814  ;;  %v2804_v43 = vpop.permute.xlu1 %2803 }
 0x7f5   : > { %v11527_v44 = vpop.permute.xlu0 %11526  ;;  %v11537_v45 = vpop.permute.xlu1 %11536 }
 0x7f6   : > { %v11529_v46 = vunpack.i.h.bf16 %v11527_v44  ;;  %v11528_v47 = vunpack.i.l.bf16 %v11527_v44  ;;  %v11539_v48 = vunpack.i.h.bf16 %v11537_v45  ;;  %v11538_v49 = vunpack.i.l.bf16 %v11537_v45 }
 0x7f8   : > { %v10098_v50 = vpack.c.bf16 %v11529_v46, %v2755_v35  ;;  %v2765_v51 = vsel %vm2472_vm1, %v2760_v39, %v11528_v47  ;;  %v2766_v52 = vsel %vm2472_vm1, %v11528_v47, %v11529_v46  ;;  %v2787_v59 = vsel %vm2496_vm2, %v2782_v41, %v11538_v49 }
 0x7f9   : > { %v11532_v53 = vpop.permute.xlu0 %11531  ;;  %v11547_v54 = vpop.permute.xlu1 %11546  ;;  %v10081_v55 = vpack.c.bf16 %v2766_v52, %v2754_v34  ;;  %v10083_v56 = vpack.c.bf16 %v2765_v51, %v14941_v25  ;;  %v2788_v61 = vsel %vm2496_vm2, %v11538_v49, %v11539_v48  ;;  %v9410_v51 = vld [vmem:[#allocation10 + $0x40] sm:$0xff]  }
 0x7fa   : > { %v11534_v57 = vunpack.i.h.bf16 %v11532_v53  ;;  %v11533_v58 = vunpack.i.l.bf16 %v11532_v53  ;;  %10099 = vmatpush3.bf16.msra.mxu1 %v10098_v50  ;;  %v11548_v60 = vunpack.i.l.bf16 %v11547_v54  ;;  %v11549_v1 = vunpack.i.h.bf16 %v11547_v54  ;;  %v9304_v52 = vld [vmem:[#allocation10] sm:$0xff]   ;;  %v9411_v53 = vld [vmem:[#allocation10 + $0x48] sm:$0xff]  }
 0x7fb   : > { %10082 = vmatprep.subr.bf16.mxu0 %v10081_v55  ;;  %10100 = vmatprep.subr.bf16.mxu1 %v13747_v0 }
 0x7fc   : > { %v2776_v62 = vsel %vm2484_vm3, %v2771_v38, %v11533_v58  ;;  %v10101_v63 = vpack.c.bf16 %v11539_v48, %v11534_v57  ;;  %10084 = vmatpush1.bf16.msra.mxu0 %v10083_v56  ;;  %v2777_v2 = vsel %vm2484_vm3, %v11533_v58, %v11534_v57  ;;  %v2809_v12 = vsel %vm2520_vm4, %v2804_v43, %v11548_v60  ;;  %v9403_v57 = vld [vmem:[#allocation10 + $0x8] sm:$0xff]  }
 0x7fd   : > { %v11542_v3 = vpop.permute.xlu0 %11541  ;;  %v11557_v4 = vpop.permute.xlu1 %11556  ;;  %v10085_v6 = vpack.c.bf16 %v2788_v61, %v2777_v2  ;;  %v10087_v8 = vpack.c.bf16 %v2787_v59, %v2776_v62  ;;  %v2810_v18 = vsel %vm2520_vm4, %v11548_v60, %v11549_v1  ;;  %v9412_v59 = vld [vmem:[#allocation10 + $0x50] sm:$0xff]   ;;  %v9413_v61 = vld [vmem:[#allocation10 + $0x58] sm:$0xff]   ;;  %v9415_v2 = vld [vmem:[#allocation10 + $0x68] sm:$0xff]  }
 0x7fe   : > { %v11544_v10 = vunpack.i.h.bf16 %v11542_v3  ;;  %v11543_v11 = vunpack.i.l.bf16 %v11542_v3  ;;  %10102 = vmatpush3.bf16.msra.mxu1 %v10101_v63  ;;  %v11559_v13 = vunpack.i.h.bf16 %v11557_v4  ;;  %v11558_v14 = vunpack.i.l.bf16 %v11557_v4  ;;  %v9404_v60 = vld [vmem:[#allocation10 + $0x10] sm:$0xff]   ;;  %v9405_v62 = vld [vmem:[#allocation10 + $0x18] sm:$0xff]   ;;  %v9414_v63 = vld [vmem:[#allocation10 + $0x60] sm:$0xff]  }
 0x7ff   : > { %10086 = vmatprep.subr.bf16.mxu0 %v10085_v6  ;;  %10103 = vmatprep.subr.bf16.mxu1 %v13747_v0  ;;  %v9407_v3 = vld [vmem:[#allocation10 + $0x28] sm:$0xff]   ;;  %v9416_v4 = vld [vmem:[#allocation10 + $0x70] sm:$0xff]  }
 0x800   : > { %v2798_v15 = vsel %vm2508_vm5, %v2793_v40, %v11543_v11  ;;  %v10104_v16 = vpack.c.bf16 %v11549_v1, %v11544_v10  ;;  %10088 = vmatpush1.bf16.msra.mxu0 %v10087_v8  ;;  %v2799_v17 = vsel %vm2508_vm5, %v11543_v11, %v11544_v10  ;;  %v2832_v27 = vsel %vm15857_vm6, %v11558_v14, %v11559_v13  ;;  %v9406_v1 = vld [vmem:[#allocation10 + $0x20] sm:$0xff]   ;;  %v9408_v6 = vld [vmem:[#allocation10 + $0x30] sm:$0xff]   ;;  %v9417_v11 = vld [vmem:[#allocation10 + $0x78] sm:$0xff]  }
 0x801   : > { %v11552_v20 = vpop.permute.xlu0 %11551  ;;  %v2826_v21 = vpop.permute.xlu1 %2825  ;;  %v10089_v23 = vpack.c.bf16 %v2810_v18, %v2799_v17  ;;  %v10091_v24 = vpack.c.bf16 %v2809_v12, %v2798_v15  ;;  %v9409_v12 = vld [vmem:[#allocation10 + $0x38] sm:$0xff]  }
 0x802   : > { %v11554_v25 = vunpack.i.h.bf16 %v11552_v20  ;;  %v11553_v26 = vunpack.i.l.bf16 %v11552_v20  ;;  %10105 = vmatpush3.bf16.msra.mxu1 %v10104_v16  ;;  %v2831_v30 = vsel %vm15857_vm6, %v2826_v21, %v11558_v14  ;;  %vm5559_vm6 = vcmask 875520  }
 0x803   : > { %10090 = vmatprep.subr.bf16.mxu0 %v10089_v23  ;;  %10106 = vmatprep.subr.bf16.mxu1 %v13747_v0 }
 0x804   : > { %v10107_v28 = vpack.c.bf16 %v11559_v13, %v11554_v25  ;;  %v2820_v29 = vsel %vm2532_vm7, %v2815_v42, %v11553_v26  ;;  %10092 = vmatpush1.bf16.msra.mxu0 %v10091_v24  ;;  %v2821_v31 = vsel %vm2532_vm7, %v11553_v26, %v11554_v25 }
 0x805   : > { %v10095_v32 = vpack.c.bf16 %v2831_v30, %v2820_v29  ;;  %v2839_v33 = vpop.permute.xlu0 %2838  ;;  %v2841_v34 = vpop.permute.xlu1 %2840  ;;  %v10093_v35 = vpack.c.bf16 %v2832_v27, %v2821_v31  ;;  %v11876_v31 = vld [vmem:[#allocation10 + $0x80] sm:$0x3f]  }
 0x806   : > { %10108 = vmatpush3.bf16.msra.mxu1 %v10107_v28  ;;  %v2843_v36 = vsel %vm15856_vm8, %v2839_v33, %v2841_v34 }
 0x807   : > { %10094 = vmatprep.subr.bf16.mxu0 %v10093_v35  ;;  %9690 = vmatprep.subr.mxu1 %v13754_v5 }
 0x808   : > { %10096 = vmatpush1.bf16.msra.mxu0 %v10095_v32 }
 0x809   : > { %v2837_v38 = vpop.permute.xlu0 %2836  ;;  %2873 = vmatprep.subr.mxu0 %v2843_v36 }
 0x80a   : > { %v2842_v39 = vsel %vm15856_vm8, %v2837_v38, %v2839_v33  ;;  %9691 = vmatpush3.msra.mxu1 %v2841_v34 }
 0x80b   : > { %9693 = vmatmul.mubr.msk.f32.vlgmr.msra.gmra.mrb[2].mxu1 %vm2569_vm9, %v2847_v37  ;;  %10110 = vmatprep.subr.bf16.mxu1 %v9410_v51  ;;  %v3282_v51 = vld [vmem:[#allocation12] sm:$0xff] }
 0x80c   : > { %2874 = vmatpush1.msra.mxu0 %v2842_v39  ;;  %10112 = vmatpush3.bf16.msra.mxu1 %v9304_v52  ;;  %v3283_v39 = vld [vmem:[#allocation13] sm:$0xff] }
 0x80d   : > { %9126 = vmatmul.mubr.msk.f32.vlgmr.msra.gmra.mrb[2].mxu0 %vm2569_vm9, %v2847_v37  ;;  %10169 = vmatprep.subr.bf16.mxu0 %v13747_v0 }
 0x80e   : > { %9762 = vmatprep.mubr.msk.f32.mxu0 %vm13753_vm0, %v13754_v5  ;;  %10114 = vmatprep.subr.bf16.mxu1 %v9411_v53  ;;  %v3365_v53 = vld [vmem:[#allocation15] sm:$0x1] }
 0x810   : > { %10116 = vmatpush3.bf16.msra.mxu1 %v9403_v57 }
 0x811   : > { %10118 = vmatprep.subr.bf16.mxu1 %v9412_v59 }
 0x814   : > { %10120 = vmatpush3.bf16.msra.mxu1 %v9404_v60 }
 0x815   : > { %10122 = vmatprep.subr.bf16.mxu1 %v9413_v61 }
 0x816   : > { %v2852_v40 = vpop.permute.xlu1 %2851 }
 0x818   : > { %10124 = vmatpush3.bf16.msra.mxu1 %v9405_v62 }
 0x819   : > { %10126 = vmatprep.subr.bf16.mxu1 %v9414_v63  ;;  %v3398_v63 = vld [vmem:[#allocation18] sm:$0xff] }
 0x81c   : > { %10128 = vmatpush3.bf16.msra.mxu1 %v9406_v1 }
 0x81d   : > { %10130 = vmatprep.subr.bf16.mxu1 %v9415_v2 }
 0x820   : > { %10132 = vmatpush3.bf16.msra.mxu1 %v9407_v3 }
 0x821   : > { %10134 = vmatprep.subr.bf16.mxu1 %v9416_v4 }
 0x824   : > { %10136 = vmatpush3.bf16.msra.mxu1 %v9408_v6 }
 0x825   : > { %10138 = vmatprep.subr.bf16.mxu1 %v9417_v11 }
 0x828   : > { %10140 = vmatpush3.bf16.msra.mxu1 %v9409_v12 }
 0x829   : > { %10141 = vmatprep.subr.bf16.mxu1 %v13747_v0 }
 0x8de   : > { %v2994_v41 = vpop.f32.mrb[2].mxu1 }
 0x8df   : > { %v2995_v42 = vadd.f32 %v2994_v41, %v2852_v40  ;;  %v9694_v43 = vpop.f32.mrb[3].mxu1 }
 0x8e0   : > { %v2923_v44 = vpop.f32.mrb[2].mxu0 }
 0x8e1   : > { %v3003_v45 = vmul.f32 0.01, %v2995_v42  ;;  %v2924_v46 = vadd.f32 %v2923_v44, %v2852_v40  ;;  %v2925_v47 = vpop.f32.mrb[3].mxu0  ;;  %vm3000_vm13 = vcmp.ge.f32.partialorder %v2995_v42, 0.0 }
 0x8e2   : > { %v2926_v48 = vadd.f32 %v2925_v47, %v2852_v40 }
 0x8e3   : > { %vm2998_vm14 = vcmp.ge.f32.partialorder %v2924_v46, 0.0  ;;  %v3001_v49 = vmul.f32 0.01, %v2924_v46  ;;  %v3006_v50 = vsel %vm3000_vm13, %v2995_v42, %v3003_v45  ;;  %vm3109_vm13 = vcmask 89088  }
 0x8e4   : > { %vm2999_vm15 = vcmp.ge.f32.partialorder %v2926_v48, 0.0  ;;  %v3002_v54 = vmul.f32 0.01, %v2926_v48  ;;  %3014 = vrot.lane.b32.xlu1 %v3006_v50, %s15842_s6 }
 0x8e5   : > { %v3004_v55 = vsel %vm2998_vm14, %v2924_v46, %v3001_v49 }
 0x8e6   : > { %v3005_v56 = vsel %vm2999_vm15, %v2926_v48, %v3002_v54  ;;  %v3366_v54 = vunpack.c.l.bf16 %v3365_v53  ;;  %v3611_v53 = vld [vmem:[#allocation19 + $0x8] sm:$0xff] }
 0x8e7   : > { %v11560_v58 = vpack.i.bf16 %v3004_v55, %v3005_v56 }
 0x8e8   : > { %v3370_v59 = vrot.slane %v3366_v54, %v14931_v9  ;;  %v3711_v54 = vld [vmem:[#allocation22] sm:$0x1] }
 0x8e9   : > { %11561 = vrot.lane.b32.xlu0 %v11560_v58, %s15842_s6 }
 0x956   : > { %v3015_v8 = vpop.permute.xlu1 %3014 }
 0x957   : > { %v3023_v10 = vmax.f32 %v3006_v50, %v3015_v8 }
 0x959   : > { %3031 = vrot.lane.b32.xlu1 %v3023_v10, %s15824_s5 }
 0x95b   : > { %v11562_v13 = vpop.permute.xlu0 %11561 }
 0x95c   : > { %v11564_v14 = vunpack.i.h.bf16 %v11562_v13  ;;  %v11563_v15 = vunpack.i.l.bf16 %v11562_v13 }
 0x95e   : > { %v3016_v16 = vsel %vm2472_vm1, %v11564_v14, %v11563_v15  ;;  %v3017_v17 = vsel %vm2472_vm1, %v11563_v15, %v3015_v8  ;;  %v3397_v15 = vld [vmem:[#allocation16] sm:$0xff] }
 0x95f   : > { %v3021_v18 = vmax.f32 %v3004_v55, %v3016_v16  ;;  %v3022_v20 = vmax.f32 %v3005_v56, %v3017_v17 }
 0x961   : > { %v11565_v21 = vpack.i.bf16 %v3021_v18, %v3022_v20 }
 0x963   : > { %11566 = vrot.lane.b32.xlu0 %v11565_v21, %s15824_s5  ;;  %s15833_s5 = smov 116  }
 0x9cb   : > { %v3032_v26 = vpop.permute.xlu1 %3031 }
 0x9cc   : > { %v3040_v32 = vmax.f32 %v3023_v10, %v3032_v26 }
 0x9d5   : > { %v11567_v23 = vpop.permute.xlu0 %11566 }
 0x9d6   : > { %v11569_v24 = vunpack.i.h.bf16 %v11567_v23  ;;  %v11568_v25 = vunpack.i.l.bf16 %v11567_v23 }
 0x9d8   : > { %v3033_v27 = vsel %vm2496_vm2, %v11569_v24, %v11568_v25  ;;  %v3034_v28 = vsel %vm2496_vm2, %v11568_v25, %v3032_v26 }
 0x9d9   : > { %v3039_v29 = vmax.f32 %v3022_v20, %v3034_v28  ;;  %v3038_v30 = vmax.f32 %v3021_v18, %v3033_v27 }
 0x9db   : > { %3181 = vmatprep.mubr.f32.mxu1 %v3039_v29 }
 0x9dc   : > { %3182 = vmatmul.mubr.f32.vlgmr.msra.gmra.mrb[4].mxu1 %v3038_v30 }
 0x9dd   : > { %10144 = vmatpush3.bf16.msk.msra.mxu1 %vm10143_vm12, %v11876_v31  ;;  %9699 = vmatprep.mubr.msk.f32.mxu1 %vm13753_vm0, %v13754_v5  ;;  %vm3508_vm12 = vcmask 547840  }
 0x9de   : > { %10145 = vmatprep.subr.bf16.mxu1 %v13747_v0 }
 0x9e0   : > { %9700 = vmatmul.mubr.msk.f32.vlgmr.msra.gmra.mrb[6].mxu1 %vm3109_vm13, %v3040_v32 }
 0x9e1   : > { %9720 = vmatprep.mubr.msk.f32.mxu1 %vm13753_vm0, %v13754_v5 }
 0xaaf   : > { %v9475_v33 = vpop.f32.mrb[4].mxu1 }
 0xab0   : > { %v9476_v34 = vpop.f32.mrb[5].mxu1 }
 0xab1   : > { %v9477_v35 = vadd.f32 %v9476_v34, %v9475_v33 }
 0xab3   : > { %v3253_v36 = vpop.f32.mrb[6].mxu1 }
 0xab4   : > { %v15014_v37 = vadd.f32 %v9477_v35, %v3253_v36  ;;  %v9701_v38 = vpop.f32.mrb[7].mxu1 }
 0xab5   : > { %v3610_v38 = vld [vmem:[#allocation19] sm:$0xff] }
 0xab6   : > { %3261 = vrot.lane.b32.xlu1 %v15014_v37, %s15828_s11  ;;  %3258 = vrot.lane.b32.xlu0 %v15014_v37, %s15842_s6  ;;  %s15835_s11 = smov 107  }
 0xaba   : > { %3267 = vrot.lane.b32.xlu1 %v15014_v37, %s15837_s3  ;;  %3264 = vrot.lane.b32.xlu0 %v15014_v37, %s15839_s8 }
 0xabe   : > { %3273 = vrot.lane.b32.xlu1 %v15014_v37, %s15961_s10  ;;  %3270 = vrot.lane.b32.xlu0 %v15014_v37, %s15833_s5 }
 0xac2   : > { %3279 = vrot.lane.b32.xlu1 %v15014_v37, %s15830_s1  ;;  %3276 = vrot.lane.b32.xlu0 %v15014_v37, %s15835_s11  ;;  %s15963_s1 = smov 126  }
 0xac6   : > { %3286 = vperm.xlu0 %11570, %v3283_v39   ;;  %v3613_v39 = vld [vmem:[#allocation21 + $0x8] sm:$0xff] }
 0xb28   : > { %v3262_v40 = vpop.permute.xlu1 %3261  ;;  %v3259_v41 = vpop.permute.xlu0 %3258 }
 0xb29   : > { %v10146_v42 = vpack.c.bf16 %v3259_v41, %v15014_v37 }
 0xb2b   : > { %10147 = vmatpush3.bf16.msra.mxu1 %v10146_v42 }
 0xb2c   : > { %v3265_v43 = vpop.permute.xlu0 %3264  ;;  %10148 = vmatprep.subr.bf16.mxu1 %v13747_v0  ;;  %v3268_v45 = vpop.permute.xlu1 %3267 }
 0xb2d   : > { %v10149_v44 = vpack.c.bf16 %v3265_v43, %v3262_v40  ;;  %v3612_v40 = vld [vmem:[#allocation21] sm:$0xff] }
 0xb2f   : > { %10150 = vmatpush3.bf16.msra.mxu1 %v10149_v44 }
 0xb30   : > { %v3271_v46 = vpop.permute.xlu0 %3270  ;;  %10151 = vmatprep.subr.bf16.mxu1 %v13747_v0  ;;  %v3274_v48 = vpop.permute.xlu1 %3273 }
 0xb31   : > { %v10152_v47 = vpack.c.bf16 %v3271_v46, %v3268_v45 }
 0xb33   : > { %10153 = vmatpush3.bf16.msra.mxu1 %v10152_v47 }
 0xb34   : > { %v3277_v49 = vpop.permute.xlu0 %3276  ;;  %10154 = vmatprep.subr.bf16.mxu1 %v13747_v0  ;;  %v3280_v52 = vpop.permute.xlu1 %3279 }
 0xb35   : > { %v10155_v50 = vpack.c.bf16 %v3277_v49, %v3274_v48 }
 0xb37   : > { %10156 = vmatpush3.bf16.msra.mxu1 %v10155_v50 }
 0xb38   : > { %9718 = vmatprep.subr.mxu1 %v13754_v5 }
 0xb3b   : > { %9719 = vmatpush3.msra.mxu1 %v3280_v52 }
 0xb3c   : > { %9721 = vmatmul.mubr.msk.f32.vlgmr.msra.gmra.mrb[8].mxu1 %vm2569_vm9, %v3282_v51  ;;  %10157 = vmatprep.subr.bf16.mxu1 %v13747_v0 }
 0xb3d   : > { %9741 = vmatprep.mubr.msk.f32.mxu1 %vm13753_vm0, %v13754_v5 }
 0xb45   : > { %v3287_v55 = vpop.permute.xlu0 %3286 }
 0xc0f   : > { %v3358_v56 = vpop.f32.mrb[8].mxu1 }
 0xc10   : > { %v3359_v57 = vadd.f32 %v3358_v56, %v3287_v55  ;;  %v9722_v58 = vpop.f32.mrb[9].mxu1  ;;  %v3712_v55 = vunpack.c.l.bf16 %v3711_v54 }
 0xc12   : > { %vm3362_vm14 = vcmp.ge.f32.partialorder %v3359_v57, 0.0  ;;  %v3363_v60 = vmul.f32 0.01, %v3359_v57 }
 0xc14   : > { %v3364_v61 = vsel %vm3362_vm14, %v3359_v57, %v3363_v60  ;;  %vm3785_vm14 = vcmask 130048  }
 0xc15   : > { %v3371_v62 = vmul.f32 %v3370_v59, %v3364_v61  ;;  %v3716_v61 = vrot.slane %v3712_v55, %v14931_v9 }
 0xc17   : > { %3379 = vrot.lane.b32.xlu0 %v3371_v62, %s15839_s8  ;;  %3373 = vrot.lane.b32.xlu1 %v3371_v62, %s15842_s6 }
 0xc1b   : > { %3385 = vrot.lane.b32.xlu0 %v3371_v62, %s15833_s5  ;;  %3376 = vrot.lane.b32.xlu1 %v3371_v62, %s15963_s1  ;;  %s15965_s5 = sld [smem:[#allocation118_spill]] }
 0xc1f   : > { %3391 = vrot.lane.b32.xlu0 %v3371_v62, %s15835_s11  ;;  %3382 = vrot.lane.b32.xlu1 %v3371_v62, %s15837_s3  ;;  %s15850_s11 = smov 121   ;;  %s13766_s3 = smov 122  }
 0xc21   : > { %v9368_v17 = vld [vmem:[%s15965_s5] sm:$0xff]   ;;  %v9418_v18 = vld [vmem:[%s15965_s5 + $0x8] sm:$0xff]   ;;  %v9419_v25 = vld [vmem:[%s15965_s5 + $0x10] sm:$0xff]  }
 0xc22   : > { %10171 = vmatpush3.bf16.msra.mxu0 %v9368_v17  ;;  %v9420_v28 = vld [vmem:[%s15965_s5 + $0x18] sm:$0xff]   ;;  %v3498_v29 = vld [vmem:[%s15965_s5 + $0x20] sm:$0x3]  ;;  %s13767_s5 = smov 120  }
 0xc23   : > { %3401 = vperm.xlu0 %11570, %v3398_v63   ;;  %3388 = vrot.lane.b32.xlu1 %v3371_v62, %s15961_s10  ;;  %v3507_v30 = vunpack.c.l.bf16 %v3498_v29 }
 0xc24   : > { %10172 = vmatprep.subr.bf16.mxu0 %v13747_v0 }
 0xc26   : > { %10174 = vmatpush3.bf16.msra.mxu0 %v9418_v18 }
 0xc27   : > { %3394 = vrot.lane.b32.xlu1 %v3371_v62, %s15964_s4  ;;  %10175 = vmatprep.subr.bf16.mxu0 %v13747_v0 }
 0xc2a   : > { %10177 = vmatpush3.bf16.msra.mxu0 %v9419_v25 }
 0xc2b   : > { %10178 = vmatprep.subr.bf16.mxu0 %v13747_v0 }
 0xc2e   : > { %10180 = vmatpush3.bf16.msra.mxu0 %v9420_v28 }
 0xc2f   : > { %9760 = vmatprep.subr.mxu0 %v13754_v5 }
 0xc32   : > { %9761 = vmatpush3.msk.msra.mxu0 %vm3113_vm10, %v3507_v30 }
 0xc33   : > { %10197 = vmatprep.subr.bf16.mxu0 %v13747_v0 }
 0xc89   : > { %v3380_v1 = vpop.permute.xlu0 %3379  ;;  %v3374_v2 = vpop.permute.xlu1 %3373 }
 0xc8a   : > { %v10158_v3 = vpack.c.bf16 %v3374_v2, %v3371_v62 }
 0xc8c   : > { %10159 = vmatpush3.bf16.msra.mxu1 %v10158_v3 }
 0xc8d   : > { %v3377_v4 = vpop.permute.xlu1 %3376  ;;  %10160 = vmatprep.subr.bf16.mxu1 %v13747_v0  ;;  %v3386_v8 = vpop.permute.xlu0 %3385 }
 0xc8e   : > { %v10161_v6 = vpack.c.bf16 %v3380_v1, %v3377_v4 }
 0xc90   : > { %10162 = vmatpush3.bf16.msra.mxu1 %v10161_v6 }
 0xc91   : > { %v3383_v10 = vpop.permute.xlu1 %3382  ;;  %10163 = vmatprep.subr.bf16.mxu1 %v13747_v0  ;;  %v3392_v12 = vpop.permute.xlu0 %3391 }
 0xc92   : > { %v10164_v11 = vpack.c.bf16 %v3386_v8, %v3383_v10 }
 0xc94   : > { %10165 = vmatpush3.bf16.msra.mxu1 %v10164_v11  ;;  %v3774_v11 = vld [vmem:[#allocation25 + $0x8] sm:$0xff] }
 0xc95   : > { %v3389_v13 = vpop.permute.xlu1 %3388  ;;  %10166 = vmatprep.subr.bf16.mxu1 %v13747_v0 }
 0xc96   : > { %v10167_v14 = vpack.c.bf16 %v3392_v12, %v3389_v13  ;;  %v3773_v12 = vld [vmem:[#allocation25] sm:$0xff]  ;;  %v3770_v13 = vld [vmem:[#allocation24 + $0x8] sm:$0xff] }
 0xc98   : > { %10168 = vmatpush3.bf16.msra.mxu1 %v10167_v14 }
 0xc99   : > { %9739 = vmatprep.subr.mxu1 %v13754_v5  ;;  %v3395_v16 = vpop.permute.xlu1 %3394 }
 0xc9c   : > { %9740 = vmatpush3.msra.mxu1 %v3395_v16 }
 0xc9d   : > { %9742 = vmatmul.mubr.msk.f32.vlgmr.msra.gmra.mrb[10].mxu1 %vm2569_vm9, %v3397_v15 }
 0xc9e   : > { %9783 = vmatprep.mubr.msk.f32.mxu1 %vm2569_vm9, %v3610_v38 }
 0xca2   : > { %v3402_v20 = vpop.permute.xlu0 %3401 }
 0xd70   : > { %v3473_v21 = vpop.f32.mrb[10].mxu1 }
 0xd71   : > { %v3474_v23 = vadd.f32 %v3473_v21, %v3402_v20  ;;  %v9743_v24 = vpop.f32.mrb[11].mxu1 }
 0xd73   : > { %v3478_v26 = vmul.f32 0.01, %v3474_v23  ;;  %vm3477_vm15 = vcmp.ge.f32.partialorder %v3474_v23, 0.0 }
 0xd75   : > { %v3479_v27 = vsel %vm3477_vm15, %v3474_v23, %v3478_v26 }
 0xd76   : > { %3481 = vrot.lane.b32.xlu1 %v3479_v27, %s15842_s6 }
 0xde8   : > { %v3482_v31 = vpop.permute.xlu1 %3481 }
 0xde9   : > { %v3484_v32 = vmax.f32 %v3479_v27, %v3482_v31 }
 0xdeb   : > { %3486 = vrot.lane.b32.xlu0 %v3484_v32, %s15839_s8  ;;  %s15966_s8 = smov 116  }
 0xe5d   : > { %v3487_v33 = vpop.permute.xlu0 %3486 }
 0xe5e   : > { %v3489_v34 = vmax.f32 %v3484_v32, %v3487_v33 }
 0xe60   : > { %9763 = vmatmul.mubr.msk.f32.vlgmr.msra.gmra.mrb[4].mxu0 %vm3508_vm12, %v3489_v34 }
 0xe61   : > { %9136 = vmatprep.mubr.msk.f32.mxu0 %vm3785_vm14, %v3770_v13 }
 0xf33   : > { %v15068_v35 = vpop.f32.mrb[4].mxu0 }
 0xf34   : > { %3589 = vrot.lane.b32.xlu0 %v15068_v35, %s15963_s1  ;;  %3586 = vrot.lane.b32.xlu1 %v15068_v35, %s15842_s6  ;;  %v9764_v36 = vpop.f32.mrb[5].mxu0  ;;  %s15848_s6 = smov 114  }
 0xf38   : > { %3595 = vrot.lane.b32.xlu0 %v15068_v35, %s15850_s11  ;;  %3592 = vrot.lane.b32.xlu1 %v15068_v35, %s13766_s3 }
 0xf3c   : > { %3601 = vrot.lane.b32.xlu0 %v15068_v35, %s15966_s8  ;;  %3598 = vrot.lane.b32.xlu1 %v15068_v35, %s13767_s5 }
 0xf40   : > { %3607 = vrot.lane.b32.xlu0 %v15068_v35, %s15848_s6  ;;  %3604 = vrot.lane.b32.xlu1 %v15068_v35, %s15845_s7  ;;  %s15967_s7 = smov 127  }
 0xf44   : > { %3621 = vperm.xlu0 %11570, %v3613_v39   ;;  %3616 = vperm.xlu1 %11524, %v3612_v40  }
 0xfa6   : > { %v3590_v41 = vpop.permute.xlu0 %3589  ;;  %v3587_v42 = vpop.permute.xlu1 %3586 }
 0xfa7   : > { %v10181_v43 = vpack.c.bf16 %v3587_v42, %v15068_v35 }
 0xfa9   : > { %10182 = vmatprep.subr.bf16.mxu1 %v10181_v43 }
 0xfaa   : > { %v3596_v44 = vpop.permute.xlu0 %3595  ;;  %10184 = vmatpush3.bf16.msra.mxu1 %v10181_v43  ;;  %v3593_v45 = vpop.permute.xlu1 %3592 }
 0xfab   : > { %v10185_v46 = vpack.c.bf16 %v3593_v45, %v3590_v41 }
 0xfad   : > { %10186 = vmatprep.subr.bf16.mxu1 %v10185_v46 }
 0xfae   : > { %10188 = vmatpush3.bf16.msra.mxu1 %v10185_v46  ;;  %v3599_v47 = vpop.permute.xlu1 %3598  ;;  %v3602_v49 = vpop.permute.xlu0 %3601 }
 0xfaf   : > { %v10189_v48 = vpack.c.bf16 %v3599_v47, %v3596_v44 }
 0xfb1   : > { %10190 = vmatprep.subr.bf16.mxu1 %v10189_v48 }
 0xfb2   : > { %10192 = vmatpush3.bf16.msra.mxu1 %v10189_v48  ;;  %v3605_v50 = vpop.permute.xlu1 %3604  ;;  %v3608_v52 = vpop.permute.xlu0 %3607 }
 0xfb3   : > { %v10193_v51 = vpack.c.bf16 %v3605_v50, %v3602_v49  ;;  %v3769_v50 = vld [vmem:[#allocation24] sm:$0xff] }
 0xfb5   : > { %10194 = vmatprep.subr.bf16.mxu1 %v10193_v51 }
 0xfb6   : > { %10196 = vmatpush3.bf16.msra.mxu1 %v10193_v51  ;;  %v3772_v51 = vld [vmem:[#allocation24 + $0x18] sm:$0xff] }
 0xfb7   : > { %9781 = vmatprep.subr.mxu1 %v3608_v52 }
 0xfba   : > { %9782 = vmatpush3.msra.mxu1 %v3608_v52  ;;  %v3771_v52 = vld [vmem:[#allocation24 + $0x10] sm:$0xff] }
 0xfbb   : > { %9784 = vmatmul.mubr.msk.f32.vlgmr.msra.gmra.mrb[12].mxu1 %vm2569_vm9, %v3611_v53 }
 0xfc3   : > { %v3622_v56 = vpop.permute.xlu0 %3621  ;;  %v3617_v58 = vpop.permute.xlu1 %3616 }
0x108e   : > { %v9785_v57 = vpop.f32.mrb[12].mxu1 }
0x108f   : > { %v3702_v59 = vadd.f32 %v9785_v57, %v3622_v56  ;;  %v3696_v60 = vpop.f32.mrb[13].mxu1 }
0x1090   : > { %v3697_v62 = vadd.f32 %v3696_v60, %v3617_v58 }
0x1091   : > { %vm3706_vm10 = vcmp.ge.f32.partialorder %v3702_v59, 0.0  ;;  %v3708_v63 = vmul.f32 0.01, %v3702_v59 }
0x1092   : > { %vm3705_vm13 = vcmp.ge.f32.partialorder %v3697_v62, 0.0  ;;  %v3707_v1 = vmul.f32 0.01, %v3697_v62 }
0x1093   : > { %v3710_v2 = vsel %vm3706_vm10, %v3702_v59, %v3708_v63  ;;  %vm3904_vm10 = vcmask 1046528  }
0x1094   : > { %v3718_v3 = vmul.f32 %v3716_v61, %v3710_v2  ;;  %v3709_v4 = vsel %vm3705_vm13, %v3697_v62, %v3707_v1  ;;  %v9384_v2 = vld [vmem:[#allocation27] sm:$0xff]   ;;  %vm10225_vm13 = vmpackc.low %vm3904_vm10, %vm15855_vm11  ;;  %vm4236_vm10 = vcmask 64512  }
0x1095   : > { %v3717_v6 = vmul.f32 %v3716_v61, %v3709_v4  ;;  %10226 = vmatprep.subr.msk.bf16.mxu1 %vm10225_vm13, %v9384_v2 }
0x1096   : > { %10229 = vmatpush3.bf16.msk.msra.mxu1 %vm10225_vm13, %v9384_v2 }
0x1097   : > { %v11576_v8 = vpack.i.bf16 %v3718_v3, %v3717_v6  ;;  %v10198_v10 = vpack.c.bf16 %v3718_v3, %v3717_v6  ;;  %10230 = vmatprep.subr.bf16.mxu1 %v13747_v0 }
0x1099   : > { %11577 = vrot.lane.b32.xlu0 %v11576_v8, %s15963_s1  ;;  %11572 = vrot.lane.b32.xlu1 %v11576_v8, %s15967_s7 }
0x109a   : > { %10199 = vmatpush1.bf16.msra.mxu0 %v10198_v10 }
0x109b   : > { %10200 = vmatprep.subr.bf16.mxu0 %v13747_v0 }
0x109d   : > { %11587 = vrot.lane.b32.xlu0 %v11576_v8, %s15850_s11  ;;  %11582 = vrot.lane.b32.xlu1 %v11576_v8, %s13766_s3  ;;  %s13771_s11 = smov 124  }
0x10a1   : > { %11597 = vrot.lane.b32.xlu0 %v11576_v8, %s15966_s8  ;;  %11592 = vrot.lane.b32.xlu1 %v11576_v8, %s13767_s5 }
0x10a5   : > { %11607 = vrot.lane.b32.xlu0 %v11576_v8, %s15848_s6  ;;  %11602 = vrot.lane.b32.xlu1 %v11576_v8, %s15968_s12  ;;  %s13770_s6 = smov 123  }
0x10a9   : > { %3782 = vperm.xlu0 %11570, %v3774_v11   ;;  %3777 = vperm.xlu1 %11524, %v3773_v12  }
0x110b   : > { %v11578_v14 = vpop.permute.xlu0 %11577  ;;  %v11573_v15 = vpop.permute.xlu1 %11572 }
0x110c   : > { %v11575_v16 = vunpack.i.h.bf16 %v11573_v15  ;;  %v11574_v17 = vunpack.i.l.bf16 %v11573_v15  ;;  %v11580_v18 = vunpack.i.h.bf16 %v11578_v14  ;;  %v11579_v20 = vunpack.i.l.bf16 %v11578_v14 }
0x110e   : > { %v10201_v21 = vpack.c.bf16 %v11575_v16, %v11574_v17  ;;  %v10204_v24 = vpack.c.bf16 %v11580_v18, %v11579_v20  ;;  %v4035_v18 = vld [vmem:[#allocation30] sm:$0xff]  ;;  %v4034_v20 = vld [vmem:[#allocation28 + $0x8] sm:$0xff] }
0x110f   : > { %v11583_v23 = vpop.permute.xlu1 %11582  ;;  %v11588_v27 = vpop.permute.xlu0 %11587 }
0x1110   : > { %10202 = vmatpush1.bf16.msra.mxu0 %v10201_v21  ;;  %v11585_v25 = vunpack.i.h.bf16 %v11583_v23  ;;  %v11584_v26 = vunpack.i.l.bf16 %v11583_v23  ;;  %v11590_v28 = vunpack.i.h.bf16 %v11588_v27  ;;  %v11589_v29 = vunpack.i.l.bf16 %v11588_v27 }
0x1111   : > { %10203 = vmatprep.subr.bf16.mxu0 %v13747_v0 }
0x1112   : > { %v10207_v30 = vpack.c.bf16 %v11585_v25, %v11584_v26  ;;  %v10210_v32 = vpack.c.bf16 %v11590_v28, %v11589_v29 }
0x1113   : > { %v11593_v31 = vpop.permute.xlu1 %11592  ;;  %v11598_v36 = vpop.permute.xlu0 %11597 }
0x1114   : > { %10205 = vmatpush1.bf16.msra.mxu0 %v10204_v24  ;;  %v11595_v33 = vunpack.i.h.bf16 %v11593_v31  ;;  %v11594_v34 = vunpack.i.l.bf16 %v11593_v31  ;;  %v11600_v38 = vunpack.i.h.bf16 %v11598_v36  ;;  %v11599_v39 = vunpack.i.l.bf16 %v11598_v36 }
0x1115   : > { %10206 = vmatprep.subr.bf16.mxu0 %v13747_v0 }
0x1116   : > { %v10213_v40 = vpack.c.bf16 %v11595_v33, %v11594_v34  ;;  %v10216_v42 = vpack.c.bf16 %v11600_v38, %v11599_v39 }
0x1117   : > { %v11603_v41 = vpop.permute.xlu1 %11602  ;;  %v11608_v45 = vpop.permute.xlu0 %11607 }
0x1118   : > { %10208 = vmatpush1.bf16.msra.mxu0 %v10207_v30  ;;  %v11605_v43 = vunpack.i.h.bf16 %v11603_v41  ;;  %v11604_v44 = vunpack.i.l.bf16 %v11603_v41  ;;  %v11610_v46 = vunpack.i.h.bf16 %v11608_v45  ;;  %v11609_v47 = vunpack.i.l.bf16 %v11608_v45 }
0x1119   : > { %10209 = vmatprep.subr.bf16.mxu0 %v13747_v0 }
0x111a   : > { %v10219_v48 = vpack.c.bf16 %v11605_v43, %v11604_v44  ;;  %v10222_v49 = vpack.c.bf16 %v11610_v46, %v11609_v47 }
0x111c   : > { %10211 = vmatpush1.bf16.msra.mxu0 %v10210_v32 }
0x111d   : > { %10212 = vmatprep.subr.bf16.mxu0 %v13747_v0 }
0x1120   : > { %10214 = vmatpush1.bf16.msra.mxu0 %v10213_v40 }
0x1121   : > { %10215 = vmatprep.subr.bf16.mxu0 %v13747_v0 }
0x1124   : > { %10217 = vmatpush1.bf16.msra.mxu0 %v10216_v42 }
0x1125   : > { %10218 = vmatprep.subr.bf16.mxu0 %v13747_v0 }
0x1128   : > { %10220 = vmatpush1.bf16.msra.mxu0 %v10219_v48  ;;  %v3778_v53 = vpop.permute.xlu1 %3777  ;;  %v3783_v58 = vpop.permute.xlu0 %3782 }
0x1129   : > { %10221 = vmatprep.subr.bf16.mxu0 %v13747_v0 }
0x112c   : > { %10223 = vmatpush1.bf16.msra.mxu0 %v10222_v49 }
0x112d   : > { %10257 = vmatprep.subr.bf16.mxu0 %v13747_v0 }
0x112f   : > { %3857 = vmatmul.mubr.f32.vlgmr.msra.gmra.mrb[6].mxu0 %v3769_v50 }
0x1130   : > { %9137 = vmatprep.mubr.msk.f32.mxu0 %vm3785_vm14, %v3772_v51 }
0x1133   : > { %3862 = vmatmul.mubr.f32.gmra.mrb[8].mxu0 %v3771_v52 }
0x1134   : > { %9811 = vmatprep.mubr.msk.f32.mxu0 %vm13753_vm0, %v13754_v5 }
0x1202   : > { %v3858_v54 = vpop.f32.mrb[6].mxu0 }
0x1203   : > { %v3859_v55 = vadd.f32 %v3858_v54, %v3778_v53  ;;  %v3860_v56 = vpop.f32.mrb[7].mxu0 }
0x1204   : > { %v4033_v56 = vld [vmem:[#allocation28] sm:$0xff] }
0x1205   : > { %v3869_v57 = vmul.f32 0.01, %v3859_v55  ;;  %vm3867_vm15 = vcmp.ge.f32.partialorder %v3859_v55, 0.0 }
0x1206   : > { %v3863_v59 = vpop.f32.mrb[8].mxu0 }
0x1207   : > { %v3864_v60 = vadd.f32 %v3863_v59, %v3783_v58  ;;  %v3865_v61 = vpop.f32.mrb[9].mxu0  ;;  %v3871_v62 = vsel %vm3867_vm15, %v3859_v55, %v3869_v57  ;;  %vm3897_vm15 = vcmask 121856   ;;  %v4117_v57 = vld [vmem:[#allocation31] sm:$0x1] }
0x1208   : > { %3875 = vrot.lane.b32.xlu1 %v3871_v62, %s15967_s7  ;;  %v4118_v58 = vunpack.c.l.bf16 %v4117_v57 }
0x1209   : > { %v3870_v63 = vmul.f32 0.01, %v3864_v60  ;;  %vm3868_vm12 = vcmp.ge.f32.partialorder %v3864_v60, 0.0 }
0x120b   : > { %v3872_v1 = vsel %vm3868_vm12, %v3864_v60, %v3870_v63  ;;  %v4122_v63 = vrot.slane %v4118_v58, %v14931_v9 }
0x120c   : > { %3877 = vrot.lane.b32.xlu0 %v3872_v1, %s15967_s7 }
0x127a   : > { %v3876_v3 = vpop.permute.xlu1 %3875 }
0x127b   : > { %v3881_v4 = vmax.f32 %v3871_v62, %v3876_v3 }
0x127d   : > { %3885 = vrot.lane.b32.xlu1 %v3881_v4, %s13766_s3 }
0x127e   : > { %v3878_v6 = vpop.permute.xlu0 %3877 }
0x127f   : > { %v3882_v8 = vmax.f32 %v3872_v1, %v3878_v6  ;;  %v4150_v6 = vld [vmem:[#allocation34] sm:$0xff] }
0x1281   : > { %3887 = vrot.lane.b32.xlu0 %v3882_v8, %s13766_s3 }
0x12ef   : > { %v3886_v10 = vpop.permute.xlu1 %3885 }
0x12f0   : > { %v3891_v11 = vmax.f32 %v3881_v4, %v3886_v10  ;;  %v4653_v4 = vld [vmem:[#allocation37] sm:$0xff] }
0x12f2   : > { %9790 = vmatprep.mubr.msk.f32.mxu1 %vm3897_vm15, %v3891_v11 }
0x12f3   : > { %v3888_v12 = vpop.permute.xlu0 %3887 }
0x12f4   : > { %v3892_v13 = vmax.f32 %v3882_v8, %v3888_v12 }
0x12f6   : > { %9791 = vmatmul.mubr.msk.f32.vlgmr.msra.gmra.mrb[14].mxu1 %vm3897_vm15, %v3892_v13  ;;  %vm15854_vm15 = vcmask 1045504  }
0x12f7   : > { %9141 = vmatprep.mubr.msk.f32.mxu1 %vm3785_vm14, %v4034_v20 }
0x13c9   : > { %v15117_v14 = vpop.f32.mrb[14].mxu1 }
0x13ca   : > { %v15119_v15 = vpop.f32.mrb[15].mxu1 }
0x13cb   : > { %v11616_v16 = vpack.i.bf16 %v15117_v14, %v15119_v15  ;;  %v10231_v17 = vpack.c.bf16 %v15117_v14, %v15119_v15 }
0x13cd   : > { %11617 = vrot.lane.b32.xlu0 %v11616_v16, %s15963_s1  ;;  %11612 = vrot.lane.b32.xlu1 %v11616_v16, %s15967_s7 }
0x13ce   : > { %10232 = vmatpush1.bf16.msra.mxu1 %v10231_v17 }
0x13cf   : > { %10233 = vmatprep.subr.bf16.mxu1 %v13747_v0 }
0x13d1   : > { %11627 = vrot.lane.b32.xlu0 %v11616_v16, %s13770_s6  ;;  %11622 = vrot.lane.b32.xlu1 %v11616_v16, %s13771_s11 }
0x13d5   : > { %11637 = vrot.lane.b32.xlu0 %v11616_v16, %s13767_s5  ;;  %11632 = vrot.lane.b32.xlu1 %v11616_v16, %s13766_s3 }
0x13d9   : > { %11647 = vrot.lane.b32.xlu0 %v11616_v16, %s15969_s13  ;;  %11642 = vrot.lane.b32.xlu1 %v11616_v16, %s13772_s14 }
0x13dd   : > { %4038 = vperm.xlu1 %11524, %v4035_v18  }
0x143f   : > { %v11618_v21 = vpop.permute.xlu0 %11617  ;;  %v11613_v23 = vpop.permute.xlu1 %11612 }
0x1440   : > { %v11615_v24 = vunpack.i.h.bf16 %v11613_v23  ;;  %v11614_v25 = vunpack.i.l.bf16 %v11613_v23  ;;  %v11620_v26 = vunpack.i.h.bf16 %v11618_v21  ;;  %v11619_v27 = vunpack.i.l.bf16 %v11618_v21 }
0x1442   : > { %v10234_v28 = vpack.c.bf16 %v11615_v24, %v11614_v25  ;;  %v10237_v30 = vpack.c.bf16 %v11620_v26, %v11619_v27  ;;  %v4149_v24 = vld [vmem:[#allocation33] sm:$0xff]  ;;  %v4232_v26 = vld [vmem:[#allocation36] sm:$0xff] }
0x1443   : > { %v11623_v29 = vpop.permute.xlu1 %11622  ;;  %v11628_v33 = vpop.permute.xlu0 %11627 }
0x1444   : > { %10235 = vmatpush1.bf16.msra.mxu1 %v10234_v28  ;;  %v11625_v31 = vunpack.i.h.bf16 %v11623_v29  ;;  %v11624_v32 = vunpack.i.l.bf16 %v11623_v29  ;;  %v11630_v34 = vunpack.i.h.bf16 %v11628_v33  ;;  %v11629_v36 = vunpack.i.l.bf16 %v11628_v33 }
0x1445   : > { %10236 = vmatprep.subr.bf16.mxu1 %v13747_v0 }
0x1446   : > { %v10240_v38 = vpack.c.bf16 %v11625_v31, %v11624_v32  ;;  %v10243_v40 = vpack.c.bf16 %v11630_v34, %v11629_v36  ;;  %v4334_v31 = vld [vmem:[#allocation39] sm:$0x7] }
0x1447   : > { %v11633_v39 = vpop.permute.xlu1 %11632  ;;  %v11638_v43 = vpop.permute.xlu0 %11637  ;;  %v4233_v34 = vld [vmem:[#allocation36 + $0x8] sm:$0xff]  ;;  %v4335_v36 = vunpack.c.l.bf16 %v4334_v31 }
0x1448   : > { %10238 = vmatpush1.bf16.msra.mxu1 %v10237_v30  ;;  %v11635_v41 = vunpack.i.h.bf16 %v11633_v39  ;;  %v11634_v42 = vunpack.i.l.bf16 %v11633_v39  ;;  %v11640_v44 = vunpack.i.h.bf16 %v11638_v43  ;;  %v11639_v45 = vunpack.i.l.bf16 %v11638_v43  ;;  %v4235_v39 = vld [vmem:[#allocation36 + $0x18] sm:$0xff]  ;;  %v4574_v43 = vld [vmem:[#allocation39 + $0xc] sm:$0x7] }
0x1449   : > { %10239 = vmatprep.subr.bf16.mxu1 %v13747_v0 }
0x144a   : > { %v10246_v46 = vpack.c.bf16 %v11635_v41, %v11634_v42  ;;  %v10249_v48 = vpack.c.bf16 %v11640_v44, %v11639_v45  ;;  %v4494_v42 = vld [vmem:[#allocation39 + $0x8] sm:$0x7]  ;;  %v4575_v45 = vunpack.c.l.bf16 %v4574_v43  ;;  %v4811_v43 = vld [vmem:[#allocation48] sm:$0xff] }
0x144b   : > { %v11643_v47 = vpop.permute.xlu1 %11642  ;;  %v11648_v51 = vpop.permute.xlu0 %11647  ;;  %v4495_v44 = vunpack.c.l.bf16 %v4494_v42  ;;  %v5483_v42 = vld [vmem:[#allocation54] sm:$0xff] }
0x144c   : > { %10241 = vmatpush1.bf16.msra.mxu1 %v10240_v38  ;;  %v11645_v49 = vunpack.i.h.bf16 %v11643_v47  ;;  %v11644_v50 = vunpack.i.l.bf16 %v11643_v47  ;;  %v11650_v52 = vunpack.i.h.bf16 %v11648_v51  ;;  %v11649_v53 = vunpack.i.l.bf16 %v11648_v51  ;;  %v4234_v38 = vld [vmem:[#allocation36 + $0x10] sm:$0xff] }
0x144d   : > { %10242 = vmatprep.subr.bf16.mxu1 %v13747_v0 }
0x144e   : > { %v10252_v54 = vpack.c.bf16 %v11645_v49, %v11644_v50  ;;  %v10255_v55 = vpack.c.bf16 %v11650_v52, %v11649_v53 }
0x1450   : > { %10244 = vmatpush1.bf16.msra.mxu1 %v10243_v40  ;;  %v4337_v40 = vld [vmem:[#allocation39 + $0x4] sm:$0x7] }
0x1451   : > { %10245 = vmatprep.subr.bf16.mxu1 %v13747_v0  ;;  %v4338_v41 = vunpack.c.l.bf16 %v4337_v40 }
0x1454   : > { %10247 = vmatpush1.bf16.msra.mxu1 %v10246_v46 }
0x1455   : > { %10248 = vmatprep.subr.bf16.mxu1 %v13747_v0 }
0x1458   : > { %10250 = vmatpush1.bf16.msra.mxu1 %v10249_v48 }
0x1459   : > { %10251 = vmatprep.subr.bf16.mxu1 %v13747_v0 }
0x145c   : > { %10253 = vmatpush1.bf16.msra.mxu1 %v10252_v54  ;;  %v4039_v59 = vpop.permute.xlu1 %4038 }
0x145d   : > { %10254 = vmatprep.subr.bf16.mxu1 %v13747_v0 }
0x1460   : > { %10256 = vmatpush1.bf16.msra.mxu1 %v10255_v55  ;;  %v4663_v55 = vld [vmem:[#allocation40] sm:$0x1] }
0x1463   : > { %4109 = vmatmul.mubr.f32.vlgmr.msra.gmra.mrb[16].mxu1 %v4033_v56 }
0x1464   : > { %9816 = vmatprep.mubr.msk.f32.mxu1 %vm4236_vm10, %v4232_v26  ;;  %v9388_v26 = vld [vmem:[#allocation51] sm:$0xff]  }
0x1536   : > { %v4110_v60 = vpop.f32.mrb[16].mxu1 }
0x1537   : > { %v4111_v61 = vadd.f32 %v4110_v60, %v4039_v59  ;;  %v4112_v62 = vpop.f32.mrb[17].mxu1 }
0x1539   : > { %vm4114_vm12 = vcmp.ge.f32.partialorder %v4111_v61, 0.0  ;;  %v4115_v1 = vmul.f32 0.01, %v4111_v61 }
0x153b   : > { %v4116_v2 = vsel %vm4114_vm12, %v4111_v61, %v4115_v1  ;;  %vm4339_vm12 = vcmask 48128   ;;  %v4664_v61 = vunpack.c.l.bf16 %v4663_v55  ;;  %v4810_v55 = vld [vmem:[#allocation46] sm:$0xff] }
0x153c   : > { %v4123_v3 = vmul.f32 %v4122_v63, %v4116_v2 }
0x153d   : > { %v4668_v2 = vrot.slane %v4664_v61, %v14931_v9  ;;  %v5114_v61 = vld [vmem:[#allocation55 + $0x48] sm:$0x33] }
0x153e   : > { %4128 = vrot.lane.b32.xlu1 %v4123_v3, %s15963_s1  ;;  %4125 = vrot.lane.b32.xlu0 %v4123_v3, %s15967_s7 }
0x1542   : > { %4134 = vrot.lane.b32.xlu1 %v4123_v3, %s13770_s6  ;;  %4131 = vrot.lane.b32.xlu0 %v4123_v3, %s13771_s11  ;;  %s15971_s11 = smov 114   ;;  %s15975_s6 = smov 107  }
0x1546   : > { %4140 = vrot.lane.b32.xlu1 %v4123_v3, %s13767_s5  ;;  %4137 = vrot.lane.b32.xlu0 %v4123_v3, %s13766_s3 }
0x154a   : > { %4146 = vrot.lane.b32.xlu1 %v4123_v3, %s15969_s13  ;;  %4143 = vrot.lane.b32.xlu0 %v4123_v3, %s13772_s14  ;;  %s15970_s14 = smov 121  }
0x154e   : > { %4656 = vperm.xlu1 %11524, %v4653_v4   ;;  %4153 = vperm.xlu0 %11570, %v4150_v6  }
0x15b0   : > { %v4129_v8 = vpop.permute.xlu1 %4128  ;;  %v4126_v10 = vpop.permute.xlu0 %4125 }
0x15b1   : > { %v10258_v11 = vpack.c.bf16 %v4126_v10, %v4123_v3 }
0x15b3   : > { %10259 = vmatpush3.bf16.msra.mxu0 %v10258_v11 }
0x15b4   : > { %v4132_v12 = vpop.permute.xlu0 %4131  ;;  %10260 = vmatprep.subr.bf16.mxu0 %v13747_v0  ;;  %v4135_v16 = vpop.permute.xlu1 %4134 }
0x15b5   : > { %v10261_v13 = vpack.c.bf16 %v4132_v12, %v4129_v8  ;;  %v4696_v8 = vld [vmem:[#allocation43] sm:$0xff] }
0x15b7   : > { %10262 = vmatpush3.bf16.msra.mxu0 %v10261_v13 }
0x15b8   : > { %v4138_v17 = vpop.permute.xlu0 %4137  ;;  %10263 = vmatprep.subr.bf16.mxu0 %v13747_v0  ;;  %v4141_v20 = vpop.permute.xlu1 %4140 }
0x15b9   : > { %v10264_v18 = vpack.c.bf16 %v4138_v17, %v4135_v16 }
0x15bb   : > { %10265 = vmatpush3.bf16.msra.mxu0 %v10264_v18 }
0x15bc   : > { %v4144_v21 = vpop.permute.xlu0 %4143  ;;  %10266 = vmatprep.subr.bf16.mxu0 %v13747_v0  ;;  %v4147_v25 = vpop.permute.xlu1 %4146 }
0x15bd   : > { %v10267_v23 = vpack.c.bf16 %v4144_v21, %v4141_v20 }
0x15bf   : > { %10268 = vmatpush3.bf16.msra.mxu0 %v10267_v23 }
0x15c0   : > { %9809 = vmatprep.subr.mxu0 %v13754_v5 }
0x15c3   : > { %9810 = vmatpush3.msra.mxu0 %v4147_v25  ;;  %v4695_v25 = vld [vmem:[#allocation42] sm:$0xff] }
0x15c4   : > { %9812 = vmatmul.mubr.msk.f32.vlgmr.msra.gmra.mrb[10].mxu0 %vm2569_vm9, %v4149_v24  ;;  %9822 = vmatprep.subr.mxu0 %v13754_v5 }
0x15c5   : > { %9824 = vmatprep.mubr.msk.f32.mxu0 %vm13753_vm0, %v13754_v5  ;;  %9823 = vmatpush3.msk.msra.mxu0 %vm15854_vm15, %v4338_v41 }
0x15c6   : > { %9832 = vmatprep.subr.mxu0 %v13754_v5 }
0x15cd   : > { %v4154_v27 = vpop.permute.xlu0 %4153  ;;  %v4657_v63 = vpop.permute.xlu1 %4656 }
0x1697   : > { %v4225_v28 = vpop.f32.mrb[10].mxu0 }
0x1698   : > { %v4226_v29 = vadd.f32 %v4225_v28, %v4154_v27  ;;  %v9813_v30 = vpop.f32.mrb[11].mxu0  ;;  %v11877_v28 = vld [vmem:[#allocation51 + $0x8] sm:$0x1f]  }
0x1699   : > { %v4778_v30 = vld [vmem:[#allocation45] sm:$0x1] }
0x169a   : > { %v4230_v32 = vmul.f32 0.01, %v4226_v29  ;;  %vm4229_vm13 = vcmp.ge.f32.partialorder %v4226_v29, 0.0  ;;  %v4779_v31 = vunpack.c.l.bf16 %v4778_v30  ;;  %v11889_v30 = vld [vmem:[#allocation55 + $0x10] ss:$8 sps:$4 sm:$0xff]  }
0x169c   : > { %v4231_v33 = vsel %vm4229_vm13, %v4226_v29, %v4230_v32  ;;  %vm4913_vm13 = vcmask 1041408  }
0x169d   : > { %9814 = vmatprep.subr.mxu1 %v4231_v33 }
0x169e   : > { %9815 = vmatpush3.msra.mxu1 %v4231_v33 }
0x169f   : > { %9817 = vmatmul.mubr.msk.f32.vlgmr.msra.gmra.mrb[18].mxu1 %vm4236_vm10, %v4233_v34  ;;  %9827 = vmatprep.subr.mxu1 %v13754_v5 }
0x16a0   : > { %9819 = vmatprep.mubr.msk.f32.mxu1 %vm4236_vm10, %v4234_v38  ;;  %9828 = vmatpush3.msk.msra.mxu1 %vm15854_vm15, %v4335_v36  ;;  %v4783_v38 = vrot.slane %v4779_v31, %v14931_v9 }
0x16a1   : > { %9837 = vmatprep.subr.mxu1 %v13754_v5 }
0x16a3   : > { %9820 = vmatmul.mubr.msk.f32.gmra.mrb[20].mxu1 %vm4236_vm10, %v4235_v39 }
0x16a4   : > { %9829 = vmatprep.mubr.msk.f32.mxu1 %vm13753_vm0, %v13754_v5 }
0x1772   : > { %v9818_v46 = vpop.f32.mrb[18].mxu1 }
0x1773   : > { %v4315_v47 = vpop.f32.mrb[19].mxu1  ;;  %9825 = vmatmul.mubr.msk.f32.vlgmr.msra.gmra.mrb[12].mxu0 %vm4339_vm12, %v9818_v46 }
0x1774   : > { %9830 = vmatmul.mubr.msk.f32.vlgmr.msra.gmra.mrb[22].mxu1 %vm4339_vm12, %v4315_v47  ;;  %9833 = vmatpush3.msk.msra.mxu0 %vm15854_vm15, %v4495_v44 }
0x1775   : > { %9834 = vmatprep.mubr.msk.f32.mxu0 %vm13753_vm0, %v13754_v5  ;;  %9838 = vmatpush3.msk.msra.mxu1 %vm15854_vm15, %v4575_v45 }
0x1776   : > { %v9821_v48 = vpop.f32.mrb[20].mxu1  ;;  %9839 = vmatprep.mubr.msk.f32.mxu1 %vm13753_vm0, %v13754_v5  ;;  %10269 = vmatprep.subr.bf16.mxu0 %v13747_v0 }
0x1777   : > { %v4325_v49 = vpop.f32.mrb[21].mxu1  ;;  %10281 = vmatprep.subr.bf16.mxu1 %v13747_v0 }
0x1778   : > { %9835 = vmatmul.mubr.msk.f32.vlgmr.msra.gmra.mrb[14].mxu0 %vm4339_vm12, %v4325_v49  ;;  %9840 = vmatmul.mubr.msk.f32.vlgmr.msra.gmra.mrb[24].mxu1 %vm4339_vm12, %v9821_v48  ;;  %vm4908_vm12 = vcmask 211968  }
0x1779   : > { %9860 = vmatprep.mubr.msk.f32.mxu0 %vm13753_vm0, %v13754_v5  ;;  %9881 = vmatprep.mubr.msk.f32.mxu1 %vm13753_vm0, %v13754_v5 }
0x1846   : > { %v4413_v50 = vpop.f32.mrb[12].mxu0 }
0x1847   : > { %v4489_v51 = vpop.f32.mrb[22].mxu1  ;;  %v9826_v52 = vpop.f32.mrb[13].mxu0 }
0x1848   : > { %v4490_v53 = vadd.f32 %v4489_v51, %v4413_v50  ;;  %v9831_v54 = vpop.f32.mrb[23].mxu1 }
0x184b   : > { %v4568_v56 = vpop.f32.mrb[14].mxu0  ;;  %v4648_v57 = vpop.f32.mrb[24].mxu1 }
0x184c   : > { %v4572_v58 = vadd.f32 %v4568_v56, %v4490_v53  ;;  %v9836_v59 = vpop.f32.mrb[15].mxu0  ;;  %v9841_v60 = vpop.f32.mrb[25].mxu1 }
0x184d   : > { %v11880_v59 = vld [vmem:[#allocation55 + $0x28] ss:$8 sps:$4 sm:$0xff]   ;;  %v11881_v60 = vld [vmem:[#allocation55 + $0x3c] ss:$8 sps:$4 sm:$0xff]  }
0x184e   : > { %v4652_v62 = vadd.f32 %v4648_v57, %v4572_v58  ;;  %v4992_v57 = vld [vmem:[#allocation52] sm:$0xff]  ;;  %v11878_v58 = vld [vmem:[#allocation55 + $0x2c] ss:$8 sps:$4 sm:$0xff]  }
0x1850   : > { %v4659_v1 = vadd.f32 %v4657_v63, %v4652_v62  ;;  %v11883_v62 = vld [vmem:[#allocation55 + $0x38] ss:$8 sps:$4 sm:$0xff]   ;;  %v5124_v63 = vunpack.c.h.bf16 %v5114_v61 }
0x1852   : > { %vm4660_vm10 = vcmp.ge.f32.partialorder %v4659_v1, 0.0  ;;  %v4661_v3 = vmul.f32 0.01, %v4659_v1 }
0x1854   : > { %v4662_v4 = vsel %vm4660_vm10, %v4659_v1, %v4661_v3  ;;  %vm15201_vm10 = vmpackc.low %vm4913_vm13, %vm15855_vm11  ;;  %v5123_v1 = vunpack.c.l.bf16 %v5114_v61 }
0x1855   : > { %v4669_v6 = vmul.f32 %v4668_v2, %v4662_v4  ;;  %v4893_v2 = vld [vmem:[#allocation49] sm:$0x1] }
0x1856   : > { %v4894_v3 = vunpack.c.l.bf16 %v4893_v2 }
0x1857   : > { %4674 = vrot.lane.b32.xlu1 %v4669_v6, %s15963_s1  ;;  %4671 = vrot.lane.b32.xlu0 %v4669_v6, %s15967_s7 }
0x185b   : > { %4680 = vrot.lane.b32.xlu1 %v4669_v6, %s15970_s14  ;;  %4677 = vrot.lane.b32.xlu0 %v4669_v6, %s13766_s3 }
0x185f   : > { %4686 = vrot.lane.b32.xlu1 %v4669_v6, %s15966_s8  ;;  %4683 = vrot.lane.b32.xlu0 %v4669_v6, %s13767_s5 }
0x1863   : > { %4692 = vrot.lane.b32.xlu1 %v4669_v6, %s15971_s11  ;;  %4689 = vrot.lane.b32.xlu0 %v4669_v6, %s15968_s12 }
0x1867   : > { %4699 = vperm.xlu0 %11570, %v4696_v8  }
0x18c9   : > { %v4675_v10 = vpop.permute.xlu1 %4674  ;;  %v4672_v11 = vpop.permute.xlu0 %4671 }
0x18ca   : > { %v10270_v12 = vpack.c.bf16 %v4672_v11, %v4669_v6  ;;  %v4898_v11 = vrot.slane %v4894_v3, %v14931_v9 }
0x18cc   : > { %10271 = vmatpush3.bf16.msra.mxu0 %v10270_v12 }
0x18cd   : > { %v4678_v13 = vpop.permute.xlu0 %4677  ;;  %10272 = vmatprep.subr.bf16.mxu0 %v13747_v0  ;;  %v4681_v17 = vpop.permute.xlu1 %4680 }
0x18ce   : > { %v10273_v16 = vpack.c.bf16 %v4678_v13, %v4675_v10 }
0x18d0   : > { %10274 = vmatpush3.bf16.msra.mxu0 %v10273_v16 }
0x18d1   : > { %v4684_v18 = vpop.permute.xlu0 %4683  ;;  %10275 = vmatprep.subr.bf16.mxu0 %v13747_v0  ;;  %v4687_v21 = vpop.permute.xlu1 %4686 }
0x18d2   : > { %v10276_v20 = vpack.c.bf16 %v4684_v18, %v4681_v17  ;;  %v4993_v18 = vld [vmem:[#allocation52 + $0x8] sm:$0xff] }
0x18d4   : > { %10277 = vmatpush3.bf16.msra.mxu0 %v10276_v20  ;;  %v4994_v20 = vld [vmem:[#allocation52 + $0x10] sm:$0xff] }
0x18d5   : > { %v4690_v23 = vpop.permute.xlu0 %4689  ;;  %10278 = vmatprep.subr.bf16.mxu0 %v13747_v0  ;;  %v4693_v27 = vpop.permute.xlu1 %4692 }
0x18d6   : > { %v10279_v24 = vpack.c.bf16 %v4690_v23, %v4687_v21  ;;  %v4995_v21 = vld [vmem:[#allocation52 + $0x18] sm:$0xff]  ;;  %v11884_v23 = vld [vmem:[#allocation55 + $0x4] ss:$8 sps:$4 sm:$0xff]  }
0x18d8   : > { %10280 = vmatpush3.bf16.msra.mxu0 %v10279_v24  ;;  %v11886_v24 = vld [vmem:[#allocation55] ss:$8 sps:$4 sm:$0xff]  }
0x18d9   : > { %9858 = vmatprep.subr.mxu0 %v13754_v5 }
0x18dc   : > { %9859 = vmatpush3.msra.mxu0 %v4693_v27  ;;  %v5098_v27 = vld [vmem:[#allocation55 + $0x20] sm:$0x33] }
0x18dd   : > { %9861 = vmatmul.mubr.msk.f32.vlgmr.msra.gmra.mrb[16].mxu0 %vm2569_vm9, %v4695_v25  ;;  %10294 = vmatprep.subr.bf16.mxu0 %v9388_v26  ;;  %v11887_v25 = vld [vmem:[#allocation55 + $0x14] ss:$8 sps:$4 sm:$0xff]   ;;  %v5108_v31 = vunpack.c.h.bf16 %v5098_v27 }
0x18de   : > { %10296 = vmatpush3.bf16.msra.mxu0 %v9388_v26  ;;  %9892 = vmatprep.mubr.msk.f32.mxu0 %vm4908_vm12, %v15119_v15 }
0x18df   : > { %10299 = vmatprep.subr.msk.bf16.mxu0 %vm15201_vm10, %v11877_v28 }
0x18e2   : > { %10302 = vmatpush3.bf16.msk.msra.mxu0 %vm15201_vm10, %v11877_v28 }
0x18e3   : > { %10308 = vmatprep.subr.bf16.mxu0 %v11878_v58 }
0x18e5   : > { %9893 = vmatmul.mubr.msk.f32.vlgmr.msra.gmra.mrb[18].mxu0 %vm4908_vm12, %v15117_v14  ;;  %vm5129_vm12 = vcmask 1043456  }
0x18e6   : > { %5200 = vmatprep.mubr.f32.mxu0 %v13754_v5  ;;  %v4700_v32 = vpop.permute.xlu0 %4699  ;;  %10310 = vmatpush1.bf16.msra.mxu0 %v11880_v59 }
0x18e7   : > { %10312 = vmatprep.subr.bf16.mxu0 %v11881_v60 }
0x18ea   : > { %10314 = vmatpush1.bf16.msra.mxu0 %v11883_v62 }
0x18eb   : > { %9164 = vmatprep.subr.msk.mxu0 %vm5129_vm12, %v5124_v63 }
0x18ee   : > { %9165 = vmatpush1.msk.msra.mxu0 %vm5129_vm12, %v5123_v1 }
0x18ef   : > { %10316 = vmatprep.subr.bf16.mxu0 %v11884_v23 }
0x19b0   : > { %v4771_v33 = vpop.f32.mrb[16].mxu0 }
0x19b1   : > { %v4772_v34 = vadd.f32 %v4771_v33, %v4700_v32  ;;  %v9862_v36 = vpop.f32.mrb[17].mxu0 }
0x19b2   : > { %v11890_v36 = vld [vmem:[#allocation55 + $0x54] ss:$8 sps:$4 sm:$0xff]  }
0x19b3   : > { %vm4775_vm15 = vcmp.ge.f32.partialorder %v4772_v34, 0.0  ;;  %v4776_v15 = vmul.f32 0.01, %v4772_v34 }
0x19b5   : > { %v4777_v39 = vsel %vm4775_vm15, %v4772_v34, %v4776_v15  ;;  %vm4996_vm15 = vcmask 195584   ;;  %v5107_v34 = vunpack.c.l.bf16 %v5098_v27  ;;  %v11893_v15 = vld [vmem:[#allocation55 + $0x64] ss:$8 sps:$4 sm:$0xff]  }
0x19b6   : > { %v4784_v40 = vmul.f32 %v4783_v38, %v4777_v39  ;;  %v11892_v38 = vld [vmem:[#allocation55 + $0x50] ss:$8 sps:$4 sm:$0xff]  }
0x19b7   : > { %v5292_v39 = vld [vmem:[#allocation55 + $0x70] sm:$0x33] }
0x19b8   : > { %v15214_v41 = vpop.f32.mrb[18].mxu0  ;;  %4789 = vrot.lane.b32.xlu0 %v4784_v40, %s15963_s1  ;;  %4786 = vrot.lane.b32.xlu1 %v4784_v40, %s15967_s7 }
0x19b9   : > { %v4983_v14 = vpop.f32.mrb[19].mxu0 }
0x19bc   : > { %4795 = vrot.lane.b32.xlu0 %v4784_v40, %s15970_s14  ;;  %4792 = vrot.lane.b32.xlu1 %v4784_v40, %s13766_s3  ;;  %s15980_s3 = smov 91   ;;  %s15981_s14 = smov 92  }
0x19c0   : > { %4801 = vrot.lane.b32.xlu0 %v4784_v40, %s15966_s8  ;;  %4798 = vrot.lane.b32.xlu1 %v4784_v40, %s13767_s5  ;;  %s15978_s5 = smov 109  }
0x19c4   : > { %4807 = vrot.lane.b32.xlu0 %v4784_v40, %s15971_s11  ;;  %4804 = vrot.lane.b32.xlu1 %v4784_v40, %s15968_s12  ;;  %s15974_s12 = smov 117   ;;  %s15986_s11 = sld [smem:[#allocation155_spill]] }
0x19c8   : > { %5486 = vperm.xlu0 %11570, %v5483_v42   ;;  %4814 = vperm.xlu1 %11524, %v4811_v43   ;;  %v11896_v42 = vld [vmem:[#allocation55 + $0x7c] ss:$8 sps:$4 sm:$0xff]   ;;  %v11898_v43 = vld [vmem:[#allocation55 + $0x78] ss:$8 sps:$4 sm:$0xff]  }
0x1a2a   : > { %v4790_v44 = vpop.permute.xlu0 %4789  ;;  %v4787_v45 = vpop.permute.xlu1 %4786 }
0x1a2b   : > { %v10282_v46 = vpack.c.bf16 %v4787_v45, %v4784_v40  ;;  %v11895_v40 = vld [vmem:[#allocation55 + $0x60] ss:$8 sps:$4 sm:$0xff]   ;;  %v5390_v45 = vld [vmem:[#allocation55 + $0x98] sm:$0x33] }
0x1a2d   : > { %10283 = vmatpush3.bf16.msra.mxu1 %v10282_v46  ;;  %v11901_v46 = vld [vmem:[#allocation55 + $0x88] ss:$8 sps:$4 sm:$0xff]  }
0x1a2e   : > { %v4793_v47 = vpop.permute.xlu1 %4792  ;;  %10284 = vmatprep.subr.bf16.mxu1 %v13747_v0  ;;  %v4796_v49 = vpop.permute.xlu0 %4795 }
0x1a2f   : > { %v10285_v48 = vpack.c.bf16 %v4793_v47, %v4790_v44  ;;  %v11899_v44 = vld [vmem:[#allocation55 + $0x8c] ss:$8 sps:$4 sm:$0xff]   ;;  %v5400_v47 = vunpack.c.h.bf16 %v5390_v45 }
0x1a31   : > { %10286 = vmatpush3.bf16.msra.mxu1 %v10285_v48  ;;  %v5399_v48 = vunpack.c.l.bf16 %v5390_v45 }
0x1a32   : > { %v4799_v50 = vpop.permute.xlu1 %4798  ;;  %10287 = vmatprep.subr.bf16.mxu1 %v13747_v0  ;;  %v4802_v52 = vpop.permute.xlu0 %4801 }
0x1a33   : > { %v10288_v51 = vpack.c.bf16 %v4799_v50, %v4796_v49  ;;  %v5497_v49 = vld [vmem:[#allocation57] sm:$0x3] }
0x1a34   : > { %v5498_v50 = vunpack.c.l.bf16 %v5497_v49 }
0x1a35   : > { %10289 = vmatpush3.bf16.msra.mxu1 %v10288_v51 }
0x1a36   : > { %v4805_v53 = vpop.permute.xlu1 %4804  ;;  %10290 = vmatprep.subr.bf16.mxu1 %v13747_v0  ;;  %v4808_v56 = vpop.permute.xlu0 %4807  ;;  %v5503_v51 = vrot.slane %v5498_v50, %v14931_v9 }
0x1a37   : > { %v10291_v54 = vpack.c.bf16 %v4805_v53, %v4802_v52  ;;  %v5507_v52 = vrot.slane %v5498_v50, %v14936_v19 }
0x1a39   : > { %10292 = vmatpush3.bf16.msra.mxu1 %v10291_v54  ;;  %v5517_v60 = vrot.slane %v5507_v52, %v14931_v9 }
0x1a3a   : > { %9879 = vmatprep.subr.mxu1 %v13754_v5 }
0x1a3d   : > { %9880 = vmatpush3.msra.mxu1 %v4808_v56 }
0x1a3e   : > { %9882 = vmatmul.mubr.msk.f32.vlgmr.msra.gmra.mrb[26].mxu1 %vm2569_vm9, %v4810_v55 }
0x1a3f   : > { %9901 = vmatprep.mubr.msk.f32.mxu1 %vm4996_vm15, %v4992_v57  ;;  %v5513_v57 = vrot.slane %v5503_v51, %v14931_v9 }
0x1a47   : > { %v4815_v4 = vpop.permute.xlu1 %4814  ;;  %v5487_v53 = vpop.permute.xlu0 %5486 }
0x1b11   : > { %v4886_v6 = vpop.f32.mrb[26].mxu1 }
0x1b12   : > { %v4887_v8 = vadd.f32 %v4886_v6, %v4815_v4  ;;  %v9883_v10 = vpop.f32.mrb[27].mxu1  ;;  %v5570_v4 = vld [vmem:[#allocation60] sm:$0xff] }
0x1b14   : > { %vm4890_vm11 = vcmp.ge.f32.partialorder %v4887_v8, 0.0  ;;  %v4891_v12 = vmul.f32 0.01, %v4887_v8 }
0x1b16   : > { %v4892_v13 = vsel %vm4890_vm11, %v4887_v8, %v4891_v12  ;;  %vm5125_vm11 = vcmask 293888  }
0x1b17   : > { %v4899_v16 = vmul.f32 %v4898_v11, %v4892_v13 }
0x1b19   : > { %v10303_v17 = vpack.c.bf16 %v4983_v14, %v4899_v16  ;;  %v5301_v14 = vunpack.c.l.bf16 %v5292_v39 }
0x1b1b   : > { %10304 = vmatprep.subr.bf16.mxu1 %v10303_v17 }
0x1b1c   : > { %10306 = vmatpush3.bf16.msra.mxu1 %v10303_v17 }
0x1b1d   : > { %9899 = vmatprep.subr.mxu1 %v15214_v41 }
0x1b20   : > { %9900 = vmatpush3.msra.mxu1 %v15214_v41  ;;  %v5302_v41 = vunpack.c.h.bf16 %v5292_v39 }
0x1b21   : > { %9902 = vmatmul.mubr.msk.f32.vlgmr.msra.gmra.mrb[28].mxu1 %vm4996_vm15, %v4993_v18  ;;  %10339 = vmatprep.subr.bf16.mxu1 %v13747_v0 }
0x1b22   : > { %9904 = vmatprep.mubr.msk.f32.mxu1 %vm4996_vm15, %v4994_v20 }
0x1b25   : > { %9905 = vmatmul.mubr.msk.f32.gmra.mrb[30].mxu1 %vm4996_vm15, %v4995_v21 }
0x1b26   : > { %9925 = vmatprep.mubr.msk.f32.mxu1 %vm13753_vm0, %v13754_v5 }
0x1bf4   : > { %v9903_v26 = vpop.f32.mrb[28].mxu1 }
0x1bf5   : > { %9166 = vmatmul.mubr.msk.f32.vlgmr.msra.gmra.mrb[20].mxu0 %vm5125_vm11, %v9903_v26  ;;  %v5075_v28 = vpop.f32.mrb[29].mxu1 }
0x1bf6   : > { %10318 = vmatpush1.bf16.msra.mxu0 %v11886_v24  ;;  %5280 = vmatprep.mubr.f32.mxu0 %v13754_v5 }
0x1bf7   : > { %10320 = vmatprep.subr.bf16.mxu0 %v11887_v25 }
0x1bf8   : > { %v9906_v32 = vpop.f32.mrb[30].mxu1 }
0x1bf9   : > { %v5085_v33 = vpop.f32.mrb[31].mxu1 }
0x1bfa   : > { %10322 = vmatpush1.bf16.msra.mxu0 %v11889_v30 }
0x1bfb   : > { %9167 = vmatprep.subr.msk.mxu0 %vm5129_vm12, %v5108_v31 }
0x1bfe   : > { %9168 = vmatpush1.msk.msra.mxu0 %vm5129_vm12, %v5107_v34 }
0x1bff   : > { %9169 = vmatmul.mubr.msk.f32.vlgmr.msra.gmra.mrb[20].mxu0 %vm5125_vm11, %v5075_v28  ;;  %10324 = vmatprep.subr.bf16.mxu0 %v11890_v36 }
0x1c00   : > { %10326 = vmatpush1.bf16.msra.mxu0 %v11892_v38  ;;  %5376 = vmatprep.mubr.f32.mxu0 %v13754_v5 }
0x1c01   : > { %10328 = vmatprep.subr.bf16.mxu0 %v11893_v15 }
0x1c04   : > { %10330 = vmatpush1.bf16.msra.mxu0 %v11895_v40 }
0x1c05   : > { %9170 = vmatprep.subr.msk.mxu0 %vm5129_vm12, %v5302_v41 }
0x1c08   : > { %9171 = vmatpush1.msk.msra.mxu0 %vm5129_vm12, %v5301_v14  ;;  %v5569_v14 = vld [vmem:[#allocation58] sm:$0xff] }
0x1c09   : > { %10332 = vmatprep.subr.bf16.mxu0 %v11896_v42  ;;  %9172 = vmatmul.mubr.msk.f32.vlgmr.msra.gmra.mrb[20].mxu0 %vm5125_vm11, %v5085_v33 }
0x1c0a   : > { %10334 = vmatpush1.bf16.msra.mxu0 %v11898_v43  ;;  %5474 = vmatprep.mubr.f32.mxu0 %v13754_v5  ;;  %v5652_v43 = vld [vmem:[#allocation61] sm:$0x1] }
0x1c0b   : > { %10336 = vmatprep.subr.bf16.mxu0 %v11899_v44  ;;  %v5653_v44 = vunpack.c.l.bf16 %v5652_v43 }
0x1c0d   : > { %v5657_v49 = vrot.slane %v5653_v44, %v14931_v9 }
0x1c0e   : > { %10338 = vmatpush1.bf16.msra.mxu0 %v11901_v46 }
0x1c0f   : > { %9173 = vmatprep.subr.msk.mxu0 %vm5129_vm12, %v5400_v47 }
0x1c12   : > { %9174 = vmatpush1.msk.msra.mxu0 %vm5129_vm12, %v5399_v48 }
0x1c13   : > { %9175 = vmatmul.mubr.msk.f32.vlgmr.msra.gmra.mrb[20].mxu0 %vm5125_vm11, %v9906_v32  ;;  %vm5539_vm11 = vcmask 957440  }
0x1ce6   : > { %v5476_v54 = vpop.f32.mrb[20].mxu0 }
0x1ce7   : > { %v5489_v55 = vadd.f32 %v5487_v53, %v5476_v54  ;;  %v5478_v56 = vpop.f32.mrb[21].mxu0  ;;  %v5685_v54 = vld [vmem:[#allocation64] sm:$0xff] }
0x1ce8   : > { %v5490_v58 = vadd.f32 %v5487_v53, %v5478_v56  ;;  %v6917_v53 = vld [vmem:[#allocation69] sm:$0xff] }
0x1ce9   : > { %vm5491_vm15 = vcmp.ge.f32.partialorder %v5489_v55, 0.0  ;;  %v5493_v59 = vmul.f32 0.01, %v5489_v55 }
0x1cea   : > { %vm5492_vm8 = vcmp.ge.f32.partialorder %v5490_v58, 0.0  ;;  %v5494_v61 = vmul.f32 0.01, %v5490_v58 }
0x1ceb   : > { %v5495_v62 = vsel %vm5491_vm15, %v5489_v55, %v5493_v59  ;;  %vm5546_vm15 = vcmask 949248  }
0x1cec   : > { %v5518_v63 = vmul.f32 %v5513_v57, %v5495_v62  ;;  %v5496_v1 = vsel %vm5492_vm8, %v5490_v58, %v5494_v61  ;;  %vm5532_vm8 = vcmask 965632  }
0x1ced   : > { %v5519_v2 = vmul.f32 %v5517_v60, %v5496_v1 }
0x1cee   : > { %5521 = vrot.lane.b32.xlu1 %v5518_v63, %s15967_s7 }
0x1cef   : > { %v11651_v3 = vpack.i.bf16 %v5519_v2, %v5518_v63 }
0x1cf1   : > { %11652 = vrot.lane.b32.xlu0 %v11651_v3, %s15969_s13 }
0x1cf2   : > { %5524 = vrot.lane.b32.xlu1 %v5518_v63, %s15963_s1 }
0x1cf5   : > { %11657 = vrot.lane.b32.xlu0 %v11651_v3, %s15974_s12 }
0x1cf6   : > { %11662 = vrot.lane.b32.xlu1 %v11651_v3, %s15966_s8 }
0x1cf9   : > { %11667 = vrot.lane.b32.xlu0 %v11651_v3, %s15961_s10 }
0x1cfa   : > { %11672 = vrot.lane.b32.xlu1 %v11651_v3, %s15975_s6  ;;  %v5684_v3 = vld [vmem:[#allocation63] sm:$0xff] }
0x1cfd   : > { %5562 = vrot.lane.b32.xlu0 %v5518_v63, %s15964_s4 }
0x1cfe   : > { %5564 = vrot.lane.b32.xlu1 %v5519_v2, %s15964_s4 }
0x1d01   : > { %5573 = vperm.xlu0 %11570, %v5570_v4  }
0x1d60   : > { %v5522_v6 = vpop.permute.xlu1 %5521 }
0x1d61   : > { %v10340_v8 = vpack.c.bf16 %v5522_v6, %v5518_v63 }
0x1d63   : > { %10341 = vmatpush3.bf16.msra.mxu1 %v10340_v8  ;;  %v11653_v10 = vpop.permute.xlu0 %11652 }
0x1d64   : > { %v11655_v11 = vunpack.i.h.bf16 %v11653_v10  ;;  %v11654_v12 = vunpack.i.l.bf16 %v11653_v10  ;;  %v5525_v13 = vpop.permute.xlu1 %5524  ;;  %10342 = vmatprep.subr.bf16.mxu1 %v13747_v0 }
0x1d66   : > { %v5533_v16 = vsel %vm5532_vm8, %v11654_v12, %v11655_v11  ;;  %vm5566_vm8 = vcmask 867328  }
0x1d67   : > { %v10343_v17 = vpack.c.bf16 %v5533_v16, %v5525_v13  ;;  %v11658_v18 = vpop.permute.xlu0 %11657  ;;  %v5864_v13 = vld [vmem:[#allocation67] sm:$0xff] }
0x1d68   : > { %v11660_v20 = vunpack.i.h.bf16 %v11658_v18  ;;  %v11659_v21 = vunpack.i.l.bf16 %v11658_v18  ;;  %v11663_v23 = vpop.permute.xlu1 %11662  ;;  %9970 = vmatprep.mubr.msk.f32.mxu0 %vm3785_vm14, %v5864_v13 }
0x1d69   : > { %v11665_v24 = vunpack.i.h.bf16 %v11663_v23  ;;  %v11664_v25 = vunpack.i.l.bf16 %v11663_v23  ;;  %10344 = vmatpush3.bf16.msra.mxu1 %v10343_v17 }
0x1d6a   : > { %v5540_v26 = vsel %vm5539_vm11, %v11659_v21, %v11660_v20  ;;  %10345 = vmatprep.subr.bf16.mxu1 %v13747_v0  ;;  %vm5788_vm11 = vcmask 408576  }
0x1d6b   : > { %v5547_v27 = vsel %vm5546_vm15, %v11664_v25, %v11665_v24  ;;  %v11668_v28 = vpop.permute.xlu0 %11667  ;;  %vm6122_vm15 = vcmask 818176  }
0x1d6c   : > { %v10346_v30 = vpack.c.bf16 %v5547_v27, %v5540_v26  ;;  %v11670_v31 = vunpack.i.h.bf16 %v11668_v28  ;;  %v11669_v32 = vunpack.i.l.bf16 %v11668_v28  ;;  %v11673_v33 = vpop.permute.xlu1 %11672 }
0x1d6d   : > { %v11675_v34 = vunpack.i.h.bf16 %v11673_v33  ;;  %v11674_v36 = vunpack.i.l.bf16 %v11673_v33 }
0x1d6e   : > { %v5553_v38 = vsel %vm2520_vm4, %v11669_v32, %v11670_v31  ;;  %10347 = vmatpush3.bf16.msra.mxu1 %v10346_v30 }
0x1d6f   : > { %v5560_v15 = vsel %vm5559_vm6, %v11674_v36, %v11675_v34  ;;  %10348 = vmatprep.subr.bf16.mxu1 %v13747_v0  ;;  %v5563_v40 = vpop.permute.xlu0 %5562 }
0x1d70   : > { %v10349_v39 = vpack.c.bf16 %v5560_v15, %v5553_v38  ;;  %v5565_v41 = vpop.permute.xlu1 %5564  ;;  %v5767_v15 = vld [vmem:[#allocation66] sm:$0x1] }
0x1d71   : > { %v5567_v42 = vsel %vm5566_vm8, %v5563_v40, %v5565_v41 }
0x1d72   : > { %10350 = vmatpush3.bf16.msra.mxu1 %v10349_v39  ;;  %v5768_v39 = vunpack.c.l.bf16 %v5767_v15 }
0x1d73   : > { %9923 = vmatprep.subr.mxu1 %v13754_v5 }
0x1d74   : > { %v5772_v41 = vrot.slane %v5768_v39, %v14931_v9 }
0x1d76   : > { %9924 = vmatpush3.msra.mxu1 %v5567_v42 }
0x1d77   : > { %9926 = vmatmul.mubr.msk.f32.vlgmr.msra.gmra.mrb[32].mxu1 %vm2569_vm9, %v5569_v14  ;;  %10351 = vmatprep.subr.bf16.mxu1 %v13747_v0 }
0x1d78   : > { %9946 = vmatprep.mubr.msk.f32.mxu1 %vm13753_vm0, %v13754_v5 }
0x1d80   : > { %v5574_v45 = vpop.permute.xlu0 %5573 }
0x1e4a   : > { %v5645_v46 = vpop.f32.mrb[32].mxu1 }
0x1e4b   : > { %v5646_v47 = vadd.f32 %v5645_v46, %v5574_v45  ;;  %v9927_v48 = vpop.f32.mrb[33].mxu1 }
0x1e4d   : > { %vm5649_vm6 = vcmp.ge.f32.partialorder %v5646_v47, 0.0  ;;  %v5650_v50 = vmul.f32 0.01, %v5646_v47 }
0x1e4f   : > { %v5651_v51 = vsel %vm5649_vm6, %v5646_v47, %v5650_v50  ;;  %v5865_v47 = vld [vmem:[#allocation67 + $0x8] sm:$0xff] }
0x1e50   : > { %v5658_v52 = vmul.f32 %v5657_v49, %v5651_v51  ;;  %v5866_v49 = vld [vmem:[#allocation67 + $0x10] sm:$0xff]  ;;  %v5867_v51 = vld [vmem:[#allocation67 + $0x18] sm:$0xff] }
0x1e52   : > { %5663 = vrot.lane.b32.xlu0 %v5658_v52, %s15963_s1  ;;  %5660 = vrot.lane.b32.xlu1 %v5658_v52, %s15967_s7 }
0x1e56   : > { %5669 = vrot.lane.b32.xlu0 %v5658_v52, %s15974_s12  ;;  %5666 = vrot.lane.b32.xlu1 %v5658_v52, %s15969_s13  ;;  %s15976_s13 = sld [smem:[#allocation148_spill]] }
0x1e5a   : > { %5675 = vrot.lane.b32.xlu0 %v5658_v52, %s15961_s10  ;;  %5672 = vrot.lane.b32.xlu1 %v5658_v52, %s15966_s8  ;;  %s15979_s8 = smov 110  }
0x1e5c   : > { %v9392_v6 = vld [vmem:[%s15976_s13] sm:$0xff]   ;;  %v9421_v8 = vld [vmem:[%s15976_s13 + $0x8] sm:$0xff]   ;;  %v9422_v10 = vld [vmem:[%s15976_s13 + $0x10] sm:$0xff]  }
0x1e5d   : > { %v5780_v11 = vld [vmem:[%s15976_s13 + $0x18] sm:$0x1] }
0x1e5e   : > { %5681 = vrot.lane.b32.xlu0 %v5658_v52, %s15964_s4  ;;  %5678 = vrot.lane.b32.xlu1 %v5658_v52, %s15975_s6  ;;  %s15977_s4 = sld [smem:[#allocation151_spill]]  ;;  %v5787_v12 = vunpack.c.l.bf16 %v5780_v11 }
0x1e62   : > { %6920 = vperm.xlu0 %11570, %v6917_v53   ;;  %5688 = vperm.xlu1 %11524, %v5685_v54  }
0x1e64   : > { %v11905_v16 = vld [vmem:[%s15977_s4 + $0xdc] ss:$16 sps:$4 sm:$0xff]   ;;  %v11907_v17 = vld [vmem:[%s15977_s4 + $0xd8] ss:$16 sps:$4 sm:$0xff]   ;;  %v11902_v46 = vld [vmem:[%s15977_s4 + $0xd4] ss:$16 sps:$4 sm:$0xff]  }
0x1e65   : > { %v11911_v18 = vld [vmem:[%s15977_s4 + $0xfc] ss:$16 sps:$4 sm:$0xff]   ;;  %v11913_v20 = vld [vmem:[%s15977_s4 + $0xf8] ss:$16 sps:$4 sm:$0xff]   ;;  %v11904_v48 = vld [vmem:[%s15977_s4 + $0xd0] ss:$16 sps:$4 sm:$0xff]  }
0x1e66   : > { %v11917_v21 = vld [vmem:[%s15977_s4 + $0x11c] ss:$16 sps:$4 sm:$0xff]   ;;  %v11925_v24 = vld [vmem:[%s15977_s4 + $0x138] ss:$16 sps:$4 sm:$0xff]   ;;  %v11908_v50 = vld [vmem:[%s15977_s4 + $0xf4] ss:$16 sps:$4 sm:$0xff]  }
0x1e67   : > { %v11923_v23 = vld [vmem:[%s15977_s4 + $0x13c] ss:$16 sps:$4 sm:$0xff]   ;;  %v11931_v26 = vld [vmem:[%s15977_s4 + $0x158] ss:$16 sps:$4 sm:$0xff]   ;;  %v11914_v53 = vld [vmem:[%s15977_s4 + $0x114] ss:$16 sps:$4 sm:$0xff]  }
0x1e68   : > { %v11929_v25 = vld [vmem:[%s15977_s4 + $0x15c] ss:$16 sps:$4 sm:$0xff]   ;;  %v11937_v30 = vld [vmem:[%s15977_s4 + $0x178] ss:$16 sps:$4 sm:$0xff]   ;;  %v11916_v54 = vld [vmem:[%s15977_s4 + $0x110] ss:$16 sps:$4 sm:$0xff]  }
0x1e69   : > { %v11935_v27 = vld [vmem:[%s15977_s4 + $0x17c] ss:$16 sps:$4 sm:$0xff]   ;;  %v11949_v13 = vld [vmem:[%s15977_s4 + $0x28] ss:$16 sps:$4 sm:$0xff]  }
0x1e6a   : > { %v9209_v28 = vld [vmem:[%s15977_s4 + $0x198] sm:$0x33] }
0x1e6b   : > { %v6121_v31 = vunpack.c.h.bf16 %v9209_v28  ;;  %v6120_v32 = vunpack.c.l.bf16 %v9209_v28  ;;  %v11965_v28 = vld [vmem:[%s15977_s4 + $0x8c] ss:$16 sps:$4 sm:$0xff]   ;;  %v11973_v15 = vld [vmem:[%s15977_s4 + $0xa8] ss:$16 sps:$4 sm:$0xff]  }
0x1ec4   : > { %v5664_v55 = vpop.permute.xlu0 %5663  ;;  %v5661_v56 = vpop.permute.xlu1 %5660 }
0x1ec5   : > { %v10352_v57 = vpack.c.bf16 %v5661_v56, %v5658_v52  ;;  %v11910_v52 = vld [vmem:[%s15977_s4 + $0xf0] ss:$16 sps:$4 sm:$0xff]  }
0x1ec6   : > { %v11922_v56 = vld [vmem:[%s15977_s4 + $0x130] ss:$16 sps:$4 sm:$0xff]  }
0x1ec7   : > { %10353 = vmatpush3.bf16.msra.mxu1 %v10352_v57  ;;  %v11926_v57 = vld [vmem:[%s15977_s4 + $0x154] ss:$16 sps:$4 sm:$0xff]  }
0x1ec8   : > { %v5667_v58 = vpop.permute.xlu1 %5666  ;;  %10354 = vmatprep.subr.bf16.mxu1 %v13747_v0  ;;  %v5670_v60 = vpop.permute.xlu0 %5669 }
0x1ec9   : > { %v10355_v59 = vpack.c.bf16 %v5667_v58, %v5664_v55  ;;  %v11920_v55 = vld [vmem:[%s15977_s4 + $0x134] ss:$16 sps:$4 sm:$0xff]   ;;  %v11928_v58 = vld [vmem:[%s15977_s4 + $0x150] ss:$16 sps:$4 sm:$0xff]  }
0x1ecb   : > { %10356 = vmatpush3.bf16.msra.mxu1 %v10355_v59  ;;  %v11932_v59 = vld [vmem:[%s15977_s4 + $0x174] ss:$16 sps:$4 sm:$0xff]  }
0x1ecc   : > { %v5673_v61 = vpop.permute.xlu1 %5672  ;;  %10357 = vmatprep.subr.bf16.mxu1 %v13747_v0  ;;  %v5676_v63 = vpop.permute.xlu0 %5675 }
0x1ecd   : > { %v10358_v62 = vpack.c.bf16 %v5673_v61, %v5670_v60  ;;  %v9208_v60 = vld [vmem:[%s15977_s4 + $0x190] sm:$0x33] }
0x1ece   : > { %v11934_v61 = vld [vmem:[%s15977_s4 + $0x170] ss:$16 sps:$4 sm:$0xff]  }
0x1ecf   : > { %10359 = vmatpush3.bf16.msra.mxu1 %v10358_v62  ;;  %v6119_v62 = vunpack.c.h.bf16 %v9208_v60 }
0x1ed0   : > { %v5679_v1 = vpop.permute.xlu1 %5678  ;;  %10360 = vmatprep.subr.bf16.mxu1 %v13747_v0  ;;  %v5682_v4 = vpop.permute.xlu0 %5681 }
0x1ed1   : > { %v10361_v2 = vpack.c.bf16 %v5679_v1, %v5676_v63  ;;  %v6118_v63 = vunpack.c.l.bf16 %v9208_v60  ;;  %v11938_v1 = vld [vmem:[%s15977_s4 + $0x4] ss:$16 sps:$4 sm:$0xff]   ;;  %v12000_v60 = vld [vmem:[%s15977_s4 + $0x220] ss:$16 sps:$4 sm:$0xff]  }
0x1ed3   : > { %10362 = vmatpush3.bf16.msra.mxu1 %v10361_v2  ;;  %v11941_v2 = vld [vmem:[%s15977_s4 + $0xc] ss:$16 sps:$4 sm:$0xff]  }
0x1ed4   : > { %9944 = vmatprep.subr.mxu1 %v13754_v5 }
0x1ed7   : > { %9945 = vmatpush3.msra.mxu1 %v5682_v4  ;;  %v11943_v4 = vld [vmem:[%s15977_s4 + $0x8] ss:$16 sps:$4 sm:$0xff]  }
0x1ed8   : > { %9947 = vmatmul.mubr.msk.f32.vlgmr.msra.gmra.mrb[34].mxu1 %vm2569_vm9, %v5684_v3  ;;  %10363 = vmatprep.subr.bf16.mxu1 %v13747_v0  ;;  %v11940_v3 = vld [vmem:[%s15977_s4] ss:$16 sps:$4 sm:$0xff]  }
0x1ed9   : > { %10365 = vmatpush3.bf16.msra.mxu1 %v9392_v6  ;;  %9963 = vmatprep.mubr.msk.f32.mxu1 %vm13753_vm0, %v13754_v5  ;;  %v11944_v6 = vld [vmem:[%s15977_s4 + $0x24] ss:$16 sps:$4 sm:$0xff]  }
0x1eda   : > { %10366 = vmatprep.subr.bf16.mxu1 %v13747_v0 }
0x1edd   : > { %10368 = vmatpush3.bf16.msra.mxu1 %v9421_v8  ;;  %v11947_v8 = vld [vmem:[%s15977_s4 + $0x2c] ss:$16 sps:$4 sm:$0xff]  }
0x1ede   : > { %10369 = vmatprep.subr.bf16.mxu1 %v13747_v0 }
0x1ee1   : > { %10371 = vmatpush3.bf16.msra.mxu1 %v9422_v10  ;;  %v5689_v34 = vpop.permute.xlu1 %5688 }
0x1ee2   : > { %9961 = vmatprep.subr.mxu1 %v13754_v5 }
0x1ee5   : > { %9962 = vmatpush3.msk.msra.mxu1 %vm4913_vm13, %v5787_v12  ;;  %v11946_v12 = vld [vmem:[%s15977_s4 + $0x20] ss:$16 sps:$4 sm:$0xff]  }
0x1ee6   : > { %9964 = vmatmul.mubr.msk.f32.vlgmr.msra.gmra.mrb[36].mxu1 %vm5788_vm11, %v15068_v35  ;;  %10401 = vmatprep.subr.bf16.mxu1 %v11905_v16  ;;  %v11919_v35 = vld [vmem:[%s15977_s4 + $0x118] ss:$16 sps:$4 sm:$0xff]   ;;  %v11950_v16 = vld [vmem:[%s15977_s4 + $0x44] ss:$16 sps:$4 sm:$0xff]  }
0x1ee7   : > { %6273 = vmatprep.mubr.f32.mxu1 %v13754_v5  ;;  %10403 = vmatpush1.bf16.msra.mxu1 %v11907_v17  ;;  %v11953_v17 = vld [vmem:[%s15977_s4 + $0x4c] ss:$16 sps:$4 sm:$0xff]  }
0x1ee8   : > { %10405 = vmatprep.subr.bf16.mxu1 %v11911_v18 }
0x1eeb   : > { %10407 = vmatpush1.bf16.msra.mxu1 %v11913_v20 }
0x1eec   : > { %10409 = vmatprep.subr.bf16.mxu1 %v11917_v21  ;;  %v11952_v21 = vld [vmem:[%s15977_s4 + $0x40] ss:$16 sps:$4 sm:$0xff]  }
0x1eef   : > { %10411 = vmatpush1.bf16.msra.mxu1 %v11919_v35  ;;  %v11955_v35 = vld [vmem:[%s15977_s4 + $0x48] ss:$16 sps:$4 sm:$0xff]  }
0x1ef0   : > { %10413 = vmatprep.subr.bf16.mxu1 %v11923_v23  ;;  %v11956_v23 = vld [vmem:[%s15977_s4 + $0x64] ss:$16 sps:$4 sm:$0xff]  }
0x1ef3   : > { %10415 = vmatpush1.bf16.msra.mxu1 %v11925_v24  ;;  %v11959_v24 = vld [vmem:[%s15977_s4 + $0x6c] ss:$16 sps:$4 sm:$0xff]  }
0x1ef4   : > { %10417 = vmatprep.subr.bf16.mxu1 %v11929_v25  ;;  %v11958_v25 = vld [vmem:[%s15977_s4 + $0x60] ss:$16 sps:$4 sm:$0xff]  }
0x1ef7   : > { %10419 = vmatpush1.bf16.msra.mxu1 %v11931_v26  ;;  %v11961_v26 = vld [vmem:[%s15977_s4 + $0x68] ss:$16 sps:$4 sm:$0xff]  }
0x1ef8   : > { %10421 = vmatprep.subr.bf16.mxu1 %v11935_v27  ;;  %v11962_v27 = vld [vmem:[%s15977_s4 + $0x84] ss:$16 sps:$4 sm:$0xff]  }
0x1efb   : > { %10423 = vmatpush1.bf16.msra.mxu1 %v11937_v30  ;;  %v11964_v30 = vld [vmem:[%s15977_s4 + $0x80] ss:$16 sps:$4 sm:$0xff]  }
0x1efc   : > { %9213 = vmatprep.subr.msk.mxu1 %vm5129_vm12, %v6121_v31  ;;  %v11967_v31 = vld [vmem:[%s15977_s4 + $0x88] ss:$16 sps:$4 sm:$0xff]  }
0x1eff   : > { %9214 = vmatpush1.msk.msra.mxu1 %vm5129_vm12, %v6120_v32  ;;  %v11968_v32 = vld [vmem:[%s15977_s4 + $0xa4] ss:$16 sps:$4 sm:$0xff]  }
0x1f00   : > { %10449 = vmatprep.subr.bf16.mxu1 %v11941_v2  ;;  %v9247_v2 = vld [vmem:[%s15977_s4 + $0x268] sm:$0x33] }
0x1fab   : > { %v5760_v33 = vpop.f32.mrb[34].mxu1 }
0x1fac   : > { %v9948_v36 = vpop.f32.mrb[35].mxu1  ;;  %v5761_v38 = vadd.f32 %v5760_v33, %v5689_v34  ;;  %v11971_v33 = vld [vmem:[%s15977_s4 + $0xac] ss:$16 sps:$4 sm:$0xff]   ;;  %v5989_v34 = vld [vmem:[%s15977_s4 + $0xc0] sm:$0x33] }
0x1fad   : > { %v5990_v36 = vld [vmem:[%s15977_s4 + $0xc8] sm:$0x33]  ;;  %v6040_v39 = vunpack.c.h.bf16 %v5989_v34 }
0x1fae   : > { %v5765_v40 = vmul.f32 0.01, %v5761_v38  ;;  %vm5764_vm13 = vcmp.ge.f32.partialorder %v5761_v38, 0.0 }
0x1fb0   : > { %v5766_v14 = vsel %vm5764_vm13, %v5761_v38, %v5765_v40  ;;  %v11970_v38 = vld [vmem:[%s15977_s4 + $0xa0] ss:$16 sps:$4 sm:$0xff]   ;;  %v6042_v40 = vunpack.c.h.bf16 %v5990_v36  ;;  %vm15982_vm13 = vcmask 744448  }
0x1fb1   : > { %v5773_v42 = vmul.f32 %v5772_v41, %v5766_v14  ;;  %v6039_v41 = vunpack.c.l.bf16 %v5989_v34  ;;  %v6041_v14 = vunpack.c.l.bf16 %v5990_v36  ;;  %v12037_v34 = vld [vmem:[%s15977_s4 + $0x2fc] ss:$16 sps:$4 sm:$0xff]   ;;  %v12036_v36 = vld [vmem:[%s15977_s4 + $0x2f0] ss:$16 sps:$4 sm:$0xff]  }
0x1fb9   : > { %v5860_v43 = vpop.f32.mrb[36].mxu1 }
0x1fba   : > { %v10372_v44 = vpack.c.bf16 %v5860_v43, %v5773_v42  ;;  %v9965_v45 = vpop.f32.mrb[37].mxu1  ;;  %v11974_v42 = vld [vmem:[%s15977_s4 + $0x1a4] ss:$16 sps:$4 sm:$0xff]   ;;  %v11977_v43 = vld [vmem:[%s15977_s4 + $0x1ac] ss:$16 sps:$4 sm:$0xff]  }
0x1fbb   : > { %v11979_v45 = vld [vmem:[%s15977_s4 + $0x1a8] ss:$16 sps:$4 sm:$0xff]  }
0x1fbc   : > { %10373 = vmatprep.subr.bf16.mxu0 %v10372_v44 }
0x1fbd   : > { %10375 = vmatpush3.bf16.msra.mxu0 %v10372_v44  ;;  %v11976_v44 = vld [vmem:[%s15977_s4 + $0x1a0] ss:$16 sps:$4 sm:$0xff]  }
0x1fbe   : > { %10377 = vmatprep.subr.bf16.mxu0 %v11902_v46  ;;  %v11980_v46 = vld [vmem:[%s15977_s4 + $0x1c4] ss:$16 sps:$4 sm:$0xff]  }
0x1fc0   : > { %9971 = vmatmul.mubr.msk.f32.vlgmr.msra.gmra.mrb[22].mxu0 %vm3785_vm14, %v5865_v47  ;;  %v11983_v47 = vld [vmem:[%s15977_s4 + $0x1cc] ss:$16 sps:$4 sm:$0xff]  }
0x1fc1   : > { %9973 = vmatprep.mubr.msk.f32.mxu0 %vm3785_vm14, %v5866_v49  ;;  %10379 = vmatpush1.bf16.msra.mxu0 %v11904_v48  ;;  %v11982_v48 = vld [vmem:[%s15977_s4 + $0x1c0] ss:$16 sps:$4 sm:$0xff]   ;;  %v11985_v49 = vld [vmem:[%s15977_s4 + $0x1c8] ss:$16 sps:$4 sm:$0xff]  }
0x1fc2   : > { %10381 = vmatprep.subr.bf16.mxu0 %v11908_v50  ;;  %v11986_v50 = vld [vmem:[%s15977_s4 + $0x1e4] ss:$16 sps:$4 sm:$0xff]  }
0x1fc4   : > { %9974 = vmatmul.mubr.msk.f32.gmra.mrb[24].mxu0 %vm3785_vm14, %v5867_v51  ;;  %v11989_v51 = vld [vmem:[%s15977_s4 + $0x1ec] ss:$16 sps:$4 sm:$0xff]  }
0x1fc5   : > { %10383 = vmatpush1.bf16.msra.mxu0 %v11910_v52  ;;  %6202 = vmatprep.mubr.f32.mxu0 %v13754_v5  ;;  %v11988_v52 = vld [vmem:[%s15977_s4 + $0x1e0] ss:$16 sps:$4 sm:$0xff]  }
0x1fc6   : > { %10385 = vmatprep.subr.bf16.mxu0 %v11914_v53  ;;  %v11991_v53 = vld [vmem:[%s15977_s4 + $0x1e8] ss:$16 sps:$4 sm:$0xff]  }
0x1fc9   : > { %10387 = vmatpush1.bf16.msra.mxu0 %v11916_v54  ;;  %v11992_v54 = vld [vmem:[%s15977_s4 + $0x204] ss:$16 sps:$4 sm:$0xff]  }
0x1fca   : > { %10389 = vmatprep.subr.bf16.mxu0 %v11920_v55  ;;  %v11995_v55 = vld [vmem:[%s15977_s4 + $0x20c] ss:$16 sps:$4 sm:$0xff]  }
0x1fcd   : > { %10391 = vmatpush1.bf16.msra.mxu0 %v11922_v56  ;;  %v11994_v56 = vld [vmem:[%s15977_s4 + $0x200] ss:$16 sps:$4 sm:$0xff]  }
0x1fce   : > { %10393 = vmatprep.subr.bf16.mxu0 %v11926_v57  ;;  %v11997_v57 = vld [vmem:[%s15977_s4 + $0x208] ss:$16 sps:$4 sm:$0xff]  }
0x1fd1   : > { %10395 = vmatpush1.bf16.msra.mxu0 %v11928_v58  ;;  %v11998_v58 = vld [vmem:[%s15977_s4 + $0x224] ss:$16 sps:$4 sm:$0xff]  }
0x1fd2   : > { %10397 = vmatprep.subr.bf16.mxu0 %v11932_v59  ;;  %v12001_v59 = vld [vmem:[%s15977_s4 + $0x22c] ss:$16 sps:$4 sm:$0xff]  }
0x1fd5   : > { %10399 = vmatpush1.bf16.msra.mxu0 %v11934_v61  ;;  %v12003_v61 = vld [vmem:[%s15977_s4 + $0x228] ss:$16 sps:$4 sm:$0xff]  }
0x1fd6   : > { %9210 = vmatprep.subr.msk.mxu0 %vm5129_vm12, %v6119_v62  ;;  %v12004_v62 = vld [vmem:[%s15977_s4 + $0x244] ss:$16 sps:$4 sm:$0xff]  }
0x1fd9   : > { %9211 = vmatpush1.msk.msra.mxu0 %vm5129_vm12, %v6118_v63  ;;  %v12007_v63 = vld [vmem:[%s15977_s4 + $0x24c] ss:$16 sps:$4 sm:$0xff]  }
0x1fda   : > { %10425 = vmatprep.subr.bf16.mxu0 %v11938_v1  ;;  %v9246_v1 = vld [vmem:[%s15977_s4 + $0x260] sm:$0x33] }
0x2093   : > { %v9972_v10 = vpop.f32.mrb[22].mxu0 }
0x2094   : > { %9212 = vmatmul.mubr.msk.f32.vlgmr.msra.gmra.mrb[26].mxu0 %vm6122_vm15, %v9972_v10  ;;  %9215 = vmatmul.mubr.msk.f32.vlgmr.msra.gmra.mrb[38].mxu1 %vm6122_vm15, %v9972_v10  ;;  %v5946_v11 = vpop.f32.mrb[23].mxu0  ;;  %v6512_v10 = vunpack.c.l.bf16 %v9246_v1 }
0x2095   : > { %10427 = vmatpush1.bf16.msra.mxu0 %v11940_v3  ;;  %10451 = vmatpush1.bf16.msra.mxu1 %v11943_v4  ;;  %v12006_v3 = vld [vmem:[%s15977_s4 + $0x240] ss:$16 sps:$4 sm:$0xff]   ;;  %v12009_v4 = vld [vmem:[%s15977_s4 + $0x248] ss:$16 sps:$4 sm:$0xff]  }
0x2096   : > { %10429 = vmatprep.subr.bf16.mxu0 %v11944_v6  ;;  %10453 = vmatprep.subr.bf16.mxu1 %v11947_v8  ;;  %v6513_v6 = vunpack.c.h.bf16 %v9246_v1  ;;  %v6515_v8 = vunpack.c.h.bf16 %v9247_v2 }
0x2097   : > { %6359 = vmatprep.mubr.f32.mxu0 %v13754_v5  ;;  %6430 = vmatprep.mubr.f32.mxu1 %v13754_v5  ;;  %v15353_v18 = vpop.f32.mrb[24].mxu0 }
0x2098   : > { %v15355_v20 = vpop.f32.mrb[25].mxu0 }
0x2099   : > { %10431 = vmatpush1.bf16.msra.mxu0 %v11946_v12  ;;  %10455 = vmatpush1.bf16.msra.mxu1 %v11949_v13  ;;  %v12010_v12 = vld [vmem:[%s15977_s4 + $0x274] ss:$16 sps:$4 sm:$0xff]   ;;  %v12013_v13 = vld [vmem:[%s15977_s4 + $0x27c] ss:$16 sps:$4 sm:$0xff]  }
0x209a   : > { %10433 = vmatprep.subr.bf16.mxu0 %v11950_v16  ;;  %10457 = vmatprep.subr.bf16.mxu1 %v11953_v17  ;;  %v12012_v16 = vld [vmem:[%s15977_s4 + $0x270] ss:$16 sps:$4 sm:$0xff]   ;;  %v12015_v17 = vld [vmem:[%s15977_s4 + $0x278] ss:$16 sps:$4 sm:$0xff]  }
0x209d   : > { %10435 = vmatpush1.bf16.msra.mxu0 %v11952_v21  ;;  %10459 = vmatpush1.bf16.msra.mxu1 %v11955_v35  ;;  %v12016_v21 = vld [vmem:[%s15977_s4 + $0x294] ss:$16 sps:$4 sm:$0xff]   ;;  %v12019_v35 = vld [vmem:[%s15977_s4 + $0x29c] ss:$16 sps:$4 sm:$0xff]  }
0x209e   : > { %10437 = vmatprep.subr.bf16.mxu0 %v11956_v23  ;;  %10461 = vmatprep.subr.bf16.mxu1 %v11959_v24  ;;  %v12018_v23 = vld [vmem:[%s15977_s4 + $0x290] ss:$16 sps:$4 sm:$0xff]   ;;  %v12021_v24 = vld [vmem:[%s15977_s4 + $0x298] ss:$16 sps:$4 sm:$0xff]  }
0x20a1   : > { %10439 = vmatpush1.bf16.msra.mxu0 %v11958_v25  ;;  %10463 = vmatpush1.bf16.msra.mxu1 %v11961_v26  ;;  %v12022_v25 = vld [vmem:[%s15977_s4 + $0x2b4] ss:$16 sps:$4 sm:$0xff]   ;;  %v12025_v26 = vld [vmem:[%s15977_s4 + $0x2bc] ss:$16 sps:$4 sm:$0xff]  }
0x20a2   : > { %10441 = vmatprep.subr.bf16.mxu0 %v11962_v27  ;;  %10465 = vmatprep.subr.bf16.mxu1 %v11965_v28  ;;  %v12027_v27 = vld [vmem:[%s15977_s4 + $0x2b8] ss:$16 sps:$4 sm:$0xff]   ;;  %v12028_v28 = vld [vmem:[%s15977_s4 + $0x2d4] ss:$16 sps:$4 sm:$0xff]  }
0x20a5   : > { %10443 = vmatpush1.bf16.msra.mxu0 %v11964_v30  ;;  %10467 = vmatpush1.bf16.msra.mxu1 %v11967_v31  ;;  %v12031_v30 = vld [vmem:[%s15977_s4 + $0x2dc] ss:$16 sps:$4 sm:$0xff]   ;;  %v12030_v31 = vld [vmem:[%s15977_s4 + $0x2d0] ss:$16 sps:$4 sm:$0xff]  }
0x20a6   : > { %10445 = vmatprep.subr.bf16.mxu0 %v11968_v32  ;;  %10469 = vmatprep.subr.bf16.mxu1 %v11971_v33  ;;  %v12033_v32 = vld [vmem:[%s15977_s4 + $0x2d8] ss:$16 sps:$4 sm:$0xff]   ;;  %v12034_v33 = vld [vmem:[%s15977_s4 + $0x2f4] ss:$16 sps:$4 sm:$0xff]  }
0x20a9   : > { %10447 = vmatpush1.bf16.msra.mxu0 %v11970_v38  ;;  %10471 = vmatpush1.bf16.msra.mxu1 %v11973_v15  ;;  %v12039_v38 = vld [vmem:[%s15977_s4 + $0x2f8] ss:$16 sps:$4 sm:$0xff]   ;;  %v12040_v15 = vld [vmem:[%s15977_s4 + $0x314] ss:$16 sps:$4 sm:$0xff]  }
0x20aa   : > { %9216 = vmatprep.subr.msk.mxu0 %vm5129_vm12, %v6040_v39  ;;  %9219 = vmatprep.subr.msk.mxu1 %vm5129_vm12, %v6042_v40  ;;  %v12043_v39 = vld [vmem:[%s15977_s4 + $0x31c] ss:$16 sps:$4 sm:$0xff]   ;;  %v9278_v40 = vld [vmem:[%s15977_s4 + $0x330] sm:$0x33] }
0x20ad   : > { %9217 = vmatpush1.msk.msra.mxu0 %vm5129_vm12, %v6039_v41  ;;  %9220 = vmatpush1.msk.msra.mxu1 %vm5129_vm12, %v6041_v14  ;;  %v9279_v41 = vld [vmem:[%s15977_s4 + $0x338] sm:$0x33]  ;;  %v12042_v14 = vld [vmem:[%s15977_s4 + $0x310] ss:$16 sps:$4 sm:$0xff]  }
0x20ae   : > { %9218 = vmatmul.mubr.msk.f32.vlgmr.msra.gmra.mrb[26].mxu0 %vm6122_vm15, %v5946_v11  ;;  %9221 = vmatmul.mubr.msk.f32.vlgmr.msra.gmra.mrb[38].mxu1 %vm6122_vm15, %v5946_v11  ;;  %v6514_v11 = vunpack.c.l.bf16 %v9247_v2 }
0x20af   : > { %10473 = vmatprep.subr.bf16.mxu0 %v11974_v42  ;;  %10497 = vmatprep.subr.bf16.mxu1 %v11977_v43  ;;  %v12045_v42 = vld [vmem:[%s15977_s4 + $0x318] ss:$16 sps:$4 sm:$0xff]   ;;  %v6753_v43 = vunpack.c.h.bf16 %v9278_v40 }
0x20b0   : > { %10475 = vmatpush1.bf16.msra.mxu0 %v11976_v44  ;;  %10499 = vmatpush1.bf16.msra.mxu1 %v11979_v45  ;;  %v6755_v44 = vunpack.c.h.bf16 %v9279_v41  ;;  %v6752_v45 = vunpack.c.l.bf16 %v9278_v40 }
0x20b1   : > { %10477 = vmatprep.subr.bf16.mxu0 %v11980_v46  ;;  %10501 = vmatprep.subr.bf16.mxu1 %v11983_v47  ;;  %v6754_v46 = vunpack.c.l.bf16 %v9279_v41  ;;  %v6939_v47 = vld [vmem:[#allocation70] sm:$0xf] }
0x20b2   : > { %6595 = vmatprep.mubr.f32.mxu0 %v13754_v5  ;;  %6666 = vmatprep.mubr.f32.mxu1 %v13754_v5 }
0x20b4   : > { %10479 = vmatpush1.bf16.msra.mxu0 %v11982_v48  ;;  %10503 = vmatpush1.bf16.msra.mxu1 %v11985_v49  ;;  %v6940_v48 = vunpack.c.l.bf16 %v6939_v47 }
0x20b5   : > { %10481 = vmatprep.subr.bf16.mxu0 %v11986_v50  ;;  %10505 = vmatprep.subr.bf16.mxu1 %v11989_v51  ;;  %v6921_v50 = vpop.permute.xlu0 %6920 }
0x20b6   : > { %v6945_v49 = vrot.slane %v6940_v48, %v14931_v9 }
0x20b8   : > { %10483 = vmatpush1.bf16.msra.mxu0 %v11988_v52  ;;  %10507 = vmatpush1.bf16.msra.mxu1 %v11991_v53 }
0x20b9   : > { %10485 = vmatprep.subr.bf16.mxu0 %v11992_v54  ;;  %10509 = vmatprep.subr.bf16.mxu1 %v11995_v55 }
0x20bc   : > { %10487 = vmatpush1.bf16.msra.mxu0 %v11994_v56  ;;  %10511 = vmatpush1.bf16.msra.mxu1 %v11997_v57  ;;  %v6953_v57 = vrot.slane %v6940_v48, %v14939_v22 }
0x20bd   : > { %10489 = vmatprep.subr.bf16.mxu0 %v11998_v58  ;;  %10513 = vmatprep.subr.bf16.mxu1 %v12001_v59  ;;  %v6949_v59 = vrot.slane %v6940_v48, %v14936_v19 }
0x20be   : > { %v6973_v2 = vrot.slane %v6953_v57, %v14931_v9 }
0x20c0   : > { %10491 = vmatpush1.bf16.msra.mxu0 %v12000_v60  ;;  %10515 = vmatpush1.bf16.msra.mxu1 %v12003_v61 }
0x20c1   : > { %10493 = vmatprep.subr.bf16.mxu0 %v12004_v62  ;;  %10517 = vmatprep.subr.bf16.mxu1 %v12007_v63 }
0x20c4   : > { %10495 = vmatpush1.bf16.msra.mxu0 %v12006_v3  ;;  %10519 = vmatpush1.bf16.msra.mxu1 %v12009_v4  ;;  %v6969_v3 = vrot.slane %v6949_v59, %v14931_v9 }
0x20c5   : > { %9248 = vmatprep.subr.msk.mxu0 %vm5129_vm12, %v6513_v6  ;;  %9251 = vmatprep.subr.msk.mxu1 %vm5129_vm12, %v6515_v8 }
0x20c8   : > { %9249 = vmatpush1.msk.msra.mxu0 %vm5129_vm12, %v6512_v10  ;;  %9252 = vmatpush1.msk.msra.mxu1 %vm5129_vm12, %v6514_v11  ;;  %v6956_v11 = vsub.s32 6, %v14928_v7 }
0x20c9   : > { %10521 = vmatprep.subr.bf16.mxu0 %v12010_v12  ;;  %10545 = vmatprep.subr.bf16.mxu1 %v12013_v13 }
0x20ca   : > { %9250 = vmatmul.mubr.msk.f32.vlgmr.msra.gmra.mrb[26].mxu0 %vm6122_vm15, %v15355_v20  ;;  %9253 = vmatmul.mubr.msk.f32.vlgmr.msra.gmra.mrb[38].mxu1 %vm6122_vm15, %v15355_v20  ;;  %v12024_v20 = vld [vmem:[%s15977_s4 + $0x2b0] ss:$16 sps:$4 sm:$0xff]  }
0x20cb   : > { %10523 = vmatpush1.bf16.msra.mxu0 %v12012_v16  ;;  %10547 = vmatpush1.bf16.msra.mxu1 %v12015_v17  ;;  %v6957_v16 = vrot.slane %v6940_v48, %v6956_v11 }
0x20cc   : > { %10525 = vmatprep.subr.bf16.mxu0 %v12016_v21  ;;  %10549 = vmatprep.subr.bf16.mxu1 %v12019_v35 }
0x20cd   : > { %6835 = vmatprep.mubr.f32.mxu0 %v13754_v5  ;;  %6906 = vmatprep.mubr.f32.mxu1 %v13754_v5  ;;  %v6977_v21 = vrot.slane %v6957_v16, %v14931_v9 }
0x20cf   : > { %10527 = vmatpush1.bf16.msra.mxu0 %v12018_v23  ;;  %10551 = vmatpush1.bf16.msra.mxu1 %v12021_v24  ;;  %v7084_v24 = vld [vmem:[#allocation73] sm:$0xff] }
0x20d0   : > { %10529 = vmatprep.subr.bf16.mxu0 %v12022_v25  ;;  %10553 = vmatprep.subr.bf16.mxu1 %v12025_v26 }
0x20d3   : > { %10531 = vmatpush1.bf16.msra.mxu0 %v12024_v20  ;;  %10555 = vmatpush1.bf16.msra.mxu1 %v12027_v27 }
0x20d4   : > { %10533 = vmatprep.subr.bf16.mxu0 %v12028_v28  ;;  %10557 = vmatprep.subr.bf16.mxu1 %v12031_v30 }
0x20d7   : > { %10535 = vmatpush1.bf16.msra.mxu0 %v12030_v31  ;;  %10559 = vmatpush1.bf16.msra.mxu1 %v12033_v32 }
0x20d8   : > { %10537 = vmatprep.subr.bf16.mxu0 %v12034_v33  ;;  %10561 = vmatprep.subr.bf16.mxu1 %v12037_v34 }
0x20db   : > { %10539 = vmatpush1.bf16.msra.mxu0 %v12036_v36  ;;  %10563 = vmatpush1.bf16.msra.mxu1 %v12039_v38 }
0x20dc   : > { %10541 = vmatprep.subr.bf16.mxu0 %v12040_v15  ;;  %10565 = vmatprep.subr.bf16.mxu1 %v12043_v39 }
0x20df   : > { %10543 = vmatpush1.bf16.msra.mxu0 %v12042_v14  ;;  %10567 = vmatpush1.bf16.msra.mxu1 %v12045_v42 }
0x20e0   : > { %9280 = vmatprep.subr.msk.mxu0 %vm5129_vm12, %v6753_v43  ;;  %9283 = vmatprep.subr.msk.mxu1 %vm5129_vm12, %v6755_v44 }
0x20e3   : > { %9281 = vmatpush1.msk.msra.mxu0 %vm5129_vm12, %v6752_v45  ;;  %9284 = vmatpush1.msk.msra.mxu1 %vm5129_vm12, %v6754_v46 }
0x20e4   : > { %9282 = vmatmul.mubr.msk.f32.vlgmr.msra.gmra.mrb[26].mxu0 %vm6122_vm15, %v15353_v18  ;;  %9285 = vmatmul.mubr.msk.f32.vlgmr.msra.gmra.mrb[38].mxu1 %vm6122_vm15, %v15353_v18  ;;  %v6965_v18 = vrot.slane %v6945_v49, %v14931_v9  ;;  %vm15983_vm15 = vmmov %vm15982_vm13 }
0x20e5   : > { %10584 = vmatprep.subr.bf16.mxu1 %v13747_v0  ;;  %7157 = vmatprep.mubr.f32.mxu0 %v13754_v5 }
0x20e6   : > { %9994 = vmatprep.mubr.msk.f32.mxu1 %vm13753_vm0, %v13754_v5 }
0x21b7   : > { %v6837_v51 = vpop.f32.mrb[26].mxu0  ;;  %v6908_v52 = vpop.f32.mrb[38].mxu1 }
0x21b8   : > { %v6923_v53 = vadd.f32 %v6921_v50, %v6837_v51  ;;  %v6925_v54 = vadd.f32 %v6921_v50, %v6908_v52  ;;  %v6839_v55 = vpop.f32.mrb[27].mxu0  ;;  %v6910_v56 = vpop.f32.mrb[39].mxu1 }
0x21b9   : > { %v6924_v58 = vadd.f32 %v6921_v50, %v6839_v55  ;;  %v6926_v13 = vadd.f32 %v6921_v50, %v6910_v56 }
0x21ba   : > { %vm6927_vm12 = vcmp.ge.f32.partialorder %v6923_v53, 0.0  ;;  %v6931_v60 = vmul.f32 0.01, %v6923_v53  ;;  %v6933_v61 = vmul.f32 0.01, %v6925_v54  ;;  %vm6929_vm8 = vcmp.ge.f32.partialorder %v6925_v54, 0.0 }
0x21bb   : > { %vm6928_vm6 = vcmp.ge.f32.partialorder %v6924_v58, 0.0  ;;  %v6932_v62 = vmul.f32 0.01, %v6924_v58  ;;  %v6934_v17 = vmul.f32 0.01, %v6926_v13  ;;  %vm6930_vm11 = vcmp.ge.f32.partialorder %v6926_v13, 0.0 }
0x21bc   : > { %v6935_v63 = vsel %vm6927_vm12, %v6923_v53, %v6931_v60  ;;  %v6937_v4 = vsel %vm6929_vm8, %v6925_v54, %v6933_v61  ;;  %vm15984_vm12 = vmmov %vm15982_vm13  ;;  %vm15985_vm8 = vcmask 736256  }
0x21bd   : > { %v15459_v1 = vmul.f32 %v6965_v18, %v6935_v63  ;;  %v6936_v6 = vsel %vm6928_vm6, %v6924_v58, %v6932_v62  ;;  %v6980_v8 = vmul.f32 %v6973_v2, %v6937_v4  ;;  %v6938_v35 = vsel %vm6930_vm11, %v6926_v13, %v6934_v17  ;;  %vm15987_vm6 = vmmov %vm15985_vm8 }
0x21be   : > { %v6979_v10 = vmul.f32 %v6969_v3, %v6936_v6  ;;  %v6981_v7 = vmul.f32 %v6977_v21, %v6938_v35  ;;  %vm15988_vm11 = vmmov %vm15987_vm6 }
0x21bf   : > { %6996 = vrot.lane.b32.xlu1 %v15459_v1, %s15963_s1  ;;  %6985 = vrot.lane.b32.xlu0 %v15459_v1, %s15967_s7 }
0x21c0   : > { %v11676_v12 = vpack.i.bf16 %v6980_v8, %v6979_v10  ;;  %v11716_v23 = vpack.i.bf16 %v6981_v7, %v15459_v1 }
0x21c3   : > { %7018 = vrot.lane.b32.xlu1 %v15459_v1, %s15978_s5  ;;  %7007 = vrot.lane.b32.xlu0 %v15459_v1, %s15979_s8 }
0x21c7   : > { %7029 = vrot.lane.b32.xlu0 %v15459_v1, %s15961_s10  ;;  %11677 = vrot.lane.b32.xlu1 %v11676_v12, %s15967_s7 }
0x21cb   : > { %11687 = vrot.lane.b32.xlu0 %v11676_v12, %s15979_s8  ;;  %11682 = vrot.lane.b32.xlu1 %v11676_v12, %s15963_s1 }
0x21cf   : > { %11697 = vrot.lane.b32.xlu0 %v11676_v12, %s15961_s10  ;;  %11692 = vrot.lane.b32.xlu1 %v11676_v12, %s15978_s5 }
0x21d3   : > { %11707 = vrot.lane.b32.xlu0 %v11676_v12, %s15980_s3  ;;  %11702 = vrot.lane.b32.xlu1 %v11676_v12, %s15981_s14 }
0x21d7   : > { %11717 = vrot.lane.b32.xlu0 %v11716_v23, %s15980_s3  ;;  %11712 = vrot.lane.b32.xlu1 %v11716_v23, %s15981_s14 }
0x21db   : > { %7073 = vrot.lane.b32.xlu0 %v6980_v8, %s15962_s2  ;;  %7071 = vrot.lane.b32.xlu1 %v6979_v10, %s15962_s2 }
0x21df   : > { %7075 = vrot.lane.b32.xlu0 %v6981_v7, %s15962_s2  ;;  %7069 = vrot.lane.b32.xlu1 %v15459_v1, %s15962_s2 }
0x21e3   : > { %7087 = vperm.xlu1 %11524, %v7084_v24  }
0x2231   : > { %v6997_v25 = vpop.permute.xlu1 %6996  ;;  %v6986_v26 = vpop.permute.xlu0 %6985 }
0x2235   : > { %v7019_v20 = vpop.permute.xlu1 %7018  ;;  %v7008_v27 = vpop.permute.xlu0 %7007 }
0x2239   : > { %v7030_v28 = vpop.permute.xlu0 %7029  ;;  %v11678_v30 = vpop.permute.xlu1 %11677 }
0x223a   : > { %v11680_v31 = vunpack.i.h.bf16 %v11678_v30  ;;  %v11679_v32 = vunpack.i.l.bf16 %v11678_v30 }
0x223c   : > { %v10585_v33 = vpack.c.bf16 %v11680_v31, %v6980_v8  ;;  %v6991_v34 = vsel %vm2472_vm1, %v6986_v26, %v11679_v32  ;;  %v6992_v36 = vsel %vm2472_vm1, %v11679_v32, %v11680_v31 }
0x223d   : > { %v10570_v38 = vpack.c.bf16 %v6991_v34, %v15459_v1  ;;  %v11688_v15 = vpop.permute.xlu0 %11687  ;;  %v11683_v39 = vpop.permute.xlu1 %11682  ;;  %v10568_v40 = vpack.c.bf16 %v6992_v36, %v6979_v10 }
0x223e   : > { %v11690_v41 = vunpack.i.h.bf16 %v11688_v15  ;;  %v11689_v14 = vunpack.i.l.bf16 %v11688_v15  ;;  %v11685_v42 = vunpack.i.h.bf16 %v11683_v39  ;;  %v11684_v43 = vunpack.i.l.bf16 %v11683_v39  ;;  %10586 = vmatpush3.bf16.msra.mxu1 %v10585_v33  ;;  %v7083_v33 = vld [vmem:[#allocation72] sm:$0xff] }
0x223f   : > { %10569 = vmatprep.subr.bf16.mxu0 %v10568_v40  ;;  %10587 = vmatprep.subr.bf16.mxu1 %v13747_v0 }
0x2240   : > { %v7013_v44 = vsel %vm2496_vm2, %v7008_v27, %v11689_v14  ;;  %v10588_v45 = vpack.c.bf16 %v11690_v41, %v11685_v42  ;;  %v7002_v46 = vsel %vm2484_vm3, %v6997_v25, %v11684_v43  ;;  %10571 = vmatpush1.bf16.msra.mxu0 %v10570_v38  ;;  %v7003_v47 = vsel %vm2484_vm3, %v11684_v43, %v11685_v42  ;;  %v7243_v38 = vld [vmem:[%s15986_s11] sm:$0x7] }
0x2241   : > { %v10574_v48 = vpack.c.bf16 %v7013_v44, %v7002_v46  ;;  %v11698_v49 = vpop.permute.xlu0 %11697  ;;  %v11693_v50 = vpop.permute.xlu1 %11692  ;;  %v7014_v51 = vsel %vm2496_vm2, %v11689_v14, %v11690_v41  ;;  %v7244_v15 = vunpack.c.l.bf16 %v7243_v38 }
0x2242   : > { %v11700_v52 = vunpack.i.h.bf16 %v11698_v49  ;;  %v11699_v53 = vunpack.i.l.bf16 %v11698_v49  ;;  %v11695_v54 = vunpack.i.h.bf16 %v11693_v50  ;;  %v11694_v55 = vunpack.i.l.bf16 %v11693_v50  ;;  %10589 = vmatpush3.bf16.msra.mxu1 %v10588_v45 }
0x2243   : > { %v10572_v56 = vpack.c.bf16 %v7014_v51, %v7003_v47  ;;  %10590 = vmatprep.subr.bf16.mxu1 %v13747_v0  ;;  %v7249_v39 = vrot.slane %v7244_v15, %v14931_v9  ;;  %v7257_v51 = vrot.slane %v7244_v15, %v14939_v22 }
0x2244   : > { %v7035_v18 = vsel %vm2520_vm4, %v7030_v28, %v11699_v53  ;;  %v10591_v57 = vpack.c.bf16 %v11700_v52, %v11695_v54  ;;  %v7024_v58 = vsel %vm2508_vm5, %v7019_v20, %v11694_v55  ;;  %v7025_v59 = vsel %vm2508_vm5, %v11694_v55, %v11695_v54 }
0x2245   : > { %v10578_v60 = vpack.c.bf16 %v7035_v18, %v7024_v58  ;;  %10573 = vmatprep.subr.bf16.mxu0 %v10572_v56  ;;  %v11708_v61 = vpop.permute.xlu0 %11707  ;;  %v11703_v62 = vpop.permute.xlu1 %11702  ;;  %v7036_v63 = vsel %vm2520_vm4, %v11699_v53, %v11700_v52  ;;  %v7264_v45 = vrot.slane %v7249_v39, %v14931_v9  ;;  %v7253_v52 = vrot.slane %v7244_v15, %v14936_v19 }
0x2246   : > { %10575 = vmatpush1.bf16.msra.mxu0 %v10574_v48  ;;  %v11710_v1 = vunpack.i.h.bf16 %v11708_v61  ;;  %v11709_v2 = vunpack.i.l.bf16 %v11708_v61  ;;  %v11705_v3 = vunpack.i.h.bf16 %v11703_v62  ;;  %v11704_v4 = vunpack.i.l.bf16 %v11703_v62  ;;  %10592 = vmatpush3.bf16.msra.mxu1 %v10591_v57  ;;  %v7368_v61 = vld [vmem:[#allocation76] sm:$0xff] }
0x2247   : > { %v10576_v6 = vpack.c.bf16 %v7036_v63, %v7025_v59  ;;  %10593 = vmatprep.subr.bf16.mxu1 %v13747_v0  ;;  %v7272_v55 = vrot.slane %v7257_v51, %v14931_v9  ;;  %v7268_v56 = vrot.slane %v7253_v52, %v14931_v9 }
0x2248   : > { %v7050_v8 = vsel %vm2532_vm7, %v11704_v4, %v11705_v3  ;;  %v7064_v10 = vsel %vm15982_vm13, %v11709_v2, %v11710_v1 }
0x2249   : > { %10577 = vmatprep.subr.bf16.mxu0 %v10576_v6  ;;  %v11718_v11 = vpop.permute.xlu0 %11717  ;;  %v11713_v12 = vpop.permute.xlu1 %11712  ;;  %v10580_v13 = vpack.c.bf16 %v7064_v10, %v7050_v8 }
0x224a   : > { %10579 = vmatpush1.bf16.msra.mxu0 %v10578_v60  ;;  %v11720_v16 = vunpack.i.h.bf16 %v11718_v11  ;;  %v11719_v17 = vunpack.i.l.bf16 %v11718_v11  ;;  %v11715_v21 = vunpack.i.h.bf16 %v11713_v12  ;;  %v11714_v35 = vunpack.i.l.bf16 %v11713_v12 }
0x224b   : > { %10581 = vmatprep.subr.bf16.mxu0 %v10580_v13 }
0x224c   : > { %v7065_v7 = vsel %vm15983_vm15, %v11710_v1, %v11720_v16  ;;  %v7063_v23 = vsel %vm15984_vm12, %v11719_v17, %v11709_v2  ;;  %v7051_v24 = vsel %vm2532_vm7, %v11705_v3, %v11715_v21  ;;  %v7049_v25 = vsel %vm2532_vm7, %v11714_v35, %v11704_v4 }
0x224d   : > { %v10594_v26 = vpack.c.bf16 %v7065_v7, %v7051_v24  ;;  %v10582_v20 = vpack.c.bf16 %v7063_v23, %v7049_v25  ;;  %v7074_v27 = vpop.permute.xlu0 %7073  ;;  %v7072_v28 = vpop.permute.xlu1 %7071 }
0x224e   : > { %v7078_v30 = vsel %vm15985_vm8, %v7072_v28, %v7074_v27  ;;  %vm15989_vm8 = vcmask 744448  }
0x224f   : > { %10583 = vmatpush1.bf16.msra.mxu0 %v10582_v20  ;;  %10595 = vmatpush3.bf16.msra.mxu1 %v10594_v26 }
0x2250   : > { %7109 = vmatprep.subr.mxu0 %v7078_v30  ;;  %9992 = vmatprep.subr.mxu1 %v13754_v5 }
0x2251   : > { %v7076_v31 = vpop.permute.xlu0 %7075  ;;  %v7070_v32 = vpop.permute.xlu1 %7069 }
0x2252   : > { %v7079_v34 = vsel %vm15987_vm6, %v7074_v27, %v7076_v31  ;;  %v7077_v36 = vsel %vm15988_vm11, %v7070_v32, %v7072_v28  ;;  %vm15990_vm6 = vmmov %vm15989_vm8 }
0x2253   : > { %7110 = vmatpush1.msra.mxu0 %v7077_v36  ;;  %9993 = vmatpush3.msra.mxu1 %v7079_v34 }
0x2254   : > { %9286 = vmatmul.mubr.msk.f32.vlgmr.msra.gmra.mrb[28].mxu0 %vm2569_vm9, %v7083_v33  ;;  %9995 = vmatmul.mubr.msk.f32.vlgmr.msra.gmra.mrb[40].mxu1 %vm2569_vm9, %v7083_v33 }
0x2255   : > { %10612 = vmatprep.subr.bf16.mxu1 %v13747_v0  ;;  %10015 = vmatprep.mubr.msk.f32.mxu1 %vm13753_vm0, %v13754_v5 }
0x2256   : > { %7441 = vmatprep.mubr.f32.mxu0 %v13754_v5 }
0x2262   : > { %v7088_v40 = vpop.permute.xlu1 %7087 }
0x2327   : > { %v7159_v41 = vpop.f32.mrb[28].mxu0  ;;  %v7230_v14 = vpop.f32.mrb[40].mxu1 }
0x2328   : > { %v7160_v42 = vadd.f32 %v7159_v41, %v7088_v40  ;;  %v7161_v43 = vpop.f32.mrb[29].mxu0  ;;  %v9996_v44 = vpop.f32.mrb[41].mxu1  ;;  %v7231_v47 = vadd.f32 %v7230_v14, %v7088_v40 }
0x2329   : > { %v7162_v48 = vadd.f32 %v7161_v43, %v7088_v40 }
0x232a   : > { %vm7234_vm13 = vcmp.ge.f32.partialorder %v7160_v42, 0.0  ;;  %v7237_v46 = vmul.f32 0.01, %v7160_v42  ;;  %v7239_v53 = vmul.f32 0.01, %v7231_v47  ;;  %vm7236_vm15 = vcmp.ge.f32.partialorder %v7231_v47, 0.0 }
0x232b   : > { %v7238_v54 = vmul.f32 0.01, %v7162_v48  ;;  %vm7235_vm12 = vcmp.ge.f32.partialorder %v7162_v48, 0.0 }
0x232c   : > { %v7240_v49 = vsel %vm7234_vm13, %v7160_v42, %v7237_v46  ;;  %v7242_v18 = vsel %vm7236_vm15, %v7231_v47, %v7239_v53  ;;  %vm15991_vm13 = vmmov %vm15988_vm11 }
0x232d   : > { %v15523_v50 = vmul.f32 %v7264_v45, %v7240_v49  ;;  %v7241_v57 = vsel %vm7235_vm12, %v7162_v48, %v7238_v54  ;;  %v7275_v58 = vmul.f32 %v7272_v55, %v7242_v18 }
0x232e   : > { %v7274_v59 = vmul.f32 %v7268_v56, %v7241_v57 }
0x232f   : > { %7290 = vrot.lane.b32.xlu0 %v15523_v50, %s15963_s1  ;;  %7279 = vrot.lane.b32.xlu1 %v15523_v50, %s15967_s7 }
0x2330   : > { %v11721_v60 = vpack.i.bf16 %v7275_v58, %v7274_v59 }
0x2333   : > { %7312 = vrot.lane.b32.xlu0 %v15523_v50, %s15978_s5  ;;  %7301 = vrot.lane.b32.xlu1 %v15523_v50, %s15979_s8 }
0x2337   : > { %7334 = vrot.lane.b32.xlu0 %v15523_v50, %s15981_s14  ;;  %7323 = vrot.lane.b32.xlu1 %v15523_v50, %s15961_s10 }
0x233b   : > { %11722 = vrot.lane.b32.xlu0 %v11721_v60, %s15967_s7  ;;  %11732 = vrot.lane.b32.xlu1 %v11721_v60, %s15979_s8 }
0x233f   : > { %11727 = vrot.lane.b32.xlu0 %v11721_v60, %s15963_s1  ;;  %11742 = vrot.lane.b32.xlu1 %v11721_v60, %s15961_s10 }
0x2343   : > { %11737 = vrot.lane.b32.xlu0 %v11721_v60, %s15978_s5  ;;  %11752 = vrot.lane.b32.xlu1 %v11721_v60, %s15980_s3 }
0x2347   : > { %11747 = vrot.lane.b32.xlu0 %v11721_v60, %s15981_s14  ;;  %7345 = vrot.lane.b32.xlu1 %v15523_v50, %s15980_s3 }
0x234b   : > { %7358 = vrot.lane.b32.xlu0 %v7274_v59, %s15962_s2  ;;  %7360 = vrot.lane.b32.xlu1 %v7275_v58, %s15962_s2 }
0x234f   : > { %7356 = vrot.lane.b32.xlu0 %v15523_v50, %s15962_s2  ;;  %7371 = vperm.xlu1 %11524, %v7368_v61  }
0x23a1   : > { %v7291_v62 = vpop.permute.xlu0 %7290  ;;  %v7280_v63 = vpop.permute.xlu1 %7279 }
0x23a5   : > { %v7313_v1 = vpop.permute.xlu0 %7312  ;;  %v7302_v2 = vpop.permute.xlu1 %7301 }
0x23a9   : > { %v7335_v3 = vpop.permute.xlu0 %7334  ;;  %v7324_v4 = vpop.permute.xlu1 %7323 }
0x23ad   : > { %v11723_v6 = vpop.permute.xlu0 %11722  ;;  %v11733_v8 = vpop.permute.xlu1 %11732 }
0x23ae   : > { %v11725_v10 = vunpack.i.h.bf16 %v11723_v6  ;;  %v11724_v11 = vunpack.i.l.bf16 %v11723_v6  ;;  %v11735_v12 = vunpack.i.h.bf16 %v11733_v8  ;;  %v11734_v13 = vunpack.i.l.bf16 %v11733_v8  ;;  %v12051_v6 = vld [vmem:[#allocation79 + $0x1c] ss:$12 sps:$4 sm:$0xff]   ;;  %v12050_v8 = vld [vmem:[#allocation79 + $0x20] ss:$12 sps:$4 sm:$0xff]  }
0x23b0   : > { %v10613_v16 = vpack.c.bf16 %v11725_v10, %v7275_v58  ;;  %v7285_v17 = vsel %vm2472_vm1, %v7280_v63, %v11724_v11  ;;  %v7286_v21 = vsel %vm2472_vm1, %v11724_v11, %v11725_v10  ;;  %v7307_v20 = vsel %vm2496_vm2, %v7302_v2, %v11734_v13  ;;  %v12046_v63 = vld [vmem:[#allocation79 + $0x8] ss:$12 sps:$4 sm:$0xff]   ;;  %v12047_v2 = vld [vmem:[#allocation79 + $0x4] ss:$12 sps:$4 sm:$0xff]  }
0x23b1   : > { %v10598_v35 = vpack.c.bf16 %v7285_v17, %v15523_v50  ;;  %v11728_v7 = vpop.permute.xlu0 %11727  ;;  %v11743_v23 = vpop.permute.xlu1 %11742  ;;  %v10596_v24 = vpack.c.bf16 %v7286_v21, %v7274_v59  ;;  %v7308_v28 = vsel %vm2496_vm2, %v11734_v13, %v11735_v12  ;;  %v12053_v10 = vld [vmem:[#allocation79 + $0x18] ss:$12 sps:$4 sm:$0xff]   ;;  %v12055_v11 = vld [vmem:[#allocation79 + $0x34] ss:$12 sps:$4 sm:$0xff]   ;;  %v12057_v13 = vld [vmem:[#allocation79 + $0x30] ss:$12 sps:$4 sm:$0xff]  }
0x23b2   : > { %v11730_v25 = vunpack.i.h.bf16 %v11728_v7  ;;  %v11729_v26 = vunpack.i.l.bf16 %v11728_v7  ;;  %10614 = vmatpush3.bf16.msra.mxu1 %v10613_v16  ;;  %v11744_v27 = vunpack.i.l.bf16 %v11743_v23  ;;  %v11745_v32 = vunpack.i.h.bf16 %v11743_v23  ;;  %v12059_v16 = vld [vmem:[#allocation79 + $0x4c] ss:$12 sps:$4 sm:$0xff]   ;;  %v12058_v17 = vld [vmem:[#allocation79 + $0x50] ss:$12 sps:$4 sm:$0xff]   ;;  %v12061_v21 = vld [vmem:[#allocation79 + $0x48] ss:$12 sps:$4 sm:$0xff]  }
0x23b3   : > { %10597 = vmatprep.subr.bf16.mxu0 %v10596_v24  ;;  %10615 = vmatprep.subr.bf16.mxu1 %v13747_v0  ;;  %v12062_v7 = vld [vmem:[#allocation79 + $0x68] ss:$12 sps:$4 sm:$0xff]   ;;  %v12065_v23 = vld [vmem:[#allocation79 + $0x60] ss:$12 sps:$4 sm:$0xff]  }
0x23b4   : > { %v7296_v30 = vsel %vm2484_vm3, %v7291_v62, %v11729_v26  ;;  %v10616_v31 = vpack.c.bf16 %v11735_v12, %v11730_v25  ;;  %10599 = vmatpush1.bf16.msra.mxu0 %v10598_v35  ;;  %v7297_v33 = vsel %vm2484_vm3, %v11729_v26, %v11730_v25  ;;  %v7329_v41 = vsel %vm2520_vm4, %v7324_v4, %v11744_v27  ;;  %v7367_v62 = vld [vmem:[#allocation75] sm:$0xff]  ;;  %v12054_v12 = vld [vmem:[#allocation79 + $0x38] ss:$12 sps:$4 sm:$0xff]   ;;  %v12067_v24 = vld [vmem:[#allocation79 + $0x7c] ss:$12 sps:$4 sm:$0xff]  }
0x23b5   : > { %v10602_v34 = vpack.c.bf16 %v7307_v20, %v7296_v30  ;;  %v11738_v36 = vpop.permute.xlu0 %11737  ;;  %v11753_v38 = vpop.permute.xlu1 %11752  ;;  %v10600_v15 = vpack.c.bf16 %v7308_v28, %v7297_v33  ;;  %v7330_v46 = vsel %vm2520_vm4, %v11744_v27, %v11745_v32  ;;  %v12049_v4 = vld [vmem:[#allocation79] ss:$12 sps:$4 sm:$0xff]   ;;  %v12063_v35 = vld [vmem:[#allocation79 + $0x64] ss:$12 sps:$4 sm:$0xff]   ;;  %v7527_v33 = vld [vmem:[#allocation78] sm:$0x7] }
0x23b6   : > { %v11740_v39 = vunpack.i.h.bf16 %v11738_v36  ;;  %v11739_v40 = vunpack.i.l.bf16 %v11738_v36  ;;  %10617 = vmatpush3.bf16.msra.mxu1 %v10616_v31  ;;  %v11755_v14 = vunpack.i.h.bf16 %v11753_v38  ;;  %v11754_v42 = vunpack.i.l.bf16 %v11753_v38  ;;  %v12066_v25 = vld [vmem:[#allocation79 + $0x80] ss:$12 sps:$4 sm:$0xff]   ;;  %v12069_v26 = vld [vmem:[#allocation79 + $0x78] ss:$12 sps:$4 sm:$0xff]   ;;  %v12073_v28 = vld [vmem:[#allocation79 + $0x90] ss:$12 sps:$4 sm:$0xff]  }
0x23b7   : > { %10601 = vmatprep.subr.bf16.mxu0 %v10600_v15  ;;  %10618 = vmatprep.subr.bf16.mxu1 %v13747_v0  ;;  %v12071_v20 = vld [vmem:[#allocation79 + $0x94] ss:$12 sps:$4 sm:$0xff]   ;;  %v12070_v27 = vld [vmem:[#allocation79 + $0x98] ss:$12 sps:$4 sm:$0xff]  }
0x23b8   : > { %v7318_v43 = vsel %vm2508_vm5, %v7313_v1, %v11739_v40  ;;  %v10619_v44 = vpack.c.bf16 %v11745_v32, %v11740_v39  ;;  %10603 = vmatpush1.bf16.msra.mxu0 %v10602_v34  ;;  %v7319_v45 = vsel %vm2508_vm5, %v11739_v40, %v11740_v39  ;;  %v7352_v53 = vsel %vm15989_vm8, %v11754_v42, %v11755_v14  ;;  %v12075_v30 = vld [vmem:[#allocation79 + $0xac] ss:$12 sps:$4 sm:$0x1f]   ;;  %v12074_v31 = vld [vmem:[#allocation79 + $0xb0] ss:$12 sps:$4 sm:$0x1f]  }
0x23b9   : > { %v10606_v47 = vpack.c.bf16 %v7329_v41, %v7318_v43  ;;  %v11748_v48 = vpop.permute.xlu0 %11747  ;;  %v7346_v49 = vpop.permute.xlu1 %7345  ;;  %v10604_v50 = vpack.c.bf16 %v7330_v46, %v7319_v45  ;;  %v12077_v32 = vld [vmem:[#allocation79 + $0xa8] ss:$12 sps:$4 sm:$0x1f]   ;;  %v7528_v34 = vunpack.c.l.bf16 %v7527_v33  ;;  %vm16000_vm8 = vmmov 1  }
0x23ba   : > { %v11750_v51 = vunpack.i.h.bf16 %v11748_v48  ;;  %v11749_v52 = vunpack.i.l.bf16 %v11748_v48  ;;  %10620 = vmatpush3.bf16.msra.mxu1 %v10619_v44  ;;  %v7351_v56 = vsel %vm15990_vm6, %v7346_v49, %v11754_v42 }
0x23bb   : > { %10605 = vmatprep.subr.bf16.mxu0 %v10604_v50  ;;  %10621 = vmatprep.subr.bf16.mxu1 %v13747_v0  ;;  %v7541_v39 = vrot.slane %v7528_v34, %v14939_v22  ;;  %v7537_v40 = vrot.slane %v7528_v34, %v14936_v19  ;;  %v7533_v22 = vrot.slane %v7528_v34, %v14931_v9 }
0x23bc   : > { %v10622_v54 = vpack.c.bf16 %v11755_v14, %v11750_v51  ;;  %v7340_v55 = vsel %vm2532_vm7, %v7335_v3, %v11749_v52  ;;  %10607 = vmatpush1.bf16.msra.mxu0 %v10606_v47  ;;  %v7341_v18 = vsel %vm2532_vm7, %v11749_v52, %v11750_v51 }
0x23bd   : > { %v10610_v57 = vpack.c.bf16 %v7351_v56, %v7340_v55  ;;  %v7359_v58 = vpop.permute.xlu0 %7358  ;;  %v7361_v59 = vpop.permute.xlu1 %7360  ;;  %v10608_v60 = vpack.c.bf16 %v7352_v53, %v7341_v18  ;;  %v7556_v44 = vrot.slane %v7541_v39, %v14931_v9  ;;  %v7552_v45 = vrot.slane %v7537_v40, %v14931_v9 }
0x23be   : > { %10623 = vmatpush3.bf16.msra.mxu1 %v10622_v54  ;;  %v7363_v61 = vsel %vm15988_vm11, %v7359_v58, %v7361_v59  ;;  %v7548_v52 = vrot.slane %v7533_v22, %v14931_v9  ;;  %v7976_v9 = vld [vmem:[%s14066_s9 + $0x8] sm:$0xff] }
0x23bf   : > { %10609 = vmatprep.subr.bf16.mxu0 %v10608_v60  ;;  %10013 = vmatprep.subr.mxu1 %v13754_v5 }
0x23c0   : > { %10611 = vmatpush1.bf16.msra.mxu0 %v10610_v57 }
0x23c1   : > { %v7357_v1 = vpop.permute.xlu0 %7356  ;;  %7393 = vmatprep.subr.mxu0 %v7363_v61 }
0x23c2   : > { %v7362_v3 = vsel %vm15991_vm13, %v7357_v1, %v7359_v58  ;;  %10014 = vmatpush3.msra.mxu1 %v7361_v59  ;;  %vm8235_vm13 = vcmask 244736  }
0x23c3   : > { %10016 = vmatmul.mubr.msk.f32.vlgmr.msra.gmra.mrb[42].mxu1 %vm2569_vm9, %v7367_v62  ;;  %10658 = vmatprep.subr.bf16.mxu1 %v13747_v0 }
0x23c4   : > { %7394 = vmatpush1.msra.mxu0 %v7362_v3  ;;  %10660 = vmatpush3.bf16.msra.mxu1 %v12046_v63  ;;  %v7977_v63 = vld [vmem:[#allocation81] sm:$0xff] }
0x23c5   : > { %9288 = vmatmul.mubr.msk.f32.vlgmr.msra.gmra.mrb[30].mxu0 %vm2569_vm9, %v7367_v62  ;;  %10625 = vmatprep.subr.bf16.mxu0 %v12047_v2 }
0x23c6   : > { %10627 = vmatpush1.bf16.msra.mxu0 %v12049_v4  ;;  %10661 = vmatprep.subr.bf16.mxu1 %v13747_v0 }
0x23c7   : > { %10629 = vmatprep.subr.bf16.mxu0 %v12051_v6  ;;  %10050 = vmatprep.mubr.msk.f32.mxu1 %vm13753_vm0, %v13754_v5  ;;  %vm7640_vm0 = vcmask 998400  }
0x23c8   : > { %10663 = vmatpush3.bf16.msra.mxu1 %v12050_v8  ;;  %7716 = vmatprep.mubr.f32.mxu0 %v13754_v5 }
0x23c9   : > { %10664 = vmatprep.subr.bf16.mxu1 %v13747_v0 }
0x23ca   : > { %10631 = vmatpush1.bf16.msra.mxu0 %v12053_v10 }
0x23cb   : > { %10633 = vmatprep.subr.bf16.mxu0 %v12055_v11 }
0x23cc   : > { %10666 = vmatpush3.bf16.msra.mxu1 %v12054_v12 }
0x23cd   : > { %10667 = vmatprep.subr.bf16.mxu1 %v13747_v0 }
0x23ce   : > { %10635 = vmatpush1.bf16.msra.mxu0 %v12057_v13  ;;  %v7372_v36 = vpop.permute.xlu1 %7371 }
0x23cf   : > { %10637 = vmatprep.subr.bf16.mxu0 %v12059_v16 }
0x23d0   : > { %10669 = vmatpush3.bf16.msra.mxu1 %v12058_v17 }
0x23d1   : > { %10670 = vmatprep.subr.bf16.mxu1 %v13747_v0 }
0x23d2   : > { %10639 = vmatpush1.bf16.msra.mxu0 %v12061_v21 }
0x23d3   : > { %10641 = vmatprep.subr.bf16.mxu0 %v12063_v35 }
0x23d4   : > { %10672 = vmatpush3.bf16.msra.mxu1 %v12062_v7 }
0x23d5   : > { %10673 = vmatprep.subr.bf16.mxu1 %v13747_v0 }
0x23d6   : > { %10643 = vmatpush1.bf16.msra.mxu0 %v12065_v23 }
0x23d7   : > { %10645 = vmatprep.subr.bf16.mxu0 %v12067_v24 }
0x23d8   : > { %10675 = vmatpush3.bf16.msra.mxu1 %v12066_v25 }
0x23d9   : > { %10676 = vmatprep.subr.bf16.mxu1 %v13747_v0 }
0x23da   : > { %10647 = vmatpush1.bf16.msra.mxu0 %v12069_v26 }
0x23db   : > { %10649 = vmatprep.subr.bf16.mxu0 %v12071_v20 }
0x23dc   : > { %10678 = vmatpush3.bf16.msra.mxu1 %v12070_v27 }
0x23dd   : > { %10679 = vmatprep.subr.bf16.mxu1 %v13747_v0 }
0x23de   : > { %10651 = vmatpush1.bf16.msra.mxu0 %v12073_v28 }
0x23df   : > { %10654 = vmatprep.subr.msk.bf16.mxu0 %vm15201_vm10, %v12075_v30 }
0x23e0   : > { %10682 = vmatpush3.bf16.msk.msra.mxu1 %vm15201_vm10, %v12074_v31 }
0x23e1   : > { %10719 = vmatprep.subr.bf16.mxu1 %v13747_v0 }
0x23e2   : > { %10657 = vmatpush1.bf16.msk.msra.mxu0 %vm15201_vm10, %v12077_v32 }
0x23e3   : > { %10051 = vmatmul.mubr.msk.f32.vlgmr.msra.gmra.mrb[44].mxu1 %vm7640_vm0, %v15014_v37 }
0x23e4   : > { %9296 = vmatprep.mubr.msk.f32.mxu1 %vm3785_vm14, %v7976_v9 }
0x23e5   : > { %9292 = vmatmul.mubr.msk.f32.vlgmr.msra.gmra.mrb[32].mxu0 %vm7640_vm0, %v15014_v37 }
0x23e6   : > { %9295 = vmatprep.mubr.msk.f32.mxu0 %vm3785_vm14, %v7976_v9 }
0x2496   : > { %v7514_v38 = vpop.f32.mrb[42].mxu1 }
0x2497   : > { %v7515_v15 = vadd.f32 %v7514_v38, %v7372_v36  ;;  %v10017_v41 = vpop.f32.mrb[43].mxu1 }
0x2498   : > { %v7443_v14 = vpop.f32.mrb[30].mxu0 }
0x2499   : > { %vm7520_vm9 = vcmp.ge.f32.partialorder %v7515_v15, 0.0  ;;  %v7523_v42 = vmul.f32 0.01, %v7515_v15  ;;  %v7445_v43 = vpop.f32.mrb[31].mxu0  ;;  %v7444_v19 = vadd.f32 %v7443_v14, %v7372_v36 }
0x249a   : > { %v7446_v29 = vadd.f32 %v7445_v43, %v7372_v36 }
0x249b   : > { %v7526_v37 = vsel %vm7520_vm9, %v7515_v15, %v7523_v42  ;;  %v7521_v51 = vmul.f32 0.01, %v7444_v19  ;;  %vm7518_vm15 = vcmp.ge.f32.partialorder %v7444_v19, 0.0 }
0x249c   : > { %vm7519_vm10 = vcmp.ge.f32.partialorder %v7446_v29, 0.0  ;;  %v7522_v46 = vmul.f32 0.01, %v7446_v29  ;;  %v7559_v48 = vmul.f32 %v7556_v44, %v7526_v37 }
0x249d   : > { %v7524_v53 = vsel %vm7518_vm15, %v7444_v19, %v7521_v51 }
0x249e   : > { %v7525_v47 = vsel %vm7519_vm10, %v7446_v29, %v7522_v46  ;;  %v7557_v55 = vmul.f32 %v7548_v52, %v7524_v53 }
0x249f   : > { %v7558_v49 = vmul.f32 %v7552_v45, %v7525_v47 }
0x24a1   : > { %v11761_v50 = vpack.i.bf16 %v7559_v48, %v7558_v49 }
0x24a3   : > { %11762 = vrot.lane.b32.xlu1 %v11761_v50, %s15963_s1  ;;  %11757 = vrot.lane.b32.xlu0 %v11761_v50, %s15967_s7 }
0x24a7   : > { %11772 = vrot.lane.b32.xlu1 %v11761_v50, %s15978_s5  ;;  %11767 = vrot.lane.b32.xlu0 %v11761_v50, %s15979_s8 }
0x24b6   : > { %v7789_v54 = vpop.f32.mrb[44].mxu1 }
0x24b7   : > { %v10052_v56 = vpop.f32.mrb[45].mxu1  ;;  %v10720_v18 = vpack.c.bf16 %v7789_v54, %v7559_v48 }
0x24b8   : > { %v7718_v57 = vpop.f32.mrb[32].mxu0 }
0x24b9   : > { %v7720_v58 = vpop.f32.mrb[33].mxu0  ;;  %10721 = vmatpush1.bf16.msra.mxu1 %v10720_v18  ;;  %v11781_v59 = vpack.i.bf16 %v7718_v57, %v7557_v55  ;;  %v10685_v60 = vpack.c.bf16 %v7718_v57, %v7557_v55 }
0x24ba   : > { %v10683_v61 = vpack.c.bf16 %v7720_v58, %v7558_v49  ;;  %v11791_v62 = vpack.i.bf16 %v7789_v54, %v7720_v58  ;;  %10722 = vmatprep.subr.bf16.mxu1 %v13747_v0 }
0x24bb   : > { %11782 = vrot.lane.b32.xlu1 %v11781_v59, %s15963_s1  ;;  %11777 = vrot.lane.b32.xlu0 %v11781_v59, %s15967_s7 }
0x24bc   : > { %10684 = vmatprep.subr.bf16.mxu0 %v10683_v61 }
0x24bd   : > { %10686 = vmatpush1.bf16.msra.mxu0 %v10685_v60 }
0x24bf   : > { %11792 = vrot.lane.b32.xlu1 %v11791_v62, %s15967_s7  ;;  %11787 = vrot.lane.b32.xlu0 %v11781_v59, %s15979_s8 }
0x24c3   : > { %11797 = vrot.lane.b32.xlu1 %v11781_v59, %s15978_s5  ;;  %11802 = vrot.lane.b32.xlu0 %v11761_v50, %s15961_s10 }
0x24c7   : > { %11817 = vrot.lane.b32.xlu1 %v11791_v62, %s15979_s8  ;;  %11807 = vrot.lane.b32.xlu0 %v11791_v62, %s15963_s1 }
0x24cb   : > { %11822 = vrot.lane.b32.xlu1 %v11761_v50, %s15981_s14  ;;  %11812 = vrot.lane.b32.xlu0 %v11781_v59, %s15961_s10 }
0x24cf   : > { %11832 = vrot.lane.b32.xlu1 %v11791_v62, %s15961_s10  ;;  %11827 = vrot.lane.b32.xlu0 %v11791_v62, %s15978_s5 }
0x24d3   : > { %11837 = vrot.lane.b32.xlu1 %v11781_v59, %s15981_s14  ;;  %11842 = vrot.lane.b32.xlu0 %v11761_v50, %s15980_s3 }
0x24d7   : > { %11857 = vrot.lane.b32.xlu1 %v11791_v62, %s15980_s3  ;;  %11847 = vrot.lane.b32.xlu0 %v11791_v62, %s15981_s14 }
0x24db   : > { %11862 = vrot.lane.b32.xlu1 %v11761_v50, %s15962_s2  ;;  %11852 = vrot.lane.b32.xlu0 %v11781_v59, %s15980_s3 }
0x24df   : > { %11872 = vrot.lane.b32.xlu1 %v11781_v59, %s15962_s2  ;;  %11867 = vrot.lane.b32.xlu0 %v11791_v62, %s15962_s2  ;;  %s9302_s2 = sshll.u32 %s16003_s28, 4 }
0x24e0   : > { %s2459_s7 = scalar_lea.vmem %s14081_s27, %s9302_s2 }
0x24e3   : > { %7980 = vperm.xlu0 %11570, %v7977_v63  }
0x2515   : > { %v11763_v1 = vpop.permute.xlu1 %11762  ;;  %v11758_v2 = vpop.permute.xlu0 %11757 }
0x2516   : > { %v11760_v10 = vunpack.i.h.bf16 %v11758_v2  ;;  %v11759_v11 = vunpack.i.l.bf16 %v11758_v2  ;;  %v11765_v31 = vunpack.i.h.bf16 %v11763_v1  ;;  %v11764_v32 = vunpack.i.l.bf16 %v11763_v1 }
0x2518   : > { %v7812_v7 = vsel %vm2472_vm1, %v11759_v11, %v11760_v10  ;;  %v7834_v48 = vsel %vm2484_vm3, %v11764_v32, %v11765_v31 }
0x2519   : > { %v15631_v3 = vpop.permute.xlu1 %11772  ;;  %v15633_v4 = vpop.permute.xlu0 %11767 }
0x251a   : > { %v11770_v14 = vunpack.i.h.bf16 %v15633_v4  ;;  %v11769_v42 = vunpack.i.l.bf16 %v15633_v4  ;;  %v11775_v51 = vunpack.i.h.bf16 %v15631_v3  ;;  %v11774_v52 = vunpack.i.l.bf16 %v15631_v3 }
0x251c   : > { %v7856_v54 = vsel %vm2496_vm2, %v11769_v42, %v11770_v14 }
0x252d   : > { %v11783_v6 = vpop.permute.xlu1 %11782  ;;  %v11778_v8 = vpop.permute.xlu0 %11777 }
0x252e   : > { %v11779_v12 = vunpack.i.l.bf16 %v11778_v8  ;;  %v11780_v17 = vunpack.i.h.bf16 %v11778_v8  ;;  %v11785_v33 = vunpack.i.h.bf16 %v11783_v6  ;;  %v11784_v34 = vunpack.i.l.bf16 %v11783_v6 }
0x2530   : > { %v7811_v23 = vsel %vm2472_vm1, %v11779_v12, %v11759_v11  ;;  %v7833_v44 = vsel %vm2484_vm3, %v11784_v34, %v11764_v32 }
0x2531   : > { %v11793_v13 = vpop.permute.xlu1 %11792  ;;  %v11788_v16 = vpop.permute.xlu0 %11787 }
0x2532   : > { %v11795_v21 = vunpack.i.h.bf16 %v11793_v13  ;;  %v11794_v35 = vunpack.i.l.bf16 %v11793_v13  ;;  %v11790_v50 = vunpack.i.h.bf16 %v11788_v16  ;;  %v11789_v19 = vunpack.i.l.bf16 %v11788_v16 }
0x2534   : > { %v10723_v24 = vpack.c.bf16 %v11795_v21, %v11760_v10  ;;  %v7813_v25 = vsel %vm2472_vm1, %v11780_v17, %v11794_v35  ;;  %v7814_v26 = vsel %vm2472_vm1, %v11794_v35, %v11795_v21  ;;  %v7855_v63 = vsel %vm2496_vm2, %v11789_v19, %v11769_v42  ;;  %vm15992_vm1 = vmmov %vm15990_vm6 }
0x2535   : > { %v10689_v20 = vpack.c.bf16 %v7813_v25, %v7811_v23  ;;  %v11798_v27 = vpop.permute.xlu1 %11797  ;;  %v15639_v28 = vpop.permute.xlu0 %11802  ;;  %v10687_v30 = vpack.c.bf16 %v7814_v26, %v7812_v7  ;;  %v7878_v21 = vsel %vm2508_vm5, %v11774_v52, %v11775_v51  ;;  %vm16001_vm6 = vcmask 1045504  }
0x2536   : > { %10724 = vmatpush1.bf16.msra.mxu1 %v10723_v24  ;;  %v11800_v55 = vunpack.i.h.bf16 %v11798_v27  ;;  %v11799_v56 = vunpack.i.l.bf16 %v11798_v27  ;;  %v11805_v1 = vunpack.i.h.bf16 %v15639_v28  ;;  %v11804_v2 = vunpack.i.l.bf16 %v15639_v28 }
0x2537   : > { %10688 = vmatprep.subr.bf16.mxu0 %v10687_v30  ;;  %10725 = vmatprep.subr.bf16.mxu1 %v13747_v0 }
0x2538   : > { %10690 = vmatpush1.bf16.msra.mxu0 %v10689_v20  ;;  %v7877_v8 = vsel %vm2508_vm5, %v11799_v56, %v11774_v52  ;;  %v7900_v20 = vsel %vm2520_vm4, %v11804_v2, %v11805_v1 }
0x2539   : > { %v11818_v36 = vpop.permute.xlu1 %11817  ;;  %v11808_v38 = vpop.permute.xlu0 %11807 }
0x253a   : > { %v11820_v15 = vunpack.i.h.bf16 %v11818_v36  ;;  %v11819_v39 = vunpack.i.l.bf16 %v11818_v36  ;;  %v11810_v40 = vunpack.i.h.bf16 %v11808_v38  ;;  %v11809_v41 = vunpack.i.l.bf16 %v11808_v38 }
0x253c   : > { %v10726_v43 = vpack.c.bf16 %v11810_v40, %v11765_v31  ;;  %v7835_v29 = vsel %vm2484_vm3, %v11785_v33, %v11809_v41  ;;  %v7836_v46 = vsel %vm2484_vm3, %v11809_v41, %v11810_v40  ;;  %v7858_v49 = vsel %vm2496_vm2, %v11819_v39, %v11820_v15  ;;  %vm15994_vm3 = vmmov %vm15992_vm1 }
0x253d   : > { %v15646_v45 = vpop.permute.xlu1 %11822  ;;  %v11813_v37 = vpop.permute.xlu0 %11812  ;;  %v10693_v47 = vpack.c.bf16 %v7835_v29, %v7833_v44  ;;  %v10691_v22 = vpack.c.bf16 %v7836_v46, %v7834_v48  ;;  %v10729_v53 = vpack.c.bf16 %v11820_v15, %v11770_v14  ;;  %v7857_v18 = vsel %vm2496_vm2, %v11790_v50, %v11819_v39  ;;  %vm15993_vm2 = vmmov %vm15992_vm1 }
0x253e   : > { %10727 = vmatpush1.bf16.msra.mxu1 %v10726_v43  ;;  %v10695_v59 = vpack.c.bf16 %v7858_v49, %v7856_v54  ;;  %v10697_v3 = vpack.c.bf16 %v7857_v18, %v7855_v63  ;;  %v11814_v10 = vunpack.i.l.bf16 %v11813_v37  ;;  %v11815_v16 = vunpack.i.h.bf16 %v11813_v37 }
0x253f   : > { %10728 = vmatprep.subr.bf16.mxu1 %v13747_v0  ;;  %10692 = vmatprep.subr.bf16.mxu0 %v10691_v22  ;;  %v11825_v7 = vunpack.i.h.bf16 %v15646_v45  ;;  %v11824_v23 = vunpack.i.l.bf16 %v15646_v45 }
0x2540   : > { %10694 = vmatpush1.bf16.msra.mxu0 %v10693_v47  ;;  %v7899_v27 = vsel %vm2520_vm4, %v11814_v10, %v11804_v2  ;;  %v12081_v10 = vld [vmem:[%s14076_s17 + $0x14] ss:$8 sps:$4 sm:$0xff]  }
0x2541   : > { %v11833_v57 = vpop.permute.xlu1 %11832  ;;  %v11828_v58 = vpop.permute.xlu0 %11827  ;;  %10696 = vmatprep.subr.bf16.mxu0 %v10695_v59  ;;  %v7922_v41 = vsel %vm2532_vm7, %v11824_v23, %v11825_v7 }
0x2542   : > { %v11835_v60 = vunpack.i.h.bf16 %v11833_v57  ;;  %v11834_v61 = vunpack.i.l.bf16 %v11833_v57  ;;  %v11830_v62 = vunpack.i.h.bf16 %v11828_v58  ;;  %v11829_v9 = vunpack.i.l.bf16 %v11828_v58  ;;  %10730 = vmatpush1.bf16.msra.mxu1 %v10729_v53 }
0x2543   : > { %10731 = vmatprep.subr.bf16.mxu1 %v13747_v0 }
0x2544   : > { %v10732_v4 = vpack.c.bf16 %v11830_v62, %v11775_v51  ;;  %v7879_v6 = vsel %vm2508_vm5, %v11800_v55, %v11829_v9  ;;  %v7880_v13 = vsel %vm2508_vm5, %v11829_v9, %v11830_v62  ;;  %10698 = vmatpush1.bf16.msra.mxu0 %v10697_v3  ;;  %v7902_v35 = vsel %vm2520_vm4, %v11834_v61, %v11835_v60  ;;  %vm15996_vm5 = vmmov %vm15988_vm11 }
0x2545   : > { %v11838_v11 = vpop.permute.xlu1 %11837  ;;  %v11843_v12 = vpop.permute.xlu0 %11842  ;;  %v10701_v17 = vpack.c.bf16 %v7879_v6, %v7877_v8  ;;  %v10699_v24 = vpack.c.bf16 %v7880_v13, %v7878_v21  ;;  %v7901_v25 = vsel %vm2520_vm4, %v11815_v16, %v11834_v61  ;;  %v10735_v26 = vpack.c.bf16 %v11835_v60, %v11805_v1  ;;  %vm15995_vm4 = vmmov %vm15992_vm1  ;;  %v7975_v6 = vld [vmem:[%s14066_s9] sm:$0xff]  ;;  %v12087_v16 = vld [vmem:[%s14076_s17 + $0x34] ss:$8 sps:$4 sm:$0xff]  }
0x2546   : > { %10733 = vmatpush1.bf16.msra.mxu1 %v10732_v4  ;;  %v11840_v28 = vunpack.i.h.bf16 %v11838_v11  ;;  %v11839_v30 = vunpack.i.l.bf16 %v11838_v11  ;;  %v10703_v33 = vpack.c.bf16 %v7902_v35, %v7900_v20  ;;  %v10705_v39 = vpack.c.bf16 %v7901_v25, %v7899_v27  ;;  %vm15998_vm14 = vmmov %vm15996_vm5  ;;  %v12080_v8 = vld [vmem:[%s14076_s17] ss:$8 sps:$4 sm:$0xff]   ;;  %v12083_v11 = vld [vmem:[%s14076_s17 + $0x10] ss:$8 sps:$4 sm:$0xff]  }
0x2547   : > { %10734 = vmatprep.subr.bf16.mxu1 %v13747_v0  ;;  %10700 = vmatprep.subr.bf16.mxu0 %v10699_v24  ;;  %v11845_v40 = vunpack.i.h.bf16 %v11843_v12  ;;  %v11844_v14 = vunpack.i.l.bf16 %v11843_v12  ;;  %vm15999_vm12 = vmmov %vm15996_vm5  ;;  %v12084_v12 = vld [vmem:[%s14076_s17 + $0x24] ss:$8 sps:$4 sm:$0xff]   ;;  %v12086_v13 = vld [vmem:[%s14076_s17 + $0x20] ss:$8 sps:$4 sm:$0xff]  }
0x2548   : > { %10702 = vmatpush1.bf16.msra.mxu0 %v10701_v17  ;;  %v7921_v44 = vsel %vm2532_vm7, %v11839_v30, %v11824_v23  ;;  %v12089_v17 = vld [vmem:[%s14076_s17 + $0x30] ss:$8 sps:$4 sm:$0xff]   ;;  %v12090_v21 = vld [vmem:[%s14076_s17 + $0x44] ss:$8 sps:$4 sm:$0xff]   ;;  %v12092_v35 = vld [vmem:[%s14076_s17 + $0x40] ss:$8 sps:$4 sm:$0xff]  }
0x2549   : > { %v11858_v31 = vpop.permute.xlu1 %11857  ;;  %v11848_v32 = vpop.permute.xlu0 %11847  ;;  %10704 = vmatprep.subr.bf16.mxu0 %v10703_v33  ;;  %v7944_v54 = vsel %vm15995_vm4, %v11844_v14, %v11845_v40  ;;  %v12095_v23 = vld [vmem:[%s14076_s17 + $0x50] ss:$8 sps:$4 sm:$0xff]   ;;  %v12096_v24 = vld [vmem:[%s14076_s17 + $0x64] ss:$8 sps:$4 sm:$0xff]   ;;  %v12098_v25 = vld [vmem:[%s14076_s17 + $0x60] ss:$8 sps:$4 sm:$0xff]  }
0x254a   : > { %v11860_v34 = vunpack.i.h.bf16 %v11858_v31  ;;  %v11859_v36 = vunpack.i.l.bf16 %v11858_v31  ;;  %v11850_v38 = vunpack.i.h.bf16 %v11848_v32  ;;  %v11849_v15 = vunpack.i.l.bf16 %v11848_v32  ;;  %10736 = vmatpush1.bf16.msra.mxu1 %v10735_v26  ;;  %v12099_v26 = vld [vmem:[%s14076_s17 + $0x74] ss:$8 sps:$4 sm:$0xff]   ;;  %v12101_v20 = vld [vmem:[%s14076_s17 + $0x70] ss:$8 sps:$4 sm:$0xff]   ;;  %v12102_v27 = vld [vmem:[%s14076_s17 + $0x84] ss:$8 sps:$4 sm:$0xff]  }
0x254b   : > { %10737 = vmatprep.subr.bf16.mxu1 %v13747_v0  ;;  %v12105_v30 = vld [vmem:[%s14076_s17 + $0x94] ss:$8 sps:$4 sm:$0xff]   ;;  %v12107_v31 = vld [vmem:[%s14076_s17 + $0x90] ss:$8 sps:$4 sm:$0xff]   ;;  %v12108_v32 = vld [vmem:[%s14076_s17 + $0xa4] ss:$8 sps:$4 sm:$0xff]  }
0x254c   : > { %v10738_v42 = vpack.c.bf16 %v11850_v38, %v11825_v7  ;;  %v7923_v43 = vsel %vm2532_vm7, %v11840_v28, %v11849_v15  ;;  %v7924_v29 = vsel %vm2532_vm7, %v11849_v15, %v11850_v38  ;;  %10706 = vmatpush1.bf16.msra.mxu0 %v10705_v39  ;;  %v7946_v50 = vsel %vm15992_vm1, %v11859_v36, %v11860_v34  ;;  %vm15997_vm7 = vmmov %vm15996_vm5  ;;  %v12093_v7 = vld [vmem:[%s14076_s17 + $0x54] ss:$8 sps:$4 sm:$0xff]   ;;  %v12104_v28 = vld [vmem:[%s14076_s17 + $0x80] ss:$8 sps:$4 sm:$0xff]  }
0x254d   : > { %v11863_v45 = vpop.permute.xlu1 %11862  ;;  %v11853_v37 = vpop.permute.xlu0 %11852  ;;  %v10707_v46 = vpack.c.bf16 %v7924_v29, %v7922_v41  ;;  %v10709_v47 = vpack.c.bf16 %v7923_v43, %v7921_v44  ;;  %v10741_v51 = vpack.c.bf16 %v11860_v34, %v11845_v40  ;;  %v10711_v57 = vpack.c.bf16 %v7946_v50, %v7944_v54  ;;  %v12110_v33 = vld [vmem:[%s14076_s17 + $0xa0] ss:$8 sps:$4 sm:$0xff]   ;;  %v12111_v34 = vld [vmem:[%s14076_s17 + $0xb4] ss:$8 sps:$4 sm:$0xff]   ;;  %v12114_v38 = vld [vmem:[%s14076_s17 + $0xc4] ss:$8 sps:$4 sm:$0xff]  }
0x254e   : > { %v11855_v48 = vunpack.i.h.bf16 %v11853_v37  ;;  %v11854_v49 = vunpack.i.l.bf16 %v11853_v37  ;;  %10739 = vmatpush1.bf16.msra.mxu1 %v10738_v42  ;;  %v11865_v19 = vunpack.i.h.bf16 %v11863_v45  ;;  %v11864_v22 = vunpack.i.l.bf16 %v11863_v45  ;;  %v12116_v15 = vld [vmem:[%s14076_s17 + $0xc0] ss:$8 sps:$4 sm:$0xff]   ;;  %v12117_v39 = vld [vmem:[%s14076_s17 + $0xd4] ss:$8 sps:$4 sm:$0xff]   ;;  %v12119_v40 = vld [vmem:[%s14076_s17 + $0xd0] ss:$8 sps:$4 sm:$0xff]  }
0x254f   : > { %10708 = vmatprep.subr.bf16.mxu0 %v10707_v46  ;;  %10740 = vmatprep.subr.bf16.mxu1 %v13747_v0  ;;  %v12120_v41 = vld [vmem:[%s14076_s17 + $0xe4] ss:$8 sps:$4 sm:$0xff]   ;;  %v12123_v42 = vld [vmem:[%s14076_s17 + $0xf4] ss:$8 sps:$4 sm:$0xff]   ;;  %v12125_v43 = vld [vmem:[%s14076_s17 + $0xf0] ss:$8 sps:$4 sm:$0xff]  }
0x2550   : > { %v7945_v52 = vsel %vm15993_vm2, %v11855_v48, %v11859_v36  ;;  %v7943_v53 = vsel %vm15994_vm3, %v11854_v49, %v11844_v14  ;;  %10710 = vmatpush1.bf16.msra.mxu0 %v10709_v47  ;;  %v7966_v62 = vsel %vm15996_vm5, %v11864_v22, %v11865_v19  ;;  %v12113_v36 = vld [vmem:[%s14076_s17 + $0xb0] ss:$8 sps:$4 sm:$0xff]   ;;  %v12122_v14 = vld [vmem:[%s14076_s17 + $0xe0] ss:$8 sps:$4 sm:$0xff]   ;;  %v12126_v29 = vld [vmem:[%s14076_s17 + $0x104] ss:$8 sps:$4 sm:$0xff]  }
0x2551   : > { %v10713_v55 = vpack.c.bf16 %v7945_v52, %v7943_v53  ;;  %v11873_v56 = vpop.permute.xlu1 %11872  ;;  %v11868_v18 = vpop.permute.xlu0 %11867  ;;  %10712 = vmatprep.subr.bf16.mxu0 %v10711_v57  ;;  %v12128_v49 = vld [vmem:[%s14076_s17 + $0x100] ss:$8 sps:$4 sm:$0xff]   ;;  %vm10815_vm11 = vmpackc.low %vm16001_vm6, %vm16000_vm8 }
0x2552   : > { %v11875_v58 = vunpack.i.h.bf16 %v11873_v56  ;;  %v11874_v59 = vunpack.i.l.bf16 %v11873_v56  ;;  %v11870_v60 = vunpack.i.h.bf16 %v11868_v18  ;;  %v11869_v61 = vunpack.i.l.bf16 %v11868_v18  ;;  %10742 = vmatpush1.bf16.msra.mxu1 %v10741_v51 }
0x2553   : > { %10743 = vmatprep.subr.bf16.mxu1 %v13747_v0  ;;  %v12078_v0 = vld [vmem:[%s14076_s17 + $0x4] ss:$8 sps:$4 sm:$0xff]  }
0x2554   : > { %v7965_v9 = vsel %vm15997_vm7, %v11874_v59, %v11864_v22  ;;  %v10744_v63 = vpack.c.bf16 %v11870_v60, %v11865_v19  ;;  %v7967_v1 = vsel %vm15998_vm14, %v11875_v58, %v11869_v61  ;;  %v7968_v2 = vsel %vm15999_vm12, %v11869_v61, %v11870_v60  ;;  %10714 = vmatpush1.bf16.msra.mxu0 %v10713_v55  ;;  %v12129_v19 = vld [vmem:[%s14076_s17 + $0x114] ss:$8 sps:$4 sm:$0x7f]   ;;  %v12131_v22 = vld [vmem:[%s14076_s17 + $0x110] ss:$8 sps:$4 sm:$0x7f]  }
0x2555   : > { %v10715_v3 = vpack.c.bf16 %v7968_v2, %v7966_v62  ;;  %v10717_v4 = vpack.c.bf16 %v7967_v1, %v7965_v9 }
0x2556   : > { %10745 = vmatpush1.bf16.msra.mxu1 %v10744_v63 }
0x2557   : > { %10716 = vmatprep.subr.bf16.mxu0 %v10715_v3 }
0x2558   : > { %10718 = vmatpush1.bf16.msra.mxu0 %v10717_v4 }
0x2559   : > { %8122 = vmatmul.mubr.f32.vlgmr.msra.gmra.mrb[46].mxu1 %v7975_v6  ;;  %10747 = vmatprep.subr.bf16.mxu0 %v12078_v0 }
0x255b   : > { %8051 = vmatmul.mubr.f32.vlgmr.msra.gmra.mrb[34].mxu0 %v7975_v6 }
0x255c   : > { %10749 = vmatpush1.bf16.msra.mxu0 %v12080_v8 }
0x255d   : > { %10751 = vmatprep.subr.bf16.mxu0 %v12081_v10 }
0x2560   : > { %10753 = vmatpush1.bf16.msra.mxu0 %v12083_v11 }
0x2561   : > { %10755 = vmatprep.subr.bf16.mxu0 %v12084_v12 }
0x2562   : > { %v7981_v46 = vpop.permute.xlu0 %7980 }
0x2564   : > { %10757 = vmatpush1.bf16.msra.mxu0 %v12086_v13 }
0x2565   : > { %10759 = vmatprep.subr.bf16.mxu0 %v12087_v16 }
0x2568   : > { %10761 = vmatpush1.bf16.msra.mxu0 %v12089_v17 }
0x2569   : > { %10763 = vmatprep.subr.bf16.mxu0 %v12090_v21 }
0x256c   : > { %10765 = vmatpush1.bf16.msra.mxu0 %v12092_v35 }
0x256d   : > { %10767 = vmatprep.subr.bf16.mxu0 %v12093_v7 }
0x2570   : > { %10769 = vmatpush1.bf16.msra.mxu0 %v12095_v23 }
0x2571   : > { %10771 = vmatprep.subr.bf16.mxu0 %v12096_v24 }
0x2574   : > { %10773 = vmatpush1.bf16.msra.mxu0 %v12098_v25 }
0x2575   : > { %10775 = vmatprep.subr.bf16.mxu0 %v12099_v26 }
0x2578   : > { %10777 = vmatpush1.bf16.msra.mxu0 %v12101_v20 }
0x2579   : > { %10779 = vmatprep.subr.bf16.mxu0 %v12102_v27 }
0x257c   : > { %10781 = vmatpush1.bf16.msra.mxu0 %v12104_v28 }
0x257d   : > { %10783 = vmatprep.subr.bf16.mxu0 %v12105_v30 }
0x2580   : > { %10785 = vmatpush1.bf16.msra.mxu0 %v12107_v31 }
0x2581   : > { %10787 = vmatprep.subr.bf16.mxu0 %v12108_v32 }
0x2584   : > { %10789 = vmatpush1.bf16.msra.mxu0 %v12110_v33 }
0x2585   : > { %10791 = vmatprep.subr.bf16.mxu0 %v12111_v34 }
0x2588   : > { %10793 = vmatpush1.bf16.msra.mxu0 %v12113_v36 }
0x2589   : > { %10795 = vmatprep.subr.bf16.mxu0 %v12114_v38 }
0x258c   : > { %10797 = vmatpush1.bf16.msra.mxu0 %v12116_v15 }
0x258d   : > { %10799 = vmatprep.subr.bf16.mxu0 %v12117_v39 }
0x2590   : > { %10801 = vmatpush1.bf16.msra.mxu0 %v12119_v40 }
0x2591   : > { %10803 = vmatprep.subr.bf16.mxu0 %v12120_v41 }
0x2594   : > { %10805 = vmatpush1.bf16.msra.mxu0 %v12122_v14 }
0x2595   : > { %10807 = vmatprep.subr.bf16.mxu0 %v12123_v42 }
0x2598   : > { %10809 = vmatpush1.bf16.msra.mxu0 %v12125_v43 }
0x2599   : > { %10811 = vmatprep.subr.bf16.mxu0 %v12126_v29 }
0x262c   : > { %v8123_v44 = vpop.f32.mrb[46].mxu1 }
0x262d   : > { %v8125_v45 = vpop.f32.mrb[47].mxu1  ;;  %v8124_v51 = vadd.f32 %v8123_v44, %v7981_v46 }
0x262e   : > { %v8052_v37 = vpop.f32.mrb[34].mxu0 }
0x262f   : > { %v8054_v47 = vpop.f32.mrb[35].mxu0  ;;  %v8053_v50 = vadd.f32 %v8052_v37, %v7981_v46 }
0x2630   : > { %v8055_v48 = vadd.f32 %v8054_v47, %v7981_v46 }
0x2632   : > { %8309 = vmatprep.mubr.f32.mxu0 %v8055_v48 }
0x2633   : > { %8310 = vmatmul.mubr.f32.vlgmr.msra.gmra.mrb[36].mxu0 %v8053_v50 }
0x2634   : > { %10813 = vmatpush1.bf16.msra.mxu0 %v12128_v49  ;;  %8380 = vmatprep.mubr.f32.mxu0 %v13754_v5 }
0x2635   : > { %10816 = vmatprep.subr.msk.bf16.mxu0 %vm10815_vm11, %v12129_v19 }
0x2638   : > { %10819 = vmatpush1.bf16.msk.msra.mxu0 %vm10815_vm11, %v12131_v22 }
0x263b   : > { %9299 = vmatmul.mubr.msk.f32.vlgmr.msra.gmra.mrb[36].mxu0 %vm8235_vm13, %v8124_v51 }
0x270e   : > { %v8382_v52 = vpop.f32.mrb[36].mxu0 }
0x270f   : > { %8387 = vst [vmem:[%s2459_s7] sm:$0xff] %v8382_v52  ;;  %v8384_v53 = vpop.f32.mrb[37].mxu0 }
0x2710   : > { %8388 = vst [vmem:[%s2459_s7 + $0x8] sm:$0xff] %v8384_v53 }
0x2711 PF: > { %s158_s0 = sadd.s32 1, %s13624_s0  }
0x2712   : > { %p155_p3 = scmp.ge.s32.totalorder %s158_s0, 4  }
0x2714   :  { %157 = sbr.rel (!%p155_p3) target bundleno = 146 (0x92), region = 572 }
0x271b   :  { %8410 = vsyncpa [#allocation3], 1 }
0x271c   :  { %8412 = vsyncpa [#allocation3 + $0x1], 1 }
0x271d   :  { %8413 = vsyncpa [#allocation5], 1 }
0x271e   :  { %8414 = vsyncpa [#allocation8], 1 }
0x271f   :  { %8415 = vsyncpa [#allocation11], 1 }
0x2720   :  { %8416 = vsyncpa [#allocation14], 1 }
0x2721   :  { %8417 = vsyncpa [#allocation17], 1 }
0x2722   :  { %8418 = vsyncpa [#allocation20], 1 }
0x2723   :  { %8419 = vsyncpa [#allocation23], 1 }
0x2724   :  { %8420 = vsyncpa [#allocation26], 1 }
0x2725   :  { %8421 = vsyncpa [#allocation29], 1 }
0x2726   :  { %8422 = vsyncpa [#allocation32], 1 }
0x2727   :  { %8423 = vsyncpa [#allocation35], 1 }
0x2728   :  { %8424 = vsyncpa [#allocation38], 1 }
0x2729   :  { %8425 = vsyncpa [#allocation41], 1 }
0x272a   :  { %8426 = vsyncpa [#allocation44], 1 }
0x272b   :  { %8427 = vsyncpa [#allocation47], 1 }
0x272c   :  { %8428 = vsyncpa [#allocation50], 1 }
0x272d   :  { %8429 = vsyncpa [#allocation53], 1 }
0x272e   :  { %8430 = vsyncpa [#allocation56], 1 }
0x272f   :  { %8431 = vsyncpa [#allocation59], 1 }
0x2730   :  { %8432 = vsyncpa [#allocation62], 1 }
0x2731   :  { %8433 = vsyncpa [#allocation65], 1 }
0x2732   :  { %8434 = vsyncpa [#allocation68], 1 }
0x2733   :  { %8435 = vsyncpa [#allocation71], 1 }
0x2734   :  { %8436 = vsyncpa [#allocation74], 1 }
0x2735   :  { %8437 = vsyncpa [#allocation77], 1 }
0x2736   :  { %8438 = vsyncpa [#allocation80], 1 }

</bundles_post_ra>
